<compile_context>
chip_gen: v6e
topology: v6e:2x2x1
jax: 0.10.0
libtpu: 0.0.40
codegen_flags: <defaults>
</compile_context>

<pallas_src>
import functools
import math

import jax
import jax.numpy as jnp
from jax.experimental import pallas as pl
from jax.experimental.pallas import tpu as pltpu

_VMEM_LIMIT = 32 * 1024 * 1024  # explicit scoped-VMEM budget (safe on v5e/v6e/v7x)


# ----------------------------------------------------------------------------
# Pallas kernels
# ----------------------------------------------------------------------------
def _gemm_bn_kernel(*refs, prologue, prologue_relu, epilogue, epilogue_relu,
                    multi_k, mm_dtype):
    """Tiled GEMM with optional fused BN(+ReLU) prologue (per input channel /
    K column) and epilogue (per output channel).  Refs are passed in the order
    [a, b, (si, bi), (so, bo), out, (acc)] depending on the static flags."""
    it = iter(refs)
    a_ref = next(it)
    b_ref = next(it)
    si_ref = next(it) if prologue else None
    bi_ref = next(it) if prologue else None
    so_ref = next(it) if epilogue else None
    bo_ref = next(it) if epilogue else None
    o_ref = next(it)
    acc_ref = next(it) if multi_k else None

    a = a_ref[...]
    if prologue:
        a = a.astype(jnp.float32) * si_ref[...] + bi_ref[...]
        if prologue_relu:
            a = jnp.maximum(a, 0.0)
        a = a.astype(mm_dtype)
    part = jnp.dot(a, b_ref[...], preferred_element_type=jnp.float32)

    def _epi(y):
        if epilogue:
            y = y * so_ref[...] + bo_ref[...]
            if epilogue_relu:
                y = jnp.maximum(y, 0.0)
        return y

    if multi_k:                       # K split across the last ("arbitrary") axis
        @pl.when(pl.program_id(2) == 0)
        def _init():
            acc_ref[...] = jnp.zeros_like(acc_ref)

        acc_ref[...] += part

        @pl.when(pl.program_id(2) == pl.num_programs(2) - 1)
        def _finalize():
            o_ref[...] = _epi(acc_ref[...]).astype(o_ref.dtype)
    else:                             # single K block: no scratch round trip
        o_ref[...] = _epi(part).astype(o_ref.dtype)


def _conv3x3_flat_kernel(x_ref, w_ref, o_ref, *, wp):
    """Direct 3x3 / stride-1 / pad-1 conv on one image.  x_ref is the padded
    image flattened to (1, (H+3)*Wp, C): tap (ih, iw) is then a contiguous
    row-window of length H*Wp, so each tap is one plain MXU matmul.  Output
    rows x in [W, Wp) are junk and dropped by the caller."""
    L = o_ref.shape[1]                               # H * Wp
    acc = jnp.zeros((L, o_ref.shape[2]), jnp.float32)
    for ih in range(3):
        for iw in range(3):
            a = x_ref[0, pl.ds(ih * wp + iw, L), :]  # (L, C) window, read once
            acc = acc + jnp.dot(a, w_ref[ih * 3 + iw],
                                preferred_element_type=jnp.float32)
    o_ref[0] = acc.astype(o_ref.dtype)


def _maxpool_phase_kernel(ee_ref, eo_ref, oe_ref, oo_ref, o_ref):
    """3x3 / stride-2 / pad-1 max pool.  The (-inf padded) input was split into
    its 4 even/odd (H, W) phases outside the kernel so all 9 taps become plain
    stride-1 slices; the feature map is read exactly once by the kernel."""
    Ho, Wo = o_ref.shape[1], o_ref.shape[2]
    ee = ee_ref[...]
    eo = eo_ref[...]
    oe = oe_ref[...]
    oo = oo_ref[...]
    r = ee[:, 0:Ho, 0:Wo, :]
    r = jnp.maximum(r, ee[:, 0:Ho, 1:Wo + 1, :])
    r = jnp.maximum(r, ee[:, 1:Ho + 1, 0:Wo, :])
    r = jnp.maximum(r, ee[:, 1:Ho + 1, 1:Wo + 1, :])
    r = jnp.maximum(r, eo[:, 0:Ho, 0:Wo, :])
    r = jnp.maximum(r, eo[:, 1:Ho + 1, 0:Wo, :])
    r = jnp.maximum(r, oe[:, 0:Ho, 0:Wo, :])
    r = jnp.maximum(r, oe[:, 0:Ho, 1:Wo + 1, :])
    r = jnp.maximum(r, oo[:, 0:Ho, 0:Wo, :])
    o_ref[...] = r


def _avgpool2x2_kernel(x_ref, o_ref):
    """2x2 / stride-2 average pool on a (bt, 2, Wo, 2, C) view (free reshape
    outside): H/W pairs are separate size-2 axes, so no sub-128 lane slicing."""
    x = x_ref[...].astype(jnp.float32)               # (bt, 2, Wo, 2, C)
    h = x[:, 0] + x[:, 1]                            # pool over the H pair
    w = h[:, :, 0, :] + h[:, :, 1, :]                # pool over the W pair
    o_ref[...] = (0.25 * w).astype(o_ref.dtype)


def _head_kernel(x_ref, s_ref, b_ref, w_ref, lb_ref, o_ref,
                 *, n_per_view, apply_sigmoid):
    """norm5 (no relu) + global average pool + max over the two views +
    Linear (+ optional sigmoid), fused into one kernel."""
    x = x_ref[...].astype(jnp.float32)               # (2N, H*W, C)
    x = x * s_ref[...] + b_ref[...]                  # folded norm5
    g = jnp.mean(x, axis=1)                          # adaptive avg pool -> (2N, C)
    p = jnp.maximum(g[0:n_per_view, :], g[n_per_view:2 * n_per_view, :])
    logits = jnp.dot(p, w_ref[...], preferred_element_type=jnp.float32) + lb_ref[...]
    if apply_sigmoid:
        logits = 1.0 / (1.0 + jnp.exp(-logits))
    o_ref[...] = logits


# ----------------------------------------------------------------------------
# pallas_call wrappers
# ----------------------------------------------------------------------------
def _round_up(x, m):
    return (x + m - 1) // m * m


def _pick_tile(dim, target, step):
    """Largest multiple of `step` <= target dividing `dim`, else `target`."""
    for cand in range(target, step - 1, -step):
        if dim % cand == 0:
            return cand
    return target


def fused_gemm(a, b, *, si=None, bi=None, so=None, bo=None,
               prologue_relu=True, epilogue_relu=True,
               out_dtype=jnp.bfloat16, tm_target=512, tk_target=2048,
               tn_target=512):
    """out = epilogue(prologue(a) @ b); a:(M,K), b:(K,N)."""
    M, K = a.shape
    Kb, N = b.shape
    assert K == Kb
    prologue = si is not None
    epilogue = so is not None

    # --- M tiles (parallel).  Prefer sizes that divide M (no pad / no slice),
    #     and >=2 tiles when M is big enough so both v7x TensorCores get work.
    if M <= tm_target:
        tm = M // 2 if (M >= 256 and M % 16 == 0) else M
    else:
        tm = _pick_tile(M, tm_target, 128)
    m_pad = _round_up(M, tm)
    if m_pad != M:
        # TODO(synk): masked tail M tile instead of an HBM pad round trip.
        a = jnp.pad(a, ((0, m_pad - M), (0, 0)))

    # --- K tiles (reduction, innermost grid axis).
    tk = K if K <= tk_target else _pick_tile(K, tk_target, 128)
    k_pad = _round_up(K, tk)
    if k_pad != K:
        a = jnp.pad(a, ((0, 0), (0, k_pad - K)))
        b = jnp.pad(b, ((0, k_pad - K), (0, 0)))
        if prologue:
            si = jnp.pad(si, ((0, 0), (0, k_pad - K)))
            bi = jnp.pad(bi, ((0, 0), (0, k_pad - K)))

    # --- N tiles: keep the whole weight resident (single N block) when it fits
    #     so b is DMA'd into VMEM exactly once per pallas_call.
    if N <= tn_target:
        tn = N
    else:
        tn = _pick_tile(N, tn_target, 128)
        if N % tn:
            tn = N

    nm, nn, nk = m_pad // tm, N // tn, k_pad // tk
    multi_k = nk > 1
    mm_dtype = b.dtype

    if multi_k:
        a_spec = pl.BlockSpec((tm, tk), lambda i, j, k: (i, k))
        b_spec = pl.BlockSpec((tk, tn), lambda i, j, k: (k, j))
        vk = lambda i, j, k: (0, k)
        vn = lambda i, j, k: (0, j)
        o_spec = pl.BlockSpec((tm, tn), lambda i, j, k: (i, j))
        grid = (nm, nn, nk)
        dims = ("parallel", "parallel", "arbitrary")
        scratch = [pltpu.VMEM((tm, tn), jnp.float32)]
    else:
        a_spec = pl.BlockSpec((tm, tk), lambda i, j: (i, 0))
        b_spec = pl.BlockSpec((tk, tn), lambda i, j: (0, j))
        vk = lambda i, j: (0, 0)
        vn = lambda i, j: (0, j)
        o_spec = pl.BlockSpec((tm, tn), lambda i, j: (i, j))
        grid = (nm, nn)
        dims = ("parallel", "parallel")
        scratch = []

    operands = [a, b]
    in_specs = [a_spec, b_spec]
    if prologue:
        operands += [si.astype(jnp.float32), bi.astype(jnp.float32)]
        in_specs += [pl.BlockSpec((1, tk), vk), pl.BlockSpec((1, tk), vk)]
    if epilogue:
        operands += [so.astype(jnp.float32), bo.astype(jnp.float32)]
        in_specs += [pl.BlockSpec((1, tn), vn), pl.BlockSpec((1, tn), vn)]

    kern = functools.partial(
        _gemm_bn_kernel, prologue=prologue, prologue_relu=prologue_relu,
        epilogue=epilogue, epilogue_relu=epilogue_relu, multi_k=multi_k,
        mm_dtype=mm_dtype)

    out = pl.pallas_call(
        kern,
        grid=grid,
        in_specs=in_specs,
        out_specs=o_spec,
        out_shape=jax.ShapeDtypeStruct((m_pad, N), out_dtype),
        scratch_shapes=scratch,
        compiler_params=pltpu.CompilerParams(
            dimension_semantics=dims, vmem_limit_bytes=_VMEM_LIMIT),
    )(*operands)
    return out[:M] if m_pad != M else out


def conv3x3_direct(x, w9):
    """3x3/s1/p1 conv reading the NHWC map straight from HBM (no im2col)."""
    B, H, W, C = x.shape
    G = w9.shape[-1]
    Wp = W + 2
    # 1-px conv halo + 1 extra bottom row so every flat tap window is in bounds.
    xp = jnp.pad(x, ((0, 0), (1, 2), (1, 1), (0, 0)))
    xf = xp.reshape(B, (H + 3) * Wp, C)              # free, row-major compatible
    out = pl.pallas_call(
        functools.partial(_conv3x3_flat_kernel, wp=Wp),
        grid=(B,),
        in_specs=[
            pl.BlockSpec((1, (H + 3) * Wp, C), lambda b: (b, 0, 0)),
            pl.BlockSpec((9, C, G), lambda b: (0, 0, 0)),
        ],
        out_specs=pl.BlockSpec((1, H * Wp, G), lambda b: (b, 0, 0)),
        out_shape=jax.ShapeDtypeStruct((B, H * Wp, G), x.dtype),
        compiler_params=pltpu.CompilerParams(
            dimension_semantics=("parallel",), vmem_limit_bytes=_VMEM_LIMIT),
    )(xf, w9)
    # Drop the Wp-W junk columns; XLA fuses this slice into the following concat.
    return out.reshape(B, H, Wp, G)[:, :, :W, :]


def maxpool_3x3_s2_p1(x):
    # TODO(synk): in-kernel stride-2 phase extraction (or fuse into the conv0
    # epilogue writeback) to drop the plain-JAX phase-split HBM round trip.
    B, H, W, C = x.shape
    assert H % 2 == 0 and W % 2 == 0
    Ho, Wo = H // 2, W // 2
    xp = jnp.pad(x, ((0, 0), (1, 1), (1, 1), (0, 0)), constant_values=-jnp.inf)
    ee = xp[:, 0::2, 0::2, :]                        # each phase: (B, Ho+1, Wo+1, C)
    eo = xp[:, 0::2, 1::2, :]
    oe = xp[:, 1::2, 0::2, :]
    oo = xp[:, 1::2, 1::2, :]
    return pl.pallas_call(
        _maxpool_phase_kernel,
        grid=(B,),
        in_specs=[pl.BlockSpec((1, Ho + 1, Wo + 1, C), lambda i: (i, 0, 0, 0))
                  for _ in range(4)],
        out_specs=pl.BlockSpec((1, Ho, Wo, C), lambda i: (i, 0, 0, 0)),
        out_shape=jax.ShapeDtypeStruct((B, Ho, Wo, C), x.dtype),
        compiler_params=pltpu.CompilerParams(
            dimension_semantics=("parallel",), vmem_limit_bytes=_VMEM_LIMIT),
    )(ee, eo, oe, oo)


def avgpool_2x2_s2(x):
    B, H, W, C = x.shape
    assert H % 2 == 0 and W % 2 == 0
    Ho, Wo = H // 2, W // 2
    rows = B * Ho
    x5 = x.reshape(rows, 2, Wo, 2, C)                # free, row-major compatible
    bt = rows
    if rows > 256:                                   # large maps: ~256-row blocks
        bt = _pick_tile(rows, 256, 8)
        if rows % bt:
            bt = max(math.gcd(rows, 256), 1)
    out = pl.pallas_call(
        _avgpool2x2_kernel,
        grid=(rows // bt,),
        in_specs=[pl.BlockSpec((bt, 2, Wo, 2, C), lambda i: (i, 0, 0, 0, 0))],
        out_specs=pl.BlockSpec((bt, Wo, C), lambda i: (i, 0, 0)),
        out_shape=jax.ShapeDtypeStruct((rows, Wo, C), x.dtype),
        compiler_params=pltpu.CompilerParams(
            dimension_semantics=("parallel",), vmem_limit_bytes=_VMEM_LIMIT),
    )(x5)
    return out.reshape(B, Ho, Wo, C)


def pallas_head(x3, s5, b5, lin_w, lin_b, *, n_per_view, apply_sigmoid):
    # TODO(synk): tile over the batch axis for large N (v7x VMEM / 2-TC sharing).
    B2, HW, C = x3.shape
    Np = lin_w.shape[1]
    kern = functools.partial(_head_kernel, n_per_view=n_per_view,
                             apply_sigmoid=apply_sigmoid)
    return pl.pallas_call(
        kern,
        grid=(1,),
        in_specs=[
            pl.BlockSpec((B2, HW, C), lambda i: (0, 0, 0)),
            pl.BlockSpec((1, C), lambda i: (0, 0)),
            pl.BlockSpec((1, C), lambda i: (0, 0)),
            pl.BlockSpec((C, Np), lambda i: (0, 0)),
            pl.BlockSpec((1, Np), lambda i: (0, 0)),
        ],
        out_specs=pl.BlockSpec((n_per_view, Np), lambda i: (0, 0)),
        out_shape=jax.ShapeDtypeStruct((n_per_view, Np), jnp.float32),
        compiler_params=pltpu.CompilerParams(
            dimension_semantics=("arbitrary",), vmem_limit_bytes=_VMEM_LIMIT),
    )(x3, s5, b5, lin_w, lin_b)


# ----------------------------------------------------------------------------
# conv0 glue (7x7 / stride 2 / pad 3)
# ----------------------------------------------------------------------------
def _im2col(x, kh, kw, stride, pad):
    # TODO(synk): direct strided conv0 kernel to drop the 49x patch matrix.
    B, H, W, C = x.shape
    if pad:
        x = jnp.pad(x, ((0, 0), (pad, pad), (pad, pad), (0, 0)))
    Hp, Wp = x.shape[1], x.shape[2]
    Ho = (Hp - kh) // stride + 1
    Wo = (Wp - kw) // stride + 1
    cols = []
    for ih in range(kh):
        for iw in range(kw):
            cols.append(x[:, ih:ih + stride * (Ho - 1) + 1:stride,
                          iw:iw + stride * (Wo - 1) + 1:stride, :])
    patches = jnp.concatenate(cols, axis=-1)          # tap-major, channel-minor
    return patches.reshape(B * Ho * Wo, kh * kw * C), Ho, Wo


# ----------------------------------------------------------------------------
# Parameter construction (deterministic, synthetic, scaled-down DenseNet-161)
# ----------------------------------------------------------------------------
class KeyGen:
    def __init__(self, key):
        self.key = key

    def __call__(self):
        self.key, sub = jax.random.split(self.key)
        return sub


def _conv_w(key, kh, kw, cin, cout):
    fan_in = kh * kw * cin
    return (jax.random.normal(key, (kh, kw, cin, cout), jnp.float32)
            * (1.0 / math.sqrt(fan_in)))


def _bn_p(key, c):
    k1, k2, k3, k4 = jax.random.split(key, 4)
    gamma = 1.0 + 0.1 * jax.random.normal(k1, (c,), jnp.float32)
    beta = 0.1 * jax.random.normal(k2, (c,), jnp.float32)
    mean = 0.1 * jax.random.normal(k3, (c,), jnp.float32)
    var = 1.0 + 0.1 * jax.random.uniform(k4, (c,), jnp.float32)
    eps = 1e-5
    scale = gamma / jnp.sqrt(var + eps)
    bias = beta - mean * scale
    return scale.reshape(1, c), bias.reshape(1, c)


def build_params(key, *, in_ch=3, init_feat=8, growth=4, bn_size=4,
                 blocks=(2, 2, 2, 2), out_size=5):
    kg = KeyGen(key)
    p = {}

    # conv0: 7x7/s2/p3, Cin zero-padded 3->8 so K = 7*7*8 is sublane aligned.
    w0 = _conv_w(kg(), 7, 7, in_ch, init_feat)
    w0 = jnp.pad(w0, ((0, 0), (0, 0), (0, 8 - in_ch), (0, 0)))
    p["conv0_w"] = w0.reshape(7 * 7 * 8, init_feat).astype(jnp.bfloat16)
    p["norm0_s"], p["norm0_b"] = _bn_p(kg(), init_feat)   # norm0 -> conv0 epilogue

    p["blocks"], p["trans"] = [], []
    c = init_feat
    for bi, nl in enumerate(blocks):
        layers = []
        for _ in range(nl):
            bn1_s, bn1_b = _bn_p(kg(), c)
            w1 = _conv_w(kg(), 1, 1, c, bn_size * growth).reshape(c, bn_size * growth)
            bn2_s, bn2_b = _bn_p(kg(), bn_size * growth)   # -> conv1 epilogue
            w2 = _conv_w(kg(), 3, 3, bn_size * growth, growth)
            layers.append({
                "bn1_s": bn1_s, "bn1_b": bn1_b,
                "conv1_w": w1.astype(jnp.bfloat16),
                "bn2_s": bn2_s, "bn2_b": bn2_b,
                "conv2_w": w2.reshape(9, bn_size * growth, growth).astype(jnp.bfloat16),
            })
            c += growth
        p["blocks"].append(layers)
        if bi != len(blocks) - 1:
            bn_s, bn_b = _bn_p(kg(), c)
            wt = _conv_w(kg(), 1, 1, c, c // 2).reshape(c, c // 2)
            p["trans"].append({"bn_s": bn_s, "bn_b": bn_b,
                               "conv_w": wt.astype(jnp.bfloat16)})
            c //= 2

    p["norm5_s"], p["norm5_b"] = _bn_p(kg(), c)            # norm5 (no relu), head
    p["lin_w"] = 0.1 * jax.random.normal(kg(), (c, out_size), jnp.float32)
    p["lin_b"] = 0.1 * jax.random.normal(kg(), (1, out_size), jnp.float32)
    return p


# ----------------------------------------------------------------------------
# Model forward (matches DenseNet161_trick_v3.forward, shared branch weights)
# ----------------------------------------------------------------------------
def dense_layer(x, lp):
    B, H, W, C = x.shape
    # BN1+ReLU (prologue) -> 1x1 conv -> BN2+ReLU (epilogue): ONE fused GEMM.
    h = fused_gemm(x.reshape(B * H * W, C), lp["conv1_w"],
                   si=lp["bn1_s"], bi=lp["bn1_b"], prologue_relu=True,
                   so=lp["bn2_s"], bo=lp["bn2_b"], epilogue_relu=True)
    h = h.reshape(B, H, W, -1)
    # 3x3 conv, direct (no im2col), real `growth` output channels (no 128 pad).
    y = conv3x3_direct(h, lp["conv2_w"])
    # TODO(synk): write y straight into a preallocated DenseNet slab via
    # input_output_aliases + masked unaligned-channel stores instead of concat.
    return jnp.concatenate([x, y], axis=-1)


def transition(x, tp):
    B, H, W, C = x.shape
    cout = tp["conv_w"].shape[-1]
    y = fused_gemm(x.reshape(B * H * W, C), tp["conv_w"],
                   si=tp["bn_s"], bi=tp["bn_b"], prologue_relu=True)
    return avgpool_2x2_s2(y.reshape(B, H, W, cout))


def densenet_trick_v3_forward(params, frontal_lateral_images, *, mode="inference"):
    """frontal_lateral_images: NCHW float32, (N,3,H,W) for inference/val (zeros
    appended for the lateral view, as in the PyTorch module) or (N,6,H,W) for
    train.  Both view branches share parameters, so they run as ONE batched
    pass of size 2N (identical numerics)."""
    imgs = frontal_lateral_images
    if mode != "train":
        imgs = jnp.concatenate([imgs, jnp.zeros_like(imgs)], axis=1)   # (N,6,H,W)
    n = imgs.shape[0]
    x = jnp.concatenate([imgs[:, 0:3], imgs[:, 3:6]], axis=0)          # (2N,3,H,W)
    x = jnp.transpose(x, (0, 2, 3, 1))                                 # NHWC
    cin_pad = params["conv0_w"].shape[0] // 49
    if cin_pad > x.shape[-1]:
        x = jnp.pad(x, ((0, 0), (0, 0), (0, 0), (0, cin_pad - x.shape[-1])))
    x = x.astype(jnp.bfloat16)

    # conv0 + norm0 + relu0 (BN fused as GEMM epilogue), then maxpool0.
    B = x.shape[0]
    a, Ho, Wo = _im2col(x, 7, 7, 2, 3)
    c0 = params["conv0_w"].shape[-1]
    x = fused_gemm(a, params["conv0_w"],
                   so=params["norm0_s"], bo=params["norm0_b"],
                   epilogue_relu=True).reshape(B, Ho, Wo, c0)
    x = maxpool_3x3_s2_p1(x)

    # Dense blocks with transitions (blocks 1-2 = shared_block, 3-4 = branch;
    # branch weights are shared so the 2N batched pass covers both views).
    nblocks = len(params["blocks"])
    for bi in range(nblocks):
        for lp in params["blocks"][bi]:
            x = dense_layer(x, lp)
        if bi != nblocks - 1:
            x = transition(x, params["trans"][bi])

    # norm5 (no relu) + global avg pool + max over views + Linear (+ sigmoid).
    B2, H, W, C = x.shape
    return pallas_head(x.reshape(B2, H * W, C),
                       params["norm5_s"], params["norm5_b"],
                       params["lin_w"], params["lin_b"],
                       n_per_view=n,
                       apply_sigmoid=(mode not in ["train", "val"]))


# ----------------------------------------------------------------------------
if __name__ == "__main__":
    key = jax.random.PRNGKey(0)
    pkey, xkey = jax.random.split(key)

    OUT_SIZE = 5
    params = build_params(pkey, out_size=OUT_SIZE)

    # NCHW, 3 channels (inference mode); spatial 32 is the minimum for the 5
    # spatial halvings of DenseNet.
    x = jax.random.normal(xkey, (2, 3, 32, 32), jnp.float32)

    fwd = jax.jit(functools.partial(densenet_trick_v3_forward, mode="inference"))
    out = jax.block_until_ready(fwd(params, x))

    assert out.shape == (2, OUT_SIZE), out.shape
    assert bool(jnp.all(jnp.isfinite(out)))
    assert bool(jnp.all((out >= 0.0) & (out <= 1.0)))   # sigmoid output
    print("KERNEL_OK")
</pallas_src>

<mosaic_0001>
module attributes {stable_mosaic.version = 11 : i64} {
  func.func @_gemm_bn_kernel(%arg0: i32, %arg1: i32, %arg2: memref<512x392xbf16, #tpu.memory_space<vmem>>, %arg3: memref<392x8xbf16, #tpu.memory_space<vmem>>, %arg4: memref<1x8xf32, #tpu.memory_space<vmem>>, %arg5: memref<1x8xf32, #tpu.memory_space<vmem>>, %arg6: memref<512x8xbf16, #tpu.memory_space<vmem>>) attributes {dimension_semantics = [#tpu.dimension_semantics<parallel>, #tpu.dimension_semantics<parallel>], iteration_bounds = array<i64: 2, 1>, scalar_prefetch = 0 : i64, scratch_operands = 0 : i64, tpu.core_type = #tpu.core_type<tc>, window_params = [{transform_indices = @transform_0, window_bounds = array<i64: 512, 392>}, {transform_indices = @transform_1, window_bounds = array<i64: 392, 8>}, {transform_indices = @transform_2, window_bounds = array<i64: 1, 8>}, {transform_indices = @transform_3, window_bounds = array<i64: 1, 8>}, {transform_indices = @transform_4, window_bounds = array<i64: 512, 8>}]} {
    %c0 = arith.constant 0 : index
    %c0_0 = arith.constant 0 : index
    %0 = vector.load %arg2[%c0, %c0_0] : memref<512x392xbf16, #tpu.memory_space<vmem>>, vector<512x392xbf16>
    %c0_1 = arith.constant 0 : index
    %c0_2 = arith.constant 0 : index
    %1 = vector.load %arg3[%c0_1, %c0_2] : memref<392x8xbf16, #tpu.memory_space<vmem>>, vector<392x8xbf16>
    %cst = arith.constant dense<0.000000e+00> : vector<512x8xf32>
    %2 = tpu.matmul %0, %1, %cst {dimension_numbers = #tpu.dot_dimension_numbers<[1], [0], [0], [1], [0, 0, 1, 1], [], []>} : vector<512x392xbf16>, vector<392x8xbf16>, vector<512x8xf32> -> vector<512x8xf32>
    %c0_3 = arith.constant 0 : index
    %c0_4 = arith.constant 0 : index
    %3 = vector.load %arg4[%c0_3, %c0_4] : memref<1x8xf32, #tpu.memory_space<vmem>>, vector<1x8xf32>
    %4 = vector.broadcast %3 : vector<1x8xf32> to vector<512x8xf32>
    %5 = arith.mulf %2, %4 : vector<512x8xf32>
    %c0_5 = arith.constant 0 : index
    %c0_6 = arith.constant 0 : index
    %6 = vector.load %arg5[%c0_5, %c0_6] : memref<1x8xf32, #tpu.memory_space<vmem>>, vector<1x8xf32>
    %7 = vector.broadcast %6 : vector<1x8xf32> to vector<512x8xf32>
    %8 = arith.addf %5, %7 : vector<512x8xf32>
    %cst_7 = arith.constant 0.000000e+00 : f32
    %9 = vector.broadcast %cst_7 : f32 to vector<512x8xf32>
    %10 = arith.maximumf %8, %9 : vector<512x8xf32>
    %11 = arith.truncf %10 : vector<512x8xf32> to vector<512x8xbf16>
    %c0_8 = arith.constant 0 : index
    %c0_9 = arith.constant 0 : index
    %12 = vector.load %arg6[%c0_8, %c0_9] : memref<512x8xbf16, #tpu.memory_space<vmem>>, vector<512x8xbf16>
    tpu.vector_store %arg6[%c0_8, %c0_9], %11 {strides = array<i32>} : memref<512x8xbf16, #tpu.memory_space<vmem>>, vector<512x8xbf16>,
    return
  }
  func.func @transform_0(%arg0: i32, %arg1: i32) -> (i32, i32) {
    %c0_i32 = arith.constant 0 : i32
    %c0_i32_0 = arith.constant 0 : i32
    return %arg0, %c0_i32 : i32, i32
  }
  func.func @transform_1(%arg0: i32, %arg1: i32) -> (i32, i32) {
    %c0_i32 = arith.constant 0 : i32
    %c0_i32_0 = arith.constant 0 : i32
    return %c0_i32, %arg1 : i32, i32
  }
  func.func @transform_2(%arg0: i32, %arg1: i32) -> (i32, i32) {
    %c0_i32 = arith.constant 0 : i32
    %c0_i32_0 = arith.constant 0 : i32
    return %c0_i32, %arg1 : i32, i32
  }
  func.func @transform_3(%arg0: i32, %arg1: i32) -> (i32, i32) {
    %c0_i32 = arith.constant 0 : i32
    %c0_i32_0 = arith.constant 0 : i32
    return %c0_i32, %arg1 : i32, i32
  }
  func.func @transform_4(%arg0: i32, %arg1: i32) -> (i32, i32) {
    %c0_i32 = arith.constant 0 : i32
    return %arg0, %arg1 : i32, i32
  }
}

module attributes {stable_mosaic.version = 11 : i64} {
  func.func @_maxpool_phase_kernel(%arg0: i32, %arg1: memref<1x9x9x8xbf16, #tpu.memory_space<vmem>>, %arg2: memref<1x9x9x8xbf16, #tpu.memory_space<vmem>>, %arg3: memref<1x9x9x8xbf16, #tpu.memory_space<vmem>>, %arg4: memref<1x9x9x8xbf16, #tpu.memory_space<vmem>>, %arg5: memref<1x8x8x8xbf16, #tpu.memory_space<vmem>>) attributes {dimension_semantics = [#tpu.dimension_semantics<parallel>], iteration_bounds = array<i64: 4>, scalar_prefetch = 0 : i64, scratch_operands = 0 : i64, tpu.core_type = #tpu.core_type<tc>, window_params = [{transform_indices = @transform_0, window_bounds = array<i64: 1, 9, 9, 8>}, {transform_indices = @transform_1, window_bounds = array<i64: 1, 9, 9, 8>}, {transform_indices = @transform_2, window_bounds = array<i64: 1, 9, 9, 8>}, {transform_indices = @transform_3, window_bounds = array<i64: 1, 9, 9, 8>}, {transform_indices = @transform_4, window_bounds = array<i64: 1, 8, 8, 8>}]} {
    %c0 = arith.constant 0 : index
    %c0_0 = arith.constant 0 : index
    %c0_1 = arith.constant 0 : index
    %c0_2 = arith.constant 0 : index
    %0 = vector.load %arg1[%c0, %c0_0, %c0_1, %c0_2] : memref<1x9x9x8xbf16, #tpu.memory_space<vmem>>, vector<1x9x9x8xbf16>
    %c0_3 = arith.constant 0 : index
    %c0_4 = arith.constant 0 : index
    %c0_5 = arith.constant 0 : index
    %c0_6 = arith.constant 0 : index
    %1 = vector.load %arg2[%c0_3, %c0_4, %c0_5, %c0_6] : memref<1x9x9x8xbf16, #tpu.memory_space<vmem>>, vector<1x9x9x8xbf16>
    %c0_7 = arith.constant 0 : index
    %c0_8 = arith.constant 0 : index
    %c0_9 = arith.constant 0 : index
    %c0_10 = arith.constant 0 : index
    %2 = vector.load %arg3[%c0_7, %c0_8, %c0_9, %c0_10] : memref<1x9x9x8xbf16, #tpu.memory_space<vmem>>, vector<1x9x9x8xbf16>
    %c0_11 = arith.constant 0 : index
    %c0_12 = arith.constant 0 : index
    %c0_13 = arith.constant 0 : index
    %c0_14 = arith.constant 0 : index
    %3 = vector.load %arg4[%c0_11, %c0_12, %c0_13, %c0_14] : memref<1x9x9x8xbf16, #tpu.memory_space<vmem>>, vector<1x9x9x8xbf16>
    %4 = vector.extract_strided_slice %0 {offsets = [0, 0, 0, 0], sizes = [1, 8, 8, 8], strides = [1, 1, 1, 1]} : vector<1x9x9x8xbf16> to vector<1x8x8x8xbf16>
    %5 = vector.extract_strided_slice %0 {offsets = [0, 0, 1, 0], sizes = [1, 8, 8, 8], strides = [1, 1, 1, 1]} : vector<1x9x9x8xbf16> to vector<1x8x8x8xbf16>
    %6 = arith.maximumf %4, %5 : vector<1x8x8x8xbf16>
    %7 = vector.extract_strided_slice %0 {offsets = [0, 1, 0, 0], sizes = [1, 8, 8, 8], strides = [1, 1, 1, 1]} : vector<1x9x9x8xbf16> to vector<1x8x8x8xbf16>
    %8 = arith.maximumf %6, %7 : vector<1x8x8x8xbf16>
    %9 = vector.extract_strided_slice %0 {offsets = [0, 1, 1, 0], sizes = [1, 8, 8, 8], strides = [1, 1, 1, 1]} : vector<1x9x9x8xbf16> to vector<1x8x8x8xbf16>
    %10 = arith.maximumf %8, %9 : vector<1x8x8x8xbf16>
    %11 = vector.extract_strided_slice %1 {offsets = [0, 0, 0, 0], sizes = [1, 8, 8, 8], strides = [1, 1, 1, 1]} : vector<1x9x9x8xbf16> to vector<1x8x8x8xbf16>
    %12 = arith.maximumf %10, %11 : vector<1x8x8x8xbf16>
    %13 = vector.extract_strided_slice %1 {offsets = [0, 1, 0, 0], sizes = [1, 8, 8, 8], strides = [1, 1, 1, 1]} : vector<1x9x9x8xbf16> to vector<1x8x8x8xbf16>
    %14 = arith.maximumf %12, %13 : vector<1x8x8x8xbf16>
    %15 = vector.extract_strided_slice %2 {offsets = [0, 0, 0, 0], sizes = [1, 8, 8, 8], strides = [1, 1, 1, 1]} : vector<1x9x9x8xbf16> to vector<1x8x8x8xbf16>
    %16 = arith.maximumf %14, %15 : vector<1x8x8x8xbf16>
    %17 = vector.extract_strided_slice %2 {offsets = [0, 0, 1, 0], sizes = [1, 8, 8, 8], strides = [1, 1, 1, 1]} : vector<1x9x9x8xbf16> to vector<1x8x8x8xbf16>
    %18 = arith.maximumf %16, %17 : vector<1x8x8x8xbf16>
    %19 = vector.extract_strided_slice %3 {offsets = [0, 0, 0, 0], sizes = [1, 8, 8, 8], strides = [1, 1, 1, 1]} : vector<1x9x9x8xbf16> to vector<1x8x8x8xbf16>
    %20 = arith.maximumf %18, %19 : vector<1x8x8x8xbf16>
    %c0_15 = arith.constant 0 : index
    %c0_16 = arith.constant 0 : index
    %c0_17 = arith.constant 0 : index
    %c0_18 = arith.constant 0 : index
    %21 = vector.load %arg5[%c0_15, %c0_16, %c0_17, %c0_18] : memref<1x8x8x8xbf16, #tpu.memory_space<vmem>>, vector<1x8x8x8xbf16>
    tpu.vector_store %arg5[%c0_15, %c0_16, %c0_17, %c0_18], %20 {strides = array<i32>} : memref<1x8x8x8xbf16, #tpu.memory_space<vmem>>, vector<1x8x8x8xbf16>,
    return
  }
  func.func @transform_0(%arg0: i32) -> (i32, i32, i32, i32) {
    %c0_i32 = arith.constant 0 : i32
    %c0_i32_0 = arith.constant 0 : i32
    %c0_i32_1 = arith.constant 0 : i32
    %c0_i32_2 = arith.constant 0 : i32
    return %arg0, %c0_i32, %c0_i32_0, %c0_i32_1 : i32, i32, i32, i32
  }
  func.func @transform_1(%arg0: i32) -> (i32, i32, i32, i32) {
    %c0_i32 = arith.constant 0 : i32
    %c0_i32_0 = arith.constant 0 : i32
    %c0_i32_1 = arith.constant 0 : i32
    %c0_i32_2 = arith.constant 0 : i32
    return %arg0, %c0_i32, %c0_i32_0, %c0_i32_1 : i32, i32, i32, i32
  }
  func.func @transform_2(%arg0: i32) -> (i32, i32, i32, i32) {
    %c0_i32 = arith.constant 0 : i32
    %c0_i32_0 = arith.constant 0 : i32
    %c0_i32_1 = arith.constant 0 : i32
    %c0_i32_2 = arith.constant 0 : i32
    return %arg0, %c0_i32, %c0_i32_0, %c0_i32_1 : i32, i32, i32, i32
  }
  func.func @transform_3(%arg0: i32) -> (i32, i32, i32, i32) {
    %c0_i32 = arith.constant 0 : i32
    %c0_i32_0 = arith.constant 0 : i32
    %c0_i32_1 = arith.constant 0 : i32
    %c0_i32_2 = arith.constant 0 : i32
    return %arg0, %c0_i32, %c0_i32_0, %c0_i32_1 : i32, i32, i32, i32
  }
  func.func @transform_4(%arg0: i32) -> (i32, i32, i32, i32) {
    %c0_i32 = arith.constant 0 : i32
    %c0_i32_0 = arith.constant 0 : i32
    %c0_i32_1 = arith.constant 0 : i32
    %c0_i32_2 = arith.constant 0 : i32
    return %arg0, %c0_i32, %c0_i32_0, %c0_i32_1 : i32, i32, i32, i32
  }
}

module attributes {stable_mosaic.version = 11 : i64} {
  func.func @_gemm_bn_kernel(%arg0: i32, %arg1: i32, %arg2: memref<128x8xbf16, #tpu.memory_space<vmem>>, %arg3: memref<8x16xbf16, #tpu.memory_space<vmem>>, %arg4: memref<1x8xf32, #tpu.memory_space<vmem>>, %arg5: memref<1x8xf32, #tpu.memory_space<vmem>>, %arg6: memref<1x16xf32, #tpu.memory_space<vmem>>, %arg7: memref<1x16xf32, #tpu.memory_space<vmem>>, %arg8: memref<128x16xbf16, #tpu.memory_space<vmem>>) attributes {dimension_semantics = [#tpu.dimension_semantics<parallel>, #tpu.dimension_semantics<parallel>], iteration_bounds = array<i64: 2, 1>, scalar_prefetch = 0 : i64, scratch_operands = 0 : i64, tpu.core_type = #tpu.core_type<tc>, window_params = [{transform_indices = @transform_0, window_bounds = array<i64: 128, 8>}, {transform_indices = @transform_1, window_bounds = array<i64: 8, 16>}, {pipeline_mode = #tpu.pipeline_mode<synchronous>, transform_indices = @transform_2, window_bounds = array<i64: 1, 8>}, {pipeline_mode = #tpu.pipeline_mode<synchronous>, transform_indices = @transform_3, window_bounds = array<i64: 1, 8>}, {transform_indices = @transform_4, window_bounds = array<i64: 1, 16>}, {transform_indices = @transform_5, window_bounds = array<i64: 1, 16>}, {transform_indices = @transform_6, window_bounds = array<i64: 128, 16>}]} {
    %c0 = arith.constant 0 : index
    %c0_0 = arith.constant 0 : index
    %0 = vector.load %arg2[%c0, %c0_0] : memref<128x8xbf16, #tpu.memory_space<vmem>>, vector<128x8xbf16>
    %1 = arith.extf %0 : vector<128x8xbf16> to vector<128x8xf32>
    %c0_1 = arith.constant 0 : index
    %c0_2 = arith.constant 0 : index
    %2 = vector.load %arg4[%c0_1, %c0_2] : memref<1x8xf32, #tpu.memory_space<vmem>>, vector<1x8xf32>
    %3 = vector.broadcast %2 : vector<1x8xf32> to vector<128x8xf32>
    %4 = arith.mulf %1, %3 : vector<128x8xf32>
    %c0_3 = arith.constant 0 : index
    %c0_4 = arith.constant 0 : index
    %5 = vector.load %arg5[%c0_3, %c0_4] : memref<1x8xf32, #tpu.memory_space<vmem>>, vector<1x8xf32>
    %6 = vector.broadcast %5 : vector<1x8xf32> to vector<128x8xf32>
    %7 = arith.addf %4, %6 : vector<128x8xf32>
    %cst = arith.constant 0.000000e+00 : f32
    %8 = vector.broadcast %cst : f32 to vector<128x8xf32>
    %9 = arith.maximumf %7, %8 : vector<128x8xf32>
    %10 = arith.truncf %9 : vector<128x8xf32> to vector<128x8xbf16>
    %c0_5 = arith.constant 0 : index
    %c0_6 = arith.constant 0 : index
    %11 = vector.load %arg3[%c0_5, %c0_6] : memref<8x16xbf16, #tpu.memory_space<vmem>>, vector<8x16xbf16>
    %cst_7 = arith.constant dense<0.000000e+00> : vector<128x16xf32>
    %12 = tpu.matmul %10, %11, %cst_7 {dimension_numbers = #tpu.dot_dimension_numbers<[1], [0], [0], [1], [0, 0, 1, 1], [], []>} : vector<128x8xbf16>, vector<8x16xbf16>, vector<128x16xf32> -> vector<128x16xf32>
    %c0_8 = arith.constant 0 : index
    %c0_9 = arith.constant 0 : index
    %13 = vector.load %arg6[%c0_8, %c0_9] : memref<1x16xf32, #tpu.memory_space<vmem>>, vector<1x16xf32>
    %14 = vector.broadcast %13 : vector<1x16xf32> to vector<128x16xf32>
    %15 = arith.mulf %12, %14 : vector<128x16xf32>
    %c0_10 = arith.constant 0 : index
    %c0_11 = arith.constant 0 : index
    %16 = vector.load %arg7[%c0_10, %c0_11] : memref<1x16xf32, #tpu.memory_space<vmem>>, vector<1x16xf32>
    %17 = vector.broadcast %16 : vector<1x16xf32> to vector<128x16xf32>
    %18 = arith.addf %15, %17 : vector<128x16xf32>
    %cst_12 = arith.constant 0.000000e+00 : f32
    %19 = vector.broadcast %cst_12 : f32 to vector<128x16xf32>
    %20 = arith.maximumf %18, %19 : vector<128x16xf32>
    %21 = arith.truncf %20 : vector<128x16xf32> to vector<128x16xbf16>
    %c0_13 = arith.constant 0 : index
    %c0_14 = arith.constant 0 : index
    %22 = vector.load %arg8[%c0_13, %c0_14] : memref<128x16xbf16, #tpu.memory_space<vmem>>, vector<128x16xbf16>
    tpu.vector_store %arg8[%c0_13, %c0_14], %21 {strides = array<i32>} : memref<128x16xbf16, #tpu.memory_space<vmem>>, vector<128x16xbf16>,
    return
  }
  func.func @transform_0(%arg0: i32, %arg1: i32) -> (i32, i32) {
    %c0_i32 = arith.constant 0 : i32
    %c0_i32_0 = arith.constant 0 : i32
    return %arg0, %c0_i32 : i32, i32
  }
  func.func @transform_1(%arg0: i32, %arg1: i32) -> (i32, i32) {
    %c0_i32 = arith.constant 0 : i32
    %c0_i32_0 = arith.constant 0 : i32
    return %c0_i32, %arg1 : i32, i32
  }
  func.func @transform_2(%arg0: i32, %arg1: i32) -> (i32, i32) {
    %c0_i32 = arith.constant 0 : i32
    %c0_i32_0 = arith.constant 0 : i32
    %c0_i32_1 = arith.constant 0 : i32
    return %c0_i32, %c0_i32_0 : i32, i32
  }
  func.func @transform_3(%arg0: i32, %arg1: i32) -> (i32, i32) {
    %c0_i32 = arith.constant 0 : i32
    %c0_i32_0 = arith.constant 0 : i32
    %c0_i32_1 = arith.constant 0 : i32
    return %c0_i32, %c0_i32_0 : i32, i32
  }
  func.func @transform_4(%arg0: i32, %arg1: i32) -> (i32, i32) {
    %c0_i32 = arith.constant 0 : i32
    %c0_i32_0 = arith.constant 0 : i32
    return %c0_i32, %arg1 : i32, i32
  }
  func.func @transform_5(%arg0: i32, %arg1: i32) -> (i32, i32) {
    %c0_i32 = arith.constant 0 : i32
    %c0_i32_0 = arith.constant 0 : i32
    return %c0_i32, %arg1 : i32, i32
  }
  func.func @transform_6(%arg0: i32, %arg1: i32) -> (i32, i32) {
    %c0_i32 = arith.constant 0 : i32
    return %arg0, %arg1 : i32, i32
  }
}

module attributes {stable_mosaic.version = 11 : i64} {
  func.func @_conv3x3_flat_kernel(%arg0: i32, %arg1: memref<1x110x16xbf16, #tpu.memory_space<vmem>>, %arg2: memref<9x16x4xbf16, #tpu.memory_space<vmem>>, %arg3: memref<1x80x4xbf16, #tpu.memory_space<vmem>>) attributes {dimension_semantics = [#tpu.dimension_semantics<parallel>], iteration_bounds = array<i64: 4>, scalar_prefetch = 0 : i64, scratch_operands = 0 : i64, tpu.core_type = #tpu.core_type<tc>, window_params = [{transform_indices = @transform_0, window_bounds = array<i64: 1, 110, 16>}, {pipeline_mode = #tpu.pipeline_mode<synchronous>, transform_indices = @transform_1, window_bounds = array<i64: 9, 16, 4>}, {transform_indices = @transform_2, window_bounds = array<i64: 1, 80, 4>}]} {
    %cst = arith.constant 0.000000e+00 : f32
    %0 = vector.broadcast %cst : f32 to vector<80x4xf32>
    %c0 = arith.constant 0 : index
    %c0_0 = arith.constant 0 : index
    %c0_1 = arith.constant 0 : index
    %1 = vector.load %arg1[%c0, %c0_0, %c0_1] : memref<1x110x16xbf16, #tpu.memory_space<vmem>>, vector<1x80x16xbf16>
    %2 = vector.shape_cast %1 : vector<1x80x16xbf16> to vector<80x16xbf16>
    %c0_2 = arith.constant 0 : index
    %c0_3 = arith.constant 0 : index
    %c0_4 = arith.constant 0 : index
    %3 = vector.load %arg2[%c0_2, %c0_3, %c0_4] : memref<9x16x4xbf16, #tpu.memory_space<vmem>>, vector<1x16x4xbf16>
    %4 = vector.shape_cast %3 : vector<1x16x4xbf16> to vector<16x4xbf16>
    %cst_5 = arith.constant dense<0.000000e+00> : vector<80x4xf32>
    %5 = tpu.matmul %2, %4, %cst_5 {dimension_numbers = #tpu.dot_dimension_numbers<[1], [0], [0], [1], [0, 0, 1, 1], [], []>} : vector<80x16xbf16>, vector<16x4xbf16>, vector<80x4xf32> -> vector<80x4xf32>
    %6 = arith.addf %0, %5 : vector<80x4xf32>
    %c0_6 = arith.constant 0 : index
    %c1 = arith.constant 1 : index
    %c0_7 = arith.constant 0 : index
    %7 = vector.load %arg1[%c0_6, %c1, %c0_7] : memref<1x110x16xbf16, #tpu.memory_space<vmem>>, vector<1x80x16xbf16>
    %8 = vector.shape_cast %7 : vector<1x80x16xbf16> to vector<80x16xbf16>
    %c1_8 = arith.constant 1 : index
    %c0_9 = arith.constant 0 : index
    %c0_10 = arith.constant 0 : index
    %9 = vector.load %arg2[%c1_8, %c0_9, %c0_10] : memref<9x16x4xbf16, #tpu.memory_space<vmem>>, vector<1x16x4xbf16>
    %10 = vector.shape_cast %9 : vector<1x16x4xbf16> to vector<16x4xbf16>
    %cst_11 = arith.constant dense<0.000000e+00> : vector<80x4xf32>
    %11 = tpu.matmul %8, %10, %cst_11 {dimension_numbers = #tpu.dot_dimension_numbers<[1], [0], [0], [1], [0, 0, 1, 1], [], []>} : vector<80x16xbf16>, vector<16x4xbf16>, vector<80x4xf32> -> vector<80x4xf32>
    %12 = arith.addf %6, %11 : vector<80x4xf32>
    %c0_12 = arith.constant 0 : index
    %c2 = arith.constant 2 : index
    %c0_13 = arith.constant 0 : index
    %13 = vector.load %arg1[%c0_12, %c2, %c0_13] : memref<1x110x16xbf16, #tpu.memory_space<vmem>>, vector<1x80x16xbf16>
    %14 = vector.shape_cast %13 : vector<1x80x16xbf16> to vector<80x16xbf16>
    %c2_14 = arith.constant 2 : index
    %c0_15 = arith.constant 0 : index
    %c0_16 = arith.constant 0 : index
    %15 = vector.load %arg2[%c2_14, %c0_15, %c0_16] : memref<9x16x4xbf16, #tpu.memory_space<vmem>>, vector<1x16x4xbf16>
    %16 = vector.shape_cast %15 : vector<1x16x4xbf16> to vector<16x4xbf16>
    %cst_17 = arith.constant dense<0.000000e+00> : vector<80x4xf32>
    %17 = tpu.matmul %14, %16, %cst_17 {dimension_numbers = #tpu.dot_dimension_numbers<[1], [0], [0], [1], [0, 0, 1, 1], [], []>} : vector<80x16xbf16>, vector<16x4xbf16>, vector<80x4xf32> -> vector<80x4xf32>
    %18 = arith.addf %12, %17 : vector<80x4xf32>
    %c0_18 = arith.constant 0 : index
    %c10 = arith.constant 10 : index
    %c0_19 = arith.constant 0 : index
    %19 = vector.load %arg1[%c0_18, %c10, %c0_19] : memref<1x110x16xbf16, #tpu.memory_space<vmem>>, vector<1x80x16xbf16>
    %20 = vector.shape_cast %19 : vector<1x80x16xbf16> to vector<80x16xbf16>
    %c3 = arith.constant 3 : index
    %c0_20 = arith.constant 0 : index
    %c0_21 = arith.constant 0 : index
    %21 = vector.load %arg2[%c3, %c0_20, %c0_21] : memref<9x16x4xbf16, #tpu.memory_space<vmem>>, vector<1x16x4xbf16>
    %22 = vector.shape_cast %21 : vector<1x16x4xbf16> to vector<16x4xbf16>
    %cst_22 = arith.constant dense<0.000000e+00> : vector<80x4xf32>
    %23 = tpu.matmul %20, %22, %cst_22 {dimension_numbers = #tpu.dot_dimension_numbers<[1], [0], [0], [1], [0, 0, 1, 1], [], []>} : vector<80x16xbf16>, vector<16x4xbf16>, vector<80x4xf32> -> vector<80x4xf32>
    %24 = arith.addf %18, %23 : vector<80x4xf32>
    %c0_23 = arith.constant 0 : index
    %c11 = arith.constant 11 : index
    %c0_24 = arith.constant 0 : index
    %25 = vector.load %arg1[%c0_23, %c11, %c0_24] : memref<1x110x16xbf16, #tpu.memory_space<vmem>>, vector<1x80x16xbf16>
    %26 = vector.shape_cast %25 : vector<1x80x16xbf16> to vector<80x16xbf16>
    %c4 = arith.constant 4 : index
    %c0_25 = arith.constant 0 : index
    %c0_26 = arith.constant 0 : index
    %27 = vector.load %arg2[%c4, %c0_25, %c0_26] : memref<9x16x4xbf16, #tpu.memory_space<vmem>>, vector<1x16x4xbf16>
    %28 = vector.shape_cast %27 : vector<1x16x4xbf16> to vector<16x4xbf16>
    %cst_27 = arith.constant dense<0.000000e+00> : vector<80x4xf32>
    %29 = tpu.matmul %26, %28, %cst_27 {dimension_numbers = #tpu.dot_dimension_numbers<[1], [0], [0], [1], [0, 0, 1, 1], [], []>} : vector<80x16xbf16>, vector<16x4xbf16>, vector<80x4xf32> -> vector<80x4xf32>
    %30 = arith.addf %24, %29 : vector<80x4xf32>
    %c0_28 = arith.constant 0 : index
    %c12 = arith.constant 12 : index
    %c0_29 = arith.constant 0 : index
    %31 = vector.load %arg1[%c0_28, %c12, %c0_29] : memref<1x110x16xbf16, #tpu.memory_space<vmem>>, vector<1x80x16xbf16>
    %32 = vector.shape_cast %31 : vector<1x80x16xbf16> to vector<80x16xbf16>
    %c5 = arith.constant 5 : index
    %c0_30 = arith.constant 0 : index
    %c0_31 = arith.constant 0 : index
    %33 = vector.load %arg2[%c5, %c0_30, %c0_31] : memref<9x16x4xbf16, #tpu.memory_space<vmem>>, vector<1x16x4xbf16>
    %34 = vector.shape_cast %33 : vector<1x16x4xbf16> to vector<16x4xbf16>
    %cst_32 = arith.constant dense<0.000000e+00> : vector<80x4xf32>
    %35 = tpu.matmul %32, %34, %cst_32 {dimension_numbers = #tpu.dot_dimension_numbers<[1], [0], [0], [1], [0, 0, 1, 1], [], []>} : vector<80x16xbf16>, vector<16x4xbf16>, vector<80x4xf32> -> vector<80x4xf32>
    %36 = arith.addf %30, %35 : vector<80x4xf32>
    %c0_33 = arith.constant 0 : index
    %c20 = arith.constant 20 : index
    %c0_34 = arith.constant 0 : index
    %37 = vector.load %arg1[%c0_33, %c20, %c0_34] : memref<1x110x16xbf16, #tpu.memory_space<vmem>>, vector<1x80x16xbf16>
    %38 = vector.shape_cast %37 : vector<1x80x16xbf16> to vector<80x16xbf16>
    %c6 = arith.constant 6 : index
    %c0_35 = arith.constant 0 : index
    %c0_36 = arith.constant 0 : index
    %39 = vector.load %arg2[%c6, %c0_35, %c0_36] : memref<9x16x4xbf16, #tpu.memory_space<vmem>>, vector<1x16x4xbf16>
    %40 = vector.shape_cast %39 : vector<1x16x4xbf16> to vector<16x4xbf16>
    %cst_37 = arith.constant dense<0.000000e+00> : vector<80x4xf32>
    %41 = tpu.matmul %38, %40, %cst_37 {dimension_numbers = #tpu.dot_dimension_numbers<[1], [0], [0], [1], [0, 0, 1, 1], [], []>} : vector<80x16xbf16>, vector<16x4xbf16>, vector<80x4xf32> -> vector<80x4xf32>
    %42 = arith.addf %36, %41 : vector<80x4xf32>
    %c0_38 = arith.constant 0 : index
    %c21 = arith.constant 21 : index
    %c0_39 = arith.constant 0 : index
    %43 = vector.load %arg1[%c0_38, %c21, %c0_39] : memref<1x110x16xbf16, #tpu.memory_space<vmem>>, vector<1x80x16xbf16>
    %44 = vector.shape_cast %43 : vector<1x80x16xbf16> to vector<80x16xbf16>
    %c7 = arith.constant 7 : index
    %c0_40 = arith.constant 0 : index
    %c0_41 = arith.constant 0 : index
    %45 = vector.load %arg2[%c7, %c0_40, %c0_41] : memref<9x16x4xbf16, #tpu.memory_space<vmem>>, vector<1x16x4xbf16>
    %46 = vector.shape_cast %45 : vector<1x16x4xbf16> to vector<16x4xbf16>
    %cst_42 = arith.constant dense<0.000000e+00> : vector<80x4xf32>
    %47 = tpu.matmul %44, %46, %cst_42 {dimension_numbers = #tpu.dot_dimension_numbers<[1], [0], [0], [1], [0, 0, 1, 1], [], []>} : vector<80x16xbf16>, vector<16x4xbf16>, vector<80x4xf32> -> vector<80x4xf32>
    %48 = arith.addf %42, %47 : vector<80x4xf32>
    %c0_43 = arith.constant 0 : index
    %c22 = arith.constant 22 : index
    %c0_44 = arith.constant 0 : index
    %49 = vector.load %arg1[%c0_43, %c22, %c0_44] : memref<1x110x16xbf16, #tpu.memory_space<vmem>>, vector<1x80x16xbf16>
    %50 = vector.shape_cast %49 : vector<1x80x16xbf16> to vector<80x16xbf16>
    %c8 = arith.constant 8 : index
    %c0_45 = arith.constant 0 : index
    %c0_46 = arith.constant 0 : index
    %51 = vector.load %arg2[%c8, %c0_45, %c0_46] : memref<9x16x4xbf16, #tpu.memory_space<vmem>>, vector<1x16x4xbf16>
    %52 = vector.shape_cast %51 : vector<1x16x4xbf16> to vector<16x4xbf16>
    %cst_47 = arith.constant dense<0.000000e+00> : vector<80x4xf32>
    %53 = tpu.matmul %50, %52, %cst_47 {dimension_numbers = #tpu.dot_dimension_numbers<[1], [0], [0], [1], [0, 0, 1, 1], [], []>} : vector<80x16xbf16>, vector<16x4xbf16>, vector<80x4xf32> -> vector<80x4xf32>
    %54 = arith.addf %48, %53 : vector<80x4xf32>
    %55 = arith.truncf %54 : vector<80x4xf32> to vector<80x4xbf16>
    %c0_48 = arith.constant 0 : index
    %c0_49 = arith.constant 0 : index
    %c0_50 = arith.constant 0 : index
    %56 = vector.load %arg3[%c0_48, %c0_49, %c0_50] : memref<1x80x4xbf16, #tpu.memory_space<vmem>>, vector<1x80x4xbf16>
    %57 = vector.shape_cast %56 : vector<1x80x4xbf16> to vector<80x4xbf16>
    %58 = vector.shape_cast %55 : vector<80x4xbf16> to vector<1x80x4xbf16>
    tpu.vector_store %arg3[%c0_48, %c0_49, %c0_50], %58 {strides = array<i32>} : memref<1x80x4xbf16, #tpu.memory_space<vmem>>, vector<1x80x4xbf16>,
    return
  }
  func.func @transform_0(%arg0: i32) -> (i32, i32, i32) {
    %c0_i32 = arith.constant 0 : i32
    %c0_i32_0 = arith.constant 0 : i32
    %c0_i32_1 = arith.constant 0 : i32
    return %arg0, %c0_i32, %c0_i32_0 : i32, i32, i32
  }
  func.func @transform_1(%arg0: i32) -> (i32, i32, i32) {
    %c0_i32 = arith.constant 0 : i32
    %c0_i32_0 = arith.constant 0 : i32
    %c0_i32_1 = arith.constant 0 : i32
    %c0_i32_2 = arith.constant 0 : i32
    return %c0_i32, %c0_i32_0, %c0_i32_1 : i32, i32, i32
  }
  func.func @transform_2(%arg0: i32) -> (i32, i32, i32) {
    %c0_i32 = arith.constant 0 : i32
    %c0_i32_0 = arith.constant 0 : i32
    %c0_i32_1 = arith.constant 0 : i32
    return %arg0, %c0_i32, %c0_i32_0 : i32, i32, i32
  }
}

module attributes {stable_mosaic.version = 11 : i64} {
  func.func @_gemm_bn_kernel(%arg0: i32, %arg1: i32, %arg2: memref<128x12xbf16, #tpu.memory_space<vmem>>, %arg3: memref<12x16xbf16, #tpu.memory_space<vmem>>, %arg4: memref<1x12xf32, #tpu.memory_space<vmem>>, %arg5: memref<1x12xf32, #tpu.memory_space<vmem>>, %arg6: memref<1x16xf32, #tpu.memory_space<vmem>>, %arg7: memref<1x16xf32, #tpu.memory_space<vmem>>, %arg8: memref<128x16xbf16, #tpu.memory_space<vmem>>) attributes {dimension_semantics = [#tpu.dimension_semantics<parallel>, #tpu.dimension_semantics<parallel>], iteration_bounds = array<i64: 2, 1>, scalar_prefetch = 0 : i64, scratch_operands = 0 : i64, tpu.core_type = #tpu.core_type<tc>, window_params = [{transform_indices = @transform_0, window_bounds = array<i64: 128, 12>}, {transform_indices = @transform_1, window_bounds = array<i64: 12, 16>}, {pipeline_mode = #tpu.pipeline_mode<synchronous>, transform_indices = @transform_2, window_bounds = array<i64: 1, 12>}, {pipeline_mode = #tpu.pipeline_mode<synchronous>, transform_indices = @transform_3, window_bounds = array<i64: 1, 12>}, {transform_indices = @transform_4, window_bounds = array<i64: 1, 16>}, {transform_indices = @transform_5, window_bounds = array<i64: 1, 16>}, {transform_indices = @transform_6, window_bounds = array<i64: 128, 16>}]} {
    %c0 = arith.constant 0 : index
    %c0_0 = arith.constant 0 : index
    %0 = vector.load %arg2[%c0, %c0_0] : memref<128x12xbf16, #tpu.memory_space<vmem>>, vector<128x12xbf16>
    %1 = arith.extf %0 : vector<128x12xbf16> to vector<128x12xf32>
    %c0_1 = arith.constant 0 : index
    %c0_2 = arith.constant 0 : index
    %2 = vector.load %arg4[%c0_1, %c0_2] : memref<1x12xf32, #tpu.memory_space<vmem>>, vector<1x12xf32>
    %3 = vector.broadcast %2 : vector<1x12xf32> to vector<128x12xf32>
    %4 = arith.mulf %1, %3 : vector<128x12xf32>
    %c0_3 = arith.constant 0 : index
    %c0_4 = arith.constant 0 : index
    %5 = vector.load %arg5[%c0_3, %c0_4] : memref<1x12xf32, #tpu.memory_space<vmem>>, vector<1x12xf32>
    %6 = vector.broadcast %5 : vector<1x12xf32> to vector<128x12xf32>
    %7 = arith.addf %4, %6 : vector<128x12xf32>
    %cst = arith.constant 0.000000e+00 : f32
    %8 = vector.broadcast %cst : f32 to vector<128x12xf32>
    %9 = arith.maximumf %7, %8 : vector<128x12xf32>
    %10 = arith.truncf %9 : vector<128x12xf32> to vector<128x12xbf16>
    %c0_5 = arith.constant 0 : index
    %c0_6 = arith.constant 0 : index
    %11 = vector.load %arg3[%c0_5, %c0_6] : memref<12x16xbf16, #tpu.memory_space<vmem>>, vector<12x16xbf16>
    %cst_7 = arith.constant dense<0.000000e+00> : vector<128x16xf32>
    %12 = tpu.matmul %10, %11, %cst_7 {dimension_numbers = #tpu.dot_dimension_numbers<[1], [0], [0], [1], [0, 0, 1, 1], [], []>} : vector<128x12xbf16>, vector<12x16xbf16>, vector<128x16xf32> -> vector<128x16xf32>
    %c0_8 = arith.constant 0 : index
    %c0_9 = arith.constant 0 : index
    %13 = vector.load %arg6[%c0_8, %c0_9] : memref<1x16xf32, #tpu.memory_space<vmem>>, vector<1x16xf32>
    %14 = vector.broadcast %13 : vector<1x16xf32> to vector<128x16xf32>
    %15 = arith.mulf %12, %14 : vector<128x16xf32>
    %c0_10 = arith.constant 0 : index
    %c0_11 = arith.constant 0 : index
    %16 = vector.load %arg7[%c0_10, %c0_11] : memref<1x16xf32, #tpu.memory_space<vmem>>, vector<1x16xf32>
    %17 = vector.broadcast %16 : vector<1x16xf32> to vector<128x16xf32>
    %18 = arith.addf %15, %17 : vector<128x16xf32>
    %cst_12 = arith.constant 0.000000e+00 : f32
    %19 = vector.broadcast %cst_12 : f32 to vector<128x16xf32>
    %20 = arith.maximumf %18, %19 : vector<128x16xf32>
    %21 = arith.truncf %20 : vector<128x16xf32> to vector<128x16xbf16>
    %c0_13 = arith.constant 0 : index
    %c0_14 = arith.constant 0 : index
    %22 = vector.load %arg8[%c0_13, %c0_14] : memref<128x16xbf16, #tpu.memory_space<vmem>>, vector<128x16xbf16>
    tpu.vector_store %arg8[%c0_13, %c0_14], %21 {strides = array<i32>} : memref<128x16xbf16, #tpu.memory_space<vmem>>, vector<128x16xbf16>,
    return
  }
  func.func @transform_0(%arg0: i32, %arg1: i32) -> (i32, i32) {
    %c0_i32 = arith.constant 0 : i32
    %c0_i32_0 = arith.constant 0 : i32
    return %arg0, %c0_i32 : i32, i32
  }
  func.func @transform_1(%arg0: i32, %arg1: i32) -> (i32, i32) {
    %c0_i32 = arith.constant 0 : i32
    %c0_i32_0 = arith.constant 0 : i32
    return %c0_i32, %arg1 : i32, i32
  }
  func.func @transform_2(%arg0: i32, %arg1: i32) -> (i32, i32) {
    %c0_i32 = arith.constant 0 : i32
    %c0_i32_0 = arith.constant 0 : i32
    %c0_i32_1 = arith.constant 0 : i32
    return %c0_i32, %c0_i32_0 : i32, i32
  }
  func.func @transform_3(%arg0: i32, %arg1: i32) -> (i32, i32) {
    %c0_i32 = arith.constant 0 : i32
    %c0_i32_0 = arith.constant 0 : i32
    %c0_i32_1 = arith.constant 0 : i32
    return %c0_i32, %c0_i32_0 : i32, i32
  }
  func.func @transform_4(%arg0: i32, %arg1: i32) -> (i32, i32) {
    %c0_i32 = arith.constant 0 : i32
    %c0_i32_0 = arith.constant 0 : i32
    return %c0_i32, %arg1 : i32, i32
  }
  func.func @transform_5(%arg0: i32, %arg1: i32) -> (i32, i32) {
    %c0_i32 = arith.constant 0 : i32
    %c0_i32_0 = arith.constant 0 : i32
    return %c0_i32, %arg1 : i32, i32
  }
  func.func @transform_6(%arg0: i32, %arg1: i32) -> (i32, i32) {
    %c0_i32 = arith.constant 0 : i32
    return %arg0, %arg1 : i32, i32
  }
}

module attributes {stable_mosaic.version = 11 : i64} {
  func.func @_gemm_bn_kernel(%arg0: i32, %arg1: i32, %arg2: memref<128x16xbf16, #tpu.memory_space<vmem>>, %arg3: memref<16x8xbf16, #tpu.memory_space<vmem>>, %arg4: memref<1x16xf32, #tpu.memory_space<vmem>>, %arg5: memref<1x16xf32, #tpu.memory_space<vmem>>, %arg6: memref<128x8xbf16, #tpu.memory_space<vmem>>) attributes {dimension_semantics = [#tpu.dimension_semantics<parallel>, #tpu.dimension_semantics<parallel>], iteration_bounds = array<i64: 2, 1>, scalar_prefetch = 0 : i64, scratch_operands = 0 : i64, tpu.core_type = #tpu.core_type<tc>, window_params = [{transform_indices = @transform_0, window_bounds = array<i64: 128, 16>}, {transform_indices = @transform_1, window_bounds = array<i64: 16, 8>}, {pipeline_mode = #tpu.pipeline_mode<synchronous>, transform_indices = @transform_2, window_bounds = array<i64: 1, 16>}, {pipeline_mode = #tpu.pipeline_mode<synchronous>, transform_indices = @transform_3, window_bounds = array<i64: 1, 16>}, {transform_indices = @transform_4, window_bounds = array<i64: 128, 8>}]} {
    %c0 = arith.constant 0 : index
    %c0_0 = arith.constant 0 : index
    %0 = vector.load %arg2[%c0, %c0_0] : memref<128x16xbf16, #tpu.memory_space<vmem>>, vector<128x16xbf16>
    %1 = arith.extf %0 : vector<128x16xbf16> to vector<128x16xf32>
    %c0_1 = arith.constant 0 : index
    %c0_2 = arith.constant 0 : index
    %2 = vector.load %arg4[%c0_1, %c0_2] : memref<1x16xf32, #tpu.memory_space<vmem>>, vector<1x16xf32>
    %3 = vector.broadcast %2 : vector<1x16xf32> to vector<128x16xf32>
    %4 = arith.mulf %1, %3 : vector<128x16xf32>
    %c0_3 = arith.constant 0 : index
    %c0_4 = arith.constant 0 : index
    %5 = vector.load %arg5[%c0_3, %c0_4] : memref<1x16xf32, #tpu.memory_space<vmem>>, vector<1x16xf32>
    %6 = vector.broadcast %5 : vector<1x16xf32> to vector<128x16xf32>
    %7 = arith.addf %4, %6 : vector<128x16xf32>
    %cst = arith.constant 0.000000e+00 : f32
    %8 = vector.broadcast %cst : f32 to vector<128x16xf32>
    %9 = arith.maximumf %7, %8 : vector<128x16xf32>
    %10 = arith.truncf %9 : vector<128x16xf32> to vector<128x16xbf16>
    %c0_5 = arith.constant 0 : index
    %c0_6 = arith.constant 0 : index
    %11 = vector.load %arg3[%c0_5, %c0_6] : memref<16x8xbf16, #tpu.memory_space<vmem>>, vector<16x8xbf16>
    %cst_7 = arith.constant dense<0.000000e+00> : vector<128x8xf32>
    %12 = tpu.matmul %10, %11, %cst_7 {dimension_numbers = #tpu.dot_dimension_numbers<[1], [0], [0], [1], [0, 0, 1, 1], [], []>} : vector<128x16xbf16>, vector<16x8xbf16>, vector<128x8xf32> -> vector<128x8xf32>
    %13 = arith.truncf %12 : vector<128x8xf32> to vector<128x8xbf16>
    %c0_8 = arith.constant 0 : index
    %c0_9 = arith.constant 0 : index
    %14 = vector.load %arg6[%c0_8, %c0_9] : memref<128x8xbf16, #tpu.memory_space<vmem>>, vector<128x8xbf16>
    tpu.vector_store %arg6[%c0_8, %c0_9], %13 {strides = array<i32>} : memref<128x8xbf16, #tpu.memory_space<vmem>>, vector<128x8xbf16>,
    return
  }
  func.func @transform_0(%arg0: i32, %arg1: i32) -> (i32, i32) {
    %c0_i32 = arith.constant 0 : i32
    %c0_i32_0 = arith.constant 0 : i32
    return %arg0, %c0_i32 : i32, i32
  }
  func.func @transform_1(%arg0: i32, %arg1: i32) -> (i32, i32) {
    %c0_i32 = arith.constant 0 : i32
    %c0_i32_0 = arith.constant 0 : i32
    return %c0_i32, %arg1 : i32, i32
  }
  func.func @transform_2(%arg0: i32, %arg1: i32) -> (i32, i32) {
    %c0_i32 = arith.constant 0 : i32
    %c0_i32_0 = arith.constant 0 : i32
    %c0_i32_1 = arith.constant 0 : i32
    return %c0_i32, %c0_i32_0 : i32, i32
  }
  func.func @transform_3(%arg0: i32, %arg1: i32) -> (i32, i32) {
    %c0_i32 = arith.constant 0 : i32
    %c0_i32_0 = arith.constant 0 : i32
    %c0_i32_1 = arith.constant 0 : i32
    return %c0_i32, %c0_i32_0 : i32, i32
  }
  func.func @transform_4(%arg0: i32, %arg1: i32) -> (i32, i32) {
    %c0_i32 = arith.constant 0 : i32
    return %arg0, %arg1 : i32, i32
  }
}

module attributes {stable_mosaic.version = 11 : i64} {
  func.func @_avgpool2x2_kernel(%arg0: i32, %arg1: memref<16x2x4x2x8xbf16, #tpu.memory_space<vmem>>, %arg2: memref<16x4x8xbf16, #tpu.memory_space<vmem>>) attributes {dimension_semantics = [#tpu.dimension_semantics<parallel>], iteration_bounds = array<i64: 1>, scalar_prefetch = 0 : i64, scratch_operands = 0 : i64, tpu.core_type = #tpu.core_type<tc>, window_params = [{transform_indices = @transform_0, window_bounds = array<i64: 16, 2, 4, 2, 8>}, {transform_indices = @transform_1, window_bounds = array<i64: 16, 4, 8>}]} {
    %c0 = arith.constant 0 : index
    %c0_0 = arith.constant 0 : index
    %c0_1 = arith.constant 0 : index
    %c0_2 = arith.constant 0 : index
    %c0_3 = arith.constant 0 : index
    %0 = vector.load %arg1[%c0, %c0_0, %c0_1, %c0_2, %c0_3] : memref<16x2x4x2x8xbf16, #tpu.memory_space<vmem>>, vector<16x2x4x2x8xbf16>
    %1 = arith.extf %0 : vector<16x2x4x2x8xbf16> to vector<16x2x4x2x8xf32>
    %2 = vector.extract_strided_slice %1 {offsets = [0, 0, 0, 0, 0], sizes = [16, 1, 4, 2, 8], strides = [1, 1, 1, 1, 1]} : vector<16x2x4x2x8xf32> to vector<16x1x4x2x8xf32>
    %3 = vector.shape_cast %2 : vector<16x1x4x2x8xf32> to vector<16x4x2x8xf32>
    %4 = vector.extract_strided_slice %1 {offsets = [0, 1, 0, 0, 0], sizes = [16, 1, 4, 2, 8], strides = [1, 1, 1, 1, 1]} : vector<16x2x4x2x8xf32> to vector<16x1x4x2x8xf32>
    %5 = vector.shape_cast %4 : vector<16x1x4x2x8xf32> to vector<16x4x2x8xf32>
    %6 = arith.addf %3, %5 : vector<16x4x2x8xf32>
    %7 = vector.extract_strided_slice %6 {offsets = [0, 0, 0, 0], sizes = [16, 4, 1, 8], strides = [1, 1, 1, 1]} : vector<16x4x2x8xf32> to vector<16x4x1x8xf32>
    %8 = vector.shape_cast %7 : vector<16x4x1x8xf32> to vector<16x4x8xf32>
    %9 = vector.extract_strided_slice %6 {offsets = [0, 0, 1, 0], sizes = [16, 4, 1, 8], strides = [1, 1, 1, 1]} : vector<16x4x2x8xf32> to vector<16x4x1x8xf32>
    %10 = vector.shape_cast %9 : vector<16x4x1x8xf32> to vector<16x4x8xf32>
    %11 = arith.addf %8, %10 : vector<16x4x8xf32>
    %cst = arith.constant 2.500000e-01 : f32
    %12 = vector.broadcast %cst : f32 to vector<16x4x8xf32>
    %13 = arith.mulf %12, %11 : vector<16x4x8xf32>
    %14 = arith.truncf %13 : vector<16x4x8xf32> to vector<16x4x8xbf16>
    %c0_4 = arith.constant 0 : index
    %c0_5 = arith.constant 0 : index
    %c0_6 = arith.constant 0 : index
    %15 = vector.load %arg2[%c0_4, %c0_5, %c0_6] : memref<16x4x8xbf16, #tpu.memory_space<vmem>>, vector<16x4x8xbf16>
    tpu.vector_store %arg2[%c0_4, %c0_5, %c0_6], %14 {strides = array<i32>} : memref<16x4x8xbf16, #tpu.memory_space<vmem>>, vector<16x4x8xbf16>,
    return
  }
  func.func @transform_0(%arg0: i32) -> (i32, i32, i32, i32, i32) {
    %c0_i32 = arith.constant 0 : i32
    %c0_i32_0 = arith.constant 0 : i32
    %c0_i32_1 = arith.constant 0 : i32
    %c0_i32_2 = arith.constant 0 : i32
    %c0_i32_3 = arith.constant 0 : i32
    return %arg0, %c0_i32, %c0_i32_0, %c0_i32_1, %c0_i32_2 : i32, i32, i32, i32, i32
  }
  func.func @transform_1(%arg0: i32) -> (i32, i32, i32) {
    %c0_i32 = arith.constant 0 : i32
    %c0_i32_0 = arith.constant 0 : i32
    %c0_i32_1 = arith.constant 0 : i32
    return %arg0, %c0_i32, %c0_i32_0 : i32, i32, i32
  }
}

module attributes {stable_mosaic.version = 11 : i64} {
  func.func @_gemm_bn_kernel(%arg0: i32, %arg1: i32, %arg2: memref<64x8xbf16, #tpu.memory_space<vmem>>, %arg3: memref<8x16xbf16, #tpu.memory_space<vmem>>, %arg4: memref<1x8xf32, #tpu.memory_space<vmem>>, %arg5: memref<1x8xf32, #tpu.memory_space<vmem>>, %arg6: memref<1x16xf32, #tpu.memory_space<vmem>>, %arg7: memref<1x16xf32, #tpu.memory_space<vmem>>, %arg8: memref<64x16xbf16, #tpu.memory_space<vmem>>) attributes {dimension_semantics = [#tpu.dimension_semantics<parallel>, #tpu.dimension_semantics<parallel>], iteration_bounds = array<i64: 1, 1>, scalar_prefetch = 0 : i64, scratch_operands = 0 : i64, tpu.core_type = #tpu.core_type<tc>, window_params = [{transform_indices = @transform_0, window_bounds = array<i64: 64, 8>}, {transform_indices = @transform_1, window_bounds = array<i64: 8, 16>}, {pipeline_mode = #tpu.pipeline_mode<synchronous>, transform_indices = @transform_2, window_bounds = array<i64: 1, 8>}, {pipeline_mode = #tpu.pipeline_mode<synchronous>, transform_indices = @transform_3, window_bounds = array<i64: 1, 8>}, {transform_indices = @transform_4, window_bounds = array<i64: 1, 16>}, {transform_indices = @transform_5, window_bounds = array<i64: 1, 16>}, {transform_indices = @transform_6, window_bounds = array<i64: 64, 16>}]} {
    %c0 = arith.constant 0 : index
    %c0_0 = arith.constant 0 : index
    %0 = vector.load %arg2[%c0, %c0_0] : memref<64x8xbf16, #tpu.memory_space<vmem>>, vector<64x8xbf16>
    %1 = arith.extf %0 : vector<64x8xbf16> to vector<64x8xf32>
    %c0_1 = arith.constant 0 : index
    %c0_2 = arith.constant 0 : index
    %2 = vector.load %arg4[%c0_1, %c0_2] : memref<1x8xf32, #tpu.memory_space<vmem>>, vector<1x8xf32>
    %3 = vector.broadcast %2 : vector<1x8xf32> to vector<64x8xf32>
    %4 = arith.mulf %1, %3 : vector<64x8xf32>
    %c0_3 = arith.constant 0 : index
    %c0_4 = arith.constant 0 : index
    %5 = vector.load %arg5[%c0_3, %c0_4] : memref<1x8xf32, #tpu.memory_space<vmem>>, vector<1x8xf32>
    %6 = vector.broadcast %5 : vector<1x8xf32> to vector<64x8xf32>
    %7 = arith.addf %4, %6 : vector<64x8xf32>
    %cst = arith.constant 0.000000e+00 : f32
    %8 = vector.broadcast %cst : f32 to vector<64x8xf32>
    %9 = arith.maximumf %7, %8 : vector<64x8xf32>
    %10 = arith.truncf %9 : vector<64x8xf32> to vector<64x8xbf16>
    %c0_5 = arith.constant 0 : index
    %c0_6 = arith.constant 0 : index
    %11 = vector.load %arg3[%c0_5, %c0_6] : memref<8x16xbf16, #tpu.memory_space<vmem>>, vector<8x16xbf16>
    %cst_7 = arith.constant dense<0.000000e+00> : vector<64x16xf32>
    %12 = tpu.matmul %10, %11, %cst_7 {dimension_numbers = #tpu.dot_dimension_numbers<[1], [0], [0], [1], [0, 0, 1, 1], [], []>} : vector<64x8xbf16>, vector<8x16xbf16>, vector<64x16xf32> -> vector<64x16xf32>
    %c0_8 = arith.constant 0 : index
    %c0_9 = arith.constant 0 : index
    %13 = vector.load %arg6[%c0_8, %c0_9] : memref<1x16xf32, #tpu.memory_space<vmem>>, vector<1x16xf32>
    %14 = vector.broadcast %13 : vector<1x16xf32> to vector<64x16xf32>
    %15 = arith.mulf %12, %14 : vector<64x16xf32>
    %c0_10 = arith.constant 0 : index
    %c0_11 = arith.constant 0 : index
    %16 = vector.load %arg7[%c0_10, %c0_11] : memref<1x16xf32, #tpu.memory_space<vmem>>, vector<1x16xf32>
    %17 = vector.broadcast %16 : vector<1x16xf32> to vector<64x16xf32>
    %18 = arith.addf %15, %17 : vector<64x16xf32>
    %cst_12 = arith.constant 0.000000e+00 : f32
    %19 = vector.broadcast %cst_12 : f32 to vector<64x16xf32>
    %20 = arith.maximumf %18, %19 : vector<64x16xf32>
    %21 = arith.truncf %20 : vector<64x16xf32> to vector<64x16xbf16>
    %c0_13 = arith.constant 0 : index
    %c0_14 = arith.constant 0 : index
    %22 = vector.load %arg8[%c0_13, %c0_14] : memref<64x16xbf16, #tpu.memory_space<vmem>>, vector<64x16xbf16>
    tpu.vector_store %arg8[%c0_13, %c0_14], %21 {strides = array<i32>} : memref<64x16xbf16, #tpu.memory_space<vmem>>, vector<64x16xbf16>,
    return
  }
  func.func @transform_0(%arg0: i32, %arg1: i32) -> (i32, i32) {
    %c0_i32 = arith.constant 0 : i32
    %c0_i32_0 = arith.constant 0 : i32
    return %arg0, %c0_i32 : i32, i32
  }
  func.func @transform_1(%arg0: i32, %arg1: i32) -> (i32, i32) {
    %c0_i32 = arith.constant 0 : i32
    %c0_i32_0 = arith.constant 0 : i32
    return %c0_i32, %arg1 : i32, i32
  }
  func.func @transform_2(%arg0: i32, %arg1: i32) -> (i32, i32) {
    %c0_i32 = arith.constant 0 : i32
    %c0_i32_0 = arith.constant 0 : i32
    %c0_i32_1 = arith.constant 0 : i32
    return %c0_i32, %c0_i32_0 : i32, i32
  }
  func.func @transform_3(%arg0: i32, %arg1: i32) -> (i32, i32) {
    %c0_i32 = arith.constant 0 : i32
    %c0_i32_0 = arith.constant 0 : i32
    %c0_i32_1 = arith.constant 0 : i32
    return %c0_i32, %c0_i32_0 : i32, i32
  }
  func.func @transform_4(%arg0: i32, %arg1: i32) -> (i32, i32) {
    %c0_i32 = arith.constant 0 : i32
    %c0_i32_0 = arith.constant 0 : i32
    return %c0_i32, %arg1 : i32, i32
  }
  func.func @transform_5(%arg0: i32, %arg1: i32) -> (i32, i32) {
    %c0_i32 = arith.constant 0 : i32
    %c0_i32_0 = arith.constant 0 : i32
    return %c0_i32, %arg1 : i32, i32
  }
  func.func @transform_6(%arg0: i32, %arg1: i32) -> (i32, i32) {
    %c0_i32 = arith.constant 0 : i32
    return %arg0, %arg1 : i32, i32
  }
}

module attributes {stable_mosaic.version = 11 : i64} {
  func.func @_conv3x3_flat_kernel(%arg0: i32, %arg1: memref<1x42x16xbf16, #tpu.memory_space<vmem>>, %arg2: memref<9x16x4xbf16, #tpu.memory_space<vmem>>, %arg3: memref<1x24x4xbf16, #tpu.memory_space<vmem>>) attributes {dimension_semantics = [#tpu.dimension_semantics<parallel>], iteration_bounds = array<i64: 4>, scalar_prefetch = 0 : i64, scratch_operands = 0 : i64, tpu.core_type = #tpu.core_type<tc>, window_params = [{transform_indices = @transform_0, window_bounds = array<i64: 1, 42, 16>}, {pipeline_mode = #tpu.pipeline_mode<synchronous>, transform_indices = @transform_1, window_bounds = array<i64: 9, 16, 4>}, {transform_indices = @transform_2, window_bounds = array<i64: 1, 24, 4>}]} {
    %cst = arith.constant 0.000000e+00 : f32
    %0 = vector.broadcast %cst : f32 to vector<24x4xf32>
    %c0 = arith.constant 0 : index
    %c0_0 = arith.constant 0 : index
    %c0_1 = arith.constant 0 : index
    %1 = vector.load %arg1[%c0, %c0_0, %c0_1] : memref<1x42x16xbf16, #tpu.memory_space<vmem>>, vector<1x24x16xbf16>
    %2 = vector.shape_cast %1 : vector<1x24x16xbf16> to vector<24x16xbf16>
    %c0_2 = arith.constant 0 : index
    %c0_3 = arith.constant 0 : index
    %c0_4 = arith.constant 0 : index
    %3 = vector.load %arg2[%c0_2, %c0_3, %c0_4] : memref<9x16x4xbf16, #tpu.memory_space<vmem>>, vector<1x16x4xbf16>
    %4 = vector.shape_cast %3 : vector<1x16x4xbf16> to vector<16x4xbf16>
    %cst_5 = arith.constant dense<0.000000e+00> : vector<24x4xf32>
    %5 = tpu.matmul %2, %4, %cst_5 {dimension_numbers = #tpu.dot_dimension_numbers<[1], [0], [0], [1], [0, 0, 1, 1], [], []>} : vector<24x16xbf16>, vector<16x4xbf16>, vector<24x4xf32> -> vector<24x4xf32>
    %6 = arith.addf %0, %5 : vector<24x4xf32>
    %c0_6 = arith.constant 0 : index
    %c1 = arith.constant 1 : index
    %c0_7 = arith.constant 0 : index
    %7 = vector.load %arg1[%c0_6, %c1, %c0_7] : memref<1x42x16xbf16, #tpu.memory_space<vmem>>, vector<1x24x16xbf16>
    %8 = vector.shape_cast %7 : vector<1x24x16xbf16> to vector<24x16xbf16>
    %c1_8 = arith.constant 1 : index
    %c0_9 = arith.constant 0 : index
    %c0_10 = arith.constant 0 : index
    %9 = vector.load %arg2[%c1_8, %c0_9, %c0_10] : memref<9x16x4xbf16, #tpu.memory_space<vmem>>, vector<1x16x4xbf16>
    %10 = vector.shape_cast %9 : vector<1x16x4xbf16> to vector<16x4xbf16>
    %cst_11 = arith.constant dense<0.000000e+00> : vector<24x4xf32>
    %11 = tpu.matmul %8, %10, %cst_11 {dimension_numbers = #tpu.dot_dimension_numbers<[1], [0], [0], [1], [0, 0, 1, 1], [], []>} : vector<24x16xbf16>, vector<16x4xbf16>, vector<24x4xf32> -> vector<24x4xf32>
    %12 = arith.addf %6, %11 : vector<24x4xf32>
    %c0_12 = arith.constant 0 : index
    %c2 = arith.constant 2 : index
    %c0_13 = arith.constant 0 : index
    %13 = vector.load %arg1[%c0_12, %c2, %c0_13] : memref<1x42x16xbf16, #tpu.memory_space<vmem>>, vector<1x24x16xbf16>
    %14 = vector.shape_cast %13 : vector<1x24x16xbf16> to vector<24x16xbf16>
    %c2_14 = arith.constant 2 : index
    %c0_15 = arith.constant 0 : index
    %c0_16 = arith.constant 0 : index
    %15 = vector.load %arg2[%c2_14, %c0_15, %c0_16] : memref<9x16x4xbf16, #tpu.memory_space<vmem>>, vector<1x16x4xbf16>
    %16 = vector.shape_cast %15 : vector<1x16x4xbf16> to vector<16x4xbf16>
    %cst_17 = arith.constant dense<0.000000e+00> : vector<24x4xf32>
    %17 = tpu.matmul %14, %16, %cst_17 {dimension_numbers = #tpu.dot_dimension_numbers<[1], [0], [0], [1], [0, 0, 1, 1], [], []>} : vector<24x16xbf16>, vector<16x4xbf16>, vector<24x4xf32> -> vector<24x4xf32>
    %18 = arith.addf %12, %17 : vector<24x4xf32>
    %c0_18 = arith.constant 0 : index
    %c6 = arith.constant 6 : index
    %c0_19 = arith.constant 0 : index
    %19 = vector.load %arg1[%c0_18, %c6, %c0_19] : memref<1x42x16xbf16, #tpu.memory_space<vmem>>, vector<1x24x16xbf16>
    %20 = vector.shape_cast %19 : vector<1x24x16xbf16> to vector<24x16xbf16>
    %c3 = arith.constant 3 : index
    %c0_20 = arith.constant 0 : index
    %c0_21 = arith.constant 0 : index
    %21 = vector.load %arg2[%c3, %c0_20, %c0_21] : memref<9x16x4xbf16, #tpu.memory_space<vmem>>, vector<1x16x4xbf16>
    %22 = vector.shape_cast %21 : vector<1x16x4xbf16> to vector<16x4xbf16>
    %cst_22 = arith.constant dense<0.000000e+00> : vector<24x4xf32>
    %23 = tpu.matmul %20, %22, %cst_22 {dimension_numbers = #tpu.dot_dimension_numbers<[1], [0], [0], [1], [0, 0, 1, 1], [], []>} : vector<24x16xbf16>, vector<16x4xbf16>, vector<24x4xf32> -> vector<24x4xf32>
    %24 = arith.addf %18, %23 : vector<24x4xf32>
    %c0_23 = arith.constant 0 : index
    %c7 = arith.constant 7 : index
    %c0_24 = arith.constant 0 : index
    %25 = vector.load %arg1[%c0_23, %c7, %c0_24] : memref<1x42x16xbf16, #tpu.memory_space<vmem>>, vector<1x24x16xbf16>
    %26 = vector.shape_cast %25 : vector<1x24x16xbf16> to vector<24x16xbf16>
    %c4 = arith.constant 4 : index
    %c0_25 = arith.constant 0 : index
    %c0_26 = arith.constant 0 : index
    %27 = vector.load %arg2[%c4, %c0_25, %c0_26] : memref<9x16x4xbf16, #tpu.memory_space<vmem>>, vector<1x16x4xbf16>
    %28 = vector.shape_cast %27 : vector<1x16x4xbf16> to vector<16x4xbf16>
    %cst_27 = arith.constant dense<0.000000e+00> : vector<24x4xf32>
    %29 = tpu.matmul %26, %28, %cst_27 {dimension_numbers = #tpu.dot_dimension_numbers<[1], [0], [0], [1], [0, 0, 1, 1], [], []>} : vector<24x16xbf16>, vector<16x4xbf16>, vector<24x4xf32> -> vector<24x4xf32>
    %30 = arith.addf %24, %29 : vector<24x4xf32>
    %c0_28 = arith.constant 0 : index
    %c8 = arith.constant 8 : index
    %c0_29 = arith.constant 0 : index
    %31 = vector.load %arg1[%c0_28, %c8, %c0_29] : memref<1x42x16xbf16, #tpu.memory_space<vmem>>, vector<1x24x16xbf16>
    %32 = vector.shape_cast %31 : vector<1x24x16xbf16> to vector<24x16xbf16>
    %c5 = arith.constant 5 : index
    %c0_30 = arith.constant 0 : index
    %c0_31 = arith.constant 0 : index
    %33 = vector.load %arg2[%c5, %c0_30, %c0_31] : memref<9x16x4xbf16, #tpu.memory_space<vmem>>, vector<1x16x4xbf16>
    %34 = vector.shape_cast %33 : vector<1x16x4xbf16> to vector<16x4xbf16>
    %cst_32 = arith.constant dense<0.000000e+00> : vector<24x4xf32>
    %35 = tpu.matmul %32, %34, %cst_32 {dimension_numbers = #tpu.dot_dimension_numbers<[1], [0], [0], [1], [0, 0, 1, 1], [], []>} : vector<24x16xbf16>, vector<16x4xbf16>, vector<24x4xf32> -> vector<24x4xf32>
    %36 = arith.addf %30, %35 : vector<24x4xf32>
    %c0_33 = arith.constant 0 : index
    %c12 = arith.constant 12 : index
    %c0_34 = arith.constant 0 : index
    %37 = vector.load %arg1[%c0_33, %c12, %c0_34] : memref<1x42x16xbf16, #tpu.memory_space<vmem>>, vector<1x24x16xbf16>
    %38 = vector.shape_cast %37 : vector<1x24x16xbf16> to vector<24x16xbf16>
    %c6_35 = arith.constant 6 : index
    %c0_36 = arith.constant 0 : index
    %c0_37 = arith.constant 0 : index
    %39 = vector.load %arg2[%c6_35, %c0_36, %c0_37] : memref<9x16x4xbf16, #tpu.memory_space<vmem>>, vector<1x16x4xbf16>
    %40 = vector.shape_cast %39 : vector<1x16x4xbf16> to vector<16x4xbf16>
    %cst_38 = arith.constant dense<0.000000e+00> : vector<24x4xf32>
    %41 = tpu.matmul %38, %40, %cst_38 {dimension_numbers = #tpu.dot_dimension_numbers<[1], [0], [0], [1], [0, 0, 1, 1], [], []>} : vector<24x16xbf16>, vector<16x4xbf16>, vector<24x4xf32> -> vector<24x4xf32>
    %42 = arith.addf %36, %41 : vector<24x4xf32>
    %c0_39 = arith.constant 0 : index
    %c13 = arith.constant 13 : index
    %c0_40 = arith.constant 0 : index
    %43 = vector.load %arg1[%c0_39, %c13, %c0_40] : memref<1x42x16xbf16, #tpu.memory_space<vmem>>, vector<1x24x16xbf16>
    %44 = vector.shape_cast %43 : vector<1x24x16xbf16> to vector<24x16xbf16>
    %c7_41 = arith.constant 7 : index
    %c0_42 = arith.constant 0 : index
    %c0_43 = arith.constant 0 : index
    %45 = vector.load %arg2[%c7_41, %c0_42, %c0_43] : memref<9x16x4xbf16, #tpu.memory_space<vmem>>, vector<1x16x4xbf16>
    %46 = vector.shape_cast %45 : vector<1x16x4xbf16> to vector<16x4xbf16>
    %cst_44 = arith.constant dense<0.000000e+00> : vector<24x4xf32>
    %47 = tpu.matmul %44, %46, %cst_44 {dimension_numbers = #tpu.dot_dimension_numbers<[1], [0], [0], [1], [0, 0, 1, 1], [], []>} : vector<24x16xbf16>, vector<16x4xbf16>, vector<24x4xf32> -> vector<24x4xf32>
    %48 = arith.addf %42, %47 : vector<24x4xf32>
    %c0_45 = arith.constant 0 : index
    %c14 = arith.constant 14 : index
    %c0_46 = arith.constant 0 : index
    %49 = vector.load %arg1[%c0_45, %c14, %c0_46] : memref<1x42x16xbf16, #tpu.memory_space<vmem>>, vector<1x24x16xbf16>
    %50 = vector.shape_cast %49 : vector<1x24x16xbf16> to vector<24x16xbf16>
    %c8_47 = arith.constant 8 : index
    %c0_48 = arith.constant 0 : index
    %c0_49 = arith.constant 0 : index
    %51 = vector.load %arg2[%c8_47, %c0_48, %c0_49] : memref<9x16x4xbf16, #tpu.memory_space<vmem>>, vector<1x16x4xbf16>
    %52 = vector.shape_cast %51 : vector<1x16x4xbf16> to vector<16x4xbf16>
    %cst_50 = arith.constant dense<0.000000e+00> : vector<24x4xf32>
    %53 = tpu.matmul %50, %52, %cst_50 {dimension_numbers = #tpu.dot_dimension_numbers<[1], [0], [0], [1], [0, 0, 1, 1], [], []>} : vector<24x16xbf16>, vector<16x4xbf16>, vector<24x4xf32> -> vector<24x4xf32>
    %54 = arith.addf %48, %53 : vector<24x4xf32>
    %55 = arith.truncf %54 : vector<24x4xf32> to vector<24x4xbf16>
    %c0_51 = arith.constant 0 : index
    %c0_52 = arith.constant 0 : index
    %c0_53 = arith.constant 0 : index
    %56 = vector.load %arg3[%c0_51, %c0_52, %c0_53] : memref<1x24x4xbf16, #tpu.memory_space<vmem>>, vector<1x24x4xbf16>
    %57 = vector.shape_cast %56 : vector<1x24x4xbf16> to vector<24x4xbf16>
    %58 = vector.shape_cast %55 : vector<24x4xbf16> to vector<1x24x4xbf16>
    tpu.vector_store %arg3[%c0_51, %c0_52, %c0_53], %58 {strides = array<i32>} : memref<1x24x4xbf16, #tpu.memory_space<vmem>>, vector<1x24x4xbf16>,
    return
  }
  func.func @transform_0(%arg0: i32) -> (i32, i32, i32) {
    %c0_i32 = arith.constant 0 : i32
    %c0_i32_0 = arith.constant 0 : i32
    %c0_i32_1 = arith.constant 0 : i32
    return %arg0, %c0_i32, %c0_i32_0 : i32, i32, i32
  }
  func.func @transform_1(%arg0: i32) -> (i32, i32, i32) {
    %c0_i32 = arith.constant 0 : i32
    %c0_i32_0 = arith.constant 0 : i32
    %c0_i32_1 = arith.constant 0 : i32
    %c0_i32_2 = arith.constant 0 : i32
    return %c0_i32, %c0_i32_0, %c0_i32_1 : i32, i32, i32
  }
  func.func @transform_2(%arg0: i32) -> (i32, i32, i32) {
    %c0_i32 = arith.constant 0 : i32
    %c0_i32_0 = arith.constant 0 : i32
    %c0_i32_1 = arith.constant 0 : i32
    return %arg0, %c0_i32, %c0_i32_0 : i32, i32, i32
  }
}

module attributes {stable_mosaic.version = 11 : i64} {
  func.func @_gemm_bn_kernel(%arg0: i32, %arg1: i32, %arg2: memref<64x12xbf16, #tpu.memory_space<vmem>>, %arg3: memref<12x16xbf16, #tpu.memory_space<vmem>>, %arg4: memref<1x12xf32, #tpu.memory_space<vmem>>, %arg5: memref<1x12xf32, #tpu.memory_space<vmem>>, %arg6: memref<1x16xf32, #tpu.memory_space<vmem>>, %arg7: memref<1x16xf32, #tpu.memory_space<vmem>>, %arg8: memref<64x16xbf16, #tpu.memory_space<vmem>>) attributes {dimension_semantics = [#tpu.dimension_semantics<parallel>, #tpu.dimension_semantics<parallel>], iteration_bounds = array<i64: 1, 1>, scalar_prefetch = 0 : i64, scratch_operands = 0 : i64, tpu.core_type = #tpu.core_type<tc>, window_params = [{transform_indices = @transform_0, window_bounds = array<i64: 64, 12>}, {transform_indices = @transform_1, window_bounds = array<i64: 12, 16>}, {pipeline_mode = #tpu.pipeline_mode<synchronous>, transform_indices = @transform_2, window_bounds = array<i64: 1, 12>}, {pipeline_mode = #tpu.pipeline_mode<synchronous>, transform_indices = @transform_3, window_bounds = array<i64: 1, 12>}, {transform_indices = @transform_4, window_bounds = array<i64: 1, 16>}, {transform_indices = @transform_5, window_bounds = array<i64: 1, 16>}, {transform_indices = @transform_6, window_bounds = array<i64: 64, 16>}]} {
    %c0 = arith.constant 0 : index
    %c0_0 = arith.constant 0 : index
    %0 = vector.load %arg2[%c0, %c0_0] : memref<64x12xbf16, #tpu.memory_space<vmem>>, vector<64x12xbf16>
    %1 = arith.extf %0 : vector<64x12xbf16> to vector<64x12xf32>
    %c0_1 = arith.constant 0 : index
    %c0_2 = arith.constant 0 : index
    %2 = vector.load %arg4[%c0_1, %c0_2] : memref<1x12xf32, #tpu.memory_space<vmem>>, vector<1x12xf32>
    %3 = vector.broadcast %2 : vector<1x12xf32> to vector<64x12xf32>
    %4 = arith.mulf %1, %3 : vector<64x12xf32>
    %c0_3 = arith.constant 0 : index
    %c0_4 = arith.constant 0 : index
    %5 = vector.load %arg5[%c0_3, %c0_4] : memref<1x12xf32, #tpu.memory_space<vmem>>, vector<1x12xf32>
    %6 = vector.broadcast %5 : vector<1x12xf32> to vector<64x12xf32>
    %7 = arith.addf %4, %6 : vector<64x12xf32>
    %cst = arith.constant 0.000000e+00 : f32
    %8 = vector.broadcast %cst : f32 to vector<64x12xf32>
    %9 = arith.maximumf %7, %8 : vector<64x12xf32>
    %10 = arith.truncf %9 : vector<64x12xf32> to vector<64x12xbf16>
    %c0_5 = arith.constant 0 : index
    %c0_6 = arith.constant 0 : index
    %11 = vector.load %arg3[%c0_5, %c0_6] : memref<12x16xbf16, #tpu.memory_space<vmem>>, vector<12x16xbf16>
    %cst_7 = arith.constant dense<0.000000e+00> : vector<64x16xf32>
    %12 = tpu.matmul %10, %11, %cst_7 {dimension_numbers = #tpu.dot_dimension_numbers<[1], [0], [0], [1], [0, 0, 1, 1], [], []>} : vector<64x12xbf16>, vector<12x16xbf16>, vector<64x16xf32> -> vector<64x16xf32>
    %c0_8 = arith.constant 0 : index
    %c0_9 = arith.constant 0 : index
    %13 = vector.load %arg6[%c0_8, %c0_9] : memref<1x16xf32, #tpu.memory_space<vmem>>, vector<1x16xf32>
    %14 = vector.broadcast %13 : vector<1x16xf32> to vector<64x16xf32>
    %15 = arith.mulf %12, %14 : vector<64x16xf32>
    %c0_10 = arith.constant 0 : index
    %c0_11 = arith.constant 0 : index
    %16 = vector.load %arg7[%c0_10, %c0_11] : memref<1x16xf32, #tpu.memory_space<vmem>>, vector<1x16xf32>
    %17 = vector.broadcast %16 : vector<1x16xf32> to vector<64x16xf32>
    %18 = arith.addf %15, %17 : vector<64x16xf32>
    %cst_12 = arith.constant 0.000000e+00 : f32
    %19 = vector.broadcast %cst_12 : f32 to vector<64x16xf32>
    %20 = arith.maximumf %18, %19 : vector<64x16xf32>
    %21 = arith.truncf %20 : vector<64x16xf32> to vector<64x16xbf16>
    %c0_13 = arith.constant 0 : index
    %c0_14 = arith.constant 0 : index
    %22 = vector.load %arg8[%c0_13, %c0_14] : memref<64x16xbf16, #tpu.memory_space<vmem>>, vector<64x16xbf16>
    tpu.vector_store %arg8[%c0_13, %c0_14], %21 {strides = array<i32>} : memref<64x16xbf16, #tpu.memory_space<vmem>>, vector<64x16xbf16>,
    return
  }
  func.func @transform_0(%arg0: i32, %arg1: i32) -> (i32, i32) {
    %c0_i32 = arith.constant 0 : i32
    %c0_i32_0 = arith.constant 0 : i32
    return %arg0, %c0_i32 : i32, i32
  }
  func.func @transform_1(%arg0: i32, %arg1: i32) -> (i32, i32) {
    %c0_i32 = arith.constant 0 : i32
    %c0_i32_0 = arith.constant 0 : i32
    return %c0_i32, %arg1 : i32, i32
  }
  func.func @transform_2(%arg0: i32, %arg1: i32) -> (i32, i32) {
    %c0_i32 = arith.constant 0 : i32
    %c0_i32_0 = arith.constant 0 : i32
    %c0_i32_1 = arith.constant 0 : i32
    return %c0_i32, %c0_i32_0 : i32, i32
  }
  func.func @transform_3(%arg0: i32, %arg1: i32) -> (i32, i32) {
    %c0_i32 = arith.constant 0 : i32
    %c0_i32_0 = arith.constant 0 : i32
    %c0_i32_1 = arith.constant 0 : i32
    return %c0_i32, %c0_i32_0 : i32, i32
  }
  func.func @transform_4(%arg0: i32, %arg1: i32) -> (i32, i32) {
    %c0_i32 = arith.constant 0 : i32
    %c0_i32_0 = arith.constant 0 : i32
    return %c0_i32, %arg1 : i32, i32
  }
  func.func @transform_5(%arg0: i32, %arg1: i32) -> (i32, i32) {
    %c0_i32 = arith.constant 0 : i32
    %c0_i32_0 = arith.constant 0 : i32
    return %c0_i32, %arg1 : i32, i32
  }
  func.func @transform_6(%arg0: i32, %arg1: i32) -> (i32, i32) {
    %c0_i32 = arith.constant 0 : i32
    return %arg0, %arg1 : i32, i32
  }
}

module attributes {stable_mosaic.version = 11 : i64} {
  func.func @_gemm_bn_kernel(%arg0: i32, %arg1: i32, %arg2: memref<64x16xbf16, #tpu.memory_space<vmem>>, %arg3: memref<16x8xbf16, #tpu.memory_space<vmem>>, %arg4: memref<1x16xf32, #tpu.memory_space<vmem>>, %arg5: memref<1x16xf32, #tpu.memory_space<vmem>>, %arg6: memref<64x8xbf16, #tpu.memory_space<vmem>>) attributes {dimension_semantics = [#tpu.dimension_semantics<parallel>, #tpu.dimension_semantics<parallel>], iteration_bounds = array<i64: 1, 1>, scalar_prefetch = 0 : i64, scratch_operands = 0 : i64, tpu.core_type = #tpu.core_type<tc>, window_params = [{transform_indices = @transform_0, window_bounds = array<i64: 64, 16>}, {transform_indices = @transform_1, window_bounds = array<i64: 16, 8>}, {pipeline_mode = #tpu.pipeline_mode<synchronous>, transform_indices = @transform_2, window_bounds = array<i64: 1, 16>}, {pipeline_mode = #tpu.pipeline_mode<synchronous>, transform_indices = @transform_3, window_bounds = array<i64: 1, 16>}, {transform_indices = @transform_4, window_bounds = array<i64: 64, 8>}]} {
    %c0 = arith.constant 0 : index
    %c0_0 = arith.constant 0 : index
    %0 = vector.load %arg2[%c0, %c0_0] : memref<64x16xbf16, #tpu.memory_space<vmem>>, vector<64x16xbf16>
    %1 = arith.extf %0 : vector<64x16xbf16> to vector<64x16xf32>
    %c0_1 = arith.constant 0 : index
    %c0_2 = arith.constant 0 : index
    %2 = vector.load %arg4[%c0_1, %c0_2] : memref<1x16xf32, #tpu.memory_space<vmem>>, vector<1x16xf32>
    %3 = vector.broadcast %2 : vector<1x16xf32> to vector<64x16xf32>
    %4 = arith.mulf %1, %3 : vector<64x16xf32>
    %c0_3 = arith.constant 0 : index
    %c0_4 = arith.constant 0 : index
    %5 = vector.load %arg5[%c0_3, %c0_4] : memref<1x16xf32, #tpu.memory_space<vmem>>, vector<1x16xf32>
    %6 = vector.broadcast %5 : vector<1x16xf32> to vector<64x16xf32>
    %7 = arith.addf %4, %6 : vector<64x16xf32>
    %cst = arith.constant 0.000000e+00 : f32
    %8 = vector.broadcast %cst : f32 to vector<64x16xf32>
    %9 = arith.maximumf %7, %8 : vector<64x16xf32>
    %10 = arith.truncf %9 : vector<64x16xf32> to vector<64x16xbf16>
    %c0_5 = arith.constant 0 : index
    %c0_6 = arith.constant 0 : index
    %11 = vector.load %arg3[%c0_5, %c0_6] : memref<16x8xbf16, #tpu.memory_space<vmem>>, vector<16x8xbf16>
    %cst_7 = arith.constant dense<0.000000e+00> : vector<64x8xf32>
    %12 = tpu.matmul %10, %11, %cst_7 {dimension_numbers = #tpu.dot_dimension_numbers<[1], [0], [0], [1], [0, 0, 1, 1], [], []>} : vector<64x16xbf16>, vector<16x8xbf16>, vector<64x8xf32> -> vector<64x8xf32>
    %13 = arith.truncf %12 : vector<64x8xf32> to vector<64x8xbf16>
    %c0_8 = arith.constant 0 : index
    %c0_9 = arith.constant 0 : index
    %14 = vector.load %arg6[%c0_8, %c0_9] : memref<64x8xbf16, #tpu.memory_space<vmem>>, vector<64x8xbf16>
    tpu.vector_store %arg6[%c0_8, %c0_9], %13 {strides = array<i32>} : memref<64x8xbf16, #tpu.memory_space<vmem>>, vector<64x8xbf16>,
    return
  }
  func.func @transform_0(%arg0: i32, %arg1: i32) -> (i32, i32) {
    %c0_i32 = arith.constant 0 : i32
    %c0_i32_0 = arith.constant 0 : i32
    return %arg0, %c0_i32 : i32, i32
  }
  func.func @transform_1(%arg0: i32, %arg1: i32) -> (i32, i32) {
    %c0_i32 = arith.constant 0 : i32
    %c0_i32_0 = arith.constant 0 : i32
    return %c0_i32, %arg1 : i32, i32
  }
  func.func @transform_2(%arg0: i32, %arg1: i32) -> (i32, i32) {
    %c0_i32 = arith.constant 0 : i32
    %c0_i32_0 = arith.constant 0 : i32
    %c0_i32_1 = arith.constant 0 : i32
    return %c0_i32, %c0_i32_0 : i32, i32
  }
  func.func @transform_3(%arg0: i32, %arg1: i32) -> (i32, i32) {
    %c0_i32 = arith.constant 0 : i32
    %c0_i32_0 = arith.constant 0 : i32
    %c0_i32_1 = arith.constant 0 : i32
    return %c0_i32, %c0_i32_0 : i32, i32
  }
  func.func @transform_4(%arg0: i32, %arg1: i32) -> (i32, i32) {
    %c0_i32 = arith.constant 0 : i32
    return %arg0, %arg1 : i32, i32
  }
}

module attributes {stable_mosaic.version = 11 : i64} {
  func.func @_avgpool2x2_kernel(%arg0: i32, %arg1: memref<8x2x2x2x8xbf16, #tpu.memory_space<vmem>>, %arg2: memref<8x2x8xbf16, #tpu.memory_space<vmem>>) attributes {dimension_semantics = [#tpu.dimension_semantics<parallel>], iteration_bounds = array<i64: 1>, scalar_prefetch = 0 : i64, scratch_operands = 0 : i64, tpu.core_type = #tpu.core_type<tc>, window_params = [{transform_indices = @transform_0, window_bounds = array<i64: 8, 2, 2, 2, 8>}, {transform_indices = @transform_1, window_bounds = array<i64: 8, 2, 8>}]} {
    %c0 = arith.constant 0 : index
    %c0_0 = arith.constant 0 : index
    %c0_1 = arith.constant 0 : index
    %c0_2 = arith.constant 0 : index
    %c0_3 = arith.constant 0 : index
    %0 = vector.load %arg1[%c0, %c0_0, %c0_1, %c0_2, %c0_3] : memref<8x2x2x2x8xbf16, #tpu.memory_space<vmem>>, vector<8x2x2x2x8xbf16>
    %1 = arith.extf %0 : vector<8x2x2x2x8xbf16> to vector<8x2x2x2x8xf32>
    %2 = vector.extract_strided_slice %1 {offsets = [0, 0, 0, 0, 0], sizes = [8, 1, 2, 2, 8], strides = [1, 1, 1, 1, 1]} : vector<8x2x2x2x8xf32> to vector<8x1x2x2x8xf32>
    %3 = vector.shape_cast %2 : vector<8x1x2x2x8xf32> to vector<8x2x2x8xf32>
    %4 = vector.extract_strided_slice %1 {offsets = [0, 1, 0, 0, 0], sizes = [8, 1, 2, 2, 8], strides = [1, 1, 1, 1, 1]} : vector<8x2x2x2x8xf32> to vector<8x1x2x2x8xf32>
    %5 = vector.shape_cast %4 : vector<8x1x2x2x8xf32> to vector<8x2x2x8xf32>
    %6 = arith.addf %3, %5 : vector<8x2x2x8xf32>
    %7 = vector.extract_strided_slice %6 {offsets = [0, 0, 0, 0], sizes = [8, 2, 1, 8], strides = [1, 1, 1, 1]} : vector<8x2x2x8xf32> to vector<8x2x1x8xf32>
    %8 = vector.shape_cast %7 : vector<8x2x1x8xf32> to vector<8x2x8xf32>
    %9 = vector.extract_strided_slice %6 {offsets = [0, 0, 1, 0], sizes = [8, 2, 1, 8], strides = [1, 1, 1, 1]} : vector<8x2x2x8xf32> to vector<8x2x1x8xf32>
    %10 = vector.shape_cast %9 : vector<8x2x1x8xf32> to vector<8x2x8xf32>
    %11 = arith.addf %8, %10 : vector<8x2x8xf32>
    %cst = arith.constant 2.500000e-01 : f32
    %12 = vector.broadcast %cst : f32 to vector<8x2x8xf32>
    %13 = arith.mulf %12, %11 : vector<8x2x8xf32>
    %14 = arith.truncf %13 : vector<8x2x8xf32> to vector<8x2x8xbf16>
    %c0_4 = arith.constant 0 : index
    %c0_5 = arith.constant 0 : index
    %c0_6 = arith.constant 0 : index
    %15 = vector.load %arg2[%c0_4, %c0_5, %c0_6] : memref<8x2x8xbf16, #tpu.memory_space<vmem>>, vector<8x2x8xbf16>
    tpu.vector_store %arg2[%c0_4, %c0_5, %c0_6], %14 {strides = array<i32>} : memref<8x2x8xbf16, #tpu.memory_space<vmem>>, vector<8x2x8xbf16>,
    return
  }
  func.func @transform_0(%arg0: i32) -> (i32, i32, i32, i32, i32) {
    %c0_i32 = arith.constant 0 : i32
    %c0_i32_0 = arith.constant 0 : i32
    %c0_i32_1 = arith.constant 0 : i32
    %c0_i32_2 = arith.constant 0 : i32
    %c0_i32_3 = arith.constant 0 : i32
    return %arg0, %c0_i32, %c0_i32_0, %c0_i32_1, %c0_i32_2 : i32, i32, i32, i32, i32
  }
  func.func @transform_1(%arg0: i32) -> (i32, i32, i32) {
    %c0_i32 = arith.constant 0 : i32
    %c0_i32_0 = arith.constant 0 : i32
    %c0_i32_1 = arith.constant 0 : i32
    return %arg0, %c0_i32, %c0_i32_0 : i32, i32, i32
  }
}

module attributes {stable_mosaic.version = 11 : i64} {
  func.func @_gemm_bn_kernel(%arg0: i32, %arg1: i32, %arg2: memref<16x8xbf16, #tpu.memory_space<vmem>>, %arg3: memref<8x16xbf16, #tpu.memory_space<vmem>>, %arg4: memref<1x8xf32, #tpu.memory_space<vmem>>, %arg5: memref<1x8xf32, #tpu.memory_space<vmem>>, %arg6: memref<1x16xf32, #tpu.memory_space<vmem>>, %arg7: memref<1x16xf32, #tpu.memory_space<vmem>>, %arg8: memref<16x16xbf16, #tpu.memory_space<vmem>>) attributes {dimension_semantics = [#tpu.dimension_semantics<parallel>, #tpu.dimension_semantics<parallel>], iteration_bounds = array<i64: 1, 1>, scalar_prefetch = 0 : i64, scratch_operands = 0 : i64, tpu.core_type = #tpu.core_type<tc>, window_params = [{transform_indices = @transform_0, window_bounds = array<i64: 16, 8>}, {transform_indices = @transform_1, window_bounds = array<i64: 8, 16>}, {pipeline_mode = #tpu.pipeline_mode<synchronous>, transform_indices = @transform_2, window_bounds = array<i64: 1, 8>}, {pipeline_mode = #tpu.pipeline_mode<synchronous>, transform_indices = @transform_3, window_bounds = array<i64: 1, 8>}, {transform_indices = @transform_4, window_bounds = array<i64: 1, 16>}, {transform_indices = @transform_5, window_bounds = array<i64: 1, 16>}, {transform_indices = @transform_6, window_bounds = array<i64: 16, 16>}]} {
    %c0 = arith.constant 0 : index
    %c0_0 = arith.constant 0 : index
    %0 = vector.load %arg2[%c0, %c0_0] : memref<16x8xbf16, #tpu.memory_space<vmem>>, vector<16x8xbf16>
    %1 = arith.extf %0 : vector<16x8xbf16> to vector<16x8xf32>
    %c0_1 = arith.constant 0 : index
    %c0_2 = arith.constant 0 : index
    %2 = vector.load %arg4[%c0_1, %c0_2] : memref<1x8xf32, #tpu.memory_space<vmem>>, vector<1x8xf32>
    %3 = vector.broadcast %2 : vector<1x8xf32> to vector<16x8xf32>
    %4 = arith.mulf %1, %3 : vector<16x8xf32>
    %c0_3 = arith.constant 0 : index
    %c0_4 = arith.constant 0 : index
    %5 = vector.load %arg5[%c0_3, %c0_4] : memref<1x8xf32, #tpu.memory_space<vmem>>, vector<1x8xf32>
    %6 = vector.broadcast %5 : vector<1x8xf32> to vector<16x8xf32>
    %7 = arith.addf %4, %6 : vector<16x8xf32>
    %cst = arith.constant 0.000000e+00 : f32
    %8 = vector.broadcast %cst : f32 to vector<16x8xf32>
    %9 = arith.maximumf %7, %8 : vector<16x8xf32>
    %10 = arith.truncf %9 : vector<16x8xf32> to vector<16x8xbf16>
    %c0_5 = arith.constant 0 : index
    %c0_6 = arith.constant 0 : index
    %11 = vector.load %arg3[%c0_5, %c0_6] : memref<8x16xbf16, #tpu.memory_space<vmem>>, vector<8x16xbf16>
    %cst_7 = arith.constant dense<0.000000e+00> : vector<16x16xf32>
    %12 = tpu.matmul %10, %11, %cst_7 {dimension_numbers = #tpu.dot_dimension_numbers<[1], [0], [0], [1], [0, 0, 1, 1], [], []>} : vector<16x8xbf16>, vector<8x16xbf16>, vector<16x16xf32> -> vector<16x16xf32>
    %c0_8 = arith.constant 0 : index
    %c0_9 = arith.constant 0 : index
    %13 = vector.load %arg6[%c0_8, %c0_9] : memref<1x16xf32, #tpu.memory_space<vmem>>, vector<1x16xf32>
    %14 = vector.broadcast %13 : vector<1x16xf32> to vector<16x16xf32>
    %15 = arith.mulf %12, %14 : vector<16x16xf32>
    %c0_10 = arith.constant 0 : index
    %c0_11 = arith.constant 0 : index
    %16 = vector.load %arg7[%c0_10, %c0_11] : memref<1x16xf32, #tpu.memory_space<vmem>>, vector<1x16xf32>
    %17 = vector.broadcast %16 : vector<1x16xf32> to vector<16x16xf32>
    %18 = arith.addf %15, %17 : vector<16x16xf32>
    %cst_12 = arith.constant 0.000000e+00 : f32
    %19 = vector.broadcast %cst_12 : f32 to vector<16x16xf32>
    %20 = arith.maximumf %18, %19 : vector<16x16xf32>
    %21 = arith.truncf %20 : vector<16x16xf32> to vector<16x16xbf16>
    %c0_13 = arith.constant 0 : index
    %c0_14 = arith.constant 0 : index
    %22 = vector.load %arg8[%c0_13, %c0_14] : memref<16x16xbf16, #tpu.memory_space<vmem>>, vector<16x16xbf16>
    tpu.vector_store %arg8[%c0_13, %c0_14], %21 {strides = array<i32>} : memref<16x16xbf16, #tpu.memory_space<vmem>>, vector<16x16xbf16>,
    return
  }
  func.func @transform_0(%arg0: i32, %arg1: i32) -> (i32, i32) {
    %c0_i32 = arith.constant 0 : i32
    %c0_i32_0 = arith.constant 0 : i32
    return %arg0, %c0_i32 : i32, i32
  }
  func.func @transform_1(%arg0: i32, %arg1: i32) -> (i32, i32) {
    %c0_i32 = arith.constant 0 : i32
    %c0_i32_0 = arith.constant 0 : i32
    return %c0_i32, %arg1 : i32, i32
  }
  func.func @transform_2(%arg0: i32, %arg1: i32) -> (i32, i32) {
    %c0_i32 = arith.constant 0 : i32
    %c0_i32_0 = arith.constant 0 : i32
    %c0_i32_1 = arith.constant 0 : i32
    return %c0_i32, %c0_i32_0 : i32, i32
  }
  func.func @transform_3(%arg0: i32, %arg1: i32) -> (i32, i32) {
    %c0_i32 = arith.constant 0 : i32
    %c0_i32_0 = arith.constant 0 : i32
    %c0_i32_1 = arith.constant 0 : i32
    return %c0_i32, %c0_i32_0 : i32, i32
  }
  func.func @transform_4(%arg0: i32, %arg1: i32) -> (i32, i32) {
    %c0_i32 = arith.constant 0 : i32
    %c0_i32_0 = arith.constant 0 : i32
    return %c0_i32, %arg1 : i32, i32
  }
  func.func @transform_5(%arg0: i32, %arg1: i32) -> (i32, i32) {
    %c0_i32 = arith.constant 0 : i32
    %c0_i32_0 = arith.constant 0 : i32
    return %c0_i32, %arg1 : i32, i32
  }
  func.func @transform_6(%arg0: i32, %arg1: i32) -> (i32, i32) {
    %c0_i32 = arith.constant 0 : i32
    return %arg0, %arg1 : i32, i32
  }
}

module attributes {stable_mosaic.version = 11 : i64} {
  func.func @_conv3x3_flat_kernel(%arg0: i32, %arg1: memref<1x20x16xbf16, #tpu.memory_space<vmem>>, %arg2: memref<9x16x4xbf16, #tpu.memory_space<vmem>>, %arg3: memref<1x8x4xbf16, #tpu.memory_space<vmem>>) attributes {dimension_semantics = [#tpu.dimension_semantics<parallel>], iteration_bounds = array<i64: 4>, scalar_prefetch = 0 : i64, scratch_operands = 0 : i64, tpu.core_type = #tpu.core_type<tc>, window_params = [{transform_indices = @transform_0, window_bounds = array<i64: 1, 20, 16>}, {pipeline_mode = #tpu.pipeline_mode<synchronous>, transform_indices = @transform_1, window_bounds = array<i64: 9, 16, 4>}, {transform_indices = @transform_2, window_bounds = array<i64: 1, 8, 4>}]} {
    %cst = arith.constant 0.000000e+00 : f32
    %0 = vector.broadcast %cst : f32 to vector<8x4xf32>
    %c0 = arith.constant 0 : index
    %c0_0 = arith.constant 0 : index
    %c0_1 = arith.constant 0 : index
    %1 = vector.load %arg1[%c0, %c0_0, %c0_1] : memref<1x20x16xbf16, #tpu.memory_space<vmem>>, vector<1x8x16xbf16>
    %2 = vector.shape_cast %1 : vector<1x8x16xbf16> to vector<8x16xbf16>
    %c0_2 = arith.constant 0 : index
    %c0_3 = arith.constant 0 : index
    %c0_4 = arith.constant 0 : index
    %3 = vector.load %arg2[%c0_2, %c0_3, %c0_4] : memref<9x16x4xbf16, #tpu.memory_space<vmem>>, vector<1x16x4xbf16>
    %4 = vector.shape_cast %3 : vector<1x16x4xbf16> to vector<16x4xbf16>
    %cst_5 = arith.constant dense<0.000000e+00> : vector<8x4xf32>
    %5 = tpu.matmul %2, %4, %cst_5 {dimension_numbers = #tpu.dot_dimension_numbers<[1], [0], [0], [1], [0, 0, 1, 1], [], []>} : vector<8x16xbf16>, vector<16x4xbf16>, vector<8x4xf32> -> vector<8x4xf32>
    %6 = arith.addf %0, %5 : vector<8x4xf32>
    %c0_6 = arith.constant 0 : index
    %c1 = arith.constant 1 : index
    %c0_7 = arith.constant 0 : index
    %7 = vector.load %arg1[%c0_6, %c1, %c0_7] : memref<1x20x16xbf16, #tpu.memory_space<vmem>>, vector<1x8x16xbf16>
    %8 = vector.shape_cast %7 : vector<1x8x16xbf16> to vector<8x16xbf16>
    %c1_8 = arith.constant 1 : index
    %c0_9 = arith.constant 0 : index
    %c0_10 = arith.constant 0 : index
    %9 = vector.load %arg2[%c1_8, %c0_9, %c0_10] : memref<9x16x4xbf16, #tpu.memory_space<vmem>>, vector<1x16x4xbf16>
    %10 = vector.shape_cast %9 : vector<1x16x4xbf16> to vector<16x4xbf16>
    %cst_11 = arith.constant dense<0.000000e+00> : vector<8x4xf32>
    %11 = tpu.matmul %8, %10, %cst_11 {dimension_numbers = #tpu.dot_dimension_numbers<[1], [0], [0], [1], [0, 0, 1, 1], [], []>} : vector<8x16xbf16>, vector<16x4xbf16>, vector<8x4xf32> -> vector<8x4xf32>
    %12 = arith.addf %6, %11 : vector<8x4xf32>
    %c0_12 = arith.constant 0 : index
    %c2 = arith.constant 2 : index
    %c0_13 = arith.constant 0 : index
    %13 = vector.load %arg1[%c0_12, %c2, %c0_13] : memref<1x20x16xbf16, #tpu.memory_space<vmem>>, vector<1x8x16xbf16>
    %14 = vector.shape_cast %13 : vector<1x8x16xbf16> to vector<8x16xbf16>
    %c2_14 = arith.constant 2 : index
    %c0_15 = arith.constant 0 : index
    %c0_16 = arith.constant 0 : index
    %15 = vector.load %arg2[%c2_14, %c0_15, %c0_16] : memref<9x16x4xbf16, #tpu.memory_space<vmem>>, vector<1x16x4xbf16>
    %16 = vector.shape_cast %15 : vector<1x16x4xbf16> to vector<16x4xbf16>
    %cst_17 = arith.constant dense<0.000000e+00> : vector<8x4xf32>
    %17 = tpu.matmul %14, %16, %cst_17 {dimension_numbers = #tpu.dot_dimension_numbers<[1], [0], [0], [1], [0, 0, 1, 1], [], []>} : vector<8x16xbf16>, vector<16x4xbf16>, vector<8x4xf32> -> vector<8x4xf32>
    %18 = arith.addf %12, %17 : vector<8x4xf32>
    %c0_18 = arith.constant 0 : index
    %c4 = arith.constant 4 : index
    %c0_19 = arith.constant 0 : index
    %19 = vector.load %arg1[%c0_18, %c4, %c0_19] : memref<1x20x16xbf16, #tpu.memory_space<vmem>>, vector<1x8x16xbf16>
    %20 = vector.shape_cast %19 : vector<1x8x16xbf16> to vector<8x16xbf16>
    %c3 = arith.constant 3 : index
    %c0_20 = arith.constant 0 : index
    %c0_21 = arith.constant 0 : index
    %21 = vector.load %arg2[%c3, %c0_20, %c0_21] : memref<9x16x4xbf16, #tpu.memory_space<vmem>>, vector<1x16x4xbf16>
    %22 = vector.shape_cast %21 : vector<1x16x4xbf16> to vector<16x4xbf16>
    %cst_22 = arith.constant dense<0.000000e+00> : vector<8x4xf32>
    %23 = tpu.matmul %20, %22, %cst_22 {dimension_numbers = #tpu.dot_dimension_numbers<[1], [0], [0], [1], [0, 0, 1, 1], [], []>} : vector<8x16xbf16>, vector<16x4xbf16>, vector<8x4xf32> -> vector<8x4xf32>
    %24 = arith.addf %18, %23 : vector<8x4xf32>
    %c0_23 = arith.constant 0 : index
    %c5 = arith.constant 5 : index
    %c0_24 = arith.constant 0 : index
    %25 = vector.load %arg1[%c0_23, %c5, %c0_24] : memref<1x20x16xbf16, #tpu.memory_space<vmem>>, vector<1x8x16xbf16>
    %26 = vector.shape_cast %25 : vector<1x8x16xbf16> to vector<8x16xbf16>
    %c4_25 = arith.constant 4 : index
    %c0_26 = arith.constant 0 : index
    %c0_27 = arith.constant 0 : index
    %27 = vector.load %arg2[%c4_25, %c0_26, %c0_27] : memref<9x16x4xbf16, #tpu.memory_space<vmem>>, vector<1x16x4xbf16>
    %28 = vector.shape_cast %27 : vector<1x16x4xbf16> to vector<16x4xbf16>
    %cst_28 = arith.constant dense<0.000000e+00> : vector<8x4xf32>
    %29 = tpu.matmul %26, %28, %cst_28 {dimension_numbers = #tpu.dot_dimension_numbers<[1], [0], [0], [1], [0, 0, 1, 1], [], []>} : vector<8x16xbf16>, vector<16x4xbf16>, vector<8x4xf32> -> vector<8x4xf32>
    %30 = arith.addf %24, %29 : vector<8x4xf32>
    %c0_29 = arith.constant 0 : index
    %c6 = arith.constant 6 : index
    %c0_30 = arith.constant 0 : index
    %31 = vector.load %arg1[%c0_29, %c6, %c0_30] : memref<1x20x16xbf16, #tpu.memory_space<vmem>>, vector<1x8x16xbf16>
    %32 = vector.shape_cast %31 : vector<1x8x16xbf16> to vector<8x16xbf16>
    %c5_31 = arith.constant 5 : index
    %c0_32 = arith.constant 0 : index
    %c0_33 = arith.constant 0 : index
    %33 = vector.load %arg2[%c5_31, %c0_32, %c0_33] : memref<9x16x4xbf16, #tpu.memory_space<vmem>>, vector<1x16x4xbf16>
    %34 = vector.shape_cast %33 : vector<1x16x4xbf16> to vector<16x4xbf16>
    %cst_34 = arith.constant dense<0.000000e+00> : vector<8x4xf32>
    %35 = tpu.matmul %32, %34, %cst_34 {dimension_numbers = #tpu.dot_dimension_numbers<[1], [0], [0], [1], [0, 0, 1, 1], [], []>} : vector<8x16xbf16>, vector<16x4xbf16>, vector<8x4xf32> -> vector<8x4xf32>
    %36 = arith.addf %30, %35 : vector<8x4xf32>
    %c0_35 = arith.constant 0 : index
    %c8 = arith.constant 8 : index
    %c0_36 = arith.constant 0 : index
    %37 = vector.load %arg1[%c0_35, %c8, %c0_36] : memref<1x20x16xbf16, #tpu.memory_space<vmem>>, vector<1x8x16xbf16>
    %38 = vector.shape_cast %37 : vector<1x8x16xbf16> to vector<8x16xbf16>
    %c6_37 = arith.constant 6 : index
    %c0_38 = arith.constant 0 : index
    %c0_39 = arith.constant 0 : index
    %39 = vector.load %arg2[%c6_37, %c0_38, %c0_39] : memref<9x16x4xbf16, #tpu.memory_space<vmem>>, vector<1x16x4xbf16>
    %40 = vector.shape_cast %39 : vector<1x16x4xbf16> to vector<16x4xbf16>
    %cst_40 = arith.constant dense<0.000000e+00> : vector<8x4xf32>
    %41 = tpu.matmul %38, %40, %cst_40 {dimension_numbers = #tpu.dot_dimension_numbers<[1], [0], [0], [1], [0, 0, 1, 1], [], []>} : vector<8x16xbf16>, vector<16x4xbf16>, vector<8x4xf32> -> vector<8x4xf32>
    %42 = arith.addf %36, %41 : vector<8x4xf32>
    %c0_41 = arith.constant 0 : index
    %c9 = arith.constant 9 : index
    %c0_42 = arith.constant 0 : index
    %43 = vector.load %arg1[%c0_41, %c9, %c0_42] : memref<1x20x16xbf16, #tpu.memory_space<vmem>>, vector<1x8x16xbf16>
    %44 = vector.shape_cast %43 : vector<1x8x16xbf16> to vector<8x16xbf16>
    %c7 = arith.constant 7 : index
    %c0_43 = arith.constant 0 : index
    %c0_44 = arith.constant 0 : index
    %45 = vector.load %arg2[%c7, %c0_43, %c0_44] : memref<9x16x4xbf16, #tpu.memory_space<vmem>>, vector<1x16x4xbf16>
    %46 = vector.shape_cast %45 : vector<1x16x4xbf16> to vector<16x4xbf16>
    %cst_45 = arith.constant dense<0.000000e+00> : vector<8x4xf32>
    %47 = tpu.matmul %44, %46, %cst_45 {dimension_numbers = #tpu.dot_dimension_numbers<[1], [0], [0], [1], [0, 0, 1, 1], [], []>} : vector<8x16xbf16>, vector<16x4xbf16>, vector<8x4xf32> -> vector<8x4xf32>
    %48 = arith.addf %42, %47 : vector<8x4xf32>
    %c0_46 = arith.constant 0 : index
    %c10 = arith.constant 10 : index
    %c0_47 = arith.constant 0 : index
    %49 = vector.load %arg1[%c0_46, %c10, %c0_47] : memref<1x20x16xbf16, #tpu.memory_space<vmem>>, vector<1x8x16xbf16>
    %50 = vector.shape_cast %49 : vector<1x8x16xbf16> to vector<8x16xbf16>
    %c8_48 = arith.constant 8 : index
    %c0_49 = arith.constant 0 : index
    %c0_50 = arith.constant 0 : index
    %51 = vector.load %arg2[%c8_48, %c0_49, %c0_50] : memref<9x16x4xbf16, #tpu.memory_space<vmem>>, vector<1x16x4xbf16>
    %52 = vector.shape_cast %51 : vector<1x16x4xbf16> to vector<16x4xbf16>
    %cst_51 = arith.constant dense<0.000000e+00> : vector<8x4xf32>
    %53 = tpu.matmul %50, %52, %cst_51 {dimension_numbers = #tpu.dot_dimension_numbers<[1], [0], [0], [1], [0, 0, 1, 1], [], []>} : vector<8x16xbf16>, vector<16x4xbf16>, vector<8x4xf32> -> vector<8x4xf32>
    %54 = arith.addf %48, %53 : vector<8x4xf32>
    %55 = arith.truncf %54 : vector<8x4xf32> to vector<8x4xbf16>
    %c0_52 = arith.constant 0 : index
    %c0_53 = arith.constant 0 : index
    %c0_54 = arith.constant 0 : index
    %56 = vector.load %arg3[%c0_52, %c0_53, %c0_54] : memref<1x8x4xbf16, #tpu.memory_space<vmem>>, vector<1x8x4xbf16>
    %57 = vector.shape_cast %56 : vector<1x8x4xbf16> to vector<8x4xbf16>
    %58 = vector.shape_cast %55 : vector<8x4xbf16> to vector<1x8x4xbf16>
    tpu.vector_store %arg3[%c0_52, %c0_53, %c0_54], %58 {strides = array<i32>} : memref<1x8x4xbf16, #tpu.memory_space<vmem>>, vector<1x8x4xbf16>,
    return
  }
  func.func @transform_0(%arg0: i32) -> (i32, i32, i32) {
    %c0_i32 = arith.constant 0 : i32
    %c0_i32_0 = arith.constant 0 : i32
    %c0_i32_1 = arith.constant 0 : i32
    return %arg0, %c0_i32, %c0_i32_0 : i32, i32, i32
  }
  func.func @transform_1(%arg0: i32) -> (i32, i32, i32) {
    %c0_i32 = arith.constant 0 : i32
    %c0_i32_0 = arith.constant 0 : i32
    %c0_i32_1 = arith.constant 0 : i32
    %c0_i32_2 = arith.constant 0 : i32
    return %c0_i32, %c0_i32_0, %c0_i32_1 : i32, i32, i32
  }
  func.func @transform_2(%arg0: i32) -> (i32, i32, i32) {
    %c0_i32 = arith.constant 0 : i32
    %c0_i32_0 = arith.constant 0 : i32
    %c0_i32_1 = arith.constant 0 : i32
    return %arg0, %c0_i32, %c0_i32_0 : i32, i32, i32
  }
}

module attributes {stable_mosaic.version = 11 : i64} {
  func.func @_gemm_bn_kernel(%arg0: i32, %arg1: i32, %arg2: memref<16x12xbf16, #tpu.memory_space<vmem>>, %arg3: memref<12x16xbf16, #tpu.memory_space<vmem>>, %arg4: memref<1x12xf32, #tpu.memory_space<vmem>>, %arg5: memref<1x12xf32, #tpu.memory_space<vmem>>, %arg6: memref<1x16xf32, #tpu.memory_space<vmem>>, %arg7: memref<1x16xf32, #tpu.memory_space<vmem>>, %arg8: memref<16x16xbf16, #tpu.memory_space<vmem>>) attributes {dimension_semantics = [#tpu.dimension_semantics<parallel>, #tpu.dimension_semantics<parallel>], iteration_bounds = array<i64: 1, 1>, scalar_prefetch = 0 : i64, scratch_operands = 0 : i64, tpu.core_type = #tpu.core_type<tc>, window_params = [{transform_indices = @transform_0, window_bounds = array<i64: 16, 12>}, {transform_indices = @transform_1, window_bounds = array<i64: 12, 16>}, {pipeline_mode = #tpu.pipeline_mode<synchronous>, transform_indices = @transform_2, window_bounds = array<i64: 1, 12>}, {pipeline_mode = #tpu.pipeline_mode<synchronous>, transform_indices = @transform_3, window_bounds = array<i64: 1, 12>}, {transform_indices = @transform_4, window_bounds = array<i64: 1, 16>}, {transform_indices = @transform_5, window_bounds = array<i64: 1, 16>}, {transform_indices = @transform_6, window_bounds = array<i64: 16, 16>}]} {
    %c0 = arith.constant 0 : index
    %c0_0 = arith.constant 0 : index
    %0 = vector.load %arg2[%c0, %c0_0] : memref<16x12xbf16, #tpu.memory_space<vmem>>, vector<16x12xbf16>
    %1 = arith.extf %0 : vector<16x12xbf16> to vector<16x12xf32>
    %c0_1 = arith.constant 0 : index
    %c0_2 = arith.constant 0 : index
    %2 = vector.load %arg4[%c0_1, %c0_2] : memref<1x12xf32, #tpu.memory_space<vmem>>, vector<1x12xf32>
    %3 = vector.broadcast %2 : vector<1x12xf32> to vector<16x12xf32>
    %4 = arith.mulf %1, %3 : vector<16x12xf32>
    %c0_3 = arith.constant 0 : index
    %c0_4 = arith.constant 0 : index
    %5 = vector.load %arg5[%c0_3, %c0_4] : memref<1x12xf32, #tpu.memory_space<vmem>>, vector<1x12xf32>
    %6 = vector.broadcast %5 : vector<1x12xf32> to vector<16x12xf32>
    %7 = arith.addf %4, %6 : vector<16x12xf32>
    %cst = arith.constant 0.000000e+00 : f32
    %8 = vector.broadcast %cst : f32 to vector<16x12xf32>
    %9 = arith.maximumf %7, %8 : vector<16x12xf32>
    %10 = arith.truncf %9 : vector<16x12xf32> to vector<16x12xbf16>
    %c0_5 = arith.constant 0 : index
    %c0_6 = arith.constant 0 : index
    %11 = vector.load %arg3[%c0_5, %c0_6] : memref<12x16xbf16, #tpu.memory_space<vmem>>, vector<12x16xbf16>
    %cst_7 = arith.constant dense<0.000000e+00> : vector<16x16xf32>
    %12 = tpu.matmul %10, %11, %cst_7 {dimension_numbers = #tpu.dot_dimension_numbers<[1], [0], [0], [1], [0, 0, 1, 1], [], []>} : vector<16x12xbf16>, vector<12x16xbf16>, vector<16x16xf32> -> vector<16x16xf32>
    %c0_8 = arith.constant 0 : index
    %c0_9 = arith.constant 0 : index
    %13 = vector.load %arg6[%c0_8, %c0_9] : memref<1x16xf32, #tpu.memory_space<vmem>>, vector<1x16xf32>
    %14 = vector.broadcast %13 : vector<1x16xf32> to vector<16x16xf32>
    %15 = arith.mulf %12, %14 : vector<16x16xf32>
    %c0_10 = arith.constant 0 : index
    %c0_11 = arith.constant 0 : index
    %16 = vector.load %arg7[%c0_10, %c0_11] : memref<1x16xf32, #tpu.memory_space<vmem>>, vector<1x16xf32>
    %17 = vector.broadcast %16 : vector<1x16xf32> to vector<16x16xf32>
    %18 = arith.addf %15, %17 : vector<16x16xf32>
    %cst_12 = arith.constant 0.000000e+00 : f32
    %19 = vector.broadcast %cst_12 : f32 to vector<16x16xf32>
    %20 = arith.maximumf %18, %19 : vector<16x16xf32>
    %21 = arith.truncf %20 : vector<16x16xf32> to vector<16x16xbf16>
    %c0_13 = arith.constant 0 : index
    %c0_14 = arith.constant 0 : index
    %22 = vector.load %arg8[%c0_13, %c0_14] : memref<16x16xbf16, #tpu.memory_space<vmem>>, vector<16x16xbf16>
    tpu.vector_store %arg8[%c0_13, %c0_14], %21 {strides = array<i32>} : memref<16x16xbf16, #tpu.memory_space<vmem>>, vector<16x16xbf16>,
    return
  }
  func.func @transform_0(%arg0: i32, %arg1: i32) -> (i32, i32) {
    %c0_i32 = arith.constant 0 : i32
    %c0_i32_0 = arith.constant 0 : i32
    return %arg0, %c0_i32 : i32, i32
  }
  func.func @transform_1(%arg0: i32, %arg1: i32) -> (i32, i32) {
    %c0_i32 = arith.constant 0 : i32
    %c0_i32_0 = arith.constant 0 : i32
    return %c0_i32, %arg1 : i32, i32
  }
  func.func @transform_2(%arg0: i32, %arg1: i32) -> (i32, i32) {
    %c0_i32 = arith.constant 0 : i32
    %c0_i32_0 = arith.constant 0 : i32
    %c0_i32_1 = arith.constant 0 : i32
    return %c0_i32, %c0_i32_0 : i32, i32
  }
  func.func @transform_3(%arg0: i32, %arg1: i32) -> (i32, i32) {
    %c0_i32 = arith.constant 0 : i32
    %c0_i32_0 = arith.constant 0 : i32
    %c0_i32_1 = arith.constant 0 : i32
    return %c0_i32, %c0_i32_0 : i32, i32
  }
  func.func @transform_4(%arg0: i32, %arg1: i32) -> (i32, i32) {
    %c0_i32 = arith.constant 0 : i32
    %c0_i32_0 = arith.constant 0 : i32
    return %c0_i32, %arg1 : i32, i32
  }
  func.func @transform_5(%arg0: i32, %arg1: i32) -> (i32, i32) {
    %c0_i32 = arith.constant 0 : i32
    %c0_i32_0 = arith.constant 0 : i32
    return %c0_i32, %arg1 : i32, i32
  }
  func.func @transform_6(%arg0: i32, %arg1: i32) -> (i32, i32) {
    %c0_i32 = arith.constant 0 : i32
    return %arg0, %arg1 : i32, i32
  }
}

module attributes {stable_mosaic.version = 11 : i64} {
  func.func @_gemm_bn_kernel(%arg0: i32, %arg1: i32, %arg2: memref<16x16xbf16, #tpu.memory_space<vmem>>, %arg3: memref<16x8xbf16, #tpu.memory_space<vmem>>, %arg4: memref<1x16xf32, #tpu.memory_space<vmem>>, %arg5: memref<1x16xf32, #tpu.memory_space<vmem>>, %arg6: memref<16x8xbf16, #tpu.memory_space<vmem>>) attributes {dimension_semantics = [#tpu.dimension_semantics<parallel>, #tpu.dimension_semantics<parallel>], iteration_bounds = array<i64: 1, 1>, scalar_prefetch = 0 : i64, scratch_operands = 0 : i64, tpu.core_type = #tpu.core_type<tc>, window_params = [{transform_indices = @transform_0, window_bounds = array<i64: 16, 16>}, {transform_indices = @transform_1, window_bounds = array<i64: 16, 8>}, {pipeline_mode = #tpu.pipeline_mode<synchronous>, transform_indices = @transform_2, window_bounds = array<i64: 1, 16>}, {pipeline_mode = #tpu.pipeline_mode<synchronous>, transform_indices = @transform_3, window_bounds = array<i64: 1, 16>}, {transform_indices = @transform_4, window_bounds = array<i64: 16, 8>}]} {
    %c0 = arith.constant 0 : index
    %c0_0 = arith.constant 0 : index
    %0 = vector.load %arg2[%c0, %c0_0] : memref<16x16xbf16, #tpu.memory_space<vmem>>, vector<16x16xbf16>
    %1 = arith.extf %0 : vector<16x16xbf16> to vector<16x16xf32>
    %c0_1 = arith.constant 0 : index
    %c0_2 = arith.constant 0 : index
    %2 = vector.load %arg4[%c0_1, %c0_2] : memref<1x16xf32, #tpu.memory_space<vmem>>, vector<1x16xf32>
    %3 = vector.broadcast %2 : vector<1x16xf32> to vector<16x16xf32>
    %4 = arith.mulf %1, %3 : vector<16x16xf32>
    %c0_3 = arith.constant 0 : index
    %c0_4 = arith.constant 0 : index
    %5 = vector.load %arg5[%c0_3, %c0_4] : memref<1x16xf32, #tpu.memory_space<vmem>>, vector<1x16xf32>
    %6 = vector.broadcast %5 : vector<1x16xf32> to vector<16x16xf32>
    %7 = arith.addf %4, %6 : vector<16x16xf32>
    %cst = arith.constant 0.000000e+00 : f32
    %8 = vector.broadcast %cst : f32 to vector<16x16xf32>
    %9 = arith.maximumf %7, %8 : vector<16x16xf32>
    %10 = arith.truncf %9 : vector<16x16xf32> to vector<16x16xbf16>
    %c0_5 = arith.constant 0 : index
    %c0_6 = arith.constant 0 : index
    %11 = vector.load %arg3[%c0_5, %c0_6] : memref<16x8xbf16, #tpu.memory_space<vmem>>, vector<16x8xbf16>
    %cst_7 = arith.constant dense<0.000000e+00> : vector<16x8xf32>
    %12 = tpu.matmul %10, %11, %cst_7 {dimension_numbers = #tpu.dot_dimension_numbers<[1], [0], [0], [1], [0, 0, 1, 1], [], []>} : vector<16x16xbf16>, vector<16x8xbf16>, vector<16x8xf32> -> vector<16x8xf32>
    %13 = arith.truncf %12 : vector<16x8xf32> to vector<16x8xbf16>
    %c0_8 = arith.constant 0 : index
    %c0_9 = arith.constant 0 : index
    %14 = vector.load %arg6[%c0_8, %c0_9] : memref<16x8xbf16, #tpu.memory_space<vmem>>, vector<16x8xbf16>
    tpu.vector_store %arg6[%c0_8, %c0_9], %13 {strides = array<i32>} : memref<16x8xbf16, #tpu.memory_space<vmem>>, vector<16x8xbf16>,
    return
  }
  func.func @transform_0(%arg0: i32, %arg1: i32) -> (i32, i32) {
    %c0_i32 = arith.constant 0 : i32
    %c0_i32_0 = arith.constant 0 : i32
    return %arg0, %c0_i32 : i32, i32
  }
  func.func @transform_1(%arg0: i32, %arg1: i32) -> (i32, i32) {
    %c0_i32 = arith.constant 0 : i32
    %c0_i32_0 = arith.constant 0 : i32
    return %c0_i32, %arg1 : i32, i32
  }
  func.func @transform_2(%arg0: i32, %arg1: i32) -> (i32, i32) {
    %c0_i32 = arith.constant 0 : i32
    %c0_i32_0 = arith.constant 0 : i32
    %c0_i32_1 = arith.constant 0 : i32
    return %c0_i32, %c0_i32_0 : i32, i32
  }
  func.func @transform_3(%arg0: i32, %arg1: i32) -> (i32, i32) {
    %c0_i32 = arith.constant 0 : i32
    %c0_i32_0 = arith.constant 0 : i32
    %c0_i32_1 = arith.constant 0 : i32
    return %c0_i32, %c0_i32_0 : i32, i32
  }
  func.func @transform_4(%arg0: i32, %arg1: i32) -> (i32, i32) {
    %c0_i32 = arith.constant 0 : i32
    return %arg0, %arg1 : i32, i32
  }
}

module attributes {stable_mosaic.version = 11 : i64} {
  func.func @_avgpool2x2_kernel(%arg0: i32, %arg1: memref<4x2x1x2x8xbf16, #tpu.memory_space<vmem>>, %arg2: memref<4x1x8xbf16, #tpu.memory_space<vmem>>) attributes {dimension_semantics = [#tpu.dimension_semantics<parallel>], iteration_bounds = array<i64: 1>, scalar_prefetch = 0 : i64, scratch_operands = 0 : i64, tpu.core_type = #tpu.core_type<tc>, window_params = [{transform_indices = @transform_0, window_bounds = array<i64: 4, 2, 1, 2, 8>}, {transform_indices = @transform_1, window_bounds = array<i64: 4, 1, 8>}]} {
    %c0 = arith.constant 0 : index
    %c0_0 = arith.constant 0 : index
    %c0_1 = arith.constant 0 : index
    %c0_2 = arith.constant 0 : index
    %c0_3 = arith.constant 0 : index
    %0 = vector.load %arg1[%c0, %c0_0, %c0_1, %c0_2, %c0_3] : memref<4x2x1x2x8xbf16, #tpu.memory_space<vmem>>, vector<4x2x1x2x8xbf16>
    %1 = arith.extf %0 : vector<4x2x1x2x8xbf16> to vector<4x2x1x2x8xf32>
    %2 = vector.extract_strided_slice %1 {offsets = [0, 0, 0, 0, 0], sizes = [4, 1, 1, 2, 8], strides = [1, 1, 1, 1, 1]} : vector<4x2x1x2x8xf32> to vector<4x1x1x2x8xf32>
    %3 = vector.shape_cast %2 : vector<4x1x1x2x8xf32> to vector<4x1x2x8xf32>
    %4 = vector.extract_strided_slice %1 {offsets = [0, 1, 0, 0, 0], sizes = [4, 1, 1, 2, 8], strides = [1, 1, 1, 1, 1]} : vector<4x2x1x2x8xf32> to vector<4x1x1x2x8xf32>
    %5 = vector.shape_cast %4 : vector<4x1x1x2x8xf32> to vector<4x1x2x8xf32>
    %6 = arith.addf %3, %5 : vector<4x1x2x8xf32>
    %7 = vector.extract_strided_slice %6 {offsets = [0, 0, 0, 0], sizes = [4, 1, 1, 8], strides = [1, 1, 1, 1]} : vector<4x1x2x8xf32> to vector<4x1x1x8xf32>
    %8 = vector.shape_cast %7 : vector<4x1x1x8xf32> to vector<4x1x8xf32>
    %9 = vector.extract_strided_slice %6 {offsets = [0, 0, 1, 0], sizes = [4, 1, 1, 8], strides = [1, 1, 1, 1]} : vector<4x1x2x8xf32> to vector<4x1x1x8xf32>
    %10 = vector.shape_cast %9 : vector<4x1x1x8xf32> to vector<4x1x8xf32>
    %11 = arith.addf %8, %10 : vector<4x1x8xf32>
    %cst = arith.constant 2.500000e-01 : f32
    %12 = vector.broadcast %cst : f32 to vector<4x1x8xf32>
    %13 = arith.mulf %12, %11 : vector<4x1x8xf32>
    %14 = arith.truncf %13 : vector<4x1x8xf32> to vector<4x1x8xbf16>
    %c0_4 = arith.constant 0 : index
    %c0_5 = arith.constant 0 : index
    %c0_6 = arith.constant 0 : index
    %15 = vector.load %arg2[%c0_4, %c0_5, %c0_6] : memref<4x1x8xbf16, #tpu.memory_space<vmem>>, vector<4x1x8xbf16>
    tpu.vector_store %arg2[%c0_4, %c0_5, %c0_6], %14 {strides = array<i32>} : memref<4x1x8xbf16, #tpu.memory_space<vmem>>, vector<4x1x8xbf16>,
    return
  }
  func.func @transform_0(%arg0: i32) -> (i32, i32, i32, i32, i32) {
    %c0_i32 = arith.constant 0 : i32
    %c0_i32_0 = arith.constant 0 : i32
    %c0_i32_1 = arith.constant 0 : i32
    %c0_i32_2 = arith.constant 0 : i32
    %c0_i32_3 = arith.constant 0 : i32
    return %arg0, %c0_i32, %c0_i32_0, %c0_i32_1, %c0_i32_2 : i32, i32, i32, i32, i32
  }
  func.func @transform_1(%arg0: i32) -> (i32, i32, i32) {
    %c0_i32 = arith.constant 0 : i32
    %c0_i32_0 = arith.constant 0 : i32
    %c0_i32_1 = arith.constant 0 : i32
    return %arg0, %c0_i32, %c0_i32_0 : i32, i32, i32
  }
}

module attributes {stable_mosaic.version = 11 : i64} {
  func.func @_conv3x3_flat_kernel(%arg0: i32, %arg1: memref<1x12x16xbf16, #tpu.memory_space<vmem>>, %arg2: memref<9x16x4xbf16, #tpu.memory_space<vmem>>, %arg3: memref<1x3x4xbf16, #tpu.memory_space<vmem>>) attributes {dimension_semantics = [#tpu.dimension_semantics<parallel>], iteration_bounds = array<i64: 4>, scalar_prefetch = 0 : i64, scratch_operands = 0 : i64, tpu.core_type = #tpu.core_type<tc>, window_params = [{transform_indices = @transform_0, window_bounds = array<i64: 1, 12, 16>}, {pipeline_mode = #tpu.pipeline_mode<synchronous>, transform_indices = @transform_1, window_bounds = array<i64: 9, 16, 4>}, {transform_indices = @transform_2, window_bounds = array<i64: 1, 3, 4>}]} {
    %cst = arith.constant 0.000000e+00 : f32
    %0 = vector.broadcast %cst : f32 to vector<3x4xf32>
    %c0 = arith.constant 0 : index
    %c0_0 = arith.constant 0 : index
    %c0_1 = arith.constant 0 : index
    %1 = vector.load %arg1[%c0, %c0_0, %c0_1] : memref<1x12x16xbf16, #tpu.memory_space<vmem>>, vector<1x3x16xbf16>
    %2 = vector.shape_cast %1 : vector<1x3x16xbf16> to vector<3x16xbf16>
    %c0_2 = arith.constant 0 : index
    %c0_3 = arith.constant 0 : index
    %c0_4 = arith.constant 0 : index
    %3 = vector.load %arg2[%c0_2, %c0_3, %c0_4] : memref<9x16x4xbf16, #tpu.memory_space<vmem>>, vector<1x16x4xbf16>
    %4 = vector.shape_cast %3 : vector<1x16x4xbf16> to vector<16x4xbf16>
    %cst_5 = arith.constant dense<0.000000e+00> : vector<3x4xf32>
    %5 = tpu.matmul %2, %4, %cst_5 {dimension_numbers = #tpu.dot_dimension_numbers<[1], [0], [0], [1], [0, 0, 1, 1], [], []>} : vector<3x16xbf16>, vector<16x4xbf16>, vector<3x4xf32> -> vector<3x4xf32>
    %6 = arith.addf %0, %5 : vector<3x4xf32>
    %c0_6 = arith.constant 0 : index
    %c1 = arith.constant 1 : index
    %c0_7 = arith.constant 0 : index
    %7 = vector.load %arg1[%c0_6, %c1, %c0_7] : memref<1x12x16xbf16, #tpu.memory_space<vmem>>, vector<1x3x16xbf16>
    %8 = vector.shape_cast %7 : vector<1x3x16xbf16> to vector<3x16xbf16>
    %c1_8 = arith.constant 1 : index
    %c0_9 = arith.constant 0 : index
    %c0_10 = arith.constant 0 : index
    %9 = vector.load %arg2[%c1_8, %c0_9, %c0_10] : memref<9x16x4xbf16, #tpu.memory_space<vmem>>, vector<1x16x4xbf16>
    %10 = vector.shape_cast %9 : vector<1x16x4xbf16> to vector<16x4xbf16>
    %cst_11 = arith.constant dense<0.000000e+00> : vector<3x4xf32>
    %11 = tpu.matmul %8, %10, %cst_11 {dimension_numbers = #tpu.dot_dimension_numbers<[1], [0], [0], [1], [0, 0, 1, 1], [], []>} : vector<3x16xbf16>, vector<16x4xbf16>, vector<3x4xf32> -> vector<3x4xf32>
    %12 = arith.addf %6, %11 : vector<3x4xf32>
    %c0_12 = arith.constant 0 : index
    %c2 = arith.constant 2 : index
    %c0_13 = arith.constant 0 : index
    %13 = vector.load %arg1[%c0_12, %c2, %c0_13] : memref<1x12x16xbf16, #tpu.memory_space<vmem>>, vector<1x3x16xbf16>
    %14 = vector.shape_cast %13 : vector<1x3x16xbf16> to vector<3x16xbf16>
    %c2_14 = arith.constant 2 : index
    %c0_15 = arith.constant 0 : index
    %c0_16 = arith.constant 0 : index
    %15 = vector.load %arg2[%c2_14, %c0_15, %c0_16] : memref<9x16x4xbf16, #tpu.memory_space<vmem>>, vector<1x16x4xbf16>
    %16 = vector.shape_cast %15 : vector<1x16x4xbf16> to vector<16x4xbf16>
    %cst_17 = arith.constant dense<0.000000e+00> : vector<3x4xf32>
    %17 = tpu.matmul %14, %16, %cst_17 {dimension_numbers = #tpu.dot_dimension_numbers<[1], [0], [0], [1], [0, 0, 1, 1], [], []>} : vector<3x16xbf16>, vector<16x4xbf16>, vector<3x4xf32> -> vector<3x4xf32>
    %18 = arith.addf %12, %17 : vector<3x4xf32>
    %c0_18 = arith.constant 0 : index
    %c3 = arith.constant 3 : index
    %c0_19 = arith.constant 0 : index
    %19 = vector.load %arg1[%c0_18, %c3, %c0_19] : memref<1x12x16xbf16, #tpu.memory_space<vmem>>, vector<1x3x16xbf16>
    %20 = vector.shape_cast %19 : vector<1x3x16xbf16> to vector<3x16xbf16>
    %c3_20 = arith.constant 3 : index
    %c0_21 = arith.constant 0 : index
    %c0_22 = arith.constant 0 : index
    %21 = vector.load %arg2[%c3_20, %c0_21, %c0_22] : memref<9x16x4xbf16, #tpu.memory_space<vmem>>, vector<1x16x4xbf16>
    %22 = vector.shape_cast %21 : vector<1x16x4xbf16> to vector<16x4xbf16>
    %cst_23 = arith.constant dense<0.000000e+00> : vector<3x4xf32>
    %23 = tpu.matmul %20, %22, %cst_23 {dimension_numbers = #tpu.dot_dimension_numbers<[1], [0], [0], [1], [0, 0, 1, 1], [], []>} : vector<3x16xbf16>, vector<16x4xbf16>, vector<3x4xf32> -> vector<3x4xf32>
    %24 = arith.addf %18, %23 : vector<3x4xf32>
    %c0_24 = arith.constant 0 : index
    %c4 = arith.constant 4 : index
    %c0_25 = arith.constant 0 : index
    %25 = vector.load %arg1[%c0_24, %c4, %c0_25] : memref<1x12x16xbf16, #tpu.memory_space<vmem>>, vector<1x3x16xbf16>
    %26 = vector.shape_cast %25 : vector<1x3x16xbf16> to vector<3x16xbf16>
    %c4_26 = arith.constant 4 : index
    %c0_27 = arith.constant 0 : index
    %c0_28 = arith.constant 0 : index
    %27 = vector.load %arg2[%c4_26, %c0_27, %c0_28] : memref<9x16x4xbf16, #tpu.memory_space<vmem>>, vector<1x16x4xbf16>
    %28 = vector.shape_cast %27 : vector<1x16x4xbf16> to vector<16x4xbf16>
    %cst_29 = arith.constant dense<0.000000e+00> : vector<3x4xf32>
    %29 = tpu.matmul %26, %28, %cst_29 {dimension_numbers = #tpu.dot_dimension_numbers<[1], [0], [0], [1], [0, 0, 1, 1], [], []>} : vector<3x16xbf16>, vector<16x4xbf16>, vector<3x4xf32> -> vector<3x4xf32>
    %30 = arith.addf %24, %29 : vector<3x4xf32>
    %c0_30 = arith.constant 0 : index
    %c5 = arith.constant 5 : index
    %c0_31 = arith.constant 0 : index
    %31 = vector.load %arg1[%c0_30, %c5, %c0_31] : memref<1x12x16xbf16, #tpu.memory_space<vmem>>, vector<1x3x16xbf16>
    %32 = vector.shape_cast %31 : vector<1x3x16xbf16> to vector<3x16xbf16>
    %c5_32 = arith.constant 5 : index
    %c0_33 = arith.constant 0 : index
    %c0_34 = arith.constant 0 : index
    %33 = vector.load %arg2[%c5_32, %c0_33, %c0_34] : memref<9x16x4xbf16, #tpu.memory_space<vmem>>, vector<1x16x4xbf16>
    %34 = vector.shape_cast %33 : vector<1x16x4xbf16> to vector<16x4xbf16>
    %cst_35 = arith.constant dense<0.000000e+00> : vector<3x4xf32>
    %35 = tpu.matmul %32, %34, %cst_35 {dimension_numbers = #tpu.dot_dimension_numbers<[1], [0], [0], [1], [0, 0, 1, 1], [], []>} : vector<3x16xbf16>, vector<16x4xbf16>, vector<3x4xf32> -> vector<3x4xf32>
    %36 = arith.addf %30, %35 : vector<3x4xf32>
    %c0_36 = arith.constant 0 : index
    %c6 = arith.constant 6 : index
    %c0_37 = arith.constant 0 : index
    %37 = vector.load %arg1[%c0_36, %c6, %c0_37] : memref<1x12x16xbf16, #tpu.memory_space<vmem>>, vector<1x3x16xbf16>
    %38 = vector.shape_cast %37 : vector<1x3x16xbf16> to vector<3x16xbf16>
    %c6_38 = arith.constant 6 : index
    %c0_39 = arith.constant 0 : index
    %c0_40 = arith.constant 0 : index
    %39 = vector.load %arg2[%c6_38, %c0_39, %c0_40] : memref<9x16x4xbf16, #tpu.memory_space<vmem>>, vector<1x16x4xbf16>
    %40 = vector.shape_cast %39 : vector<1x16x4xbf16> to vector<16x4xbf16>
    %cst_41 = arith.constant dense<0.000000e+00> : vector<3x4xf32>
    %41 = tpu.matmul %38, %40, %cst_41 {dimension_numbers = #tpu.dot_dimension_numbers<[1], [0], [0], [1], [0, 0, 1, 1], [], []>} : vector<3x16xbf16>, vector<16x4xbf16>, vector<3x4xf32> -> vector<3x4xf32>
    %42 = arith.addf %36, %41 : vector<3x4xf32>
    %c0_42 = arith.constant 0 : index
    %c7 = arith.constant 7 : index
    %c0_43 = arith.constant 0 : index
    %43 = vector.load %arg1[%c0_42, %c7, %c0_43] : memref<1x12x16xbf16, #tpu.memory_space<vmem>>, vector<1x3x16xbf16>
    %44 = vector.shape_cast %43 : vector<1x3x16xbf16> to vector<3x16xbf16>
    %c7_44 = arith.constant 7 : index
    %c0_45 = arith.constant 0 : index
    %c0_46 = arith.constant 0 : index
    %45 = vector.load %arg2[%c7_44, %c0_45, %c0_46] : memref<9x16x4xbf16, #tpu.memory_space<vmem>>, vector<1x16x4xbf16>
    %46 = vector.shape_cast %45 : vector<1x16x4xbf16> to vector<16x4xbf16>
    %cst_47 = arith.constant dense<0.000000e+00> : vector<3x4xf32>
    %47 = tpu.matmul %44, %46, %cst_47 {dimension_numbers = #tpu.dot_dimension_numbers<[1], [0], [0], [1], [0, 0, 1, 1], [], []>} : vector<3x16xbf16>, vector<16x4xbf16>, vector<3x4xf32> -> vector<3x4xf32>
    %48 = arith.addf %42, %47 : vector<3x4xf32>
    %c0_48 = arith.constant 0 : index
    %c8 = arith.constant 8 : index
    %c0_49 = arith.constant 0 : index
    %49 = vector.load %arg1[%c0_48, %c8, %c0_49] : memref<1x12x16xbf16, #tpu.memory_space<vmem>>, vector<1x3x16xbf16>
    %50 = vector.shape_cast %49 : vector<1x3x16xbf16> to vector<3x16xbf16>
    %c8_50 = arith.constant 8 : index
    %c0_51 = arith.constant 0 : index
    %c0_52 = arith.constant 0 : index
    %51 = vector.load %arg2[%c8_50, %c0_51, %c0_52] : memref<9x16x4xbf16, #tpu.memory_space<vmem>>, vector<1x16x4xbf16>
    %52 = vector.shape_cast %51 : vector<1x16x4xbf16> to vector<16x4xbf16>
    %cst_53 = arith.constant dense<0.000000e+00> : vector<3x4xf32>
    %53 = tpu.matmul %50, %52, %cst_53 {dimension_numbers = #tpu.dot_dimension_numbers<[1], [0], [0], [1], [0, 0, 1, 1], [], []>} : vector<3x16xbf16>, vector<16x4xbf16>, vector<3x4xf32> -> vector<3x4xf32>
    %54 = arith.addf %48, %53 : vector<3x4xf32>
    %55 = arith.truncf %54 : vector<3x4xf32> to vector<3x4xbf16>
    %c0_54 = arith.constant 0 : index
    %c0_55 = arith.constant 0 : index
    %c0_56 = arith.constant 0 : index
    %56 = vector.load %arg3[%c0_54, %c0_55, %c0_56] : memref<1x3x4xbf16, #tpu.memory_space<vmem>>, vector<1x3x4xbf16>
    %57 = vector.shape_cast %56 : vector<1x3x4xbf16> to vector<3x4xbf16>
    %58 = vector.shape_cast %55 : vector<3x4xbf16> to vector<1x3x4xbf16>
    tpu.vector_store %arg3[%c0_54, %c0_55, %c0_56], %58 {strides = array<i32>} : memref<1x3x4xbf16, #tpu.memory_space<vmem>>, vector<1x3x4xbf16>,
    return
  }
  func.func @transform_0(%arg0: i32) -> (i32, i32, i32) {
    %c0_i32 = arith.constant 0 : i32
    %c0_i32_0 = arith.constant 0 : i32
    %c0_i32_1 = arith.constant 0 : i32
    return %arg0, %c0_i32, %c0_i32_0 : i32, i32, i32
  }
  func.func @transform_1(%arg0: i32) -> (i32, i32, i32) {
    %c0_i32 = arith.constant 0 : i32
    %c0_i32_0 = arith.constant 0 : i32
    %c0_i32_1 = arith.constant 0 : i32
    %c0_i32_2 = arith.constant 0 : i32
    return %c0_i32, %c0_i32_0, %c0_i32_1 : i32, i32, i32
  }
  func.func @transform_2(%arg0: i32) -> (i32, i32, i32) {
    %c0_i32 = arith.constant 0 : i32
    %c0_i32_0 = arith.constant 0 : i32
    %c0_i32_1 = arith.constant 0 : i32
    return %arg0, %c0_i32, %c0_i32_0 : i32, i32, i32
  }
}

module attributes {stable_mosaic.version = 11 : i64} {
  func.func @_gemm_bn_kernel(%arg0: i32, %arg1: i32, %arg2: memref<4x8xbf16, #tpu.memory_space<vmem>>, %arg3: memref<8x16xbf16, #tpu.memory_space<vmem>>, %arg4: memref<1x8xf32, #tpu.memory_space<vmem>>, %arg5: memref<1x8xf32, #tpu.memory_space<vmem>>, %arg6: memref<1x16xf32, #tpu.memory_space<vmem>>, %arg7: memref<1x16xf32, #tpu.memory_space<vmem>>, %arg8: memref<4x16xbf16, #tpu.memory_space<vmem>>) attributes {dimension_semantics = [#tpu.dimension_semantics<parallel>, #tpu.dimension_semantics<parallel>], iteration_bounds = array<i64: 1, 1>, scalar_prefetch = 0 : i64, scratch_operands = 0 : i64, tpu.core_type = #tpu.core_type<tc>, window_params = [{transform_indices = @transform_0, window_bounds = array<i64: 4, 8>}, {transform_indices = @transform_1, window_bounds = array<i64: 8, 16>}, {pipeline_mode = #tpu.pipeline_mode<synchronous>, transform_indices = @transform_2, window_bounds = array<i64: 1, 8>}, {pipeline_mode = #tpu.pipeline_mode<synchronous>, transform_indices = @transform_3, window_bounds = array<i64: 1, 8>}, {transform_indices = @transform_4, window_bounds = array<i64: 1, 16>}, {transform_indices = @transform_5, window_bounds = array<i64: 1, 16>}, {transform_indices = @transform_6, window_bounds = array<i64: 4, 16>}]} {
    %c0 = arith.constant 0 : index
    %c0_0 = arith.constant 0 : index
    %0 = vector.load %arg2[%c0, %c0_0] : memref<4x8xbf16, #tpu.memory_space<vmem>>, vector<4x8xbf16>
    %1 = arith.extf %0 : vector<4x8xbf16> to vector<4x8xf32>
    %c0_1 = arith.constant 0 : index
    %c0_2 = arith.constant 0 : index
    %2 = vector.load %arg4[%c0_1, %c0_2] : memref<1x8xf32, #tpu.memory_space<vmem>>, vector<1x8xf32>
    %3 = vector.broadcast %2 : vector<1x8xf32> to vector<4x8xf32>
    %4 = arith.mulf %1, %3 : vector<4x8xf32>
    %c0_3 = arith.constant 0 : index
    %c0_4 = arith.constant 0 : index
    %5 = vector.load %arg5[%c0_3, %c0_4] : memref<1x8xf32, #tpu.memory_space<vmem>>, vector<1x8xf32>
    %6 = vector.broadcast %5 : vector<1x8xf32> to vector<4x8xf32>
    %7 = arith.addf %4, %6 : vector<4x8xf32>
    %cst = arith.constant 0.000000e+00 : f32
    %8 = vector.broadcast %cst : f32 to vector<4x8xf32>
    %9 = arith.maximumf %7, %8 : vector<4x8xf32>
    %10 = arith.truncf %9 : vector<4x8xf32> to vector<4x8xbf16>
    %c0_5 = arith.constant 0 : index
    %c0_6 = arith.constant 0 : index
    %11 = vector.load %arg3[%c0_5, %c0_6] : memref<8x16xbf16, #tpu.memory_space<vmem>>, vector<8x16xbf16>
    %cst_7 = arith.constant dense<0.000000e+00> : vector<4x16xf32>
    %12 = tpu.matmul %10, %11, %cst_7 {dimension_numbers = #tpu.dot_dimension_numbers<[1], [0], [0], [1], [0, 0, 1, 1], [], []>} : vector<4x8xbf16>, vector<8x16xbf16>, vector<4x16xf32> -> vector<4x16xf32>
    %c0_8 = arith.constant 0 : index
    %c0_9 = arith.constant 0 : index
    %13 = vector.load %arg6[%c0_8, %c0_9] : memref<1x16xf32, #tpu.memory_space<vmem>>, vector<1x16xf32>
    %14 = vector.broadcast %13 : vector<1x16xf32> to vector<4x16xf32>
    %15 = arith.mulf %12, %14 : vector<4x16xf32>
    %c0_10 = arith.constant 0 : index
    %c0_11 = arith.constant 0 : index
    %16 = vector.load %arg7[%c0_10, %c0_11] : memref<1x16xf32, #tpu.memory_space<vmem>>, vector<1x16xf32>
    %17 = vector.broadcast %16 : vector<1x16xf32> to vector<4x16xf32>
    %18 = arith.addf %15, %17 : vector<4x16xf32>
    %cst_12 = arith.constant 0.000000e+00 : f32
    %19 = vector.broadcast %cst_12 : f32 to vector<4x16xf32>
    %20 = arith.maximumf %18, %19 : vector<4x16xf32>
    %21 = arith.truncf %20 : vector<4x16xf32> to vector<4x16xbf16>
    %c0_13 = arith.constant 0 : index
    %c0_14 = arith.constant 0 : index
    %22 = vector.load %arg8[%c0_13, %c0_14] : memref<4x16xbf16, #tpu.memory_space<vmem>>, vector<4x16xbf16>
    tpu.vector_store %arg8[%c0_13, %c0_14], %21 {strides = array<i32>} : memref<4x16xbf16, #tpu.memory_space<vmem>>, vector<4x16xbf16>,
    return
  }
  func.func @transform_0(%arg0: i32, %arg1: i32) -> (i32, i32) {
    %c0_i32 = arith.constant 0 : i32
    %c0_i32_0 = arith.constant 0 : i32
    return %arg0, %c0_i32 : i32, i32
  }
  func.func @transform_1(%arg0: i32, %arg1: i32) -> (i32, i32) {
    %c0_i32 = arith.constant 0 : i32
    %c0_i32_0 = arith.constant 0 : i32
    return %c0_i32, %arg1 : i32, i32
  }
  func.func @transform_2(%arg0: i32, %arg1: i32) -> (i32, i32) {
    %c0_i32 = arith.constant 0 : i32
    %c0_i32_0 = arith.constant 0 : i32
    %c0_i32_1 = arith.constant 0 : i32
    return %c0_i32, %c0_i32_0 : i32, i32
  }
  func.func @transform_3(%arg0: i32, %arg1: i32) -> (i32, i32) {
    %c0_i32 = arith.constant 0 : i32
    %c0_i32_0 = arith.constant 0 : i32
    %c0_i32_1 = arith.constant 0 : i32
    return %c0_i32, %c0_i32_0 : i32, i32
  }
  func.func @transform_4(%arg0: i32, %arg1: i32) -> (i32, i32) {
    %c0_i32 = arith.constant 0 : i32
    %c0_i32_0 = arith.constant 0 : i32
    return %c0_i32, %arg1 : i32, i32
  }
  func.func @transform_5(%arg0: i32, %arg1: i32) -> (i32, i32) {
    %c0_i32 = arith.constant 0 : i32
    %c0_i32_0 = arith.constant 0 : i32
    return %c0_i32, %arg1 : i32, i32
  }
  func.func @transform_6(%arg0: i32, %arg1: i32) -> (i32, i32) {
    %c0_i32 = arith.constant 0 : i32
    return %arg0, %arg1 : i32, i32
  }
}

module attributes {stable_mosaic.version = 11 : i64} {
  func.func @_gemm_bn_kernel(%arg0: i32, %arg1: i32, %arg2: memref<4x12xbf16, #tpu.memory_space<vmem>>, %arg3: memref<12x16xbf16, #tpu.memory_space<vmem>>, %arg4: memref<1x12xf32, #tpu.memory_space<vmem>>, %arg5: memref<1x12xf32, #tpu.memory_space<vmem>>, %arg6: memref<1x16xf32, #tpu.memory_space<vmem>>, %arg7: memref<1x16xf32, #tpu.memory_space<vmem>>, %arg8: memref<4x16xbf16, #tpu.memory_space<vmem>>) attributes {dimension_semantics = [#tpu.dimension_semantics<parallel>, #tpu.dimension_semantics<parallel>], iteration_bounds = array<i64: 1, 1>, scalar_prefetch = 0 : i64, scratch_operands = 0 : i64, tpu.core_type = #tpu.core_type<tc>, window_params = [{transform_indices = @transform_0, window_bounds = array<i64: 4, 12>}, {transform_indices = @transform_1, window_bounds = array<i64: 12, 16>}, {pipeline_mode = #tpu.pipeline_mode<synchronous>, transform_indices = @transform_2, window_bounds = array<i64: 1, 12>}, {pipeline_mode = #tpu.pipeline_mode<synchronous>, transform_indices = @transform_3, window_bounds = array<i64: 1, 12>}, {transform_indices = @transform_4, window_bounds = array<i64: 1, 16>}, {transform_indices = @transform_5, window_bounds = array<i64: 1, 16>}, {transform_indices = @transform_6, window_bounds = array<i64: 4, 16>}]} {
    %c0 = arith.constant 0 : index
    %c0_0 = arith.constant 0 : index
    %0 = vector.load %arg2[%c0, %c0_0] : memref<4x12xbf16, #tpu.memory_space<vmem>>, vector<4x12xbf16>
    %1 = arith.extf %0 : vector<4x12xbf16> to vector<4x12xf32>
    %c0_1 = arith.constant 0 : index
    %c0_2 = arith.constant 0 : index
    %2 = vector.load %arg4[%c0_1, %c0_2] : memref<1x12xf32, #tpu.memory_space<vmem>>, vector<1x12xf32>
    %3 = vector.broadcast %2 : vector<1x12xf32> to vector<4x12xf32>
    %4 = arith.mulf %1, %3 : vector<4x12xf32>
    %c0_3 = arith.constant 0 : index
    %c0_4 = arith.constant 0 : index
    %5 = vector.load %arg5[%c0_3, %c0_4] : memref<1x12xf32, #tpu.memory_space<vmem>>, vector<1x12xf32>
    %6 = vector.broadcast %5 : vector<1x12xf32> to vector<4x12xf32>
    %7 = arith.addf %4, %6 : vector<4x12xf32>
    %cst = arith.constant 0.000000e+00 : f32
    %8 = vector.broadcast %cst : f32 to vector<4x12xf32>
    %9 = arith.maximumf %7, %8 : vector<4x12xf32>
    %10 = arith.truncf %9 : vector<4x12xf32> to vector<4x12xbf16>
    %c0_5 = arith.constant 0 : index
    %c0_6 = arith.constant 0 : index
    %11 = vector.load %arg3[%c0_5, %c0_6] : memref<12x16xbf16, #tpu.memory_space<vmem>>, vector<12x16xbf16>
    %cst_7 = arith.constant dense<0.000000e+00> : vector<4x16xf32>
    %12 = tpu.matmul %10, %11, %cst_7 {dimension_numbers = #tpu.dot_dimension_numbers<[1], [0], [0], [1], [0, 0, 1, 1], [], []>} : vector<4x12xbf16>, vector<12x16xbf16>, vector<4x16xf32> -> vector<4x16xf32>
    %c0_8 = arith.constant 0 : index
    %c0_9 = arith.constant 0 : index
    %13 = vector.load %arg6[%c0_8, %c0_9] : memref<1x16xf32, #tpu.memory_space<vmem>>, vector<1x16xf32>
    %14 = vector.broadcast %13 : vector<1x16xf32> to vector<4x16xf32>
    %15 = arith.mulf %12, %14 : vector<4x16xf32>
    %c0_10 = arith.constant 0 : index
    %c0_11 = arith.constant 0 : index
    %16 = vector.load %arg7[%c0_10, %c0_11] : memref<1x16xf32, #tpu.memory_space<vmem>>, vector<1x16xf32>
    %17 = vector.broadcast %16 : vector<1x16xf32> to vector<4x16xf32>
    %18 = arith.addf %15, %17 : vector<4x16xf32>
    %cst_12 = arith.constant 0.000000e+00 : f32
    %19 = vector.broadcast %cst_12 : f32 to vector<4x16xf32>
    %20 = arith.maximumf %18, %19 : vector<4x16xf32>
    %21 = arith.truncf %20 : vector<4x16xf32> to vector<4x16xbf16>
    %c0_13 = arith.constant 0 : index
    %c0_14 = arith.constant 0 : index
    %22 = vector.load %arg8[%c0_13, %c0_14] : memref<4x16xbf16, #tpu.memory_space<vmem>>, vector<4x16xbf16>
    tpu.vector_store %arg8[%c0_13, %c0_14], %21 {strides = array<i32>} : memref<4x16xbf16, #tpu.memory_space<vmem>>, vector<4x16xbf16>,
    return
  }
  func.func @transform_0(%arg0: i32, %arg1: i32) -> (i32, i32) {
    %c0_i32 = arith.constant 0 : i32
    %c0_i32_0 = arith.constant 0 : i32
    return %arg0, %c0_i32 : i32, i32
  }
  func.func @transform_1(%arg0: i32, %arg1: i32) -> (i32, i32) {
    %c0_i32 = arith.constant 0 : i32
    %c0_i32_0 = arith.constant 0 : i32
    return %c0_i32, %arg1 : i32, i32
  }
  func.func @transform_2(%arg0: i32, %arg1: i32) -> (i32, i32) {
    %c0_i32 = arith.constant 0 : i32
    %c0_i32_0 = arith.constant 0 : i32
    %c0_i32_1 = arith.constant 0 : i32
    return %c0_i32, %c0_i32_0 : i32, i32
  }
  func.func @transform_3(%arg0: i32, %arg1: i32) -> (i32, i32) {
    %c0_i32 = arith.constant 0 : i32
    %c0_i32_0 = arith.constant 0 : i32
    %c0_i32_1 = arith.constant 0 : i32
    return %c0_i32, %c0_i32_0 : i32, i32
  }
  func.func @transform_4(%arg0: i32, %arg1: i32) -> (i32, i32) {
    %c0_i32 = arith.constant 0 : i32
    %c0_i32_0 = arith.constant 0 : i32
    return %c0_i32, %arg1 : i32, i32
  }
  func.func @transform_5(%arg0: i32, %arg1: i32) -> (i32, i32) {
    %c0_i32 = arith.constant 0 : i32
    %c0_i32_0 = arith.constant 0 : i32
    return %c0_i32, %arg1 : i32, i32
  }
  func.func @transform_6(%arg0: i32, %arg1: i32) -> (i32, i32) {
    %c0_i32 = arith.constant 0 : i32
    return %arg0, %arg1 : i32, i32
  }
}

module attributes {stable_mosaic.version = 11 : i64} {
  func.func @_head_kernel(%arg0: i32, %arg1: memref<4x1x16xbf16, #tpu.memory_space<vmem>>, %arg2: memref<1x16xf32, #tpu.memory_space<vmem>>, %arg3: memref<1x16xf32, #tpu.memory_space<vmem>>, %arg4: memref<16x5xf32, #tpu.memory_space<vmem>>, %arg5: memref<1x5xf32, #tpu.memory_space<vmem>>, %arg6: memref<2x5xf32, #tpu.memory_space<vmem>>) attributes {dimension_semantics = [#tpu.dimension_semantics<arbitrary>], iteration_bounds = array<i64: 1>, scalar_prefetch = 0 : i64, scratch_operands = 0 : i64, tpu.core_type = #tpu.core_type<tc>, window_params = [{pipeline_mode = #tpu.pipeline_mode<synchronous>, transform_indices = @transform_0, window_bounds = array<i64: 4, 1, 16>}, {pipeline_mode = #tpu.pipeline_mode<synchronous>, transform_indices = @transform_1, window_bounds = array<i64: 1, 16>}, {pipeline_mode = #tpu.pipeline_mode<synchronous>, transform_indices = @transform_2, window_bounds = array<i64: 1, 16>}, {pipeline_mode = #tpu.pipeline_mode<synchronous>, transform_indices = @transform_3, window_bounds = array<i64: 16, 5>}, {pipeline_mode = #tpu.pipeline_mode<synchronous>, transform_indices = @transform_4, window_bounds = array<i64: 1, 5>}, {pipeline_mode = #tpu.pipeline_mode<synchronous>, transform_indices = @transform_5, window_bounds = array<i64: 2, 5>}]} {
    %c0 = arith.constant 0 : index
    %c0_0 = arith.constant 0 : index
    %c0_1 = arith.constant 0 : index
    %0 = vector.load %arg1[%c0, %c0_0, %c0_1] : memref<4x1x16xbf16, #tpu.memory_space<vmem>>, vector<4x1x16xbf16>
    %1 = arith.extf %0 : vector<4x1x16xbf16> to vector<4x1x16xf32>
    %c0_2 = arith.constant 0 : index
    %c0_3 = arith.constant 0 : index
    %2 = vector.load %arg2[%c0_2, %c0_3] : memref<1x16xf32, #tpu.memory_space<vmem>>, vector<1x16xf32>
    %3 = vector.shape_cast %2 : vector<1x16xf32> to vector<1x1x16xf32>
    %4 = vector.broadcast %3 : vector<1x1x16xf32> to vector<4x1x16xf32>
    %5 = arith.mulf %1, %4 : vector<4x1x16xf32>
    %c0_4 = arith.constant 0 : index
    %c0_5 = arith.constant 0 : index
    %6 = vector.load %arg3[%c0_4, %c0_5] : memref<1x16xf32, #tpu.memory_space<vmem>>, vector<1x16xf32>
    %7 = vector.shape_cast %6 : vector<1x16xf32> to vector<1x1x16xf32>
    %8 = vector.broadcast %7 : vector<1x1x16xf32> to vector<4x1x16xf32>
    %9 = arith.addf %5, %8 : vector<4x1x16xf32>
    %cst = arith.constant dense<0.000000e+00> : vector<4x16xf32>
    %10 = vector.multi_reduction <add>, %9, %cst [1] : vector<4x1x16xf32> to vector<4x16xf32>
    %cst_6 = arith.constant 1.000000e+00 : f32
    %11 = vector.broadcast %cst_6 : f32 to vector<4x16xf32>
    %12 = arith.divf %10, %11 : vector<4x16xf32>
    %13 = vector.extract_strided_slice %12 {offsets = [0, 0], sizes = [2, 16], strides = [1, 1]} : vector<4x16xf32> to vector<2x16xf32>
    %14 = vector.extract_strided_slice %12 {offsets = [2, 0], sizes = [2, 16], strides = [1, 1]} : vector<4x16xf32> to vector<2x16xf32>
    %15 = arith.maximumf %13, %14 : vector<2x16xf32>
    %c0_7 = arith.constant 0 : index
    %c0_8 = arith.constant 0 : index
    %16 = vector.load %arg4[%c0_7, %c0_8] : memref<16x5xf32, #tpu.memory_space<vmem>>, vector<16x5xf32>
    %cst_9 = arith.constant dense<0.000000e+00> : vector<2x5xf32>
    %17 = tpu.matmul %15, %16, %cst_9 {dimension_numbers = #tpu.dot_dimension_numbers<[1], [0], [0], [1], [0, 0, 1, 1], [], []>} : vector<2x16xf32>, vector<16x5xf32>, vector<2x5xf32> -> vector<2x5xf32>
    %c0_10 = arith.constant 0 : index
    %c0_11 = arith.constant 0 : index
    %18 = vector.load %arg5[%c0_10, %c0_11] : memref<1x5xf32, #tpu.memory_space<vmem>>, vector<1x5xf32>
    %19 = vector.broadcast %18 : vector<1x5xf32> to vector<2x5xf32>
    %20 = arith.addf %17, %19 : vector<2x5xf32>
    %cst_12 = arith.constant 0.000000e+00 : f32
    %21 = vector.broadcast %cst_12 : f32 to vector<2x5xf32>
    %22 = arith.subf %21, %20 : vector<2x5xf32>
    %23 = math.exp %22 : vector<2x5xf32>
    %cst_13 = arith.constant 1.000000e+00 : f32
    %24 = vector.broadcast %cst_13 : f32 to vector<2x5xf32>
    %25 = arith.addf %24, %23 : vector<2x5xf32>
    %cst_14 = arith.constant 1.000000e+00 : f32
    %26 = vector.broadcast %cst_14 : f32 to vector<2x5xf32>
    %27 = arith.divf %26, %25 : vector<2x5xf32>
    %c0_15 = arith.constant 0 : index
    %c0_16 = arith.constant 0 : index
    %28 = vector.load %arg6[%c0_15, %c0_16] : memref<2x5xf32, #tpu.memory_space<vmem>>, vector<2x5xf32>
    tpu.vector_store %arg6[%c0_15, %c0_16], %27 {strides = array<i32>} : memref<2x5xf32, #tpu.memory_space<vmem>>, vector<2x5xf32>,
    return
  }
  func.func @transform_0(%arg0: i32) -> (i32, i32, i32) {
    %c0_i32 = arith.constant 0 : i32
    %c0_i32_0 = arith.constant 0 : i32
    %c0_i32_1 = arith.constant 0 : i32
    %c0_i32_2 = arith.constant 0 : i32
    return %c0_i32, %c0_i32_0, %c0_i32_1 : i32, i32, i32
  }
  func.func @transform_1(%arg0: i32) -> (i32, i32) {
    %c0_i32 = arith.constant 0 : i32
    %c0_i32_0 = arith.constant 0 : i32
    %c0_i32_1 = arith.constant 0 : i32
    return %c0_i32, %c0_i32_0 : i32, i32
  }
  func.func @transform_2(%arg0: i32) -> (i32, i32) {
    %c0_i32 = arith.constant 0 : i32
    %c0_i32_0 = arith.constant 0 : i32
    %c0_i32_1 = arith.constant 0 : i32
    return %c0_i32, %c0_i32_0 : i32, i32
  }
  func.func @transform_3(%arg0: i32) -> (i32, i32) {
    %c0_i32 = arith.constant 0 : i32
    %c0_i32_0 = arith.constant 0 : i32
    %c0_i32_1 = arith.constant 0 : i32
    return %c0_i32, %c0_i32_0 : i32, i32
  }
  func.func @transform_4(%arg0: i32) -> (i32, i32) {
    %c0_i32 = arith.constant 0 : i32
    %c0_i32_0 = arith.constant 0 : i32
    %c0_i32_1 = arith.constant 0 : i32
    return %c0_i32, %c0_i32_0 : i32, i32
  }
  func.func @transform_5(%arg0: i32) -> (i32, i32) {
    %c0_i32 = arith.constant 0 : i32
    %c0_i32_0 = arith.constant 0 : i32
    %c0_i32_1 = arith.constant 0 : i32
    return %c0_i32, %c0_i32_0 : i32, i32
  }
}

</mosaic_0001>

<bundles_post_ra>
// kernel: densenet_trick_v3_forward.25
= control target key start
LH: loop header
LB: loop body
LE: loop exit
PB: predicated region body
PF: predicated region fallthrough
CT: control target
= control target key end

     0   :  { %s3143_s15 = smov 0   ;;  %s3145_s16 = smov 0   ;;  %s3769_s0 = inlined_call_operand.vmem [shape: bf16[1024,392], index: 0, kind: input, shape index: {}]   ;;  %s3770_s1 = inlined_call_operand.vmem [shape: bf16[392,8], index: 1, kind: input, shape index: {}]   ;;  %s3771_s2 = inlined_call_operand.vmem [shape: f32[1,8], index: 2, kind: input, shape index: {}]   ;;  %s3772_s3 = inlined_call_operand.vmem [shape: f32[1,8], index: 3, kind: input, shape index: {}]   ;;  %s3773_s4 = inlined_call_operand.vmem [shape: bf16[1024,8], index: 4, kind: output, shape index: {}]  }
   0x1   :  { %s3147_s17 = smov 0  }
   0x2 LB: > { %s26_s18 = sadd.s32 1, %s3111_s16  ;;  %p2529_p0 = scmp.ge.s32.totalorder %s3115_s17, 1  ;;  %s3115_s17 = sphi %s3147_s17, %s14_s17   ;;  %s3111_s16 = sphi %s3145_s16, %s3775_s16   ;;  %s3107_s15 = sphi %s3143_s15, %s3774_s15  }
   0x3   : > { %p28_p1 = scmp.ge.s32.totalorder %s26_s18, 2  ;;  %p203_p2 = scmp.lt.s32.totalorder %s3115_s17, 3 }
   0x5   : > { %s3777_s18 = smov (%p28_p1, %s26_s18), 0  ;;  %p204_p3 = pnand %p2529_p0, %p203_p2 }
   0x6   : > { %s2530_s27 = sshll.u32 (!%p204_p3), %s3107_s15, 6 }
   0x7   : > { %207 = sbr.rel (%p204_p3) target bundleno = 533 (0x215), region = 36  ;;  %p244_p4 = scmp.lt.s32.totalorder (!%p204_p3), %s2530_s27, 127 }
   0xc   : > { %v2878_v0 = vld [vmem:[%s3770_s1 + $0x38] sm:$0xff]   ;;  %v3117_v1 = vmov 0   ;;  %v2879_v2 = vld [vmem:[%s3770_s1 + $0x30] sm:$0xff]   ;;  %v2880_v3 = vld [vmem:[%s3770_s1 + $0x28] sm:$0xff]   ;;  %s3779_s27 = smov (!%p244_p4, %s2530_s27), 127  ;;  %vm1202_vm0 = vcmask 64512  }
   0xd   : > { %1303 = vmatprep.subr.bf16.mxu0 %v3117_v1  ;;  %1592 = vmatprep.subr.bf16.mxu1 %v3117_v1  ;;  %v2884_v4 = vld [vmem:[%s3770_s1 + $0xb8] sm:$0xff]   ;;  %v2886_v5 = vld [vmem:[%s3770_s1 + $0xb0] sm:$0xff]   ;;  %v2881_v6 = vld [vmem:[%s3770_s1 + $0x20] sm:$0xff]   ;;  %s2788_s14 = sshll.u32 %s3779_s27, 4  ;;  %vm1299_vm1 = vcmask 1043456   ;;  %s2534_s9 = sshll.u32 %s3779_s27, 2 }
   0xe   : > { %1304 = vmatpush1.bf16.msra.mxu0 %v2878_v0  ;;  %1593 = vmatpush1.bf16.msra.mxu1 %v2884_v4  ;;  %v2888_v7 = vld [vmem:[%s3770_s1 + $0xa8] sm:$0xff]   ;;  %v2882_v8 = vld [vmem:[%s3770_s1 + $0x18] sm:$0xff]   ;;  %v2890_v9 = vld [vmem:[%s3770_s1 + $0xa0] sm:$0xff]   ;;  %s3214_s22 = scalar_lea.vmem %s3769_s0, %s2788_s14  ;;  %s3442_s12 = scalar_lea.vmem %s3773_s4, %s2534_s9  ;;  %vm2343_vm2 = vcmask 60416  }
   0xf   : > { %1305 = vmatprep.subr.bf16.mxu0 %v3117_v1  ;;  %1594 = vmatprep.subr.bf16.mxu1 %v3117_v1  ;;  %v2883_v10 = vld [vmem:[%s3770_s1 + $0x10] sm:$0xff]   ;;  %v2892_v11 = vld [vmem:[%s3770_s1 + $0x98] sm:$0xff]   ;;  %v2885_v12 = vld [vmem:[%s3770_s1 + $0x8] sm:$0xff]  }
  0x10   : > { %v2894_v13 = vld [vmem:[%s3770_s1 + $0x90] sm:$0xff]   ;;  %v2904_v14 = vld [vmem:[%s3214_s22 + $0xc] ss:$16 sps:$4 sm:$0xff]   ;;  %v2887_v15 = vld [vmem:[%s3770_s1] sm:$0xff]  }
  0x11   : > { %2688 = vmatprep.mubr.msk.bf16.mxu1 %vm1202_vm0, %v2904_v14  ;;  %v2908_v16 = vld [vmem:[%s3214_s22 + $0x4] ss:$16 sps:$4 sm:$0xff]   ;;  %v2896_v17 = vld [vmem:[%s3770_s1 + $0x88] sm:$0xff]   ;;  %v2889_v18 = vld [vmem:[%s3770_s1 + $0x78] sm:$0xff]  }
  0x12   : > { %1306 = vmatpush1.bf16.msra.mxu0 %v2879_v2  ;;  %1595 = vmatpush1.bf16.msra.mxu1 %v2886_v5  ;;  %v2898_v19 = vld [vmem:[%s3770_s1 + $0x80] sm:$0xff]   ;;  %v2891_v21 = vld [vmem:[%s3770_s1 + $0x70] sm:$0xff]   ;;  %v2893_v23 = vld [vmem:[%s3770_s1 + $0x68] sm:$0xff]  }
  0x13   : > { %1307 = vmatprep.subr.bf16.mxu0 %v3117_v1  ;;  %1596 = vmatprep.subr.bf16.mxu1 %v3117_v1  ;;  %v2900_v20 = vld [vmem:[%s3770_s1 + $0xc0] ss:$0 sps:$4 sm:$0xff]   ;;  %v2902_v24 = vld [vmem:[%s3214_s22 + $0x8] ss:$16 sps:$4 sm:$0xff]   ;;  %v2909_v25 = vld [vmem:[%s3214_s22 + $0x2c] ss:$16 sps:$4 sm:$0xff]  }
  0x14   : > { %1335 = vmatprep.mubr.bf16.mxu0 %v2908_v16  ;;  %v1301_v22 = vsel %vm1299_vm1, %v2900_v20, 0  ;;  %v2895_v26 = vld [vmem:[%s3770_s1 + $0x60] sm:$0xff]   ;;  %v2897_v27 = vld [vmem:[%s3770_s1 + $0x58] sm:$0xff]   ;;  %v2899_v30 = vld [vmem:[%s3770_s1 + $0x50] sm:$0xff]  }
  0x15   : > { %v2911_v28 = vld [vmem:[%s3214_s22 + $0x28] ss:$16 sps:$4 sm:$0xff]   ;;  %v2915_v29 = vld [vmem:[%s3214_s22 + $0x4c] ss:$16 sps:$4 sm:$0xff]   ;;  %v2905_v34 = vld [vmem:[%s3770_s1 + $0x40] sm:$0xff]  }
  0x16   : > { %1308 = vmatpush1.bf16.msra.mxu0 %v2880_v3  ;;  %1597 = vmatpush1.bf16.msra.mxu1 %v2888_v7  ;;  %v2901_v31 = vld [vmem:[%s3770_s1 + $0x48] sm:$0xff]   ;;  %v2906_v35 = vld [vmem:[%s3214_s22] ss:$16 sps:$4 sm:$0xff]   ;;  %v2912_v36 = vld [vmem:[%s3214_s22 + $0x24] ss:$16 sps:$4 sm:$0xff]  }
  0x17   : > { %1309 = vmatprep.subr.bf16.mxu0 %v3117_v1  ;;  %1598 = vmatprep.subr.bf16.mxu1 %v3117_v1  ;;  %v2917_v32 = vld [vmem:[%s3214_s22 + $0x48] ss:$16 sps:$4 sm:$0xff]   ;;  %v2921_v33 = vld [vmem:[%s3214_s22 + $0x6c] ss:$16 sps:$4 sm:$0xff]   ;;  %v2914_v39 = vld [vmem:[%s3214_s22 + $0x20] ss:$16 sps:$4 sm:$0xff]  }
  0x18   : > { %v2923_v37 = vld [vmem:[%s3214_s22 + $0x68] ss:$16 sps:$4 sm:$0xff]   ;;  %v2927_v38 = vld [vmem:[%s3214_s22 + $0x8c] ss:$16 sps:$4 sm:$0xff]   ;;  %v2918_v40 = vld [vmem:[%s3214_s22 + $0x44] ss:$16 sps:$4 sm:$0xff]  }
  0x19   : > { %v2929_v41 = vld [vmem:[%s3214_s22 + $0x88] ss:$16 sps:$4 sm:$0xff]   ;;  %v2933_v42 = vld [vmem:[%s3214_s22 + $0xac] ss:$16 sps:$4 sm:$0xff]   ;;  %v2920_v43 = vld [vmem:[%s3214_s22 + $0x40] ss:$16 sps:$4 sm:$0xff]  }
  0x1a   : > { %1310 = vmatpush1.bf16.msra.mxu0 %v2881_v6  ;;  %1599 = vmatpush1.bf16.msra.mxu1 %v2890_v9  ;;  %v2924_v44 = vld [vmem:[%s3214_s22 + $0x64] ss:$16 sps:$4 sm:$0xff]   ;;  %v2935_v45 = vld [vmem:[%s3214_s22 + $0xa8] ss:$16 sps:$4 sm:$0xff]   ;;  %v2939_v46 = vld [vmem:[%s3214_s22 + $0xcc] ss:$16 sps:$4 sm:$0xff]  }
  0x1b   : > { %1311 = vmatprep.subr.bf16.mxu0 %v3117_v1  ;;  %1600 = vmatprep.subr.bf16.mxu1 %v3117_v1  ;;  %v2926_v47 = vld [vmem:[%s3214_s22 + $0x60] ss:$16 sps:$4 sm:$0xff]   ;;  %v2930_v48 = vld [vmem:[%s3214_s22 + $0x84] ss:$16 sps:$4 sm:$0xff]   ;;  %v2941_v49 = vld [vmem:[%s3214_s22 + $0xc8] ss:$16 sps:$4 sm:$0xff]  }
  0x1c   : > { %v2945_v50 = vld [vmem:[%s3214_s22 + $0xec] ss:$16 sps:$4 sm:$0xff]   ;;  %v2932_v51 = vld [vmem:[%s3214_s22 + $0x80] ss:$16 sps:$4 sm:$0xff]   ;;  %v2936_v52 = vld [vmem:[%s3214_s22 + $0xa4] ss:$16 sps:$4 sm:$0xff]  }
  0x1d   : > { %v2947_v53 = vld [vmem:[%s3214_s22 + $0xe8] ss:$16 sps:$4 sm:$0xff]   ;;  %v2951_v54 = vld [vmem:[%s3214_s22 + $0x10c] ss:$16 sps:$4 sm:$0xff]   ;;  %v2938_v55 = vld [vmem:[%s3214_s22 + $0xa0] ss:$16 sps:$4 sm:$0xff]  }
  0x1e   : > { %1312 = vmatpush1.bf16.msra.mxu0 %v2882_v8  ;;  %1601 = vmatpush1.bf16.msra.mxu1 %v2892_v11  ;;  %v2942_v56 = vld [vmem:[%s3214_s22 + $0xc4] ss:$16 sps:$4 sm:$0xff]   ;;  %v2953_v57 = vld [vmem:[%s3214_s22 + $0x108] ss:$16 sps:$4 sm:$0xff]   ;;  %v2957_v58 = vld [vmem:[%s3214_s22 + $0x12c] ss:$16 sps:$4 sm:$0xff]  }
  0x1f   : > { %1313 = vmatprep.subr.bf16.mxu0 %v3117_v1  ;;  %1602 = vmatprep.subr.bf16.mxu1 %v3117_v1  ;;  %v2944_v59 = vld [vmem:[%s3214_s22 + $0xc0] ss:$16 sps:$4 sm:$0xff]   ;;  %v2948_v60 = vld [vmem:[%s3214_s22 + $0xe4] ss:$16 sps:$4 sm:$0xff]   ;;  %v2959_v61 = vld [vmem:[%s3214_s22 + $0x128] ss:$16 sps:$4 sm:$0xff]  }
  0x20   : > { %v2963_v62 = vld [vmem:[%s3214_s22 + $0x14c] ss:$16 sps:$4 sm:$0xff]   ;;  %v2950_v63 = vld [vmem:[%s3214_s22 + $0xe0] ss:$16 sps:$4 sm:$0xff]   ;;  %v2954_v0 = vld [vmem:[%s3214_s22 + $0x104] ss:$16 sps:$4 sm:$0xff]  }
  0x21   : > { %v2969_v2 = vld [vmem:[%s3214_s22 + $0x16c] ss:$16 sps:$4 sm:$0xff]   ;;  %v2956_v3 = vld [vmem:[%s3214_s22 + $0x100] ss:$16 sps:$4 sm:$0xff]   ;;  %v2960_v4 = vld [vmem:[%s3214_s22 + $0x124] ss:$16 sps:$4 sm:$0xff]  }
  0x22   : > { %1314 = vmatpush1.bf16.msra.mxu0 %v2883_v10  ;;  %1603 = vmatpush1.bf16.msra.mxu1 %v2894_v13  ;;  %v2971_v5 = vld [vmem:[%s3214_s22 + $0x168] ss:$16 sps:$4 sm:$0xff]   ;;  %v2975_v6 = vld [vmem:[%s3214_s22 + $0x18c] ss:$16 sps:$4 sm:$0xff]   ;;  %v2962_v7 = vld [vmem:[%s3214_s22 + $0x120] ss:$16 sps:$4 sm:$0xff]  }
  0x23   : > { %1315 = vmatprep.subr.bf16.mxu0 %v3117_v1  ;;  %1604 = vmatprep.subr.bf16.mxu1 %v3117_v1  ;;  %v2966_v8 = vld [vmem:[%s3214_s22 + $0x144] ss:$16 sps:$4 sm:$0xff]   ;;  %v2977_v9 = vld [vmem:[%s3214_s22 + $0x188] ss:$16 sps:$4 sm:$0xff]   ;;  %v2981_v10 = vld [vmem:[%s3214_s22 + $0x1ac] ss:$16 sps:$4 sm:$0xff]  }
  0x24   : > { %v2968_v11 = vld [vmem:[%s3214_s22 + $0x140] ss:$16 sps:$4 sm:$0xff]   ;;  %v2983_v13 = vld [vmem:[%s3214_s22 + $0x1a8] ss:$16 sps:$4 sm:$0xff]   ;;  %v2987_v14 = vld [vmem:[%s3214_s22 + $0x1cc] ss:$16 sps:$4 sm:$0xff]  }
  0x25   : > { %v2978_v16 = vld [vmem:[%s3214_s22 + $0x184] ss:$16 sps:$4 sm:$0xff]  }
  0x26   : > { %1316 = vmatpush1.bf16.msra.mxu0 %v2885_v12  ;;  %1605 = vmatpush1.bf16.msra.mxu1 %v2896_v17  ;;  %v2972_v12 = vld [vmem:[%s3214_s22 + $0x164] ss:$16 sps:$4 sm:$0xff]   ;;  %v2989_v17 = vld [vmem:[%s3214_s22 + $0x1c8] ss:$16 sps:$4 sm:$0xff]  }
  0x27   : > { %1317 = vmatprep.subr.bf16.mxu0 %v3117_v1  ;;  %1606 = vmatprep.subr.bf16.mxu1 %v3117_v1  ;;  %v2984_v20 = vld [vmem:[%s3214_s22 + $0x1a4] ss:$16 sps:$4 sm:$0xff]  }
  0x2a   : > { %1318 = vmatpush1.bf16.msra.mxu0 %v2887_v15  ;;  %1607 = vmatpush1.bf16.msra.mxu1 %v2898_v19  ;;  %v2974_v15 = vld [vmem:[%s3214_s22 + $0x160] ss:$16 sps:$4 sm:$0xff]  }
  0x2b   : > { %1319 = vmatprep.subr.bf16.mxu0 %v3117_v1  ;;  %1622 = vmatprep.subr.bf16.mxu1 %v3117_v1  ;;  %v2980_v19 = vld [vmem:[%s3214_s22 + $0x180] ss:$16 sps:$4 sm:$0xff]  }
  0x2e   : > { %1320 = vmatpush2.bf16.msra.mxu0 %v2889_v18  ;;  %1623 = vmatpush2.bf16.msra.mxu1 %v1301_v22  ;;  %v2993_v18 = vld [vmem:[%s3214_s22 + $0x1ec] ss:$16 sps:$4 sm:$0xff]  }
  0x2f   : > { %1321 = vmatprep.subr.bf16.mxu0 %v3117_v1  ;;  %v2999_v22 = vld [vmem:[%s3214_s22 + $0x20c] ss:$16 sps:$4 sm:$0xff]  }
  0x31   : > { %1625 = vmatmul.mubr.bf16.vlgmr.msra.gmra.mxu1 %v2902_v24  ;;  %v2990_v24 = vld [vmem:[%s3214_s22 + $0x1c4] ss:$16 sps:$4 sm:$0xff]  }
  0x32   : > { %1322 = vmatpush2.bf16.msra.mxu0 %v2891_v21  ;;  %2689 = vmatprep.mubr.msk.bf16.mxu1 %vm1202_vm0, %v2909_v25  ;;  %v2995_v21 = vld [vmem:[%s3214_s22 + $0x1e8] ss:$16 sps:$4 sm:$0xff]  }
  0x33   : > { %1323 = vmatprep.subr.bf16.mxu0 %v3117_v1  ;;  %v3001_v25 = vld [vmem:[%s3214_s22 + $0x208] ss:$16 sps:$4 sm:$0xff]  }
  0x36   : > { %1324 = vmatpush2.bf16.msra.mxu0 %v2893_v23  ;;  %v2986_v23 = vld [vmem:[%s3214_s22 + $0x1a0] ss:$16 sps:$4 sm:$0xff]  }
  0x37   : > { %1325 = vmatprep.subr.bf16.mxu0 %v3117_v1 }
  0x39   : > { %1633 = vmatmul.mubr.bf16.gmra.mxu1 %v2911_v28  ;;  %v2996_v28 = vld [vmem:[%s3214_s22 + $0x1e4] ss:$16 sps:$4 sm:$0xff]  }
  0x3a   : > { %1326 = vmatpush2.bf16.msra.mxu0 %v2895_v26  ;;  %2690 = vmatprep.mubr.msk.bf16.mxu1 %vm1202_vm0, %v2915_v29  ;;  %v3005_v26 = vld [vmem:[%s3214_s22 + $0x22c] ss:$16 sps:$4 sm:$0xff]   ;;  %v3007_v29 = vld [vmem:[%s3214_s22 + $0x228] ss:$16 sps:$4 sm:$0xff]  }
  0x3b   : > { %1327 = vmatprep.subr.bf16.mxu0 %v3117_v1 }
  0x3e   : > { %1328 = vmatpush2.bf16.msra.mxu0 %v2897_v27  ;;  %v2992_v27 = vld [vmem:[%s3214_s22 + $0x1c0] ss:$16 sps:$4 sm:$0xff]  }
  0x3f   : > { %1329 = vmatprep.subr.bf16.mxu0 %v3117_v1 }
  0x41   : > { %1641 = vmatmul.mubr.bf16.gmra.mxu1 %v2917_v32  ;;  %v3002_v32 = vld [vmem:[%s3214_s22 + $0x204] ss:$16 sps:$4 sm:$0xff]  }
  0x42   : > { %1330 = vmatpush2.bf16.msra.mxu0 %v2899_v30  ;;  %2691 = vmatprep.mubr.msk.bf16.mxu1 %vm1202_vm0, %v2921_v33  ;;  %v3011_v30 = vld [vmem:[%s3214_s22 + $0x24c] ss:$16 sps:$4 sm:$0xff]   ;;  %v3013_v33 = vld [vmem:[%s3214_s22 + $0x248] ss:$16 sps:$4 sm:$0xff]  }
  0x43   : > { %1331 = vmatprep.subr.bf16.mxu0 %v3117_v1 }
  0x46   : > { %1332 = vmatpush2.bf16.msra.mxu0 %v2901_v31  ;;  %v2998_v31 = vld [vmem:[%s3214_s22 + $0x1e0] ss:$16 sps:$4 sm:$0xff]  }
  0x47   : > { %1333 = vmatprep.subr.bf16.mxu0 %v3117_v1  ;;  %v2965_v1 = vld [vmem:[%s3214_s22 + $0x148] ss:$16 sps:$4 sm:$0xff]  }
  0x49   : > { %1649 = vmatmul.mubr.bf16.gmra.mxu1 %v2923_v37  ;;  %v3019_v37 = vld [vmem:[%s3214_s22 + $0x268] ss:$16 sps:$4 sm:$0xff]  }
  0x4a   : > { %1334 = vmatpush2.bf16.msra.mxu0 %v2905_v34  ;;  %2692 = vmatprep.mubr.msk.bf16.mxu1 %vm1202_vm0, %v2927_v38  ;;  %v3017_v34 = vld [vmem:[%s3214_s22 + $0x26c] ss:$16 sps:$4 sm:$0xff]  }
  0x4b   : > { %v3023_v38 = vld [vmem:[%s3214_s22 + $0x28c] ss:$16 sps:$4 sm:$0xff]  }
  0x4d   : > { %1336 = vmatmul.mubr.bf16.vlgmr.msra.gmra.mxu0 %v2906_v35  ;;  %v3004_v35 = vld [vmem:[%s3214_s22 + $0x200] ss:$16 sps:$4 sm:$0xff]  }
  0x4e   : > { %1343 = vmatprep.mubr.bf16.mxu0 %v2912_v36  ;;  %v3008_v36 = vld [vmem:[%s3214_s22 + $0x224] ss:$16 sps:$4 sm:$0xff]  }
  0x51   : > { %1657 = vmatmul.mubr.bf16.gmra.mxu1 %v2929_v41  ;;  %v3025_v41 = vld [vmem:[%s3214_s22 + $0x288] ss:$16 sps:$4 sm:$0xff]  }
  0x52   : > { %2693 = vmatprep.mubr.msk.bf16.mxu1 %vm1202_vm0, %v2933_v42  ;;  %v3029_v42 = vld [vmem:[%s3214_s22 + $0x2ac] ss:$16 sps:$4 sm:$0xff]  }
  0x55   : > { %1344 = vmatmul.mubr.bf16.gmra.mxu0 %v2914_v39  ;;  %v3010_v39 = vld [vmem:[%s3214_s22 + $0x220] ss:$16 sps:$4 sm:$0xff]  }
  0x56   : > { %1351 = vmatprep.mubr.bf16.mxu0 %v2918_v40  ;;  %v3014_v40 = vld [vmem:[%s3214_s22 + $0x244] ss:$16 sps:$4 sm:$0xff]  }
  0x59   : > { %1665 = vmatmul.mubr.bf16.gmra.mxu1 %v2935_v45  ;;  %v3031_v45 = vld [vmem:[%s3214_s22 + $0x2a8] ss:$16 sps:$4 sm:$0xff]  }
  0x5a   : > { %2694 = vmatprep.mubr.msk.bf16.mxu1 %vm1202_vm0, %v2939_v46  ;;  %v3035_v46 = vld [vmem:[%s3214_s22 + $0x2cc] ss:$16 sps:$4 sm:$0xff]  }
  0x5d   : > { %1352 = vmatmul.mubr.bf16.gmra.mxu0 %v2920_v43  ;;  %v3016_v43 = vld [vmem:[%s3214_s22 + $0x240] ss:$16 sps:$4 sm:$0xff]  }
  0x5e   : > { %1359 = vmatprep.mubr.bf16.mxu0 %v2924_v44  ;;  %v3020_v44 = vld [vmem:[%s3214_s22 + $0x264] ss:$16 sps:$4 sm:$0xff]  }
  0x61   : > { %1673 = vmatmul.mubr.bf16.gmra.mxu1 %v2941_v49  ;;  %v3037_v49 = vld [vmem:[%s3214_s22 + $0x2c8] ss:$16 sps:$4 sm:$0xff]  }
  0x62   : > { %2695 = vmatprep.mubr.msk.bf16.mxu1 %vm1202_vm0, %v2945_v50  ;;  %v3041_v50 = vld [vmem:[%s3214_s22 + $0x2ec] ss:$16 sps:$4 sm:$0xff]  }
  0x65   : > { %1360 = vmatmul.mubr.bf16.gmra.mxu0 %v2926_v47  ;;  %v3022_v47 = vld [vmem:[%s3214_s22 + $0x260] ss:$16 sps:$4 sm:$0xff]  }
  0x66   : > { %1367 = vmatprep.mubr.bf16.mxu0 %v2930_v48  ;;  %v3026_v48 = vld [vmem:[%s3214_s22 + $0x284] ss:$16 sps:$4 sm:$0xff]  }
  0x69   : > { %1681 = vmatmul.mubr.bf16.gmra.mxu1 %v2947_v53  ;;  %v3043_v53 = vld [vmem:[%s3214_s22 + $0x2e8] ss:$16 sps:$4 sm:$0xff]  }
  0x6a   : > { %2696 = vmatprep.mubr.msk.bf16.mxu1 %vm1202_vm0, %v2951_v54  ;;  %v3047_v54 = vld [vmem:[%s3214_s22 + $0x30c] ss:$16 sps:$4 sm:$0xff]  }
  0x6d   : > { %1368 = vmatmul.mubr.bf16.gmra.mxu0 %v2932_v51  ;;  %v3028_v51 = vld [vmem:[%s3214_s22 + $0x280] ss:$16 sps:$4 sm:$0xff]  }
  0x6e   : > { %1375 = vmatprep.mubr.bf16.mxu0 %v2936_v52  ;;  %v3032_v52 = vld [vmem:[%s3214_s22 + $0x2a4] ss:$16 sps:$4 sm:$0xff]  }
  0x71   : > { %1689 = vmatmul.mubr.bf16.gmra.mxu1 %v2953_v57  ;;  %v3049_v57 = vld [vmem:[%s3214_s22 + $0x308] ss:$16 sps:$4 sm:$0xff]  }
  0x72   : > { %2697 = vmatprep.mubr.msk.bf16.mxu1 %vm1202_vm0, %v2957_v58  ;;  %v3052_v58 = vld [vmem:[%s3214_s22 + $0x32c] ss:$16 sps:$4 sm:$0xff]  }
  0x75   : > { %1376 = vmatmul.mubr.bf16.gmra.mxu0 %v2938_v55  ;;  %v3034_v55 = vld [vmem:[%s3214_s22 + $0x2a0] ss:$16 sps:$4 sm:$0xff]  }
  0x76   : > { %1383 = vmatprep.mubr.bf16.mxu0 %v2942_v56  ;;  %v3038_v56 = vld [vmem:[%s3214_s22 + $0x2c4] ss:$16 sps:$4 sm:$0xff]  }
  0x79   : > { %1697 = vmatmul.mubr.bf16.gmra.mxu1 %v2959_v61 }
  0x7a   : > { %2698 = vmatprep.mubr.msk.bf16.mxu1 %vm1202_vm0, %v2963_v62  ;;  %v3044_v62 = vld [vmem:[%s3214_s22 + $0x2e4] ss:$16 sps:$4 sm:$0xff]  }
  0x7d   : > { %1384 = vmatmul.mubr.bf16.gmra.mxu0 %v2944_v59 }
  0x7e   : > { %1391 = vmatprep.mubr.bf16.mxu0 %v2948_v60  ;;  %v3040_v60 = vld [vmem:[%s3214_s22 + $0x2c0] ss:$16 sps:$4 sm:$0xff]  }
  0x81   : > { %1705 = vmatmul.mubr.bf16.gmra.mxu1 %v2965_v1  ;;  %v3057_v1 = vld [vmem:[%s3214_s22 + $0x34c] ss:$16 sps:$4 sm:$0xff]  }
  0x82   : > { %2699 = vmatprep.mubr.msk.bf16.mxu1 %vm1202_vm0, %v2969_v2 }
  0x85   : > { %1392 = vmatmul.mubr.bf16.gmra.mxu0 %v2950_v63 }
  0x86   : > { %1399 = vmatprep.mubr.bf16.mxu0 %v2954_v0  ;;  %v3054_v0 = vld [vmem:[%s3214_s22 + $0x328] ss:$16 sps:$4 sm:$0xff]  }
  0x89   : > { %1713 = vmatmul.mubr.bf16.gmra.mxu1 %v2971_v5 }
  0x8a   : > { %2700 = vmatprep.mubr.msk.bf16.mxu1 %vm1202_vm0, %v2975_v6  ;;  %v3050_v6 = vld [vmem:[%s3214_s22 + $0x304] ss:$16 sps:$4 sm:$0xff]  }
  0x8d   : > { %1400 = vmatmul.mubr.bf16.gmra.mxu0 %v2956_v3 }
  0x8e   : > { %1407 = vmatprep.mubr.bf16.mxu0 %v2960_v4  ;;  %v3046_v4 = vld [vmem:[%s3214_s22 + $0x2e0] ss:$16 sps:$4 sm:$0xff]  }
  0x91   : > { %1721 = vmatmul.mubr.bf16.gmra.mxu1 %v2977_v9  ;;  %v3062_v9 = vld [vmem:[%s3214_s22 + $0x36c] ss:$16 sps:$4 sm:$0xff]  }
  0x92   : > { %2701 = vmatprep.mubr.msk.bf16.mxu1 %vm1202_vm0, %v2981_v10 }
  0x95   : > { %1408 = vmatmul.mubr.bf16.gmra.mxu0 %v2962_v7 }
  0x96   : > { %1415 = vmatprep.mubr.bf16.mxu0 %v2966_v8  ;;  %v3059_v8 = vld [vmem:[%s3214_s22 + $0x348] ss:$16 sps:$4 sm:$0xff]  }
  0x99   : > { %1729 = vmatmul.mubr.bf16.gmra.mxu1 %v2983_v13 }
  0x9a   : > { %2702 = vmatprep.mubr.msk.bf16.mxu1 %vm1202_vm0, %v2987_v14 }
  0x9d   : > { %1416 = vmatmul.mubr.bf16.gmra.mxu0 %v2968_v11  ;;  %v366_v11 = vld [vmem:[%s3214_s22 + $0x300] sm:$0xff] }
  0x9e   : > { %1423 = vmatprep.mubr.bf16.mxu0 %v2972_v12  ;;  %v368_v12 = vld [vmem:[%s3214_s22 + $0x310] sm:$0xff] }
  0x9f   : > { %v2631_v14 = vcombine.low %v366_v11, %v368_v12 }
  0xa1   : > { %1737 = vmatmul.mubr.bf16.gmra.mxu1 %v2989_v17 }
  0xa2   : > { %2703 = vmatprep.mubr.msk.bf16.mxu1 %vm1202_vm0, %v2993_v18  ;;  %v3064_v18 = vld [vmem:[%s3214_s22 + $0x368] ss:$16 sps:$4 sm:$0xff]  }
  0xa5   : > { %1424 = vmatmul.mubr.bf16.gmra.mxu0 %v2974_v15 }
  0xa6   : > { %1431 = vmatprep.mubr.bf16.mxu0 %v2978_v16  ;;  %v3055_v16 = vld [vmem:[%s3214_s22 + $0x324] ss:$16 sps:$4 sm:$0xff]  }
  0xa9   : > { %1745 = vmatmul.mubr.bf16.gmra.mxu1 %v2995_v21  ;;  %v3418_v21 = vld [vmem:[%s3771_s2] ss:$0 sm:$0xff] }
  0xaa   : > { %2704 = vmatprep.mubr.msk.bf16.mxu1 %vm1202_vm0, %v2999_v22 }
  0xad   : > { %1432 = vmatmul.mubr.bf16.gmra.mxu0 %v2980_v19  ;;  %v3067_v19 = vld [vmem:[%s3214_s22 + $0x38c] ss:$16 sps:$4 sm:$0xff]  }
  0xae   : > { %1439 = vmatprep.mubr.bf16.mxu0 %v2984_v20 }
  0xb1   : > { %1753 = vmatmul.mubr.bf16.gmra.mxu1 %v3001_v25  ;;  %v372_v25 = vld [vmem:[%s3214_s22 + $0x330] sm:$0xff] }
  0xb2   : > { %2705 = vmatprep.mubr.msk.bf16.mxu1 %vm1202_vm0, %v3005_v26  ;;  %v3425_v26 = vld [vmem:[%s3772_s3] ss:$0 sm:$0xff] }
  0xb5   : > { %1440 = vmatmul.mubr.bf16.gmra.mxu0 %v2986_v23 }
  0xb6   : > { %1447 = vmatprep.mubr.bf16.mxu0 %v2990_v24  ;;  %v370_v24 = vld [vmem:[%s3214_s22 + $0x320] sm:$0xff] }
  0xb9   : > { %1761 = vmatmul.mubr.bf16.gmra.mxu1 %v3007_v29 }
  0xba   : > { %2706 = vmatprep.mubr.msk.bf16.mxu1 %vm1202_vm0, %v3011_v30 }
  0xbd   : > { %1448 = vmatmul.mubr.bf16.gmra.mxu0 %v2992_v27 }
  0xbe   : > { %1455 = vmatprep.mubr.bf16.mxu0 %v2996_v28 }
  0xc1   : > { %1769 = vmatmul.mubr.bf16.gmra.mxu1 %v3013_v33 }
  0xc2   : > { %2707 = vmatprep.mubr.msk.bf16.mxu1 %vm1202_vm0, %v3017_v34 }
  0xc5   : > { %1456 = vmatmul.mubr.bf16.gmra.mxu0 %v2998_v31  ;;  %v2635_v31 = vcombine.low %v370_v24, %v372_v25  ;;  %v3081_v24 = vld [vmem:[%s3214_s22 + $0x3c8] ss:$16 sps:$4 sm:$0xff]  }
  0xc6   : > { %1463 = vmatprep.mubr.bf16.mxu0 %v3002_v32 }
  0xc9   : > { %1777 = vmatmul.mubr.bf16.gmra.mxu1 %v3019_v37 }
  0xca   : > { %2708 = vmatprep.mubr.msk.bf16.mxu1 %vm1202_vm0, %v3023_v38  ;;  %v3069_v38 = vld [vmem:[%s3214_s22 + $0x388] ss:$16 sps:$4 sm:$0xff]  }
  0xcd   : > { %1464 = vmatmul.mubr.bf16.gmra.mxu0 %v3004_v35  ;;  %v3060_v35 = vld [vmem:[%s3214_s22 + $0x344] ss:$16 sps:$4 sm:$0xff]  }
  0xce   : > { %1471 = vmatprep.mubr.bf16.mxu0 %v3008_v36 }
  0xd1   : > { %1785 = vmatmul.mubr.bf16.gmra.mxu1 %v3025_v41  ;;  %v3073_v41 = vld [vmem:[%s3214_s22 + $0x3ac] ss:$16 sps:$4 sm:$0xff]  }
  0xd2   : > { %2709 = vmatprep.mubr.msk.bf16.mxu1 %vm1202_vm0, %v3029_v42 }
  0xd5   : > { %1472 = vmatmul.mubr.bf16.gmra.mxu0 %v3010_v39 }
  0xd6   : > { %1479 = vmatprep.mubr.bf16.mxu0 %v3014_v40 }
  0xd9   : > { %1793 = vmatmul.mubr.bf16.gmra.mxu1 %v3031_v45 }
  0xda   : > { %2710 = vmatprep.mubr.msk.bf16.mxu1 %vm1202_vm0, %v3035_v46 }
  0xdd   : > { %1480 = vmatmul.mubr.bf16.gmra.mxu0 %v3016_v43 }
  0xde   : > { %1487 = vmatprep.mubr.bf16.mxu0 %v3020_v44 }
  0xe1   : > { %1801 = vmatmul.mubr.bf16.gmra.mxu1 %v3037_v49 }
  0xe2   : > { %2711 = vmatprep.mubr.msk.bf16.mxu1 %vm1202_vm0, %v3041_v50 }
  0xe5   : > { %1488 = vmatmul.mubr.bf16.gmra.mxu0 %v3022_v47  ;;  %v374_v47 = vld [vmem:[%s3214_s22 + $0x340] sm:$0xff] }
  0xe6   : > { %1495 = vmatprep.mubr.bf16.mxu0 %v3026_v48  ;;  %v376_v48 = vld [vmem:[%s3214_s22 + $0x350] sm:$0xff] }
  0xe9   : > { %1809 = vmatmul.mubr.bf16.gmra.mxu1 %v3043_v53 }
  0xea   : > { %2712 = vmatprep.mubr.msk.bf16.mxu1 %vm1202_vm0, %v3047_v54  ;;  %v2639_v54 = vcombine.low %v374_v47, %v376_v48  ;;  %v3087_v47 = vld [vmem:[%s3214_s22 + $0x3e8] ss:$16 sps:$4 sm:$0xff]  }
  0xed   : > { %1496 = vmatmul.mubr.bf16.gmra.mxu0 %v3028_v51 }
  0xee   : > { %1503 = vmatprep.mubr.bf16.mxu0 %v3032_v52 }
  0xf1   : > { %v1626_v59 = vpop.f32.mrf.mxu1  ;;  %1817 = vmatmul.mubr.bf16.gmra.mxu1 %v3049_v57 }
  0xf2   : > { %2713 = vmatprep.mubr.msk.bf16.mxu1 %vm1202_vm0, %v3052_v58 }
  0xf3   : > { %v1628_v61 = vpop.f32.mrf.mxu1 }
  0xf5   : > { %1504 = vmatmul.mubr.bf16.gmra.mxu0 %v3034_v55  ;;  %v1629_v63 = vpop.f32.mrf.mxu1 }
  0xf6   : > { %1511 = vmatprep.mubr.bf16.mxu0 %v3038_v56 }
  0xf7   : > { %v1631_v2 = vpop.f32.mrf.mxu1 }
  0xf9   : > { %v1634_v3 = vpop.f32.mrf.mxu1  ;;  %1825 = vmatmul.mubr.bf16.gmra.mxu1 %v3054_v0 }
  0xfa   : > { %2714 = vmatprep.mubr.msk.bf16.mxu1 %vm1202_vm0, %v3057_v1  ;;  %v3079_v1 = vld [vmem:[%s3214_s22 + $0x3cc] ss:$16 sps:$4 sm:$0xff]  }
  0xfb   : > { %v1636_v5 = vpop.f32.mrf.mxu1 }
  0xfd   : > { %1512 = vmatmul.mubr.bf16.gmra.mxu0 %v3040_v60  ;;  %v3401_v7 = vpop.f32.mrf.mxu1 }
  0xfe   : > { %1519 = vmatprep.mubr.bf16.mxu0 %v3044_v62  ;;  %v3075_v62 = vld [vmem:[%s3214_s22 + $0x3a8] ss:$16 sps:$4 sm:$0xff]  }
  0xff   : > { %v1639_v10 = vpop.f32.mrf.mxu1 }
 0x101   : > { %v3407_v13 = vpop.f32.mrf.mxu1  ;;  %1833 = vmatmul.mubr.bf16.gmra.mxu1 %v3059_v8  ;;  %v380_v8 = vld [vmem:[%s3214_s22 + $0x370] sm:$0xff] }
 0x102   : > { %2715 = vmatprep.mubr.msk.bf16.mxu1 %vm1202_vm0, %v3062_v9 }
 0x103   : > { %v1644_v15 = vpop.f32.mrf.mxu1 }
 0x105   : > { %1520 = vmatmul.mubr.bf16.gmra.mxu0 %v3046_v4  ;;  %v3411_v17 = vpop.f32.mrf.mxu1 }
 0x106   : > { %1527 = vmatprep.mubr.bf16.mxu0 %v3050_v6 }
 0x107   : > { %v1647_v22 = vpop.f32.mrf.mxu1 }
 0x109   : > { %v3427_v28 = vpop.f32.mrf.mxu1  ;;  %1841 = vmatmul.mubr.bf16.gmra.mxu1 %v3064_v18 }
 0x10a   : > { %2716 = vmatprep.mubr.msk.bf16.mxu1 %vm1202_vm0, %v3067_v19 }
 0x10b   : > { %v1652_v32 = vpop.f32.mrf.mxu1 }
 0x10d   : > { %v1337_v20 = vpop.f32.mrf.mxu0  ;;  %1528 = vmatmul.mubr.bf16.gmra.mxu0 %v2631_v14  ;;  %v3434_v37 = vpop.f32.mrf.mxu1 }
 0x10e   : > { %v1627_v23 = vadd.f32 %v1626_v59, %v1337_v20  ;;  %1535 = vmatprep.mubr.bf16.mxu0 %v3055_v16  ;;  %v3065_v59 = vld [vmem:[%s3214_s22 + $0x364] ss:$16 sps:$4 sm:$0xff]  }
 0x10f   : > { %v1339_v27 = vpop.f32.mrf.mxu0  ;;  %v1655_v43 = vpop.f32.mrf.mxu1  ;;  %v3072_v20 = vld [vmem:[%s3214_s22 + $0x384] ss:$16 sps:$4 sm:$0xff]  }
 0x110   : > { %v1888_v29 = vmul.f32 %v3418_v21, %v1627_v23 }
 0x111   : > { %v1340_v30 = vpop.f32.mrf.mxu0  ;;  %v3447_v50 = vpop.f32.mrf.mxu1  ;;  %1849 = vmatmul.mubr.bf16.gmra.mxu1 %v3069_v38 }
 0x112   : > { %v1959_v33 = vadd.f32 %v3425_v26, %v1888_v29  ;;  %v1630_v34 = vadd.f32 %v1629_v63, %v1340_v30  ;;  %2717 = vmatprep.mubr.msk.bf16.mxu1 %vm1202_vm0, %v3073_v41  ;;  %v3085_v29 = vld [vmem:[%s3214_s22 + $0x3ec] ss:$16 sps:$4 sm:$0xff]  }
 0x113   : > { %v1342_v36 = vpop.f32.mrf.mxu0  ;;  %v1660_v55 = vpop.f32.mrf.mxu1 }
 0x114   : > { %v2023_v39 = vmax.f32 %v1959_v33, 0.0  ;;  %v1889_v40 = vmul.f32 %v3418_v21, %v1630_v34 }
 0x115   : > { %v1345_v42 = vpop.f32.mrf.mxu0  ;;  %1536 = vmatmul.mubr.bf16.gmra.mxu0 %v2635_v31  ;;  %v3456_v61 = vpop.f32.mrf.mxu1 }
 0x116   : > { %v2789_v44 = vpack.c.bf16 %v2023_v39, %v2023_v39  ;;  %v1960_v45 = vadd.f32 %v3425_v26, %v1889_v40  ;;  %v1635_v46 = vadd.f32 %v1634_v3, %v1345_v42  ;;  %1543 = vmatprep.mubr.bf16.mxu0 %v3060_v35  ;;  %v3070_v40 = vld [vmem:[%s3214_s22 + $0x380] ss:$16 sps:$4 sm:$0xff]  }
 0x117   : > { %v1347_v49 = vpop.f32.mrf.mxu0  ;;  %v1663_v3 = vpop.f32.mrf.mxu1 }
 0x118   : > { %2344 = vst.msk [vmem:[%s3442_s12] sm:$0xf] %vm2343_vm2, %v2789_v44  ;;  %v2024_v51 = vmax.f32 %v1960_v45, 0.0  ;;  %v1890_v52 = vmul.f32 %v3418_v21, %v1635_v46  ;;  %v3078_v44 = vld [vmem:[%s3214_s22 + $0x3a4] ss:$16 sps:$4 sm:$0xff]  }
 0x119   : > { %v1348_v53 = vpop.f32.mrf.mxu0  ;;  %v3467_v10 = vpop.f32.mrf.mxu1  ;;  %1857 = vmatmul.mubr.bf16.gmra.mxu1 %v3075_v62 }
 0x11a   : > { %v2790_v56 = vpack.c.bf16 %v2024_v51, %v2024_v51  ;;  %v1961_v57 = vadd.f32 %v3425_v26, %v1890_v52  ;;  %v1638_v58 = vadd.f32 %v3401_v7, %v1348_v53  ;;  %v378_v7 = vld [vmem:[%s3214_s22 + $0x360] sm:$0xff]  ;;  %2718 = vmatprep.mubr.msk.bf16.mxu1 %vm1202_vm0, %v3079_v1 }
 0x11b   : > { %v1350_v60 = vpop.f32.mrf.mxu0  ;;  %v1668_v15 = vpop.f32.mrf.mxu1 }
 0x11c   : > { %2345 = vst.msk [vmem:[%s3442_s12 + $0x4] sm:$0xf] %vm2343_vm2, %v2790_v56  ;;  %v2025_v63 = vmax.f32 %v1961_v57, 0.0  ;;  %v1891_v0 = vmul.f32 %v3418_v21, %v1638_v58  ;;  %v3076_v60 = vld [vmem:[%s3214_s22 + $0x3a0] ss:$16 sps:$4 sm:$0xff]  }
 0x11d   : > { %v1353_v2 = vpop.f32.mrf.mxu0  ;;  %1544 = vmatmul.mubr.bf16.gmra.mxu0 %v2639_v54  ;;  %v3476_v23 = vpop.f32.mrf.mxu1 }
 0x11e   : > { %v2791_v4 = vpack.c.bf16 %v2025_v63, %v2025_v63  ;;  %v1962_v5 = vadd.f32 %v3425_v26, %v1891_v0  ;;  %v1643_v6 = vadd.f32 %v3407_v13, %v1353_v2  ;;  %1551 = vmatprep.mubr.bf16.mxu0 %v3065_v59  ;;  %v2643_v13 = vcombine.low %v378_v7, %v380_v8 }
 0x11f   : > { %v1355_v9 = vpop.f32.mrf.mxu0  ;;  %v1671_v31 = vpop.f32.mrf.mxu1 }
 0x120   : > { %2346 = vst.msk [vmem:[%s3442_s12 + $0x8] sm:$0xf] %vm2343_vm2, %v2791_v4  ;;  %v2026_v11 = vmax.f32 %v1962_v5, 0.0  ;;  %v1892_v12 = vmul.f32 %v3418_v21, %v1643_v6 }
 0x121   : > { %v1356_v14 = vpop.f32.mrf.mxu0  ;;  %v3485_v35 = vpop.f32.mrf.mxu1  ;;  %1865 = vmatmul.mubr.bf16.gmra.mxu1 %v3081_v24 }
 0x122   : > { %v2792_v16 = vpack.c.bf16 %v2026_v11, %v2026_v11  ;;  %v1963_v18 = vadd.f32 %v3425_v26, %v1892_v12  ;;  %v1646_v19 = vadd.f32 %v3411_v17, %v1356_v14  ;;  %2719 = vmatprep.mubr.msk.bf16.mxu1 %vm1202_vm0, %v3085_v29 }
 0x123   : > { %v1358_v22 = vpop.f32.mrf.mxu0  ;;  %v1676_v41 = vpop.f32.mrf.mxu1 }
 0x124   : > { %2347 = vst.msk [vmem:[%s3442_s12 + $0xc] sm:$0xf] %vm2343_vm2, %v2792_v16  ;;  %v2027_v25 = vmax.f32 %v1963_v18, 0.0  ;;  %v1893_v27 = vmul.f32 %v3418_v21, %v1646_v19  ;;  %v3082_v16 = vld [vmem:[%s3214_s22 + $0x3c0] ss:$16 sps:$4 sm:$0xff]  }
 0x125   : > { %v1361_v30 = vpop.f32.mrf.mxu0  ;;  %1552 = vmatmul.mubr.bf16.gmra.mxu0 %v2643_v13  ;;  %v3495_v46 = vpop.f32.mrf.mxu1 }
 0x126   : > { %v2793_v32 = vpack.c.bf16 %v2027_v25, %v2027_v25  ;;  %v1964_v33 = vadd.f32 %v3425_v26, %v1893_v27  ;;  %v1651_v17 = vadd.f32 %v3427_v28, %v1361_v30  ;;  %1559 = vmatprep.mubr.bf16.mxu0 %v3072_v20 }
 0x127   : > { %v1363_v34 = vpop.f32.mrf.mxu0  ;;  %v1679_v52 = vpop.f32.mrf.mxu1 }
 0x128   : > { %2348 = vst.msk [vmem:[%s3442_s12 + $0x10] sm:$0xf] %vm2343_vm2, %v2793_v32  ;;  %v2028_v36 = vmax.f32 %v1964_v33, 0.0  ;;  %v1894_v38 = vmul.f32 %v3418_v21, %v1651_v17 }
 0x129   : > { %v1364_v39 = vpop.f32.mrf.mxu0  ;;  %v3503_v56 = vpop.f32.mrf.mxu1  ;;  %1873 = vmatmul.mubr.bf16.gmra.mxu1 %v3087_v47 }
 0x12a   : > { %v2794_v42 = vpack.c.bf16 %v2028_v36, %v2028_v36  ;;  %v1965_v28 = vadd.f32 %v3425_v26, %v1894_v38  ;;  %v1654_v43 = vadd.f32 %v3434_v37, %v1364_v39 }
 0x12b   : > { %v1366_v45 = vpop.f32.mrf.mxu0  ;;  %v1684_v62 = vpop.f32.mrf.mxu1 }
 0x12c   : > { %2349 = vst.msk [vmem:[%s3442_s12 + $0x14] sm:$0xf] %vm2343_vm2, %v2794_v42  ;;  %v2029_v48 = vmax.f32 %v1965_v28, 0.0  ;;  %v1895_v49 = vmul.f32 %v3418_v21, %v1654_v43 }
 0x12d   : > { %v1369_v51 = vpop.f32.mrf.mxu0  ;;  %1560 = vmatmul.mubr.bf16.gmra.mxu0 %v3070_v40  ;;  %v3512_v3 = vpop.f32.mrf.mxu1  ;;  %v3088_v40 = vld [vmem:[%s3214_s22 + $0x3e0] ss:$16 sps:$4 sm:$0xff]  }
 0x12e   : > { %v2795_v53 = vpack.c.bf16 %v2029_v48, %v2029_v48  ;;  %v1966_v54 = vadd.f32 %v3425_v26, %v1895_v49  ;;  %v1659_v37 = vadd.f32 %v3447_v50, %v1369_v51  ;;  %1567 = vmatprep.mubr.bf16.mxu0 %v3078_v44  ;;  %v3084_v50 = vld [vmem:[%s3214_s22 + $0x3c4] ss:$16 sps:$4 sm:$0xff]  }
 0x12f   : > { %v1371_v55 = vpop.f32.mrf.mxu0  ;;  %v1687_v7 = vpop.f32.mrf.mxu1 }
 0x130   : > { %2350 = vst.msk [vmem:[%s3442_s12 + $0x18] sm:$0xf] %vm2343_vm2, %v2795_v53  ;;  %v2030_v57 = vmax.f32 %v1966_v54, 0.0  ;;  %v1896_v58 = vmul.f32 %v3418_v21, %v1659_v37 }
 0x131   : > { %v1372_v59 = vpop.f32.mrf.mxu0  ;;  %v3519_v12 = vpop.f32.mrf.mxu1 }
 0x132   : > { %v2796_v63 = vpack.c.bf16 %v2030_v57, %v2030_v57  ;;  %v1967_v0 = vadd.f32 %v3425_v26, %v1896_v58  ;;  %v1662_v1 = vadd.f32 %v3456_v61, %v1372_v59 }
 0x133   : > { %v1374_v2 = vpop.f32.mrf.mxu0  ;;  %v1692_v18 = vpop.f32.mrf.mxu1 }
 0x134   : > { %2351 = vst.msk [vmem:[%s3442_s12 + $0x1c] sm:$0xf] %vm2343_vm2, %v2796_v63  ;;  %v2031_v4 = vmax.f32 %v1967_v0, 0.0  ;;  %v1897_v5 = vmul.f32 %v3418_v21, %v1662_v1 }
 0x135   : > { %v1377_v6 = vpop.f32.mrf.mxu0  ;;  %1568 = vmatmul.mubr.bf16.gmra.mxu0 %v3076_v60  ;;  %v1693_v25 = vpop.f32.mrf.mxu1 }
 0x136   : > { %v2797_v8 = vpack.c.bf16 %v2031_v4, %v2031_v4  ;;  %v1968_v9 = vadd.f32 %v3425_v26, %v1897_v5  ;;  %v1667_v61 = vadd.f32 %v3467_v10, %v1377_v6  ;;  %1575 = vmatprep.mubr.bf16.mxu0 %v3084_v50  ;;  %v3090_v10 = vld [vmem:[%s3214_s22 + $0x3e4] ss:$16 sps:$4 sm:$0xff]  }
 0x137   : > { %v1379_v11 = vpop.f32.mrf.mxu0  ;;  %v1695_v31 = vpop.f32.mrf.mxu1 }
 0x138   : > { %2352 = vst.msk [vmem:[%s3442_s12 + $0x20] sm:$0xf] %vm2343_vm2, %v2797_v8  ;;  %v2032_v14 = vmax.f32 %v1968_v9, 0.0  ;;  %v1898_v13 = vmul.f32 %v3418_v21, %v1667_v61 }
 0x139   : > { %v1380_v15 = vpop.f32.mrf.mxu0  ;;  %v1698_v34 = vpop.f32.mrf.mxu1 }
 0x13a   : > { %v2798_v19 = vpack.c.bf16 %v2032_v14, %v2032_v14  ;;  %v1969_v20 = vadd.f32 %v3425_v26, %v1898_v13  ;;  %v1670_v22 = vadd.f32 %v3476_v23, %v1380_v15 }
 0x13b   : > { %v1382_v24 = vpop.f32.mrf.mxu0  ;;  %v1700_v41 = vpop.f32.mrf.mxu1 }
 0x13c   : > { %2353 = vst.msk [vmem:[%s3442_s12 + $0x24] sm:$0xf] %vm2343_vm2, %v2798_v19  ;;  %v2033_v27 = vmax.f32 %v1969_v20, 0.0  ;;  %v1899_v29 = vmul.f32 %v3418_v21, %v1670_v22 }
 0x13d   : > { %v1385_v30 = vpop.f32.mrf.mxu0  ;;  %1576 = vmatmul.mubr.bf16.gmra.mxu0 %v3082_v16  ;;  %v1701_v45 = vpop.f32.mrf.mxu1 }
 0x13e   : > { %v2799_v32 = vpack.c.bf16 %v2033_v27, %v2033_v27  ;;  %v1970_v33 = vadd.f32 %v3425_v26, %v1899_v29  ;;  %v1675_v17 = vadd.f32 %v3485_v35, %v1385_v30  ;;  %1583 = vmatprep.mubr.bf16.mxu0 %v3090_v10 }
 0x13f   : > { %v1387_v23 = vpop.f32.mrf.mxu0  ;;  %v1703_v49 = vpop.f32.mrf.mxu1 }
 0x140   : > { %2354 = vst.msk [vmem:[%s3442_s12 + $0x28] sm:$0xf] %vm2343_vm2, %v2799_v32  ;;  %v2034_v36 = vmax.f32 %v1970_v33, 0.0  ;;  %v1900_v38 = vmul.f32 %v3418_v21, %v1675_v17 }
 0x141   : > { %v1388_v39 = vpop.f32.mrf.mxu0  ;;  %v1706_v37 = vpop.f32.mrf.mxu1 }
 0x142   : > { %v2800_v42 = vpack.c.bf16 %v2034_v36, %v2034_v36  ;;  %v1971_v28 = vadd.f32 %v3425_v26, %v1900_v38  ;;  %v1678_v43 = vadd.f32 %v3495_v46, %v1388_v39 }
 0x143   : > { %v1390_v44 = vpop.f32.mrf.mxu0  ;;  %v1708_v58 = vpop.f32.mrf.mxu1 }
 0x144   : > { %2355 = vst.msk [vmem:[%s3442_s12 + $0x2c] sm:$0xf] %vm2343_vm2, %v2800_v42  ;;  %v2035_v35 = vmax.f32 %v1971_v28, 0.0  ;;  %v1901_v47 = vmul.f32 %v3418_v21, %v1678_v43 }
 0x145   : > { %v1393_v48 = vpop.f32.mrf.mxu0  ;;  %1584 = vmatmul.mubr.bf16.gmra.mxu0 %v3088_v40  ;;  %v1709_v0 = vpop.f32.mrf.mxu1 }
 0x146   : > { %v2801_v51 = vpack.c.bf16 %v2035_v35, %v2035_v35  ;;  %v1972_v52 = vadd.f32 %v3425_v26, %v1901_v47  ;;  %v1683_v53 = vadd.f32 %v3503_v56, %v1393_v48 }
 0x147   : > { %v1395_v54 = vpop.f32.mrf.mxu0  ;;  %v1711_v2 = vpop.f32.mrf.mxu1 }
 0x148   : > { %2356 = vst.msk [vmem:[%s3442_s12 + $0x30] sm:$0xf] %vm2343_vm2, %v2801_v51  ;;  %v2036_v46 = vmax.f32 %v1972_v52, 0.0  ;;  %v1902_v55 = vmul.f32 %v3418_v21, %v1683_v53 }
 0x149   : > { %v1396_v57 = vpop.f32.mrf.mxu0  ;;  %v1714_v8 = vpop.f32.mrf.mxu1 }
 0x14a   : > { %v2802_v59 = vpack.c.bf16 %v2036_v46, %v2036_v46  ;;  %v1973_v60 = vadd.f32 %v3425_v26, %v1902_v55  ;;  %v1686_v62 = vadd.f32 %v3512_v3, %v1396_v57 }
 0x14b   : > { %v1398_v63 = vpop.f32.mrf.mxu0  ;;  %v1716_v11 = vpop.f32.mrf.mxu1 }
 0x14c   : > { %2357 = vst.msk [vmem:[%s3442_s12 + $0x34] sm:$0xf] %vm2343_vm2, %v2802_v59  ;;  %v2037_v56 = vmax.f32 %v1973_v60, 0.0  ;;  %v1903_v1 = vmul.f32 %v3418_v21, %v1686_v62 }
 0x14d   : > { %v1401_v50 = vpop.f32.mrf.mxu0  ;;  %v1717_v18 = vpop.f32.mrf.mxu1 }
 0x14e   : > { %v2803_v4 = vpack.c.bf16 %v2037_v56, %v2037_v56  ;;  %v1974_v5 = vadd.f32 %v3425_v26, %v1903_v1  ;;  %v1691_v6 = vadd.f32 %v3519_v12, %v1401_v50 }
 0x14f   : > { %v1403_v7 = vpop.f32.mrf.mxu0  ;;  %v1719_v22 = vpop.f32.mrf.mxu1 }
 0x150   : > { %2358 = vst.msk [vmem:[%s3442_s12 + $0x38] sm:$0xf] %vm2343_vm2, %v2803_v4  ;;  %v2038_v3 = vmax.f32 %v1974_v5, 0.0  ;;  %v1904_v9 = vmul.f32 %v3418_v21, %v1691_v6 }
 0x151   : > { %v1404_v61 = vpop.f32.mrf.mxu0  ;;  %v1722_v30 = vpop.f32.mrf.mxu1 }
 0x152   : > { %v2804_v14 = vpack.c.bf16 %v2038_v3, %v2038_v3  ;;  %v1975_v13 = vadd.f32 %v3425_v26, %v1904_v9  ;;  %v1694_v15 = vadd.f32 %v1693_v25, %v1404_v61 }
 0x153   : > { %v1406_v16 = vpop.f32.mrf.mxu0  ;;  %v1724_v33 = vpop.f32.mrf.mxu1 }
 0x154   : > { %2359 = vst.msk [vmem:[%s3442_s12 + $0x3c] sm:$0xf] %vm2343_vm2, %v2804_v14  ;;  %v2039_v19 = vmax.f32 %v1975_v13, 0.0  ;;  %v1905_v12 = vmul.f32 %v3418_v21, %v1694_v15 }
 0x155   : > { %v1409_v20 = vpop.f32.mrf.mxu0  ;;  %v1725_v39 = vpop.f32.mrf.mxu1 }
 0x156   : > { %v2805_v10 = vpack.c.bf16 %v2039_v19, %v2039_v19  ;;  %v1976_v24 = vadd.f32 %v3425_v26, %v1905_v12  ;;  %v1699_v27 = vadd.f32 %v1698_v34, %v1409_v20 }
 0x157   : > { %v1411_v29 = vpop.f32.mrf.mxu0  ;;  %v1727_v42 = vpop.f32.mrf.mxu1 }
 0x158   : > { %2360 = vst.msk [vmem:[%s3442_s12 + $0x40] sm:$0xf] %vm2343_vm2, %v2805_v10  ;;  %v2040_v31 = vmax.f32 %v1976_v24, 0.0  ;;  %v1906_v25 = vmul.f32 %v3418_v21, %v1699_v27 }
 0x159   : > { %v1412_v32 = vpop.f32.mrf.mxu0  ;;  %v1730_v47 = vpop.f32.mrf.mxu1 }
 0x15a   : > { %v2806_v17 = vpack.c.bf16 %v2040_v31, %v2040_v31  ;;  %v1977_v23 = vadd.f32 %v3425_v26, %v1906_v25  ;;  %v1702_v36 = vadd.f32 %v1701_v45, %v1412_v32 }
 0x15b   : > { %v1414_v38 = vpop.f32.mrf.mxu0  ;;  %v1732_v51 = vpop.f32.mrf.mxu1 }
 0x15c   : > { %2361 = vst.msk [vmem:[%s3442_s12 + $0x44] sm:$0xf] %vm2343_vm2, %v2806_v17  ;;  %v2041_v40 = vmax.f32 %v1977_v23, 0.0  ;;  %v1907_v34 = vmul.f32 %v3418_v21, %v1702_v36 }
 0x15d   : > { %v1417_v41 = vpop.f32.mrf.mxu0  ;;  %v1733_v55 = vpop.f32.mrf.mxu1 }
 0x15e   : > { %v2807_v28 = vpack.c.bf16 %v2041_v40, %v2041_v40  ;;  %v1978_v43 = vadd.f32 %v3425_v26, %v1907_v34  ;;  %v1707_v44 = vadd.f32 %v1706_v37, %v1417_v41 }
 0x15f   : > { %v1419_v35 = vpop.f32.mrf.mxu0  ;;  %v1735_v59 = vpop.f32.mrf.mxu1 }
 0x160   : > { %2362 = vst.msk [vmem:[%s3442_s12 + $0x48] sm:$0xf] %vm2343_vm2, %v2807_v28  ;;  %v2042_v48 = vmax.f32 %v1978_v43, 0.0  ;;  %v1908_v45 = vmul.f32 %v3418_v21, %v1707_v44 }
 0x161   : > { %v1420_v49 = vpop.f32.mrf.mxu0  ;;  %v1738_v1 = vpop.f32.mrf.mxu1 }
 0x162   : > { %v2808_v52 = vpack.c.bf16 %v2042_v48, %v2042_v48  ;;  %v1979_v53 = vadd.f32 %v3425_v26, %v1908_v45  ;;  %v1710_v54 = vadd.f32 %v1709_v0, %v1420_v49 }
 0x163   : > { %v1422_v46 = vpop.f32.mrf.mxu0  ;;  %v1740_v4 = vpop.f32.mrf.mxu1 }
 0x164   : > { %2363 = vst.msk [vmem:[%s3442_s12 + $0x4c] sm:$0xf] %vm2343_vm2, %v2808_v52  ;;  %v2043_v57 = vmax.f32 %v1979_v53, 0.0  ;;  %v1909_v37 = vmul.f32 %v3418_v21, %v1710_v54 }
 0x165   : > { %v1425_v58 = vpop.f32.mrf.mxu0  ;;  %v1741_v9 = vpop.f32.mrf.mxu1 }
 0x166   : > { %v2809_v60 = vpack.c.bf16 %v2043_v57, %v2043_v57  ;;  %v1980_v62 = vadd.f32 %v3425_v26, %v1909_v37  ;;  %v1715_v63 = vadd.f32 %v1714_v8, %v1425_v58 }
 0x167   : > { %v1427_v56 = vpop.f32.mrf.mxu0  ;;  %v1743_v14 = vpop.f32.mrf.mxu1 }
 0x168   : > { %2364 = vst.msk [vmem:[%s3442_s12 + $0x50] sm:$0xf] %vm2343_vm2, %v2809_v60  ;;  %v2044_v50 = vmax.f32 %v1980_v62, 0.0  ;;  %v1910_v0 = vmul.f32 %v3418_v21, %v1715_v63 }
 0x169   : > { %v1428_v2 = vpop.f32.mrf.mxu0  ;;  %v1746_v12 = vpop.f32.mrf.mxu1 }
 0x16a   : > { %v2810_v5 = vpack.c.bf16 %v2044_v50, %v2044_v50  ;;  %v1981_v6 = vadd.f32 %v3425_v26, %v1910_v0  ;;  %v1718_v7 = vadd.f32 %v1717_v18, %v1428_v2 }
 0x16b   : > { %v1430_v3 = vpop.f32.mrf.mxu0  ;;  %v1748_v10 = vpop.f32.mrf.mxu1 }
 0x16c   : > { %2365 = vst.msk [vmem:[%s3442_s12 + $0x54] sm:$0xf] %vm2343_vm2, %v2810_v5  ;;  %v2045_v61 = vmax.f32 %v1981_v6, 0.0  ;;  %v1911_v8 = vmul.f32 %v3418_v21, %v1718_v7 }
 0x16d   : > { %v1433_v11 = vpop.f32.mrf.mxu0  ;;  %v1749_v25 = vpop.f32.mrf.mxu1 }
 0x16e   : > { %v2811_v13 = vpack.c.bf16 %v2045_v61, %v2045_v61  ;;  %v1982_v15 = vadd.f32 %v3425_v26, %v1911_v8  ;;  %v1723_v16 = vadd.f32 %v1722_v30, %v1433_v11 }
 0x16f   : > { %v1435_v19 = vpop.f32.mrf.mxu0  ;;  %v1751_v17 = vpop.f32.mrf.mxu1 }
 0x170   : > { %2366 = vst.msk [vmem:[%s3442_s12 + $0x58] sm:$0xf] %vm2343_vm2, %v2811_v13  ;;  %v2046_v20 = vmax.f32 %v1982_v15, 0.0  ;;  %v1912_v18 = vmul.f32 %v3418_v21, %v1723_v16 }
 0x171   : > { %v1436_v22 = vpop.f32.mrf.mxu0  ;;  %v1754_v34 = vpop.f32.mrf.mxu1 }
 0x172   : > { %v2812_v24 = vpack.c.bf16 %v2046_v20, %v2046_v20  ;;  %v1983_v27 = vadd.f32 %v3425_v26, %v1912_v18  ;;  %v1726_v29 = vadd.f32 %v1725_v39, %v1436_v22 }
 0x173   : > { %v1438_v31 = vpop.f32.mrf.mxu0  ;;  %v1756_v28 = vpop.f32.mrf.mxu1 }
 0x174   : > { %2367 = vst.msk [vmem:[%s3442_s12 + $0x5c] sm:$0xf] %vm2343_vm2, %v2812_v24  ;;  %v2047_v32 = vmax.f32 %v1983_v27, 0.0  ;;  %v1913_v30 = vmul.f32 %v3418_v21, %v1726_v29 }
 0x175   : > { %v1441_v33 = vpop.f32.mrf.mxu0  ;;  %v1757_v45 = vpop.f32.mrf.mxu1 }
 0x176   : > { %v2813_v23 = vpack.c.bf16 %v2047_v32, %v2047_v32  ;;  %v1984_v36 = vadd.f32 %v3425_v26, %v1913_v30  ;;  %v1731_v38 = vadd.f32 %v1730_v47, %v1441_v33 }
 0x177   : > { %v1443_v40 = vpop.f32.mrf.mxu0  ;;  %v1759_v52 = vpop.f32.mrf.mxu1 }
 0x178   : > { %2368 = vst.msk [vmem:[%s3442_s12 + $0x60] sm:$0xf] %vm2343_vm2, %v2813_v23  ;;  %v2048_v41 = vmax.f32 %v1984_v36, 0.0  ;;  %v1914_v39 = vmul.f32 %v3418_v21, %v1731_v38 }
 0x179   : > { %v1444_v42 = vpop.f32.mrf.mxu0  ;;  %v1762_v37 = vpop.f32.mrf.mxu1 }
 0x17a   : > { %v2814_v43 = vpack.c.bf16 %v2048_v41, %v2048_v41  ;;  %v1985_v44 = vadd.f32 %v3425_v26, %v1914_v39  ;;  %v1734_v35 = vadd.f32 %v1733_v55, %v1444_v42 }
 0x17b   : > { %v1446_v48 = vpop.f32.mrf.mxu0  ;;  %v1764_v60 = vpop.f32.mrf.mxu1 }
 0x17c   : > { %2369 = vst.msk [vmem:[%s3442_s12 + $0x64] sm:$0xf] %vm2343_vm2, %v2814_v43  ;;  %v2049_v49 = vmax.f32 %v1985_v44, 0.0  ;;  %v1915_v47 = vmul.f32 %v3418_v21, %v1734_v35 }
 0x17d   : > { %v1449_v51 = vpop.f32.mrf.mxu0  ;;  %v1765_v0 = vpop.f32.mrf.mxu1 }
 0x17e   : > { %v2815_v53 = vpack.c.bf16 %v2049_v49, %v2049_v49  ;;  %v1986_v54 = vadd.f32 %v3425_v26, %v1915_v47  ;;  %v1739_v46 = vadd.f32 %v1738_v1, %v1449_v51 }
 0x17f   : > { %v1451_v57 = vpop.f32.mrf.mxu0  ;;  %v1767_v5 = vpop.f32.mrf.mxu1 }
 0x180   : > { %2370 = vst.msk [vmem:[%s3442_s12 + $0x68] sm:$0xf] %vm2343_vm2, %v2815_v53  ;;  %v2050_v58 = vmax.f32 %v1986_v54, 0.0  ;;  %v1916_v55 = vmul.f32 %v3418_v21, %v1739_v46 }
 0x181   : > { %v1452_v59 = vpop.f32.mrf.mxu0  ;;  %v1770_v8 = vpop.f32.mrf.mxu1 }
 0x182   : > { %v2816_v62 = vpack.c.bf16 %v2050_v58, %v2050_v58  ;;  %v1987_v63 = vadd.f32 %v3425_v26, %v1916_v55  ;;  %v1742_v56 = vadd.f32 %v1741_v9, %v1452_v59 }
 0x183   : > { %v1454_v50 = vpop.f32.mrf.mxu0  ;;  %v1772_v13 = vpop.f32.mrf.mxu1 }
 0x184   : > { %2371 = vst.msk [vmem:[%s3442_s12 + $0x6c] sm:$0xf] %vm2343_vm2, %v2816_v62  ;;  %v2051_v2 = vmax.f32 %v1987_v63, 0.0  ;;  %v1917_v1 = vmul.f32 %v3418_v21, %v1742_v56 }
 0x185   : > { %v1457_v4 = vpop.f32.mrf.mxu0  ;;  %v1773_v18 = vpop.f32.mrf.mxu1 }
 0x186   : > { %v2817_v6 = vpack.c.bf16 %v2051_v2, %v2051_v2  ;;  %v1988_v7 = vadd.f32 %v3425_v26, %v1917_v1  ;;  %v1747_v3 = vadd.f32 %v1746_v12, %v1457_v4 }
 0x187   : > { %v1459_v61 = vpop.f32.mrf.mxu0  ;;  %v1775_v24 = vpop.f32.mrf.mxu1 }
 0x188   : > { %2372 = vst.msk [vmem:[%s3442_s12 + $0x70] sm:$0xf] %vm2343_vm2, %v2817_v6  ;;  %v2052_v11 = vmax.f32 %v1988_v7, 0.0  ;;  %v1918_v9 = vmul.f32 %v3418_v21, %v1747_v3 }
 0x189   : > { %v1460_v14 = vpop.f32.mrf.mxu0  ;;  %v1778_v30 = vpop.f32.mrf.mxu1 }
 0x18a   : > { %v2818_v15 = vpack.c.bf16 %v2052_v11, %v2052_v11  ;;  %v1989_v16 = vadd.f32 %v3425_v26, %v1918_v9  ;;  %v1750_v19 = vadd.f32 %v1749_v25, %v1460_v14 }
 0x18b   : > { %v1462_v20 = vpop.f32.mrf.mxu0  ;;  %v1780_v23 = vpop.f32.mrf.mxu1 }
 0x18c   : > { %2373 = vst.msk [vmem:[%s3442_s12 + $0x74] sm:$0xf] %vm2343_vm2, %v2818_v15  ;;  %v2053_v22 = vmax.f32 %v1989_v16, 0.0  ;;  %v1919_v12 = vmul.f32 %v3418_v21, %v1750_v19 }
 0x18d   : > { %v1465_v10 = vpop.f32.mrf.mxu0  ;;  %v1781_v39 = vpop.f32.mrf.mxu1 }
 0x18e   : > { %v2819_v27 = vpack.c.bf16 %v2053_v22, %v2053_v22  ;;  %v1990_v29 = vadd.f32 %v3425_v26, %v1919_v12  ;;  %v1755_v31 = vadd.f32 %v1754_v34, %v1465_v10 }
 0x18f   : > { %v1467_v32 = vpop.f32.mrf.mxu0  ;;  %v1783_v43 = vpop.f32.mrf.mxu1 }
 0x190   : > { %2374 = vst.msk [vmem:[%s3442_s12 + $0x78] sm:$0xf] %vm2343_vm2, %v2819_v27  ;;  %v2054_v33 = vmax.f32 %v1990_v29, 0.0  ;;  %v1920_v25 = vmul.f32 %v3418_v21, %v1755_v31 }
 0x191   : > { %v1468_v17 = vpop.f32.mrf.mxu0  ;;  %v1786_v47 = vpop.f32.mrf.mxu1 }
 0x192   : > { %v2820_v36 = vpack.c.bf16 %v2054_v33, %v2054_v33  ;;  %v1991_v38 = vadd.f32 %v3425_v26, %v1920_v25  ;;  %v1758_v40 = vadd.f32 %v1757_v45, %v1468_v17 }
 0x193   : > { %v1470_v41 = vpop.f32.mrf.mxu0  ;;  %v1788_v53 = vpop.f32.mrf.mxu1 }
 0x194   : > { %2375 = vst.msk [vmem:[%s3442_s12 + $0x7c] sm:$0xf] %vm2343_vm2, %v2820_v36  ;;  %v2055_v42 = vmax.f32 %v1991_v38, 0.0  ;;  %v1921_v34 = vmul.f32 %v3418_v21, %v1758_v40 }
 0x195   : > { %v1473_v28 = vpop.f32.mrf.mxu0  ;;  %v1789_v55 = vpop.f32.mrf.mxu1 }
 0x196   : > { %v2821_v44 = vpack.c.bf16 %v2055_v42, %v2055_v42  ;;  %v1992_v35 = vadd.f32 %v3425_v26, %v1921_v34  ;;  %v1763_v48 = vadd.f32 %v1762_v37, %v1473_v28 }
 0x197   : > { %v1475_v49 = vpop.f32.mrf.mxu0  ;;  %v1791_v62 = vpop.f32.mrf.mxu1 }
 0x198   : > { %2376 = vst.msk [vmem:[%s3442_s12 + $0x80] sm:$0xf] %vm2343_vm2, %v2821_v44  ;;  %v2056_v51 = vmax.f32 %v1992_v35, 0.0  ;;  %v1922_v45 = vmul.f32 %v3418_v21, %v1763_v48 }
 0x199   : > { %v1476_v52 = vpop.f32.mrf.mxu0  ;;  %v1794_v1 = vpop.f32.mrf.mxu1 }
 0x19a   : > { %v2822_v54 = vpack.c.bf16 %v2056_v51, %v2056_v51  ;;  %v1993_v46 = vadd.f32 %v3425_v26, %v1922_v45  ;;  %v1766_v57 = vadd.f32 %v1765_v0, %v1476_v52 }
 0x19b   : > { %v1478_v58 = vpop.f32.mrf.mxu0  ;;  %v1796_v6 = vpop.f32.mrf.mxu1 }
 0x19c   : > { %2377 = vst.msk [vmem:[%s3442_s12 + $0x84] sm:$0xf] %vm2343_vm2, %v2822_v54  ;;  %v2057_v59 = vmax.f32 %v1993_v46, 0.0  ;;  %v1923_v37 = vmul.f32 %v3418_v21, %v1766_v57 }
 0x19d   : > { %v1481_v60 = vpop.f32.mrf.mxu0  ;;  %v1797_v9 = vpop.f32.mrf.mxu1 }
 0x19e   : > { %v2823_v63 = vpack.c.bf16 %v2057_v59, %v2057_v59  ;;  %v1994_v56 = vadd.f32 %v3425_v26, %v1923_v37  ;;  %v1771_v50 = vadd.f32 %v1770_v8, %v1481_v60 }
 0x19f   : > { %v1483_v2 = vpop.f32.mrf.mxu0  ;;  %v1799_v15 = vpop.f32.mrf.mxu1 }
 0x1a0   : > { %2378 = vst.msk [vmem:[%s3442_s12 + $0x88] sm:$0xf] %vm2343_vm2, %v2823_v63  ;;  %v2058_v4 = vmax.f32 %v1994_v56, 0.0  ;;  %v1924_v0 = vmul.f32 %v3418_v21, %v1771_v50 }
 0x1a1   : > { %v1484_v5 = vpop.f32.mrf.mxu0  ;;  %v1802_v12 = vpop.f32.mrf.mxu1 }
 0x1a2   : > { %v2824_v7 = vpack.c.bf16 %v2058_v4, %v2058_v4  ;;  %v1995_v3 = vadd.f32 %v3425_v26, %v1924_v0  ;;  %v1774_v61 = vadd.f32 %v1773_v18, %v1484_v5 }
 0x1a3   : > { %v1486_v11 = vpop.f32.mrf.mxu0  ;;  %v1804_v27 = vpop.f32.mrf.mxu1 }
 0x1a4   : > { %2379 = vst.msk [vmem:[%s3442_s12 + $0x8c] sm:$0xf] %vm2343_vm2, %v2824_v7  ;;  %v2059_v14 = vmax.f32 %v1995_v3, 0.0  ;;  %v1925_v8 = vmul.f32 %v3418_v21, %v1774_v61 }
 0x1a5   : > { %v1489_v13 = vpop.f32.mrf.mxu0  ;;  %v1805_v25 = vpop.f32.mrf.mxu1 }
 0x1a6   : > { %v2825_v16 = vpack.c.bf16 %v2059_v14, %v2059_v14  ;;  %v1996_v19 = vadd.f32 %v3425_v26, %v1925_v8  ;;  %v1779_v20 = vadd.f32 %v1778_v30, %v1489_v13 }
 0x1a7   : > { %v1491_v22 = vpop.f32.mrf.mxu0  ;;  %v1807_v36 = vpop.f32.mrf.mxu1 }
 0x1a8   : > { %2380 = vst.msk [vmem:[%s3442_s12 + $0x90] sm:$0xf] %vm2343_vm2, %v2825_v16  ;;  %v2060_v10 = vmax.f32 %v1996_v19, 0.0  ;;  %v1926_v18 = vmul.f32 %v3418_v21, %v1779_v20 }
 0x1a9   : > { %v1492_v24 = vpop.f32.mrf.mxu0  ;;  %v1810_v34 = vpop.f32.mrf.mxu1 }
 0x1aa   : > { %v2826_v29 = vpack.c.bf16 %v2060_v10, %v2060_v10  ;;  %v1997_v31 = vadd.f32 %v3425_v26, %v1926_v18  ;;  %v1782_v32 = vadd.f32 %v1781_v39, %v1492_v24 }
 0x1ab   : > { %v1494_v33 = vpop.f32.mrf.mxu0  ;;  %v1812_v44 = vpop.f32.mrf.mxu1 }
 0x1ac   : > { %2381 = vst.msk [vmem:[%s3442_s12 + $0x94] sm:$0xf] %vm2343_vm2, %v2826_v29  ;;  %v2061_v17 = vmax.f32 %v1997_v31, 0.0  ;;  %v1927_v30 = vmul.f32 %v3418_v21, %v1782_v32 }
 0x1ad   : > { %v1497_v23 = vpop.f32.mrf.mxu0  ;;  %v1813_v45 = vpop.f32.mrf.mxu1 }
 0x1ae   : > { %v2827_v38 = vpack.c.bf16 %v2061_v17, %v2061_v17  ;;  %v1998_v40 = vadd.f32 %v3425_v26, %v1927_v30  ;;  %v1787_v41 = vadd.f32 %v1786_v47, %v1497_v23 }
 0x1af   : > { %v1499_v42 = vpop.f32.mrf.mxu0  ;;  %v1815_v54 = vpop.f32.mrf.mxu1 }
 0x1b0   : > { %2382 = vst.msk [vmem:[%s3442_s12 + $0x98] sm:$0xf] %vm2343_vm2, %v2827_v38  ;;  %v2062_v28 = vmax.f32 %v1998_v40, 0.0  ;;  %v1928_v39 = vmul.f32 %v3418_v21, %v1787_v41 }
 0x1b1   : > { %v1500_v43 = vpop.f32.mrf.mxu0  ;;  %v1818_v37 = vpop.f32.mrf.mxu1 }
 0x1b2   : > { %v2828_v35 = vpack.c.bf16 %v2062_v28, %v2062_v28  ;;  %v1999_v48 = vadd.f32 %v3425_v26, %v1928_v39  ;;  %v1790_v49 = vadd.f32 %v1789_v55, %v1500_v43 }
 0x1b3   : > { %v1502_v51 = vpop.f32.mrf.mxu0  ;;  %v1820_v63 = vpop.f32.mrf.mxu1 }
 0x1b4   : > { %2383 = vst.msk [vmem:[%s3442_s12 + $0x9c] sm:$0xf] %vm2343_vm2, %v2828_v35  ;;  %v2063_v52 = vmax.f32 %v1999_v48, 0.0  ;;  %v1929_v47 = vmul.f32 %v3418_v21, %v1790_v49 }
 0x1b5   : > { %v1505_v53 = vpop.f32.mrf.mxu0  ;;  %v1821_v0 = vpop.f32.mrf.mxu1 }
 0x1b6   : > { %v2829_v46 = vpack.c.bf16 %v2063_v52, %v2063_v52  ;;  %v2000_v57 = vadd.f32 %v3425_v26, %v1929_v47  ;;  %v1795_v58 = vadd.f32 %v1794_v1, %v1505_v53 }
 0x1b7   : > { %v1507_v59 = vpop.f32.mrf.mxu0  ;;  %v1823_v7 = vpop.f32.mrf.mxu1 }
 0x1b8   : > { %2384 = vst.msk [vmem:[%s3442_s12 + $0xa0] sm:$0xf] %vm2343_vm2, %v2829_v46  ;;  %v2064_v60 = vmax.f32 %v2000_v57, 0.0  ;;  %v1930_v55 = vmul.f32 %v3418_v21, %v1795_v58 }
 0x1b9   : > { %v1508_v62 = vpop.f32.mrf.mxu0  ;;  %v1826_v8 = vpop.f32.mrf.mxu1 }
 0x1ba   : > { %v2830_v56 = vpack.c.bf16 %v2064_v60, %v2064_v60  ;;  %v2001_v50 = vadd.f32 %v3425_v26, %v1930_v55  ;;  %v1798_v2 = vadd.f32 %v1797_v9, %v1508_v62 }
 0x1bb   : > { %v1510_v4 = vpop.f32.mrf.mxu0  ;;  %v1828_v16 = vpop.f32.mrf.mxu1 }
 0x1bc   : > { %2385 = vst.msk [vmem:[%s3442_s12 + $0xa4] sm:$0xf] %vm2343_vm2, %v2830_v56  ;;  %v2065_v5 = vmax.f32 %v2001_v50, 0.0  ;;  %v1931_v1 = vmul.f32 %v3418_v21, %v1798_v2 }
 0x1bd   : > { %v1513_v6 = vpop.f32.mrf.mxu0  ;;  %v1829_v18 = vpop.f32.mrf.mxu1 }
 0x1be   : > { %v2831_v3 = vpack.c.bf16 %v2065_v5, %v2065_v5  ;;  %v2002_v61 = vadd.f32 %v3425_v26, %v1931_v1  ;;  %v1803_v11 = vadd.f32 %v1802_v12, %v1513_v6 }
 0x1bf   : > { %v1515_v14 = vpop.f32.mrf.mxu0  ;;  %v1831_v29 = vpop.f32.mrf.mxu1 }
 0x1c0   : > { %2386 = vst.msk [vmem:[%s3442_s12 + $0xa8] sm:$0xf] %vm2343_vm2, %v2831_v3  ;;  %v2066_v13 = vmax.f32 %v2002_v61, 0.0  ;;  %v1932_v9 = vmul.f32 %v3418_v21, %v1803_v11 }
 0x1c1   : > { %v1516_v15 = vpop.f32.mrf.mxu0  ;;  %v1834_v30 = vpop.f32.mrf.mxu1 }
 0x1c2   : > { %v2832_v19 = vpack.c.bf16 %v2066_v13, %v2066_v13  ;;  %v2003_v20 = vadd.f32 %v3425_v26, %v1932_v9  ;;  %v1806_v22 = vadd.f32 %v1805_v25, %v1516_v15  ;;  %v3679_v25 = vld [vmem:[%s3771_s2] ss:$0 sm:$0xff] }
 0x1c3   : > { %v1518_v10 = vpop.f32.mrf.mxu0  ;;  %v1836_v38 = vpop.f32.mrf.mxu1 }
 0x1c4   : > { %2387 = vst.msk [vmem:[%s3442_s12 + $0xac] sm:$0xf] %vm2343_vm2, %v2832_v19  ;;  %v2067_v24 = vmax.f32 %v2003_v20, 0.0  ;;  %v1933_v12 = vmul.f32 %v3418_v21, %v1806_v22 }
 0x1c5   : > { %v1521_v27 = vpop.f32.mrf.mxu0  ;;  %v1837_v28 = vpop.f32.mrf.mxu1 }
 0x1c6   : > { %v2833_v31 = vpack.c.bf16 %v2067_v24, %v2067_v24  ;;  %v2004_v32 = vadd.f32 %v3425_v26, %v1933_v12  ;;  %v1811_v33 = vadd.f32 %v1810_v34, %v1521_v27  ;;  %v3685_v26 = vld [vmem:[%s3772_s3] ss:$0 sm:$0xff] }
 0x1c7   : > { %v1523_v17 = vpop.f32.mrf.mxu0  ;;  %v1839_v35 = vpop.f32.mrf.mxu1 }
 0x1c8   : > { %2388 = vst.msk [vmem:[%s3442_s12 + $0xb0] sm:$0xf] %vm2343_vm2, %v2833_v31  ;;  %v2068_v23 = vmax.f32 %v2004_v32, 0.0  ;;  %v1934_v36 = vmul.f32 %v3679_v25, %v1811_v33 }
 0x1c9   : > { %v1524_v21 = vpop.f32.mrf.mxu0  ;;  %v1842_v47 = vpop.f32.mrf.mxu1 }
 0x1ca   : > { %v2834_v40 = vpack.c.bf16 %v2068_v23, %v2068_v23  ;;  %v2005_v41 = vadd.f32 %v3685_v26, %v1934_v36  ;;  %v1814_v42 = vadd.f32 %v1813_v45, %v1524_v21 }
 0x1cb   : > { %v1526_v34 = vpop.f32.mrf.mxu0  ;;  %v1844_v46 = vpop.f32.mrf.mxu1 }
 0x1cc   : > { %2389 = vst.msk [vmem:[%s3442_s12 + $0xb4] sm:$0xf] %vm2343_vm2, %v2834_v40  ;;  %v2069_v39 = vmax.f32 %v2005_v41, 0.0  ;;  %v1935_v43 = vmul.f32 %v3679_v25, %v1814_v42 }
 0x1cd   : > { %v1529_v44 = vpop.f32.mrf.mxu0  ;;  %v1845_v55 = vpop.f32.mrf.mxu1 }
 0x1ce   : > { %v2835_v48 = vpack.c.bf16 %v2069_v39, %v2069_v39  ;;  %v2006_v49 = vadd.f32 %v3685_v26, %v1935_v43  ;;  %v1819_v51 = vadd.f32 %v1818_v37, %v1529_v44 }
 0x1cf   : > { %v1531_v52 = vpop.f32.mrf.mxu0  ;;  %v1847_v56 = vpop.f32.mrf.mxu1 }
 0x1d0   : > { %2390 = vst.msk [vmem:[%s3442_s12 + $0xb8] sm:$0xf] %vm2343_vm2, %v2835_v48  ;;  %v2070_v53 = vmax.f32 %v2006_v49, 0.0  ;;  %v1936_v45 = vmul.f32 %v3679_v25, %v1819_v51 }
 0x1d1   : > { %v1532_v54 = vpop.f32.mrf.mxu0  ;;  %v1850_v1 = vpop.f32.mrf.mxu1 }
 0x1d2   : > { %v2836_v57 = vpack.c.bf16 %v2070_v53, %v2070_v53  ;;  %v2007_v58 = vadd.f32 %v3685_v26, %v1936_v45  ;;  %v1822_v59 = vadd.f32 %v1821_v0, %v1532_v54 }
 0x1d3   : > { %v1534_v60 = vpop.f32.mrf.mxu0  ;;  %v1852_v3 = vpop.f32.mrf.mxu1 }
 0x1d4   : > { %2391 = vst.msk [vmem:[%s3442_s12 + $0xbc] sm:$0xf] %vm2343_vm2, %v2836_v57  ;;  %v2071_v62 = vmax.f32 %v2007_v58, 0.0  ;;  %v1937_v37 = vmul.f32 %v3679_v25, %v1822_v59 }
 0x1d5   : > { %v1537_v63 = vpop.f32.mrf.mxu0  ;;  %v1853_v9 = vpop.f32.mrf.mxu1 }
 0x1d6   : > { %v2837_v50 = vpack.c.bf16 %v2071_v62, %v2071_v62  ;;  %v2008_v2 = vadd.f32 %v3685_v26, %v1937_v37  ;;  %v1827_v4 = vadd.f32 %v1826_v8, %v1537_v63 }
 0x1d7   : > { %v1539_v5 = vpop.f32.mrf.mxu0  ;;  %v1855_v19 = vpop.f32.mrf.mxu1 }
 0x1d8   : > { %2392 = vst.msk [vmem:[%s3442_s12 + $0xc0] sm:$0xf] %vm2343_vm2, %v2837_v50  ;;  %v2072_v6 = vmax.f32 %v2008_v2, 0.0  ;;  %v1938_v0 = vmul.f32 %v3679_v25, %v1827_v4 }
 0x1d9   : > { %v1540_v7 = vpop.f32.mrf.mxu0  ;;  %v1858_v12 = vpop.f32.mrf.mxu1 }
 0x1da   : > { %v2838_v61 = vpack.c.bf16 %v2072_v6, %v2072_v6  ;;  %v2009_v11 = vadd.f32 %v3685_v26, %v1938_v0  ;;  %v1830_v14 = vadd.f32 %v1829_v18, %v1540_v7 }
 0x1db   : > { %v1542_v13 = vpop.f32.mrf.mxu0  ;;  %v1860_v31 = vpop.f32.mrf.mxu1 }
 0x1dc   : > { %2393 = vst.msk [vmem:[%s3442_s12 + $0xc4] sm:$0xf] %vm2343_vm2, %v2838_v61  ;;  %v2073_v15 = vmax.f32 %v2009_v11, 0.0  ;;  %v1939_v8 = vmul.f32 %v3679_v25, %v1830_v14 }
 0x1dd   : > { %v1545_v16 = vpop.f32.mrf.mxu0  ;;  %v1861_v36 = vpop.f32.mrf.mxu1 }
 0x1de   : > { %v2839_v20 = vpack.c.bf16 %v2073_v15, %v2073_v15  ;;  %v2010_v22 = vadd.f32 %v3685_v26, %v1939_v8  ;;  %v1835_v10 = vadd.f32 %v1834_v30, %v1545_v16 }
 0x1df   : > { %v1547_v24 = vpop.f32.mrf.mxu0  ;;  %v1863_v40 = vpop.f32.mrf.mxu1 }
 0x1e0   : > { %2394 = vst.msk [vmem:[%s3442_s12 + $0xc8] sm:$0xf] %vm2343_vm2, %v2839_v20  ;;  %v2074_v27 = vmax.f32 %v2010_v22, 0.0  ;;  %v1940_v18 = vmul.f32 %v3679_v25, %v1835_v10 }
 0x1e1   : > { %v1548_v29 = vpop.f32.mrf.mxu0  ;;  %v1866_v43 = vpop.f32.mrf.mxu1 }
 0x1e2   : > { %v2840_v32 = vpack.c.bf16 %v2074_v27, %v2074_v27  ;;  %v2011_v33 = vadd.f32 %v3685_v26, %v1940_v18  ;;  %v1838_v17 = vadd.f32 %v1837_v28, %v1548_v29 }
 0x1e3   : > { %v1550_v23 = vpop.f32.mrf.mxu0  ;;  %v1868_v48 = vpop.f32.mrf.mxu1 }
 0x1e4   : > { %2395 = vst.msk [vmem:[%s3442_s12 + $0xcc] sm:$0xf] %vm2343_vm2, %v2840_v32  ;;  %v2075_v21 = vmax.f32 %v2011_v33, 0.0  ;;  %v1941_v30 = vmul.f32 %v3679_v25, %v1838_v17 }
 0x1e5   : > { %v1553_v38 = vpop.f32.mrf.mxu0  ;;  %v1869_v45 = vpop.f32.mrf.mxu1 }
 0x1e6   : > { %v2841_v41 = vpack.c.bf16 %v2075_v21, %v2075_v21  ;;  %v2012_v42 = vadd.f32 %v3685_v26, %v1941_v30  ;;  %v1843_v34 = vadd.f32 %v1842_v47, %v1553_v38 }
 0x1e7   : > { %v1555_v39 = vpop.f32.mrf.mxu0  ;;  %v1871_v57 = vpop.f32.mrf.mxu1 }
 0x1e8   : > { %2396 = vst.msk [vmem:[%s3442_s12 + $0xd0] sm:$0xf] %vm2343_vm2, %v2841_v41  ;;  %v2076_v44 = vmax.f32 %v2012_v42, 0.0  ;;  %v1942_v28 = vmul.f32 %v3679_v25, %v1843_v34 }
 0x1e9   : > { %v1556_v35 = vpop.f32.mrf.mxu0  ;;  %v1874_v37 = vpop.f32.mrf.mxu1 }
 0x1ea   : > { %v2842_v49 = vpack.c.bf16 %v2076_v44, %v2076_v44  ;;  %v2013_v51 = vadd.f32 %v3685_v26, %v1942_v28  ;;  %v1846_v52 = vadd.f32 %v1845_v55, %v1556_v35 }
 0x1eb   : > { %v1558_v53 = vpop.f32.mrf.mxu0  ;;  %v1876_v50 = vpop.f32.mrf.mxu1 }
 0x1ec   : > { %2397 = vst.msk [vmem:[%s3442_s12 + $0xd4] sm:$0xf] %vm2343_vm2, %v2842_v49  ;;  %v2077_v54 = vmax.f32 %v2013_v51, 0.0  ;;  %v1943_v47 = vmul.f32 %v3679_v25, %v1846_v52 }
 0x1ed   : > { %v1561_v46 = vpop.f32.mrf.mxu0  ;;  %v1877_v0 = vpop.f32.mrf.mxu1 }
 0x1ee   : > { %v2843_v58 = vpack.c.bf16 %v2077_v54, %v2077_v54  ;;  %v2014_v59 = vadd.f32 %v3685_v26, %v1943_v47  ;;  %v1851_v60 = vadd.f32 %v1850_v1, %v1561_v46 }
 0x1ef   : > { %v1563_v62 = vpop.f32.mrf.mxu0  ;;  %v1879_v61 = vpop.f32.mrf.mxu1 }
 0x1f0   : > { %2398 = vst.msk [vmem:[%s3442_s12 + $0xd8] sm:$0xf] %vm2343_vm2, %v2843_v58  ;;  %v2078_v63 = vmax.f32 %v2014_v59, 0.0  ;;  %v1944_v55 = vmul.f32 %v3679_v25, %v1851_v60 }
 0x1f1   : > { %v1564_v56 = vpop.f32.mrf.mxu0 }
 0x1f2   : > { %v2844_v2 = vpack.c.bf16 %v2078_v63, %v2078_v63  ;;  %v2015_v4 = vadd.f32 %v3685_v26, %v1944_v55  ;;  %v1854_v5 = vadd.f32 %v1853_v9, %v1564_v56 }
 0x1f3   : > { %v1566_v6 = vpop.f32.mrf.mxu0 }
 0x1f4   : > { %2399 = vst.msk [vmem:[%s3442_s12 + $0xdc] sm:$0xf] %vm2343_vm2, %v2844_v2  ;;  %v2079_v7 = vmax.f32 %v2015_v4, 0.0  ;;  %v1945_v1 = vmul.f32 %v3679_v25, %v1854_v5 }
 0x1f5   : > { %v1569_v3 = vpop.f32.mrf.mxu0 }
 0x1f6   : > { %v2845_v11 = vpack.c.bf16 %v2079_v7, %v2079_v7  ;;  %v2016_v14 = vadd.f32 %v3685_v26, %v1945_v1  ;;  %v1859_v13 = vadd.f32 %v1858_v12, %v1569_v3 }
 0x1f7   : > { %v1571_v15 = vpop.f32.mrf.mxu0 }
 0x1f8   : > { %2400 = vst.msk [vmem:[%s3442_s12 + $0xe0] sm:$0xf] %vm2343_vm2, %v2845_v11  ;;  %v2080_v8 = vmax.f32 %v2016_v14, 0.0  ;;  %v1946_v9 = vmul.f32 %v3679_v25, %v1859_v13 }
 0x1f9   : > { %v1572_v16 = vpop.f32.mrf.mxu0 }
 0x1fa   : > { %v2846_v19 = vpack.c.bf16 %v2080_v8, %v2080_v8  ;;  %v2017_v20 = vadd.f32 %v3685_v26, %v1946_v9  ;;  %v1862_v22 = vadd.f32 %v1861_v36, %v1572_v16 }
 0x1fb   : > { %v1574_v10 = vpop.f32.mrf.mxu0 }
 0x1fc   : > { %2401 = vst.msk [vmem:[%s3442_s12 + $0xe4] sm:$0xf] %vm2343_vm2, %v2846_v19  ;;  %v2081_v24 = vmax.f32 %v2017_v20, 0.0  ;;  %v1947_v27 = vmul.f32 %v3679_v25, %v1862_v22 }
 0x1fd   : > { %v1577_v12 = vpop.f32.mrf.mxu0 }
 0x1fe   : > { %v2847_v18 = vpack.c.bf16 %v2081_v24, %v2081_v24  ;;  %v2018_v29 = vadd.f32 %v3685_v26, %v1947_v27  ;;  %v1867_v31 = vadd.f32 %v1866_v43, %v1577_v12 }
 0x1ff   : > { %v1579_v32 = vpop.f32.mrf.mxu0 }
 0x200   : > { %2402 = vst.msk [vmem:[%s3442_s12 + $0xe8] sm:$0xf] %vm2343_vm2, %v2847_v18  ;;  %v2082_v33 = vmax.f32 %v2018_v29, 0.0  ;;  %v1948_v17 = vmul.f32 %v3679_v25, %v1867_v31 }
 0x201   : > { %v1580_v23 = vpop.f32.mrf.mxu0 }
 0x202   : > { %v2848_v36 = vpack.c.bf16 %v2082_v33, %v2082_v33  ;;  %v2019_v21 = vadd.f32 %v3685_v26, %v1948_v17  ;;  %v1870_v30 = vadd.f32 %v1869_v45, %v1580_v23 }
 0x203   : > { %v1582_v38 = vpop.f32.mrf.mxu0 }
 0x204   : > { %2403 = vst.msk [vmem:[%s3442_s12 + $0xec] sm:$0xf] %vm2343_vm2, %v2848_v36  ;;  %v2083_v40 = vmax.f32 %v2019_v21, 0.0  ;;  %v1949_v41 = vmul.f32 %v3679_v25, %v1870_v30 }
 0x205   : > { %v1585_v42 = vpop.f32.mrf.mxu0 }
 0x206   : > { %v2849_v34 = vpack.c.bf16 %v2083_v40, %v2083_v40  ;;  %v2020_v39 = vadd.f32 %v3685_v26, %v1949_v41  ;;  %v1875_v43 = vadd.f32 %v1874_v37, %v1585_v42 }
 0x207   : > { %v1587_v44 = vpop.f32.mrf.mxu0 }
 0x208   : > { %2404 = vst.msk [vmem:[%s3442_s12 + $0xf0] sm:$0xf] %vm2343_vm2, %v2849_v34  ;;  %v2084_v28 = vmax.f32 %v2020_v39, 0.0  ;;  %v1950_v35 = vmul.f32 %v3679_v25, %v1875_v43 }
 0x209   : > { %v1588_v48 = vpop.f32.mrf.mxu0 }
 0x20a   : > { %v2850_v49 = vpack.c.bf16 %v2084_v28, %v2084_v28  ;;  %v2021_v51 = vadd.f32 %v3685_v26, %v1950_v35  ;;  %v1878_v52 = vadd.f32 %v1877_v0, %v1588_v48 }
 0x20b   : > { %v1590_v53 = vpop.f32.mrf.mxu0 }
 0x20c   : > { %2405 = vst.msk [vmem:[%s3442_s12 + $0xf4] sm:$0xf] %vm2343_vm2, %v2850_v49  ;;  %v2085_v45 = vmax.f32 %v2021_v51, 0.0  ;;  %v1951_v54 = vmul.f32 %v3679_v25, %v1878_v52 }
 0x20e   : > { %v2851_v47 = vpack.c.bf16 %v2085_v45, %v2085_v45  ;;  %v2022_v46 = vadd.f32 %v3685_v26, %v1951_v54 }
 0x210   : > { %2406 = vst.msk [vmem:[%s3442_s12 + $0xf8] sm:$0xf] %vm2343_vm2, %v2851_v47  ;;  %v2086_v57 = vmax.f32 %v2022_v46, 0.0 }
 0x212   : > { %v2852_v58 = vpack.c.bf16 %v2086_v57, %v2086_v57 }
 0x214   : > { %2407 = vst.msk [vmem:[%s3442_s12 + $0xfc] sm:$0xf] %vm2343_vm2, %v2852_v58 }
 0x215 PF: > { %s14_s17 = sadd.s32 1, %s3115_s17   ;;  %s3774_s15 = smov %s3111_s16 }
 0x216   : > { %p11_p5 = scmp.ge.s32.totalorder %s14_s17, 4   ;;  %s3775_s16 = smov %s3777_s18 }
 0x218   :  { %13 = sbr.rel (!%p11_p5) target bundleno = 2 (0x2), region = 75 }

// kernel: densenet_trick_v3_forward.26
= control target key start
LH: loop header
LB: loop body
LE: loop exit
PB: predicated region body
PF: predicated region fallthrough
CT: control target
= control target key end

     0   :  { %s787_s15 = smov 0   ;;  %s1023_s0 = inlined_call_operand.vmem [shape: bf16[4,9,9,8], index: 0, kind: input, shape index: {}]   ;;  %s1024_s1 = inlined_call_operand.vmem [shape: bf16[4,9,9,8], index: 1, kind: input, shape index: {}]   ;;  %s1025_s2 = inlined_call_operand.vmem [shape: bf16[4,9,9,8], index: 2, kind: input, shape index: {}]   ;;  %s1026_s3 = inlined_call_operand.vmem [shape: bf16[4,9,9,8], index: 3, kind: input, shape index: {}]   ;;  %s1027_s4 = inlined_call_operand.vmem [shape: bf16[4,8,8,8], index: 4, kind: output, shape index: {}]  }
   0x1 LB: > { %s731_s16 = sadd.s32 4294967295, %s760_s15   ;;  %p735_p0 = scmp.ge.s32.totalorder %s760_s15, 1  ;;  %s760_s15 = sphi %s787_s15, %s14_s15  }
   0x2   : > { %p192_p1 = scmp.lt.s32.totalorder %s760_s15, 5 }
   0x4   : > { %p193_p2 = pnand %p735_p0, %p192_p1 }
   0x5   : > { %p233_p3 = scmp.lt.s32.totalorder (!%p193_p2), %s731_s16, 3 }
   0x6   : > { %196 = sbr.rel (%p193_p2) target bundleno = 82 (0x52), region = 36 }
   0xb   : > { %s1031_s16 = smov (!%p233_p3, %s731_s16), 3  ;;  %vm309_vm0 = vsmask.f32 3328  ;;  %vm310_vm1 = vsmask.f32 7440  ;;  %vm631_vm3 = vcmask 60416  }
   0xc   : > { %s798_s17 = smul.u32 72, %s1031_s16  ;;  %vm836_vm2 = vmor %vm309_vm0, %vm310_vm1  ;;  %s744_s30 = sshll.u32 %s1031_s16, 5 }
   0xd   : > { %s917_s7 = scalar_lea.vmem %s1027_s4, %s744_s30 }
   0xe   : > { %s804_s20 = scalar_lea.vmem %s1023_s0, %s798_s17  ;;  %s810_s23 = scalar_lea.vmem %s1025_s2, %s798_s17 }
   0xf   : > { %v258_v0 = vld [vmem:[%s804_s20] sm:$0xf]  ;;  %v259_v1 = vld [vmem:[%s804_s20 + $0x4] sm:$0x1]  ;;  %v815_v2 = vld [vmem:[%s804_s20 + $0x8] sm:$0xf]  ;;  %s858_s26 = scalar_lea.vmem %s1024_s1, %s798_s17  ;;  %s890_s29 = scalar_lea.vmem %s1026_s3, %s798_s17 }
  0x10   : > { %v261_v3 = vld [vmem:[%s804_s20 + $0xc] sm:$0x1]  ;;  %v819_v4 = vld [vmem:[%s810_s23] sm:$0xf]  ;;  %v286_v5 = vld [vmem:[%s810_s23 + $0x4] sm:$0x1] }
  0x11   : > { %v313_v6 = vshrl.u32 %v258_v0, 16  ;;  %v316_v7 = vshll.u32 %v258_v0, 16  ;;  %v322_v8 = vshll.u32 %v259_v1, 16  ;;  %v327_v9 = vshrl.u32 %v815_v2, 16  ;;  %v827_v14 = vld [vmem:[%s804_s20 + $0x10] sm:$0xf] }
  0x12   : > { %v330_v10 = vshll.u32 %v815_v2, 16  ;;  %v336_v11 = vshll.u32 %v261_v3, 16  ;;  %v496_v12 = vshrl.u32 %v819_v4, 16  ;;  %v499_v13 = vshll.u32 %v819_v4, 16  ;;  %v263_v18 = vld [vmem:[%s804_s20 + $0x14] sm:$0x1] }
  0x13   : > { %v315_v15 = vrot.slane %v313_v6, 4  ;;  %v318_v16 = vrot.slane %v316_v7, 5  ;;  %v329_v17 = vrot.slane %v327_v9, 4  ;;  %v324_v19 = vrot.slane %v322_v8, 5  ;;  %v831_v23 = vld [vmem:[%s810_s23 + $0x8] sm:$0xf] }
  0x14   : > { %v332_v20 = vrot.slane %v330_v10, 5  ;;  %v498_v21 = vrot.slane %v496_v12, 4  ;;  %v501_v22 = vrot.slane %v499_v13, 5  ;;  %v338_v25 = vrot.slane %v336_v11, 5  ;;  %v288_v31 = vld [vmem:[%s810_s23 + $0xc] sm:$0x1] }
  0x15   : > { %v319_v24 = vor.u32 %v318_v16, %v315_v15  ;;  %v505_v26 = vshll.u32 %v286_v5, 16  ;;  %v341_v27 = vshrl.u32 %v827_v14, 16  ;;  %v344_v32 = vshll.u32 %v827_v14, 16  ;;  %v848_v42 = vld [vmem:[%s804_s20 + $0x18] sm:$0xf] }
  0x16   : > { %v333_v29 = vor.u32 %v332_v20, %v329_v17  ;;  %v502_v30 = vor.u32 %v501_v22, %v498_v21  ;;  %v350_v33 = vshll.u32 %v263_v18, 16  ;;  %v510_v37 = vshrl.u32 %v831_v23, 16  ;;  %v265_v47 = vld [vmem:[%s804_s20 + $0x1c] sm:$0x1]  ;;  %v867_v52 = vld [vmem:[%s810_s23 + $0x10] sm:$0xf] }
  0x17   : > { %v320_v34 = vrot.slane %v319_v24, 4  ;;  %v842_v35 = vrot.slane %v505_v26, 5  ;;  %v343_v36 = vrot.slane %v341_v27, 4  ;;  %v346_v40 = vrot.slane %v344_v32, 5  ;;  %v276_v61 = vld [vmem:[%s858_s26] sm:$0xf] }
  0x18   : > { %v334_v38 = vrot.slane %v333_v29, 4  ;;  %v845_v39 = vrot.slane %v502_v30, 4  ;;  %v352_v41 = vrot.slane %v350_v33, 5  ;;  %v512_v44 = vrot.slane %v510_v37, 4  ;;  %v277_v5 = vld [vmem:[%s858_s26 + $0x8] sm:$0xf] }
  0x19   : > { %v325_v43 = vsel %vm836_vm2, %v320_v34, %v324_v19  ;;  %v513_v45 = vshll.u32 %v831_v23, 16  ;;  %v519_v46 = vshll.u32 %v288_v31, 16  ;;  %v347_v51 = vor.u32 %v346_v40, %v343_v36  ;;  %v881_v9 = vld [vmem:[%s804_s20 + $0x20] sm:$0xf]  ;;  %v267_v19 = vld [vmem:[%s804_s20 + $0x24] sm:$0x1] }
  0x1a   : > { %v339_v48 = vsel %vm836_vm2, %v334_v38, %v338_v25  ;;  %v432_v49 = vmax.bf16 %v325_v43, %v258_v0  ;;  %v508_v50 = vsel %vm836_vm2, %v845_v39, %v842_v35  ;;  %v355_v56 = vshrl.u32 %v848_v42, 16  ;;  %v290_v0 = vld [vmem:[%s810_s23 + $0x14] sm:$0x1]  ;;  %v896_v22 = vld [vmem:[%s810_s23 + $0x18] sm:$0xf] }
  0x1b   : > { %v433_v53 = vmax.bf16 %v339_v48, %v815_v2  ;;  %v515_v54 = vrot.slane %v513_v45, 5  ;;  %v521_v55 = vrot.slane %v519_v46, 5  ;;  %v348_v58 = vrot.slane %v347_v51, 4  ;;  %v278_v26 = vld [vmem:[%s858_s26 + $0x10] sm:$0xf] }
  0x1c   : > { %v440_v57 = vmax.bf16 %v432_v49, %v815_v2  ;;  %v358_v59 = vshll.u32 %v848_v42, 16  ;;  %v364_v60 = vshll.u32 %v265_v47, 16  ;;  %v357_v1 = vrot.slane %v355_v56, 4  ;;  %v301_v35 = vld [vmem:[%s890_s29] sm:$0xf] }
  0x1d   : > { %v441_v62 = vmax.bf16 %v433_v53, %v827_v14  ;;  %v516_v63 = vor.u32 %v515_v54, %v512_v44  ;;  %v524_v3 = vshrl.u32 %v867_v52, 16  ;;  %v353_v7 = vsel %vm836_vm2, %v348_v58, %v352_v41  ;;  %v302_v40 = vld [vmem:[%s890_s29 + $0x8] sm:$0xf]  ;;  %v292_v45 = vld [vmem:[%s810_s23 + $0x1c] sm:$0x1] }
  0x1e   : > { %v463_v6 = vmax.bf16 %v440_v57, %v339_v48  ;;  %v360_v2 = vrot.slane %v358_v59, 5  ;;  %v366_v8 = vrot.slane %v364_v60, 5  ;;  %v434_v10 = vmax.bf16 %v353_v7, %v827_v14  ;;  %v912_v51 = vld [vmem:[%s804_s20 + $0x28] sm:$0xf]  ;;  %v279_v56 = vld [vmem:[%s858_s26 + $0x18] sm:$0xf] }
  0x1f   : > { %v464_v11 = vmax.bf16 %v441_v62, %v353_v7  ;;  %v517_v12 = vrot.slane %v516_v63, 4  ;;  %v526_v13 = vrot.slane %v524_v3, 4  ;;  %v527_v17 = vshll.u32 %v867_v52, 16  ;;  %v926_v60 = vld [vmem:[%s810_s23 + $0x20] sm:$0xf] }
  0x20   : > { %v471_v15 = vmax.bf16 %v463_v6, %v276_v61  ;;  %v361_v16 = vor.u32 %v360_v2, %v357_v1  ;;  %v533_v18 = vshll.u32 %v290_v0, 16  ;;  %v442_v21 = vmax.bf16 %v434_v10, %v848_v42  ;;  %v303_v7 = vld [vmem:[%s890_s29 + $0x10] sm:$0xf] }
  0x21   : > { %v472_v20 = vmax.bf16 %v464_v11, %v277_v5  ;;  %v522_v14 = vsel %vm836_vm2, %v517_v12, %v521_v55  ;;  %v369_v24 = vshrl.u32 %v881_v9, 16  ;;  %v529_v29 = vrot.slane %v527_v17, 5  ;;  %v269_v55 = vld [vmem:[%s804_s20 + $0x2c] sm:$0x1] }
  0x22   : > { %v479_v25 = vmax.bf16 %v471_v15, %v277_v5  ;;  %v362_v27 = vrot.slane %v361_v16, 4  ;;  %v535_v30 = vrot.slane %v533_v18, 5  ;;  %v372_v33 = vshll.u32 %v881_v9, 16  ;;  %v294_v16 = vld [vmem:[%s810_s23 + $0x24] sm:$0x1] }
  0x23   : > { %v480_v31 = vmax.bf16 %v472_v20, %v278_v26  ;;  %v371_v32 = vrot.slane %v369_v24, 4  ;;  %v378_v34 = vshll.u32 %v267_v19, 16  ;;  %v530_v38 = vor.u32 %v529_v29, %v526_v13  ;;  %v942_v18 = vld [vmem:[%s804_s20 + $0x30] sm:$0xf] }
  0x24   : > { %v487_v36 = vmax.bf16 %v479_v25, %v819_v4  ;;  %v367_v37 = vsel %vm836_vm2, %v362_v27, %v366_v8  ;;  %v538_v39 = vshrl.u32 %v896_v22, 16  ;;  %v374_v46 = vrot.slane %v372_v33, 5 }
  0x25   : > { %v488_v41 = vmax.bf16 %v480_v31, %v831_v23  ;;  %v435_v43 = vmax.bf16 %v367_v37, %v848_v42  ;;  %v465_v44 = vmax.bf16 %v442_v21, %v367_v37  ;;  %v531_v48 = vrot.slane %v530_v38, 4  ;;  %v280_v21 = vld [vmem:[%s858_s26 + $0x20] sm:$0xf] }
  0x26   : > { %v615_v47 = vmax.bf16 %v508_v50, %v487_v36  ;;  %v380_v4 = vrot.slane %v378_v34, 5  ;;  %v540_v49 = vrot.slane %v538_v39, 4  ;;  %v375_v42 = vor.u32 %v374_v46, %v371_v32  ;;  %v949_v32 = vld [vmem:[%s810_s23 + $0x28] sm:$0xf] }
  0x27   : > { %v616_v23 = vmax.bf16 %v522_v14, %v488_v41  ;;  %v473_v53 = vmax.bf16 %v465_v44, %v278_v26  ;;  %v443_v54 = vmax.bf16 %v435_v43, %v881_v9  ;;  %v536_v57 = vsel %vm836_vm2, %v531_v48, %v535_v30  ;;  %v304_v48 = vld [vmem:[%s890_s29 + $0x18] sm:$0xf] }
  0x28   : > { %v623_v50 = vmax.bf16 %v615_v47, %v301_v35  ;;  %v541_v58 = vshll.u32 %v896_v22, 16  ;;  %v547_v59 = vshll.u32 %v292_v45, 16  ;;  %v376_v63 = vrot.slane %v375_v42, 4  ;;  %v296_v45 = vld [vmem:[%s810_s23 + $0x2c] sm:$0x1] }
  0x29   : > { %v624_v61 = vmax.bf16 %v616_v23, %v302_v40  ;;  %v481_v62 = vmax.bf16 %v473_v53, %v279_v56  ;;  %v383_v0 = vshrl.u32 %v912_v51, 16  ;;  %v386_v5 = vshll.u32 %v912_v51, 16  ;;  %v965_v42 = vld [vmem:[%s804_s20 + $0x38] sm:$0xf] }
  0x2a   : > { %632 = vst.msk [vmem:[%s917_s7] sm:$0xf] %vm631_vm3, %v623_v50  ;;  %v543_v1 = vrot.slane %v541_v58, 5  ;;  %v549_v3 = vrot.slane %v547_v59, 5  ;;  %v392_v6 = vshll.u32 %v269_v55, 16  ;;  %v381_v8 = vsel %vm836_vm2, %v376_v63, %v380_v4 }
  0x2b   : > { %633 = vst.msk [vmem:[%s917_s7 + $0x4] sm:$0xf] %vm631_vm3, %v624_v61  ;;  %v489_v2 = vmax.bf16 %v481_v62, %v867_v52  ;;  %v385_v10 = vrot.slane %v383_v0, 4  ;;  %v552_v11 = vshrl.u32 %v926_v60, 16  ;;  %v436_v12 = vmax.bf16 %v381_v8, %v881_v9  ;;  %v271_v9 = vld [vmem:[%s804_s20 + $0x34] sm:$0x1] }
  0x2c   : > { %v466_v13 = vmax.bf16 %v443_v54, %v381_v8  ;;  %v544_v15 = vor.u32 %v543_v1, %v540_v49  ;;  %v388_v17 = vrot.slane %v386_v5, 5  ;;  %v394_v20 = vrot.slane %v392_v6, 5  ;;  %v973_v61 = vld [vmem:[%s810_s23 + $0x30] sm:$0xf]  ;;  %v281_v63 = vld [vmem:[%s858_s26 + $0x28] sm:$0xf] }
  0x2d   : > { %v617_v19 = vmax.bf16 %v536_v57, %v489_v2  ;;  %v554_v14 = vrot.slane %v552_v11, 4  ;;  %v555_v52 = vshll.u32 %v926_v60, 16  ;;  %v444_v27 = vmax.bf16 %v436_v12, %v912_v51 }
  0x2e   : > { %v474_v24 = vmax.bf16 %v466_v13, %v279_v56  ;;  %v545_v25 = vrot.slane %v544_v15, 4  ;;  %v389_v26 = vor.u32 %v388_v17, %v385_v10  ;;  %v561_v31 = vshll.u32 %v294_v16, 16  ;;  %v273_v56 = vld [vmem:[%s804_s20 + $0x3c] sm:$0x1]  ;;  %v298_v17 = vld [vmem:[%s810_s23 + $0x34] sm:$0x1] }
  0x2f   : > { %v625_v29 = vmax.bf16 %v617_v19, %v303_v7  ;;  %v557_v30 = vrot.slane %v555_v52, 5  ;;  %v397_v33 = vshrl.u32 %v942_v18, 16  ;;  %v400_v37 = vshll.u32 %v942_v18, 16 }
  0x30   : > { %v482_v34 = vmax.bf16 %v474_v24, %v280_v21  ;;  %v550_v35 = vsel %vm836_vm2, %v545_v25, %v549_v3  ;;  %v390_v36 = vrot.slane %v389_v26, 4  ;;  %v563_v39 = vrot.slane %v561_v31, 5 }
  0x31   : > { %634 = vst.msk [vmem:[%s917_s7 + $0x8] sm:$0xf] %vm631_vm3, %v625_v29  ;;  %v558_v38 = vor.u32 %v557_v30, %v554_v14  ;;  %v399_v40 = vrot.slane %v397_v33, 4  ;;  %v406_v41 = vshll.u32 %v271_v9, 16  ;;  %v402_v46 = vrot.slane %v400_v37, 5 }
  0x32   : > { %v490_v43 = vmax.bf16 %v482_v34, %v896_v22  ;;  %v395_v44 = vsel %vm836_vm2, %v390_v36, %v394_v20  ;;  %v566_v47 = vshrl.u32 %v949_v32, 16  ;;  %v569_v50 = vshll.u32 %v949_v32, 16  ;;  %v274_v20 = vld [vmem:[%s804_s20 + $0x40] sm:$0xf]  ;;  %v275_v30 = vld [vmem:[%s804_s20 + $0x44] sm:$0x1] }
  0x33   : > { %v437_v4 = vmax.bf16 %v395_v44, %v912_v51  ;;  %v467_v49 = vmax.bf16 %v444_v27, %v395_v44  ;;  %v559_v23 = vrot.slane %v558_v38, 4  ;;  %v408_v53 = vrot.slane %v406_v41, 5  ;;  %v305_v14 = vld [vmem:[%s890_s29 + $0x20] sm:$0xf]  ;;  %v282_v27 = vld [vmem:[%s858_s26 + $0x30] sm:$0xf] }
  0x34   : > { %v618_v54 = vmax.bf16 %v550_v35, %v490_v43  ;;  %v403_v55 = vor.u32 %v402_v46, %v399_v40  ;;  %v568_v22 = vrot.slane %v566_v47, 4  ;;  %v575_v51 = vshll.u32 %v296_v45, 16  ;;  %v299_v34 = vld [vmem:[%s810_s23 + $0x38] sm:$0xf] }
  0x35   : > { %v475_v57 = vmax.bf16 %v467_v49, %v280_v21  ;;  %v564_v58 = vsel %vm836_vm2, %v559_v23, %v563_v39  ;;  %v445_v59 = vmax.bf16 %v437_v4, %v942_v18  ;;  %v571_v1 = vrot.slane %v569_v50, 5  ;;  %v306_v4 = vld [vmem:[%s890_s29 + $0x28] sm:$0xf] }
  0x36   : > { %v626_v62 = vmax.bf16 %v618_v54, %v304_v48  ;;  %v404_v0 = vrot.slane %v403_v55, 4  ;;  %v411_v3 = vshrl.u32 %v965_v42, 16  ;;  %v577_v6 = vrot.slane %v575_v51, 5  ;;  %v300_v54 = vld [vmem:[%s810_s23 + $0x3c] sm:$0x1] }
  0x37   : > { %v483_v5 = vmax.bf16 %v475_v57, %v281_v63  ;;  %v414_v7 = vshll.u32 %v965_v42, 16  ;;  %v420_v2 = vshll.u32 %v273_v56, 16  ;;  %v572_v10 = vor.u32 %v571_v1, %v568_v22  ;;  %v283_v51 = vld [vmem:[%s858_s26 + $0x38] sm:$0xf] }
  0x38   : > { %635 = vst.msk [vmem:[%s917_s7 + $0xc] sm:$0xf] %vm631_vm3, %v626_v62  ;;  %v409_v8 = vsel %vm836_vm2, %v404_v0, %v408_v53  ;;  %v413_v11 = vrot.slane %v411_v3, 4  ;;  %v580_v12 = vshrl.u32 %v973_v61, 16  ;;  %v583_v25 = vshll.u32 %v973_v61, 16 }
  0x39   : > { %v491_v13 = vmax.bf16 %v483_v5, %v926_v60  ;;  %v438_v15 = vmax.bf16 %v409_v8, %v942_v18  ;;  %v468_v16 = vmax.bf16 %v445_v59, %v409_v8  ;;  %v416_v19 = vrot.slane %v414_v7, 5  ;;  %v284_v8 = vld [vmem:[%s858_s26 + $0x40] sm:$0xf] }
  0x3a   : > { %v573_v52 = vrot.slane %v572_v10, 4  ;;  %v422_v21 = vrot.slane %v420_v2, 5  ;;  %v582_v24 = vrot.slane %v580_v12, 4  ;;  %v585_v31 = vrot.slane %v583_v25, 5  ;;  %v307_v2 = vld [vmem:[%s890_s29 + $0x30] sm:$0xf] }
  0x3b   : > { %v619_v26 = vmax.bf16 %v564_v58, %v491_v13  ;;  %v476_v9 = vmax.bf16 %v468_v16, %v281_v63  ;;  %v417_v29 = vor.u32 %v416_v19, %v413_v11  ;;  %v446_v60 = vmax.bf16 %v438_v15, %v965_v42 }
  0x3c   : > { %v578_v18 = vsel %vm836_vm2, %v573_v52, %v577_v6  ;;  %v589_v33 = vshll.u32 %v298_v17, 16  ;;  %v449_v35 = vshrl.u32 %v274_v20, 16  ;;  %v452_v39 = vshll.u32 %v274_v20, 16 }
  0x3d   : > { %v627_v36 = vmax.bf16 %v619_v26, %v305_v14  ;;  %v484_v37 = vmax.bf16 %v476_v9, %v282_v27  ;;  %v418_v38 = vrot.slane %v417_v29, 4  ;;  %v586_v40 = vor.u32 %v585_v31, %v582_v24 }
  0x3e   : > { %v591_v41 = vrot.slane %v589_v33, 5  ;;  %v451_v43 = vrot.slane %v449_v35, 4  ;;  %v458_v44 = vshll.u32 %v275_v30, 16  ;;  %v454_v47 = vrot.slane %v452_v39, 5 }
  0x3f   : > { %636 = vst.msk [vmem:[%s917_s7 + $0x10] sm:$0xf] %vm631_vm3, %v627_v36  ;;  %v492_v45 = vmax.bf16 %v484_v37, %v949_v32  ;;  %v423_v46 = vsel %vm836_vm2, %v418_v38, %v422_v21  ;;  %v594_v48 = vshrl.u32 %v299_v34, 16  ;;  %v587_v53 = vrot.slane %v586_v40, 4 }
  0x40   : > { %v439_v49 = vmax.bf16 %v423_v46, %v965_v42  ;;  %v469_v23 = vmax.bf16 %v446_v60, %v423_v46  ;;  %v460_v55 = vrot.slane %v458_v44, 5  ;;  %v455_v50 = vor.u32 %v454_v47, %v451_v43 }
  0x41   : > { %v620_v22 = vmax.bf16 %v578_v18, %v492_v45  ;;  %v596_v56 = vrot.slane %v594_v48, 4  ;;  %v597_v57 = vshll.u32 %v299_v34, 16  ;;  %v603_v0 = vshll.u32 %v300_v54, 16 }
  0x42   : > { %v477_v32 = vmax.bf16 %v469_v23, %v282_v27  ;;  %v447_v58 = vmax.bf16 %v439_v49, %v274_v20  ;;  %v456_v62 = vrot.slane %v455_v50, 4  ;;  %v592_v42 = vsel %vm836_vm2, %v587_v53, %v591_v41  ;;  %v308_v20 = vld [vmem:[%s890_s29 + $0x38] sm:$0xf] }
  0x43   : > { %v628_v59 = vmax.bf16 %v620_v22, %v306_v4  ;;  %v599_v63 = vrot.slane %v597_v57, 5  ;;  %v605_v11 = vrot.slane %v603_v0, 5 }
  0x44   : > { %v485_v1 = vmax.bf16 %v477_v32, %v283_v51  ;;  %v461_v3 = vsel %vm836_vm2, %v456_v62, %v460_v55 }
  0x45   : > { %637 = vst.msk [vmem:[%s917_s7 + $0x14] sm:$0xf] %vm631_vm3, %v628_v59  ;;  %v600_v5 = vor.u32 %v599_v63, %v596_v56  ;;  %v470_v7 = vmax.bf16 %v461_v3, %v447_v58 }
  0x46   : > { %v493_v6 = vmax.bf16 %v485_v1, %v973_v61 }
  0x47   : > { %v601_v10 = vrot.slane %v600_v5, 4  ;;  %v478_v13 = vmax.bf16 %v470_v7, %v283_v51 }
  0x48   : > { %v621_v12 = vmax.bf16 %v592_v42, %v493_v6 }
  0x49   : > { %v486_v16 = vmax.bf16 %v478_v13, %v284_v8  ;;  %v606_v17 = vsel %vm836_vm2, %v601_v10, %v605_v11 }
  0x4a   : > { %v629_v15 = vmax.bf16 %v621_v12, %v307_v2 }
  0x4b   : > { %v494_v19 = vmax.bf16 %v486_v16, %v299_v34 }
  0x4c   : > { %638 = vst.msk [vmem:[%s917_s7 + $0x18] sm:$0xf] %vm631_vm3, %v629_v15 }
  0x4d   : > { %v622_v14 = vmax.bf16 %v606_v17, %v494_v19 }
  0x4f   : > { %v630_v52 = vmax.bf16 %v622_v14, %v308_v20 }
  0x51   : > { %639 = vst.msk [vmem:[%s917_s7 + $0x1c] sm:$0xf] %vm631_vm3, %v630_v52 }
  0x52 PF: > { %s14_s15 = sadd.s32 1, %s760_s15  }
  0x53   : > { %p11_p4 = scmp.ge.s32.totalorder %s14_s15, 6  }
  0x55   :  { %13 = sbr.rel (!%p11_p4) target bundleno = 1 (0x1), region = 75 }

// kernel: densenet_trick_v3_forward.27
= control target key start
LH: loop header
LB: loop body
LE: loop exit
PB: predicated region body
PF: predicated region fallthrough
CT: control target
= control target key end

     0   :  { %s1018_s21 = smov 0   ;;  %s1020_s22 = smov 0   ;;  %s1197_s0 = inlined_call_operand.vmem [shape: bf16[256,8], index: 0, kind: input, shape index: {}]   ;;  %s1198_s1 = inlined_call_operand.vmem [shape: bf16[8,16], index: 1, kind: input, shape index: {}]   ;;  %s1199_s2 = inlined_call_operand.vmem [shape: f32[1,8], index: 2, kind: input, shape index: {}]   ;;  %s1200_s3 = inlined_call_operand.vmem [shape: f32[1,8], index: 3, kind: input, shape index: {}]   ;;  %s1201_s4 = inlined_call_operand.vmem [shape: f32[1,16], index: 4, kind: input, shape index: {}]   ;;  %s1202_s5 = inlined_call_operand.vmem [shape: f32[1,16], index: 5, kind: input, shape index: {}]   ;;  %s1203_s6 = inlined_call_operand.vmem [shape: bf16[256,16], index: 6, kind: output, shape index: {}]  }
   0x1   :  { %s1022_s23 = smov 0  }
   0x2 LB: > { %s28_s24 = sadd.s32 1, %s977_s22  ;;  %p814_p0 = scmp.ge.s32.totalorder %s981_s23, 1  ;;  %s981_s23 = sphi %s1022_s23, %s16_s23   ;;  %s977_s22 = sphi %s1020_s22, %s1205_s22   ;;  %s973_s21 = sphi %s1018_s21, %s1204_s21  }
   0x3   : > { %p30_p1 = scmp.ge.s32.totalorder %s28_s24, 2  ;;  %p252_p2 = scmp.lt.s32.totalorder %s981_s23, 3 }
   0x5   : > { %s1207_s24 = smov (%p30_p1, %s28_s24), 0  ;;  %p253_p3 = pnand %p814_p0, %p252_p2 }
   0x6   : > { %s815_s27 = sshll.u32 (!%p253_p3), %s973_s21, 4 }
   0x7   : > { %256 = sbr.rel (%p253_p3) target bundleno = 245 (0xf5), region = 44  ;;  %p296_p4 = scmp.lt.s32.totalorder (!%p253_p3), %s815_s27, 31 }
   0xc   : > { %v423_v0 = vld [vmem:[%s1198_s1] sm:$0xf]  ;;  %vm449_vm0 = vcmask 1043456   ;;  %s1209_s27 = smov (!%p296_p4, %s815_s27), 31  ;;  %vm424_vm1 = vcmask 64512   ;;  %vm676_vm2 = vcmask 125952  }
   0xd   : > { %933 = vmatprep.subr.msk.bf16.mxu0 %vm449_vm0, %v423_v0  ;;  %934 = vmatprep.subr.msk.bf16.mxu1 %vm449_vm0, %v423_v0  ;;  %v451_v1 = vsel %vm449_vm0, %v423_v0, 0  ;;  %s816_s28 = sshll.u32 %s1209_s27, 2  ;;  %v1052_v2 = vld [vmem:[%s1199_s2] ss:$0 sm:$0xff] }
   0xe   : > { %914 = vmatpush3.bf16.msra.mxu0 %v451_v1  ;;  %932 = vmatpush3.bf16.msra.mxu1 %v451_v1  ;;  %s1047_s7 = scalar_lea.vmem %s1197_s0, %s816_s28  ;;  %v1061_v11 = vld [vmem:[%s1200_s3] ss:$0 sm:$0xff]  ;;  %s1130_s18 = scalar_lea.vmem %s1203_s6, %s816_s28 }
   0xf   : > { %v866_v3 = vld [vmem:[%s1047_s7] sm:$0xff]   ;;  %v897_v5 = vld [vmem:[%s1047_s7 + $0x8] sm:$0xff]   ;;  %v898_v32 = vld [vmem:[%s1047_s7 + $0x10] sm:$0xff]  }
  0x10   : > { %v900_v4 = vld [vmem:[%s1047_s7 + $0x20] sm:$0xff]   ;;  %v867_v6 = vunpack.c.l.bf16 %v866_v3  ;;  %v868_v7 = vunpack.c.h.bf16 %v866_v3  ;;  %v901_v10 = vld [vmem:[%s1047_s7 + $0x28] sm:$0xff]   ;;  %v871_v12 = vunpack.c.l.bf16 %v897_v5  ;;  %v872_v13 = vunpack.c.h.bf16 %v897_v5  ;;  %v902_v37 = vld [vmem:[%s1047_s7 + $0x30] sm:$0xff]  }
  0x11   : > { %v883_v8 = vunpack.c.l.bf16 %v900_v4  ;;  %v884_v9 = vunpack.c.h.bf16 %v900_v4  ;;  %v887_v14 = vunpack.c.l.bf16 %v901_v10  ;;  %v888_v15 = vunpack.c.h.bf16 %v901_v10  ;;  %v899_v42 = vld [vmem:[%s1047_s7 + $0x18] sm:$0xff]  }
  0x12   : > { %v360_v16 = vmul.f32 %v867_v6, %v1052_v2  ;;  %v361_v17 = vmul.f32 %v868_v7, %v1052_v2  ;;  %v362_v20 = vmul.f32 %v871_v12, %v1052_v2  ;;  %v363_v21 = vmul.f32 %v872_v13, %v1052_v2  ;;  %v903_v47 = vld [vmem:[%s1047_s7 + $0x38] sm:$0xff]  }
  0x13   : > { %v368_v18 = vmul.f32 %v883_v8, %v1052_v2  ;;  %v369_v19 = vmul.f32 %v884_v9, %v1052_v2  ;;  %v370_v22 = vmul.f32 %v887_v14, %v1052_v2  ;;  %v371_v23 = vmul.f32 %v888_v15, %v1052_v2 }
  0x14   : > { %v383_v24 = vadd.f32 %v1061_v11, %v360_v16  ;;  %v384_v25 = vadd.f32 %v1061_v11, %v361_v17  ;;  %v385_v28 = vadd.f32 %v1061_v11, %v362_v20  ;;  %v386_v29 = vadd.f32 %v1061_v11, %v363_v21 }
  0x15   : > { %v391_v26 = vadd.f32 %v1061_v11, %v368_v18  ;;  %v392_v27 = vadd.f32 %v1061_v11, %v369_v19  ;;  %v393_v30 = vadd.f32 %v1061_v11, %v370_v22  ;;  %v394_v31 = vadd.f32 %v1061_v11, %v371_v23  ;;  %v1115_v22 = vld [vmem:[%s1202_s5] ss:$0 sm:$0xff] }
  0x16   : > { %v399_v33 = vmax.f32 %v383_v24, 0.0  ;;  %v400_v34 = vmax.f32 %v384_v25, 0.0  ;;  %v401_v38 = vmax.f32 %v385_v28, 0.0  ;;  %v402_v39 = vmax.f32 %v386_v29, 0.0 }
  0x17   : > { %v407_v35 = vmax.f32 %v391_v26, 0.0  ;;  %v408_v36 = vmax.f32 %v392_v27, 0.0  ;;  %v409_v40 = vmax.f32 %v393_v30, 0.0  ;;  %v410_v41 = vmax.f32 %v394_v31, 0.0 }
  0x18   : > { %v415_v43 = vpack.c.bf16 %v400_v34, %v399_v33  ;;  %v875_v45 = vunpack.c.l.bf16 %v898_v32  ;;  %v876_v46 = vunpack.c.h.bf16 %v898_v32  ;;  %v416_v48 = vpack.c.bf16 %v402_v39, %v401_v38 }
  0x19   : > { %v419_v44 = vpack.c.bf16 %v408_v36, %v407_v35  ;;  %v420_v49 = vpack.c.bf16 %v410_v41, %v409_v40  ;;  %v891_v50 = vunpack.c.l.bf16 %v902_v37  ;;  %v892_v51 = vunpack.c.h.bf16 %v902_v37 }
  0x1a   : > { %915 = vmatprep.mubr.msk.bf16.mxu0 %vm424_vm1, %v415_v43  ;;  %v364_v52 = vmul.f32 %v875_v45, %v1052_v2  ;;  %v365_v53 = vmul.f32 %v876_v46, %v1052_v2  ;;  %v879_v54 = vunpack.c.l.bf16 %v899_v42  ;;  %v880_v55 = vunpack.c.h.bf16 %v899_v42 }
  0x1b   : > { %923 = vmatprep.mubr.msk.bf16.mxu1 %vm424_vm1, %v419_v44  ;;  %916 = vmatmul.mubr.msk.bf16.vlgmr.msra.gmra.mxu0 %vm424_vm1, %v416_v48  ;;  %v372_v56 = vmul.f32 %v891_v50, %v1052_v2  ;;  %v373_v57 = vmul.f32 %v892_v51, %v1052_v2  ;;  %v895_v58 = vunpack.c.l.bf16 %v903_v47  ;;  %v896_v59 = vunpack.c.h.bf16 %v903_v47 }
  0x1c   : > { %924 = vmatmul.mubr.msk.bf16.vlgmr.msra.gmra.mxu1 %vm424_vm1, %v420_v49  ;;  %v387_v60 = vadd.f32 %v1061_v11, %v364_v52  ;;  %v388_v61 = vadd.f32 %v1061_v11, %v365_v53  ;;  %v366_v62 = vmul.f32 %v879_v54, %v1052_v2  ;;  %v367_v63 = vmul.f32 %v880_v55, %v1052_v2 }
  0x1d   : > { %v395_v0 = vadd.f32 %v1061_v11, %v372_v56  ;;  %v396_v1 = vadd.f32 %v1061_v11, %v373_v57  ;;  %v374_v3 = vmul.f32 %v895_v58, %v1052_v2  ;;  %v375_v4 = vmul.f32 %v896_v59, %v1052_v2 }
  0x1e   : > { %v403_v5 = vmax.f32 %v387_v60, 0.0  ;;  %v404_v6 = vmax.f32 %v388_v61, 0.0  ;;  %v389_v7 = vadd.f32 %v1061_v11, %v366_v62  ;;  %v390_v8 = vadd.f32 %v1061_v11, %v367_v63 }
  0x1f   : > { %v411_v9 = vmax.f32 %v395_v0, 0.0  ;;  %v412_v10 = vmax.f32 %v396_v1, 0.0  ;;  %v397_v12 = vadd.f32 %v1061_v11, %v374_v3  ;;  %v398_v13 = vadd.f32 %v1061_v11, %v375_v4  ;;  %v1110_v11 = vld [vmem:[%s1201_s4] ss:$0 sm:$0xff] }
  0x20   : > { %v417_v14 = vpack.c.bf16 %v404_v6, %v403_v5  ;;  %v405_v15 = vmax.f32 %v389_v7, 0.0  ;;  %v406_v16 = vmax.f32 %v390_v8, 0.0 }
  0x21   : > { %v421_v17 = vpack.c.bf16 %v412_v10, %v411_v9  ;;  %v413_v18 = vmax.f32 %v397_v12, 0.0  ;;  %v414_v19 = vmax.f32 %v398_v13, 0.0 }
  0x22   : > { %919 = vmatprep.mubr.msk.bf16.mxu0 %vm424_vm1, %v417_v14  ;;  %v418_v2 = vpack.c.bf16 %v406_v16, %v405_v15 }
  0x23   : > { %927 = vmatprep.mubr.msk.bf16.mxu1 %vm424_vm1, %v421_v17  ;;  %v422_v20 = vpack.c.bf16 %v414_v19, %v413_v18 }
  0x24   : > { %920 = vmatmul.mubr.msk.bf16.gmra.mxu0 %vm424_vm1, %v418_v2 }
  0x25   : > { %928 = vmatmul.mubr.msk.bf16.gmra.mxu1 %vm424_vm1, %v422_v20 }
  0xdb   : > { %v917_v21 = vpop.f32.mrf.mxu0 }
  0xdc   : > { %v925_v23 = vpop.f32.mrf.mxu1  ;;  %v559_v24 = vmul.f32 %v917_v21, %v1110_v11 }
  0xdd   : > { %v567_v25 = vmul.f32 %v925_v23, %v1110_v11  ;;  %v487_v26 = vpop.f32.mrf.mxu0 }
  0xde   : > { %v519_v27 = vpop.f32.mrf.mxu1  ;;  %v582_v28 = vadd.f32 %v1115_v22, %v559_v24  ;;  %v557_v30 = vmul.f32 %v1110_v11, %v487_v26 }
  0xdf   : > { %v590_v29 = vadd.f32 %v1115_v22, %v567_v25  ;;  %v565_v31 = vmul.f32 %v1110_v11, %v519_v27  ;;  %v918_v32 = vpop.f32.mrf.mxu0 }
  0xe0   : > { %v926_v33 = vpop.f32.mrf.mxu1  ;;  %v598_v34 = vmax.f32 %v582_v28, 0.0  ;;  %v580_v36 = vadd.f32 %v1115_v22, %v557_v30  ;;  %v560_v38 = vmul.f32 %v918_v32, %v1110_v11 }
  0xe1   : > { %v606_v35 = vmax.f32 %v590_v29, 0.0  ;;  %v588_v37 = vadd.f32 %v1115_v22, %v565_v31  ;;  %v568_v39 = vmul.f32 %v926_v33, %v1110_v11  ;;  %v490_v40 = vpop.f32.mrf.mxu0 }
  0xe2   : > { %v522_v41 = vpop.f32.mrf.mxu1  ;;  %v851_v42 = vpack.c.bf16 %v598_v34, %v598_v34  ;;  %v596_v44 = vmax.f32 %v580_v36, 0.0  ;;  %v583_v46 = vadd.f32 %v1115_v22, %v560_v38  ;;  %v558_v48 = vmul.f32 %v1110_v11, %v490_v40 }
  0xe3   : > { %v859_v43 = vpack.c.bf16 %v606_v35, %v606_v35  ;;  %v604_v45 = vmax.f32 %v588_v37, 0.0  ;;  %v591_v47 = vadd.f32 %v1115_v22, %v568_v39  ;;  %v566_v49 = vmul.f32 %v1110_v11, %v522_v41 }
  0xe4   : > { %679 = vst.msk [vmem:[%s1130_s18 + $0x8] sm:$0xf] %vm676_vm2, %v851_v42  ;;  %v849_v50 = vpack.c.bf16 %v596_v44, %v596_v44  ;;  %v921_v52 = vpop.f32.mrf.mxu0  ;;  %v599_v53 = vmax.f32 %v583_v46, 0.0  ;;  %v581_v55 = vadd.f32 %v1115_v22, %v558_v48 }
  0xe5   : > { %687 = vst.msk [vmem:[%s1130_s18 + $0x28] sm:$0xf] %vm676_vm2, %v859_v43  ;;  %v857_v51 = vpack.c.bf16 %v604_v45, %v604_v45  ;;  %v607_v54 = vmax.f32 %v591_v47, 0.0  ;;  %v589_v56 = vadd.f32 %v1115_v22, %v566_v49  ;;  %v929_v57 = vpop.f32.mrf.mxu1  ;;  %v563_v58 = vmul.f32 %v921_v52, %v1110_v11 }
  0xe6   : > { %677 = vst.msk [vmem:[%s1130_s18] sm:$0xf] %vm676_vm2, %v849_v50  ;;  %v571_v59 = vmul.f32 %v929_v57, %v1110_v11  ;;  %v503_v60 = vpop.f32.mrf.mxu0  ;;  %v852_v61 = vpack.c.bf16 %v599_v53, %v599_v53  ;;  %v597_v63 = vmax.f32 %v581_v55, 0.0 }
  0xe7   : > { %685 = vst.msk [vmem:[%s1130_s18 + $0x20] sm:$0xf] %vm676_vm2, %v857_v51  ;;  %v860_v62 = vpack.c.bf16 %v607_v54, %v607_v54  ;;  %v605_v0 = vmax.f32 %v589_v56, 0.0  ;;  %v535_v1 = vpop.f32.mrf.mxu1  ;;  %v586_v3 = vadd.f32 %v1115_v22, %v563_v58  ;;  %v561_v5 = vmul.f32 %v1110_v11, %v503_v60 }
  0xe8   : > { %v594_v4 = vadd.f32 %v1115_v22, %v571_v59  ;;  %v569_v6 = vmul.f32 %v1110_v11, %v535_v1  ;;  %v922_v7 = vpop.f32.mrf.mxu0  ;;  %680 = vst.msk [vmem:[%s1130_s18 + $0xc] sm:$0xf] %vm676_vm2, %v852_v61  ;;  %v850_v8 = vpack.c.bf16 %v597_v63, %v597_v63 }
  0xe9   : > { %688 = vst.msk [vmem:[%s1130_s18 + $0x2c] sm:$0xf] %vm676_vm2, %v860_v62  ;;  %v858_v9 = vpack.c.bf16 %v605_v0, %v605_v0  ;;  %v564_v10 = vmul.f32 %v922_v7, %v1110_v11  ;;  %v930_v12 = vpop.f32.mrf.mxu1  ;;  %v602_v13 = vmax.f32 %v586_v3, 0.0  ;;  %v584_v15 = vadd.f32 %v1115_v22, %v561_v5 }
  0xea   : > { %v610_v14 = vmax.f32 %v594_v4, 0.0  ;;  %v592_v16 = vadd.f32 %v1115_v22, %v569_v6  ;;  %v506_v17 = vpop.f32.mrf.mxu0  ;;  %678 = vst.msk [vmem:[%s1130_s18 + $0x4] sm:$0xf] %vm676_vm2, %v850_v8  ;;  %v572_v19 = vmul.f32 %v930_v12, %v1110_v11 }
  0xeb   : > { %686 = vst.msk [vmem:[%s1130_s18 + $0x24] sm:$0xf] %vm676_vm2, %v858_v9  ;;  %v587_v18 = vadd.f32 %v1115_v22, %v564_v10  ;;  %v562_v2 = vmul.f32 %v1110_v11, %v506_v17  ;;  %v538_v20 = vpop.f32.mrf.mxu1  ;;  %v855_v21 = vpack.c.bf16 %v602_v13, %v602_v13  ;;  %v600_v24 = vmax.f32 %v584_v15, 0.0 }
  0xec   : > { %v863_v23 = vpack.c.bf16 %v610_v14, %v610_v14  ;;  %v608_v25 = vmax.f32 %v592_v16, 0.0  ;;  %v595_v27 = vadd.f32 %v1115_v22, %v572_v19  ;;  %v570_v29 = vmul.f32 %v1110_v11, %v538_v20 }
  0xed   : > { %v603_v26 = vmax.f32 %v587_v18, 0.0  ;;  %v585_v28 = vadd.f32 %v1115_v22, %v562_v2  ;;  %683 = vst.msk [vmem:[%s1130_s18 + $0x18] sm:$0xf] %vm676_vm2, %v855_v21  ;;  %v853_v30 = vpack.c.bf16 %v600_v24, %v600_v24 }
  0xee   : > { %691 = vst.msk [vmem:[%s1130_s18 + $0x38] sm:$0xf] %vm676_vm2, %v863_v23  ;;  %v861_v31 = vpack.c.bf16 %v608_v25, %v608_v25  ;;  %v611_v33 = vmax.f32 %v595_v27, 0.0  ;;  %v593_v35 = vadd.f32 %v1115_v22, %v570_v29 }
  0xef   : > { %v856_v32 = vpack.c.bf16 %v603_v26, %v603_v26  ;;  %v601_v34 = vmax.f32 %v585_v28, 0.0  ;;  %681 = vst.msk [vmem:[%s1130_s18 + $0x10] sm:$0xf] %vm676_vm2, %v853_v30 }
  0xf0   : > { %689 = vst.msk [vmem:[%s1130_s18 + $0x30] sm:$0xf] %vm676_vm2, %v861_v31  ;;  %v864_v11 = vpack.c.bf16 %v611_v33, %v611_v33  ;;  %v609_v37 = vmax.f32 %v593_v35, 0.0 }
  0xf1   : > { %684 = vst.msk [vmem:[%s1130_s18 + $0x1c] sm:$0xf] %vm676_vm2, %v856_v32  ;;  %v854_v36 = vpack.c.bf16 %v601_v34, %v601_v34 }
  0xf2   : > { %692 = vst.msk [vmem:[%s1130_s18 + $0x3c] sm:$0xf] %vm676_vm2, %v864_v11  ;;  %v862_v38 = vpack.c.bf16 %v609_v37, %v609_v37 }
  0xf3   : > { %682 = vst.msk [vmem:[%s1130_s18 + $0x14] sm:$0xf] %vm676_vm2, %v854_v36 }
  0xf4   : > { %690 = vst.msk [vmem:[%s1130_s18 + $0x34] sm:$0xf] %vm676_vm2, %v862_v38 }
  0xf5 PF: > { %s16_s23 = sadd.s32 1, %s981_s23   ;;  %s1204_s21 = smov %s977_s22 }
  0xf6   : > { %p13_p5 = scmp.ge.s32.totalorder %s16_s23, 4   ;;  %s1205_s22 = smov %s1207_s24 }
  0xf8   :  { %15 = sbr.rel (!%p13_p5) target bundleno = 2 (0x2), region = 83 }

// kernel: densenet_trick_v3_forward.29
= control target key start
LH: loop header
LB: loop body
LE: loop exit
PB: predicated region body
PF: predicated region fallthrough
CT: control target
= control target key end

     0   :  { %s1026_s21 = smov 0   ;;  %s1028_s22 = smov 0   ;;  %s1205_s0 = inlined_call_operand.vmem [shape: bf16[256,12], index: 0, kind: input, shape index: {}]   ;;  %s1206_s1 = inlined_call_operand.vmem [shape: bf16[12,16], index: 1, kind: input, shape index: {}]   ;;  %s1207_s2 = inlined_call_operand.vmem [shape: f32[1,12], index: 2, kind: input, shape index: {}]   ;;  %s1208_s3 = inlined_call_operand.vmem [shape: f32[1,12], index: 3, kind: input, shape index: {}]   ;;  %s1209_s4 = inlined_call_operand.vmem [shape: f32[1,16], index: 4, kind: input, shape index: {}]   ;;  %s1210_s5 = inlined_call_operand.vmem [shape: f32[1,16], index: 5, kind: input, shape index: {}]   ;;  %s1211_s6 = inlined_call_operand.vmem [shape: bf16[256,16], index: 6, kind: output, shape index: {}]  }
   0x1   :  { %s1030_s23 = smov 0  }
   0x2 LB: > { %s28_s24 = sadd.s32 1, %s985_s22  ;;  %p820_p0 = scmp.ge.s32.totalorder %s989_s23, 1  ;;  %s989_s23 = sphi %s1030_s23, %s16_s23   ;;  %s985_s22 = sphi %s1028_s22, %s1213_s22   ;;  %s981_s21 = sphi %s1026_s21, %s1212_s21  }
   0x3   : > { %p30_p1 = scmp.ge.s32.totalorder %s28_s24, 2  ;;  %p252_p2 = scmp.lt.s32.totalorder %s989_s23, 3 }
   0x5   : > { %s1215_s24 = smov (%p30_p1, %s28_s24), 0  ;;  %p253_p3 = pnand %p820_p0, %p252_p2 }
   0x6   : > { %s821_s27 = sshll.u32 (!%p253_p3), %s981_s21, 4 }
   0x7   : > { %256 = sbr.rel (%p253_p3) target bundleno = 245 (0xf5), region = 44  ;;  %p296_p4 = scmp.lt.s32.totalorder (!%p253_p3), %s821_s27, 31 }
   0xc   : > { %v966_v0 = vld [vmem:[%s1206_s1] sm:$0x3f]   ;;  %vm455_vm0 = vcmask 1045504   ;;  %s1217_s27 = smov (!%p296_p4, %s821_s27), 31  ;;  %vm430_vm1 = vcmask 97280   ;;  %vm682_vm2 = vcmask 125952  }
   0xd   : > { %940 = vmatprep.subr.msk.bf16.mxu0 %vm455_vm0, %v966_v0  ;;  %941 = vmatprep.subr.msk.bf16.mxu1 %vm455_vm0, %v966_v0  ;;  %v457_v1 = vsel %vm455_vm0, %v966_v0, 0  ;;  %s822_s28 = sshll.u32 %s1217_s27, 2  ;;  %v1060_v2 = vld [vmem:[%s1207_s2] ss:$0 sm:$0xff] }
   0xe   : > { %921 = vmatpush3.bf16.msra.mxu0 %v457_v1  ;;  %939 = vmatpush3.bf16.msra.mxu1 %v457_v1  ;;  %s1055_s7 = scalar_lea.vmem %s1205_s0, %s822_s28  ;;  %v1069_v11 = vld [vmem:[%s1208_s3] ss:$0 sm:$0xff]  ;;  %s1138_s18 = scalar_lea.vmem %s1211_s6, %s822_s28 }
   0xf   : > { %v873_v3 = vld [vmem:[%s1055_s7] sm:$0xff]   ;;  %v904_v5 = vld [vmem:[%s1055_s7 + $0x8] sm:$0xff]   ;;  %v905_v32 = vld [vmem:[%s1055_s7 + $0x10] sm:$0xff]  }
  0x10   : > { %v907_v4 = vld [vmem:[%s1055_s7 + $0x20] sm:$0xff]   ;;  %v874_v6 = vunpack.c.l.bf16 %v873_v3  ;;  %v875_v7 = vunpack.c.h.bf16 %v873_v3  ;;  %v908_v10 = vld [vmem:[%s1055_s7 + $0x28] sm:$0xff]   ;;  %v878_v12 = vunpack.c.l.bf16 %v904_v5  ;;  %v879_v13 = vunpack.c.h.bf16 %v904_v5  ;;  %v909_v37 = vld [vmem:[%s1055_s7 + $0x30] sm:$0xff]  }
  0x11   : > { %v890_v8 = vunpack.c.l.bf16 %v907_v4  ;;  %v891_v9 = vunpack.c.h.bf16 %v907_v4  ;;  %v894_v14 = vunpack.c.l.bf16 %v908_v10  ;;  %v895_v15 = vunpack.c.h.bf16 %v908_v10  ;;  %v906_v42 = vld [vmem:[%s1055_s7 + $0x18] sm:$0xff]  }
  0x12   : > { %v360_v16 = vmul.f32 %v874_v6, %v1060_v2  ;;  %v361_v17 = vmul.f32 %v875_v7, %v1060_v2  ;;  %v362_v20 = vmul.f32 %v878_v12, %v1060_v2  ;;  %v363_v21 = vmul.f32 %v879_v13, %v1060_v2  ;;  %v910_v47 = vld [vmem:[%s1055_s7 + $0x38] sm:$0xff]  }
  0x13   : > { %v368_v18 = vmul.f32 %v890_v8, %v1060_v2  ;;  %v369_v19 = vmul.f32 %v891_v9, %v1060_v2  ;;  %v370_v22 = vmul.f32 %v894_v14, %v1060_v2  ;;  %v371_v23 = vmul.f32 %v895_v15, %v1060_v2 }
  0x14   : > { %v383_v24 = vadd.f32 %v1069_v11, %v360_v16  ;;  %v384_v25 = vadd.f32 %v1069_v11, %v361_v17  ;;  %v385_v28 = vadd.f32 %v1069_v11, %v362_v20  ;;  %v386_v29 = vadd.f32 %v1069_v11, %v363_v21 }
  0x15   : > { %v391_v26 = vadd.f32 %v1069_v11, %v368_v18  ;;  %v392_v27 = vadd.f32 %v1069_v11, %v369_v19  ;;  %v393_v30 = vadd.f32 %v1069_v11, %v370_v22  ;;  %v394_v31 = vadd.f32 %v1069_v11, %v371_v23  ;;  %v1123_v22 = vld [vmem:[%s1210_s5] ss:$0 sm:$0xff] }
  0x16   : > { %v399_v33 = vmax.f32 %v383_v24, 0.0  ;;  %v400_v34 = vmax.f32 %v384_v25, 0.0  ;;  %v401_v38 = vmax.f32 %v385_v28, 0.0  ;;  %v402_v39 = vmax.f32 %v386_v29, 0.0 }
  0x17   : > { %v407_v35 = vmax.f32 %v391_v26, 0.0  ;;  %v408_v36 = vmax.f32 %v392_v27, 0.0  ;;  %v409_v40 = vmax.f32 %v393_v30, 0.0  ;;  %v410_v41 = vmax.f32 %v394_v31, 0.0 }
  0x18   : > { %v415_v43 = vpack.c.bf16 %v400_v34, %v399_v33  ;;  %v882_v45 = vunpack.c.l.bf16 %v905_v32  ;;  %v883_v46 = vunpack.c.h.bf16 %v905_v32  ;;  %v416_v48 = vpack.c.bf16 %v402_v39, %v401_v38 }
  0x19   : > { %v419_v44 = vpack.c.bf16 %v408_v36, %v407_v35  ;;  %v420_v49 = vpack.c.bf16 %v410_v41, %v409_v40  ;;  %v898_v50 = vunpack.c.l.bf16 %v909_v37  ;;  %v899_v51 = vunpack.c.h.bf16 %v909_v37 }
  0x1a   : > { %922 = vmatprep.mubr.msk.bf16.mxu0 %vm430_vm1, %v415_v43  ;;  %v364_v52 = vmul.f32 %v882_v45, %v1060_v2  ;;  %v365_v53 = vmul.f32 %v883_v46, %v1060_v2  ;;  %v886_v54 = vunpack.c.l.bf16 %v906_v42  ;;  %v887_v55 = vunpack.c.h.bf16 %v906_v42 }
  0x1b   : > { %930 = vmatprep.mubr.msk.bf16.mxu1 %vm430_vm1, %v419_v44  ;;  %923 = vmatmul.mubr.msk.bf16.vlgmr.msra.gmra.mxu0 %vm430_vm1, %v416_v48  ;;  %v372_v56 = vmul.f32 %v898_v50, %v1060_v2  ;;  %v373_v57 = vmul.f32 %v899_v51, %v1060_v2  ;;  %v902_v58 = vunpack.c.l.bf16 %v910_v47  ;;  %v903_v59 = vunpack.c.h.bf16 %v910_v47 }
  0x1c   : > { %931 = vmatmul.mubr.msk.bf16.vlgmr.msra.gmra.mxu1 %vm430_vm1, %v420_v49  ;;  %v387_v60 = vadd.f32 %v1069_v11, %v364_v52  ;;  %v388_v61 = vadd.f32 %v1069_v11, %v365_v53  ;;  %v366_v62 = vmul.f32 %v886_v54, %v1060_v2  ;;  %v367_v63 = vmul.f32 %v887_v55, %v1060_v2 }
  0x1d   : > { %v395_v0 = vadd.f32 %v1069_v11, %v372_v56  ;;  %v396_v1 = vadd.f32 %v1069_v11, %v373_v57  ;;  %v374_v3 = vmul.f32 %v902_v58, %v1060_v2  ;;  %v375_v4 = vmul.f32 %v903_v59, %v1060_v2 }
  0x1e   : > { %v403_v5 = vmax.f32 %v387_v60, 0.0  ;;  %v404_v6 = vmax.f32 %v388_v61, 0.0  ;;  %v389_v7 = vadd.f32 %v1069_v11, %v366_v62  ;;  %v390_v8 = vadd.f32 %v1069_v11, %v367_v63 }
  0x1f   : > { %v411_v9 = vmax.f32 %v395_v0, 0.0  ;;  %v412_v10 = vmax.f32 %v396_v1, 0.0  ;;  %v397_v12 = vadd.f32 %v1069_v11, %v374_v3  ;;  %v398_v13 = vadd.f32 %v1069_v11, %v375_v4  ;;  %v1118_v11 = vld [vmem:[%s1209_s4] ss:$0 sm:$0xff] }
  0x20   : > { %v417_v14 = vpack.c.bf16 %v404_v6, %v403_v5  ;;  %v405_v15 = vmax.f32 %v389_v7, 0.0  ;;  %v406_v16 = vmax.f32 %v390_v8, 0.0 }
  0x21   : > { %v421_v17 = vpack.c.bf16 %v412_v10, %v411_v9  ;;  %v413_v18 = vmax.f32 %v397_v12, 0.0  ;;  %v414_v19 = vmax.f32 %v398_v13, 0.0 }
  0x22   : > { %926 = vmatprep.mubr.msk.bf16.mxu0 %vm430_vm1, %v417_v14  ;;  %v418_v2 = vpack.c.bf16 %v406_v16, %v405_v15 }
  0x23   : > { %934 = vmatprep.mubr.msk.bf16.mxu1 %vm430_vm1, %v421_v17  ;;  %v422_v20 = vpack.c.bf16 %v414_v19, %v413_v18 }
  0x24   : > { %927 = vmatmul.mubr.msk.bf16.gmra.mxu0 %vm430_vm1, %v418_v2 }
  0x25   : > { %935 = vmatmul.mubr.msk.bf16.gmra.mxu1 %vm430_vm1, %v422_v20 }
  0xdb   : > { %v924_v21 = vpop.f32.mrf.mxu0 }
  0xdc   : > { %v932_v23 = vpop.f32.mrf.mxu1  ;;  %v565_v24 = vmul.f32 %v924_v21, %v1118_v11 }
  0xdd   : > { %v573_v25 = vmul.f32 %v932_v23, %v1118_v11  ;;  %v493_v26 = vpop.f32.mrf.mxu0 }
  0xde   : > { %v525_v27 = vpop.f32.mrf.mxu1  ;;  %v588_v28 = vadd.f32 %v1123_v22, %v565_v24  ;;  %v563_v30 = vmul.f32 %v1118_v11, %v493_v26 }
  0xdf   : > { %v596_v29 = vadd.f32 %v1123_v22, %v573_v25  ;;  %v571_v31 = vmul.f32 %v1118_v11, %v525_v27  ;;  %v925_v32 = vpop.f32.mrf.mxu0 }
  0xe0   : > { %v933_v33 = vpop.f32.mrf.mxu1  ;;  %v604_v34 = vmax.f32 %v588_v28, 0.0  ;;  %v586_v36 = vadd.f32 %v1123_v22, %v563_v30  ;;  %v566_v38 = vmul.f32 %v925_v32, %v1118_v11 }
  0xe1   : > { %v612_v35 = vmax.f32 %v596_v29, 0.0  ;;  %v594_v37 = vadd.f32 %v1123_v22, %v571_v31  ;;  %v574_v39 = vmul.f32 %v933_v33, %v1118_v11  ;;  %v496_v40 = vpop.f32.mrf.mxu0 }
  0xe2   : > { %v528_v41 = vpop.f32.mrf.mxu1  ;;  %v858_v42 = vpack.c.bf16 %v604_v34, %v604_v34  ;;  %v602_v44 = vmax.f32 %v586_v36, 0.0  ;;  %v589_v46 = vadd.f32 %v1123_v22, %v566_v38  ;;  %v564_v48 = vmul.f32 %v1118_v11, %v496_v40 }
  0xe3   : > { %v866_v43 = vpack.c.bf16 %v612_v35, %v612_v35  ;;  %v610_v45 = vmax.f32 %v594_v37, 0.0  ;;  %v597_v47 = vadd.f32 %v1123_v22, %v574_v39  ;;  %v572_v49 = vmul.f32 %v1118_v11, %v528_v41 }
  0xe4   : > { %685 = vst.msk [vmem:[%s1138_s18 + $0x8] sm:$0xf] %vm682_vm2, %v858_v42  ;;  %v856_v50 = vpack.c.bf16 %v602_v44, %v602_v44  ;;  %v928_v52 = vpop.f32.mrf.mxu0  ;;  %v605_v53 = vmax.f32 %v589_v46, 0.0  ;;  %v587_v55 = vadd.f32 %v1123_v22, %v564_v48 }
  0xe5   : > { %693 = vst.msk [vmem:[%s1138_s18 + $0x28] sm:$0xf] %vm682_vm2, %v866_v43  ;;  %v864_v51 = vpack.c.bf16 %v610_v45, %v610_v45  ;;  %v613_v54 = vmax.f32 %v597_v47, 0.0  ;;  %v595_v56 = vadd.f32 %v1123_v22, %v572_v49  ;;  %v936_v57 = vpop.f32.mrf.mxu1  ;;  %v569_v58 = vmul.f32 %v928_v52, %v1118_v11 }
  0xe6   : > { %683 = vst.msk [vmem:[%s1138_s18] sm:$0xf] %vm682_vm2, %v856_v50  ;;  %v577_v59 = vmul.f32 %v936_v57, %v1118_v11  ;;  %v509_v60 = vpop.f32.mrf.mxu0  ;;  %v859_v61 = vpack.c.bf16 %v605_v53, %v605_v53  ;;  %v603_v63 = vmax.f32 %v587_v55, 0.0 }
  0xe7   : > { %691 = vst.msk [vmem:[%s1138_s18 + $0x20] sm:$0xf] %vm682_vm2, %v864_v51  ;;  %v867_v62 = vpack.c.bf16 %v613_v54, %v613_v54  ;;  %v611_v0 = vmax.f32 %v595_v56, 0.0  ;;  %v541_v1 = vpop.f32.mrf.mxu1  ;;  %v592_v3 = vadd.f32 %v1123_v22, %v569_v58  ;;  %v567_v5 = vmul.f32 %v1118_v11, %v509_v60 }
  0xe8   : > { %v600_v4 = vadd.f32 %v1123_v22, %v577_v59  ;;  %v575_v6 = vmul.f32 %v1118_v11, %v541_v1  ;;  %v929_v7 = vpop.f32.mrf.mxu0  ;;  %686 = vst.msk [vmem:[%s1138_s18 + $0xc] sm:$0xf] %vm682_vm2, %v859_v61  ;;  %v857_v8 = vpack.c.bf16 %v603_v63, %v603_v63 }
  0xe9   : > { %694 = vst.msk [vmem:[%s1138_s18 + $0x2c] sm:$0xf] %vm682_vm2, %v867_v62  ;;  %v865_v9 = vpack.c.bf16 %v611_v0, %v611_v0  ;;  %v570_v10 = vmul.f32 %v929_v7, %v1118_v11  ;;  %v937_v12 = vpop.f32.mrf.mxu1  ;;  %v608_v13 = vmax.f32 %v592_v3, 0.0  ;;  %v590_v15 = vadd.f32 %v1123_v22, %v567_v5 }
  0xea   : > { %v616_v14 = vmax.f32 %v600_v4, 0.0  ;;  %v598_v16 = vadd.f32 %v1123_v22, %v575_v6  ;;  %v512_v17 = vpop.f32.mrf.mxu0  ;;  %684 = vst.msk [vmem:[%s1138_s18 + $0x4] sm:$0xf] %vm682_vm2, %v857_v8  ;;  %v578_v19 = vmul.f32 %v937_v12, %v1118_v11 }
  0xeb   : > { %692 = vst.msk [vmem:[%s1138_s18 + $0x24] sm:$0xf] %vm682_vm2, %v865_v9  ;;  %v593_v18 = vadd.f32 %v1123_v22, %v570_v10  ;;  %v568_v2 = vmul.f32 %v1118_v11, %v512_v17  ;;  %v544_v20 = vpop.f32.mrf.mxu1  ;;  %v862_v21 = vpack.c.bf16 %v608_v13, %v608_v13  ;;  %v606_v24 = vmax.f32 %v590_v15, 0.0 }
  0xec   : > { %v870_v23 = vpack.c.bf16 %v616_v14, %v616_v14  ;;  %v614_v25 = vmax.f32 %v598_v16, 0.0  ;;  %v601_v27 = vadd.f32 %v1123_v22, %v578_v19  ;;  %v576_v29 = vmul.f32 %v1118_v11, %v544_v20 }
  0xed   : > { %v609_v26 = vmax.f32 %v593_v18, 0.0  ;;  %v591_v28 = vadd.f32 %v1123_v22, %v568_v2  ;;  %689 = vst.msk [vmem:[%s1138_s18 + $0x18] sm:$0xf] %vm682_vm2, %v862_v21  ;;  %v860_v30 = vpack.c.bf16 %v606_v24, %v606_v24 }
  0xee   : > { %697 = vst.msk [vmem:[%s1138_s18 + $0x38] sm:$0xf] %vm682_vm2, %v870_v23  ;;  %v868_v31 = vpack.c.bf16 %v614_v25, %v614_v25  ;;  %v617_v33 = vmax.f32 %v601_v27, 0.0  ;;  %v599_v35 = vadd.f32 %v1123_v22, %v576_v29 }
  0xef   : > { %v863_v32 = vpack.c.bf16 %v609_v26, %v609_v26  ;;  %v607_v34 = vmax.f32 %v591_v28, 0.0  ;;  %687 = vst.msk [vmem:[%s1138_s18 + $0x10] sm:$0xf] %vm682_vm2, %v860_v30 }
  0xf0   : > { %695 = vst.msk [vmem:[%s1138_s18 + $0x30] sm:$0xf] %vm682_vm2, %v868_v31  ;;  %v871_v11 = vpack.c.bf16 %v617_v33, %v617_v33  ;;  %v615_v37 = vmax.f32 %v599_v35, 0.0 }
  0xf1   : > { %690 = vst.msk [vmem:[%s1138_s18 + $0x1c] sm:$0xf] %vm682_vm2, %v863_v32  ;;  %v861_v36 = vpack.c.bf16 %v607_v34, %v607_v34 }
  0xf2   : > { %698 = vst.msk [vmem:[%s1138_s18 + $0x3c] sm:$0xf] %vm682_vm2, %v871_v11  ;;  %v869_v38 = vpack.c.bf16 %v615_v37, %v615_v37 }
  0xf3   : > { %688 = vst.msk [vmem:[%s1138_s18 + $0x14] sm:$0xf] %vm682_vm2, %v861_v36 }
  0xf4   : > { %696 = vst.msk [vmem:[%s1138_s18 + $0x34] sm:$0xf] %vm682_vm2, %v869_v38 }
  0xf5 PF: > { %s16_s23 = sadd.s32 1, %s989_s23   ;;  %s1212_s21 = smov %s985_s22 }
  0xf6   : > { %p13_p5 = scmp.ge.s32.totalorder %s16_s23, 4   ;;  %s1213_s22 = smov %s1215_s24 }
  0xf8   :  { %15 = sbr.rel (!%p13_p5) target bundleno = 2 (0x2), region = 83 }

// kernel: densenet_trick_v3_forward.31
= control target key start
LH: loop header
LB: loop body
LE: loop exit
PB: predicated region body
PF: predicated region fallthrough
CT: control target
= control target key end

     0   :  { %s839_s15 = smov 0   ;;  %s841_s16 = smov 0   ;;  %s976_s0 = inlined_call_operand.vmem [shape: bf16[256,16], index: 0, kind: input, shape index: {}]   ;;  %s977_s1 = inlined_call_operand.vmem [shape: bf16[16,8], index: 1, kind: input, shape index: {}]   ;;  %s978_s2 = inlined_call_operand.vmem [shape: f32[1,16], index: 2, kind: input, shape index: {}]   ;;  %s979_s3 = inlined_call_operand.vmem [shape: f32[1,16], index: 3, kind: input, shape index: {}]   ;;  %s980_s4 = inlined_call_operand.vmem [shape: bf16[256,8], index: 4, kind: output, shape index: {}]  }
   0x1   :  { %s843_s17 = smov 0  }
   0x2 LB: > { %s26_s18 = sadd.s32 1, %s808_s16  ;;  %p647_p0 = scmp.ge.s32.totalorder %s812_s17, 1  ;;  %s812_s17 = sphi %s843_s17, %s14_s17   ;;  %s808_s16 = sphi %s841_s16, %s982_s16   ;;  %s804_s15 = sphi %s839_s15, %s981_s15  }
   0x3   : > { %p28_p1 = scmp.ge.s32.totalorder %s26_s18, 2  ;;  %p186_p2 = scmp.lt.s32.totalorder %s812_s17, 3 }
   0x5   : > { %s984_s18 = smov (%p28_p1, %s26_s18), 0  ;;  %p187_p3 = pnand %p647_p0, %p186_p2 }
   0x6   : > { %s648_s21 = sshll.u32 (!%p187_p3), %s804_s15, 4 }
   0x7   : > { %190 = sbr.rel (%p187_p3) target bundleno = 239 (0xef), region = 36  ;;  %p220_p4 = scmp.lt.s32.totalorder (!%p187_p3), %s648_s21, 31 }
   0xc   : > { %v789_v0 = vld [vmem:[%s977_s1] sm:$0xff]   ;;  %s986_s21 = smov (!%p220_p4, %s648_s21), 31  ;;  %vm349_vm0 = vcmask 130048   ;;  %vm535_vm1 = vcmask 60416  }
   0xd   : > { %745 = vmatprep.subr.bf16.mxu0 %v789_v0  ;;  %763 = vmatprep.subr.bf16.mxu1 %v789_v0  ;;  %s649_s22 = sshll.u32 %s986_s21, 2  ;;  %v873_v1 = vld [vmem:[%s978_s2] ss:$0 sm:$0xff] }
   0xe   : > { %746 = vmatpush3.bf16.msra.mxu0 %v789_v0  ;;  %764 = vmatpush3.bf16.msra.mxu1 %v789_v0  ;;  %s868_s25 = scalar_lea.vmem %s976_s0, %s649_s22  ;;  %v882_v10 = vld [vmem:[%s979_s3] ss:$0 sm:$0xff]  ;;  %s933_s6 = scalar_lea.vmem %s980_s4, %s649_s22 }
   0xf   : > { %v698_v2 = vld [vmem:[%s868_s25] sm:$0xff]   ;;  %v729_v4 = vld [vmem:[%s868_s25 + $0x8] sm:$0xff]   ;;  %v730_v31 = vld [vmem:[%s868_s25 + $0x10] sm:$0xff]  }
  0x10   : > { %v732_v3 = vld [vmem:[%s868_s25 + $0x20] sm:$0xff]   ;;  %v699_v5 = vunpack.c.l.bf16 %v698_v2  ;;  %v700_v6 = vunpack.c.h.bf16 %v698_v2  ;;  %v733_v9 = vld [vmem:[%s868_s25 + $0x28] sm:$0xff]   ;;  %v703_v11 = vunpack.c.l.bf16 %v729_v4  ;;  %v704_v12 = vunpack.c.h.bf16 %v729_v4  ;;  %v734_v36 = vld [vmem:[%s868_s25 + $0x30] sm:$0xff]  }
  0x11   : > { %v715_v7 = vunpack.c.l.bf16 %v732_v3  ;;  %v716_v8 = vunpack.c.h.bf16 %v732_v3  ;;  %v719_v13 = vunpack.c.l.bf16 %v733_v9  ;;  %v720_v14 = vunpack.c.h.bf16 %v733_v9  ;;  %v731_v41 = vld [vmem:[%s868_s25 + $0x18] sm:$0xff]  }
  0x12   : > { %v278_v15 = vmul.f32 %v699_v5, %v873_v1  ;;  %v279_v16 = vmul.f32 %v700_v6, %v873_v1  ;;  %v280_v19 = vmul.f32 %v703_v11, %v873_v1  ;;  %v281_v20 = vmul.f32 %v704_v12, %v873_v1  ;;  %v735_v46 = vld [vmem:[%s868_s25 + $0x38] sm:$0xff]  }
  0x13   : > { %v286_v17 = vmul.f32 %v715_v7, %v873_v1  ;;  %v287_v18 = vmul.f32 %v716_v8, %v873_v1  ;;  %v288_v21 = vmul.f32 %v719_v13, %v873_v1  ;;  %v289_v22 = vmul.f32 %v720_v14, %v873_v1 }
  0x14   : > { %v301_v23 = vadd.f32 %v882_v10, %v278_v15  ;;  %v302_v24 = vadd.f32 %v882_v10, %v279_v16  ;;  %v303_v27 = vadd.f32 %v882_v10, %v280_v19  ;;  %v304_v28 = vadd.f32 %v882_v10, %v281_v20 }
  0x15   : > { %v309_v25 = vadd.f32 %v882_v10, %v286_v17  ;;  %v310_v26 = vadd.f32 %v882_v10, %v287_v18  ;;  %v311_v29 = vadd.f32 %v882_v10, %v288_v21  ;;  %v312_v30 = vadd.f32 %v882_v10, %v289_v22 }
  0x16   : > { %v317_v32 = vmax.f32 %v301_v23, 0.0  ;;  %v318_v33 = vmax.f32 %v302_v24, 0.0  ;;  %v319_v37 = vmax.f32 %v303_v27, 0.0  ;;  %v320_v38 = vmax.f32 %v304_v28, 0.0 }
  0x17   : > { %v325_v34 = vmax.f32 %v309_v25, 0.0  ;;  %v326_v35 = vmax.f32 %v310_v26, 0.0  ;;  %v327_v39 = vmax.f32 %v311_v29, 0.0  ;;  %v328_v40 = vmax.f32 %v312_v30, 0.0 }
  0x18   : > { %v333_v42 = vpack.c.bf16 %v318_v33, %v317_v32  ;;  %v707_v44 = vunpack.c.l.bf16 %v730_v31  ;;  %v708_v45 = vunpack.c.h.bf16 %v730_v31  ;;  %v334_v47 = vpack.c.bf16 %v320_v38, %v319_v37 }
  0x19   : > { %v337_v43 = vpack.c.bf16 %v326_v35, %v325_v34  ;;  %v338_v48 = vpack.c.bf16 %v328_v40, %v327_v39  ;;  %v723_v49 = vunpack.c.l.bf16 %v734_v36  ;;  %v724_v50 = vunpack.c.h.bf16 %v734_v36 }
  0x1a   : > { %747 = vmatprep.mubr.msk.bf16.mxu0 %vm349_vm0, %v333_v42  ;;  %v282_v51 = vmul.f32 %v707_v44, %v873_v1  ;;  %v283_v52 = vmul.f32 %v708_v45, %v873_v1  ;;  %v711_v53 = vunpack.c.l.bf16 %v731_v41  ;;  %v712_v54 = vunpack.c.h.bf16 %v731_v41 }
  0x1b   : > { %755 = vmatprep.mubr.msk.bf16.mxu1 %vm349_vm0, %v337_v43  ;;  %748 = vmatmul.mubr.msk.bf16.vlgmr.msra.gmra.mxu0 %vm349_vm0, %v334_v47  ;;  %v290_v55 = vmul.f32 %v723_v49, %v873_v1  ;;  %v291_v56 = vmul.f32 %v724_v50, %v873_v1  ;;  %v727_v57 = vunpack.c.l.bf16 %v735_v46  ;;  %v728_v58 = vunpack.c.h.bf16 %v735_v46 }
  0x1c   : > { %756 = vmatmul.mubr.msk.bf16.vlgmr.msra.gmra.mxu1 %vm349_vm0, %v338_v48  ;;  %v305_v59 = vadd.f32 %v882_v10, %v282_v51  ;;  %v306_v60 = vadd.f32 %v882_v10, %v283_v52  ;;  %v284_v61 = vmul.f32 %v711_v53, %v873_v1  ;;  %v285_v62 = vmul.f32 %v712_v54, %v873_v1 }
  0x1d   : > { %v313_v63 = vadd.f32 %v882_v10, %v290_v55  ;;  %v314_v0 = vadd.f32 %v882_v10, %v291_v56  ;;  %v292_v2 = vmul.f32 %v727_v57, %v873_v1  ;;  %v293_v3 = vmul.f32 %v728_v58, %v873_v1 }
  0x1e   : > { %v321_v4 = vmax.f32 %v305_v59, 0.0  ;;  %v322_v5 = vmax.f32 %v306_v60, 0.0  ;;  %v307_v6 = vadd.f32 %v882_v10, %v284_v61  ;;  %v308_v7 = vadd.f32 %v882_v10, %v285_v62 }
  0x1f   : > { %v329_v8 = vmax.f32 %v313_v63, 0.0  ;;  %v330_v9 = vmax.f32 %v314_v0, 0.0  ;;  %v315_v11 = vadd.f32 %v882_v10, %v292_v2  ;;  %v316_v12 = vadd.f32 %v882_v10, %v293_v3 }
  0x20   : > { %v335_v13 = vpack.c.bf16 %v322_v5, %v321_v4  ;;  %v323_v14 = vmax.f32 %v307_v6, 0.0  ;;  %v324_v15 = vmax.f32 %v308_v7, 0.0 }
  0x21   : > { %v339_v16 = vpack.c.bf16 %v330_v9, %v329_v8  ;;  %v331_v17 = vmax.f32 %v315_v11, 0.0  ;;  %v332_v18 = vmax.f32 %v316_v12, 0.0 }
  0x22   : > { %751 = vmatprep.mubr.msk.bf16.mxu0 %vm349_vm0, %v335_v13  ;;  %v336_v1 = vpack.c.bf16 %v324_v15, %v323_v14 }
  0x23   : > { %759 = vmatprep.mubr.msk.bf16.mxu1 %vm349_vm0, %v339_v16  ;;  %v340_v19 = vpack.c.bf16 %v332_v18, %v331_v17 }
  0x24   : > { %752 = vmatmul.mubr.msk.bf16.gmra.mxu0 %vm349_vm0, %v336_v1 }
  0x25   : > { %760 = vmatmul.mubr.msk.bf16.gmra.mxu1 %vm349_vm0, %v340_v19 }
  0xdb   : > { %v749_v10 = vpop.f32.mrf.mxu0 }
  0xdc   : > { %v757_v20 = vpop.f32.mrf.mxu1  ;;  %v683_v21 = vpack.c.bf16 %v749_v10, %v749_v10 }
  0xdd   : > { %v691_v22 = vpack.c.bf16 %v757_v20, %v757_v20  ;;  %v408_v23 = vpop.f32.mrf.mxu0 }
  0xde   : > { %v440_v24 = vpop.f32.mrf.mxu1  ;;  %538 = vst.msk [vmem:[%s933_s6 + $0x8] sm:$0xf] %vm535_vm1, %v683_v21  ;;  %v681_v25 = vpack.c.bf16 %v408_v23, %v408_v23 }
  0xdf   : > { %546 = vst.msk [vmem:[%s933_s6 + $0x28] sm:$0xf] %vm535_vm1, %v691_v22  ;;  %v689_v26 = vpack.c.bf16 %v440_v24, %v440_v24  ;;  %v750_v27 = vpop.f32.mrf.mxu0 }
  0xe0   : > { %v758_v28 = vpop.f32.mrf.mxu1  ;;  %536 = vst.msk [vmem:[%s933_s6] sm:$0xf] %vm535_vm1, %v681_v25  ;;  %v684_v29 = vpack.c.bf16 %v750_v27, %v750_v27 }
  0xe1   : > { %544 = vst.msk [vmem:[%s933_s6 + $0x20] sm:$0xf] %vm535_vm1, %v689_v26  ;;  %v692_v30 = vpack.c.bf16 %v758_v28, %v758_v28  ;;  %v411_v31 = vpop.f32.mrf.mxu0 }
  0xe2   : > { %v443_v32 = vpop.f32.mrf.mxu1  ;;  %539 = vst.msk [vmem:[%s933_s6 + $0xc] sm:$0xf] %vm535_vm1, %v684_v29  ;;  %v682_v33 = vpack.c.bf16 %v411_v31, %v411_v31 }
  0xe3   : > { %547 = vst.msk [vmem:[%s933_s6 + $0x2c] sm:$0xf] %vm535_vm1, %v692_v30  ;;  %v690_v34 = vpack.c.bf16 %v443_v32, %v443_v32 }
  0xe4   : > { %537 = vst.msk [vmem:[%s933_s6 + $0x4] sm:$0xf] %vm535_vm1, %v682_v33  ;;  %v753_v35 = vpop.f32.mrf.mxu0 }
  0xe5   : > { %545 = vst.msk [vmem:[%s933_s6 + $0x24] sm:$0xf] %vm535_vm1, %v690_v34  ;;  %v687_v36 = vpack.c.bf16 %v753_v35, %v753_v35  ;;  %v761_v37 = vpop.f32.mrf.mxu1 }
  0xe6   : > { %v695_v38 = vpack.c.bf16 %v761_v37, %v761_v37  ;;  %v424_v39 = vpop.f32.mrf.mxu0 }
  0xe7   : > { %542 = vst.msk [vmem:[%s933_s6 + $0x18] sm:$0xf] %vm535_vm1, %v687_v36  ;;  %v685_v40 = vpack.c.bf16 %v424_v39, %v424_v39  ;;  %v456_v41 = vpop.f32.mrf.mxu1 }
  0xe8   : > { %550 = vst.msk [vmem:[%s933_s6 + $0x38] sm:$0xf] %vm535_vm1, %v695_v38  ;;  %v693_v42 = vpack.c.bf16 %v456_v41, %v456_v41  ;;  %v754_v43 = vpop.f32.mrf.mxu0 }
  0xe9   : > { %540 = vst.msk [vmem:[%s933_s6 + $0x10] sm:$0xf] %vm535_vm1, %v685_v40  ;;  %v688_v44 = vpack.c.bf16 %v754_v43, %v754_v43  ;;  %v762_v45 = vpop.f32.mrf.mxu1 }
  0xea   : > { %548 = vst.msk [vmem:[%s933_s6 + $0x30] sm:$0xf] %vm535_vm1, %v693_v42  ;;  %v696_v46 = vpack.c.bf16 %v762_v45, %v762_v45  ;;  %v427_v47 = vpop.f32.mrf.mxu0 }
  0xeb   : > { %543 = vst.msk [vmem:[%s933_s6 + $0x1c] sm:$0xf] %vm535_vm1, %v688_v44  ;;  %v686_v48 = vpack.c.bf16 %v427_v47, %v427_v47  ;;  %v459_v49 = vpop.f32.mrf.mxu1 }
  0xec   : > { %551 = vst.msk [vmem:[%s933_s6 + $0x3c] sm:$0xf] %vm535_vm1, %v696_v46  ;;  %v694_v50 = vpack.c.bf16 %v459_v49, %v459_v49 }
  0xed   : > { %541 = vst.msk [vmem:[%s933_s6 + $0x14] sm:$0xf] %vm535_vm1, %v686_v48 }
  0xee   : > { %549 = vst.msk [vmem:[%s933_s6 + $0x34] sm:$0xf] %vm535_vm1, %v694_v50 }
  0xef PF: > { %s14_s17 = sadd.s32 1, %s812_s17   ;;  %s981_s15 = smov %s808_s16 }
  0xf0   : > { %p11_p5 = scmp.ge.s32.totalorder %s14_s17, 4   ;;  %s982_s16 = smov %s984_s18 }
  0xf2   :  { %13 = sbr.rel (!%p11_p5) target bundleno = 2 (0x2), region = 69 }

// kernel: densenet_trick_v3_forward.28
= control target key start
LH: loop header
LB: loop body
LE: loop exit
PB: predicated region body
PF: predicated region fallthrough
CT: control target
= control target key end

     0   :  { %s1982_s9 = smov 0   ;;  %s2424_s0 = inlined_call_operand.vmem [shape: bf16[4,110,16], index: 0, kind: input, shape index: {}]   ;;  %s2425_s1 = inlined_call_operand.vmem [shape: bf16[9,16,4], index: 1, kind: input, shape index: {}]   ;;  %s2426_s2 = inlined_call_operand.vmem [shape: bf16[4,80,4], index: 2, kind: output, shape index: {}]  }
   0x1 LB: > { %s1537_s10 = sadd.s32 4294967295, %s1963_s9   ;;  %p1541_p0 = scmp.ge.s32.totalorder %s1963_s9, 1  ;;  %s1963_s9 = sphi %s1982_s9, %s12_s9  }
   0x2   : > { %p112_p1 = scmp.lt.s32.totalorder %s1963_s9, 5 }
   0x4   : > { %p113_p2 = pnand %p1541_p0, %p112_p1 }
   0x5   : > { %p134_p3 = scmp.lt.s32.totalorder (!%p113_p2), %s1537_s10, 3 }
   0x6   : > { %116 = sbr.rel (%p113_p2) target bundleno = 403 (0x193), region = 28 }
   0xb   : > { %v1925_v0 = vld [vmem:[%s2425_s1 + $0x8] sm:$0xff]   ;;  %v1965_v1 = vmov 0.0   ;;  %vm1966_vm0 = vmmov 0   ;;  %s2428_s10 = smov (!%p134_p3, %s1537_s10), 3  ;;  %vm189_vm1 = vsmask.f32 7424 }
   0xc   : > { %1713 = vmatprep.subr.bf16.mxu0 %v1965_v1  ;;  %1911 = vmatprep.subr.bf16.mxu1 %v1965_v1  ;;  %s1913_s13 = smul.u32 56, %s2428_s10  ;;  %vm240_vm2 = vcmask 130048   ;;  %v1930_v20 = vld [vmem:[%s2425_s1 + $0x10] sm:$0xff]   ;;  %v1931_v24 = vld [vmem:[%s2425_s1] sm:$0xff]   ;;  %vm425_vm3 = vcmask 1046528   ;;  %v1934_v46 = vld [vmem:[%s2425_s1 + $0x18] sm:$0xff]  }
   0xd   : > { %1714 = vmatpush3.bf16.msra.mxu0 %v1925_v0  ;;  %1912 = vmatpush3.bf16.msra.mxu1 %v1925_v0  ;;  %v1936_v50 = vld [vmem:[%s2425_s1 + $0x20] sm:$0xff]   ;;  %vm705_vm4 = vsmask.f32 6400  ;;  %vm870_vm5 = vcmask 1045504   ;;  %vm1150_vm6 = vsmask.f32 5376 }
   0xe   : > { %1715 = vmatprep.mubr.msk.bf16.mxu0 %vm1966_vm0, %v1965_v1  ;;  %1727 = vmatprep.mubr.msk.bf16.mxu1 %vm1966_vm0, %v1965_v1  ;;  %s2007_s16 = scalar_lea.vmem %s2424_s0, %s1913_s13  ;;  %vm1315_vm7 = vcmask 1044480   ;;  %s1914_s5 = smul.u32 40, %s2428_s10  ;;  %vm1471_vm8 = vcmask 27648  }
   0xf   : > { %1757 = vmatprep.subr.bf16.mxu0 %v1965_v1  ;;  %1735 = vmatprep.subr.bf16.mxu1 %v1965_v1  ;;  %v145_v2 = vld [vmem:[%s2007_s16] sm:$0xf]  ;;  %v146_v3 = vld [vmem:[%s2007_s16 + $0x4] sm:$0xf]  ;;  %v2012_v5 = vld [vmem:[%s2007_s16 + $0x8] sm:$0xff]  }
  0x10   : > { %v1546_v4 = vcombine.low %v145_v2, %v146_v3  ;;  %v198_v8 = vshll.u32 %v2012_v5, 16  ;;  %v2016_v9 = vld [vmem:[%s2007_s16 + $0x18] sm:$0xff]   ;;  %v2019_v10 = vld [vmem:[%s2007_s16 + $0x20] sm:$0xff]   ;;  %v2022_v11 = vld [vmem:[%s2007_s16 + $0x10] sm:$0xff]   ;;  %v202_v21 = vshrl.u32 %v2012_v5, 16  ;;  %v427_v48 = vrot.slane %v2012_v5, 1  ;;  %s2380_s8 = scalar_lea.vmem %s2426_s2, %s1914_s5 }
  0x11   : > { %v214_v14 = vshll.u32 %v2016_v9, 16  ;;  %v218_v15 = vshrl.u32 %v2016_v9, 16  ;;  %v222_v16 = vshll.u32 %v2019_v10, 16  ;;  %v2028_v17 = vld [vmem:[%s2007_s16 + $0x28] ss:$0 sps:$4 sm:$0x11]  }
  0x12   : > { %v191_v6 = vshrl.u32 %v1546_v4, 16  ;;  %v193_v7 = vshll.u32 %v1546_v4, 16  ;;  %v200_v13 = vrot.slane %v198_v8, 1  ;;  %v206_v22 = vshll.u32 %v2022_v11, 16  ;;  %v2053_v36 = vld [vmem:[%s2007_s16 + $0x24] sm:$0xff]   ;;  %v2120_v60 = vld [vmem:[%s2007_s16 + $0xc] sm:$0xff]  }
  0x13   : > { %v216_v19 = vrot.slane %v214_v14, 1  ;;  %v224_v23 = vrot.slane %v222_v16, 1  ;;  %v226_v27 = vshrl.u32 %v2019_v10, 16  ;;  %v230_v28 = vshll.u32 %v2028_v17, 16  ;;  %v418_v40 = vld [vmem:[%s2007_s16] sm:$0xe] }
  0x14   : > { %v195_v12 = vrot.slane %v193_v7, 1  ;;  %v204_v30 = vor.u32 %v202_v21, %v200_v13  ;;  %v208_v31 = vrot.slane %v206_v22, 1  ;;  %v210_v35 = vshrl.u32 %v2022_v11, 16  ;;  %v1944_v37 = vld [vmem:[%s2007_s16 + $0x2c] ss:$0 sps:$4 sm:$0x11]  }
  0x15   : > { %v220_v26 = vor.u32 %v218_v15, %v216_v19  ;;  %v228_v32 = vor.u32 %v226_v27, %v224_v23  ;;  %v232_v33 = vrot.slane %v230_v28, 1  ;;  %v590_v41 = vrot.slane %v2053_v36, 1  ;;  %v541_v56 = vld [vmem:[%s2007_s16 + $0x4] sm:$0xe]  ;;  %v2115_v57 = vld [vmem:[%s2007_s16 + $0x8] sm:$0xf] }
  0x16   : > { %v196_v18 = vor.u32 %v195_v12, %v191_v6  ;;  %v209_v34 = vsel %vm189_vm1, %v204_v30, %v208_v31  ;;  %v212_v39 = vor.u32 %v210_v35, %v208_v31  ;;  %v592_v42 = vrot.slane %v1944_v37, 1  ;;  %v1939_v12 = vld [vmem:[%s2425_s1 + $0x28] sm:$0xff]  }
  0x17   : > { %v225_v29 = vsel %vm189_vm1, %v220_v26, %v224_v23  ;;  %v233_v38 = vsel %vm189_vm1, %v228_v32, %v232_v33  ;;  %v1566_v45 = vcombine.low %v418_v40, %v146_v3  ;;  %v429_v51 = vrot.slane %v2022_v11, 1  ;;  %v2157_v23 = vld [vmem:[%s2007_s16 + $0x1c] sm:$0xff]  }
  0x18   : > { %v201_v25 = vsel %vm189_vm1, %v196_v18, %v200_v13  ;;  %1728 = vmatmul.mubr.msk.bf16.vlgmr.msra.gmra.mxu1 %vm240_vm2, %v225_v29  ;;  %v2068_v43 = vsel %vm425_vm3, %v590_v41, %v592_v42  ;;  %v217_v44 = vsel %vm189_vm1, %v212_v39, %v216_v19  ;;  %v431_v53 = vrot.slane %v2016_v9, 1  ;;  %v2139_v13 = vld [vmem:[%s2007_s16 + $0x14] sm:$0xff]   ;;  %v2181_v39 = vld [vmem:[%s2007_s16 + $0x2c] ss:$0 sps:$4 sm:$0x33]  }
  0x19   : > { %1716 = vmatmul.mubr.msk.bf16.vlgmr.msra.gmra.mxu0 %vm240_vm2, %v201_v25  ;;  %1736 = vmatpush3.bf16.msra.mxu1 %v1931_v24  ;;  %v426_v47 = vrot.slane %v1566_v45, 1  ;;  %v430_v52 = vsel %vm425_vm3, %v427_v48, %v429_v51  ;;  %v433_v55 = vrot.slane %v2019_v10, 1  ;;  %v1575_v59 = vcombine.low %v541_v56, %v2115_v57  ;;  %v1941_v19 = vld [vmem:[%s2425_s1 + $0x30] sm:$0xff]  }
  0x1a   : > { %1758 = vmatpush3.bf16.msra.mxu0 %v1930_v20  ;;  %1719 = vmatprep.mubr.msk.bf16.mxu0 %vm1966_vm0, %v1965_v1  ;;  %v432_v54 = vsel %vm425_vm3, %v429_v51, %v431_v53  ;;  %v435_v61 = vrot.slane %v2028_v17, 1  ;;  %v715_v0 = vshrl.u32 %v2120_v60, 16  ;;  %v718_v2 = vshll.u32 %v2120_v60, 16  ;;  %v986_v51 = vld [vmem:[%s2007_s16 + $0x8] sm:$0xc] }
  0x1b   : > { %1801 = vmatprep.subr.bf16.mxu0 %v1965_v1  ;;  %1731 = vmatprep.mubr.msk.bf16.mxu1 %vm1966_vm0, %v1965_v1  ;;  %v428_v49 = vsel %vm425_vm3, %v426_v47, %v427_v48  ;;  %v434_v58 = vsel %vm425_vm3, %v431_v53, %v433_v55  ;;  %v707_v62 = vshrl.u32 %v1575_v59, 16  ;;  %v710_v63 = vshll.u32 %v1575_v59, 16 }
  0x1c   : > { %1779 = vmatprep.subr.bf16.mxu1 %v1965_v1  ;;  %v583_v3 = vrot.slane %v1575_v59, 1  ;;  %v717_v8 = vrot.slane %v715_v0, 1  ;;  %v724_v15 = vshrl.u32 %v2139_v13, 16  ;;  %v727_v16 = vshll.u32 %v2139_v13, 16  ;;  %v2231_v0 = vld [vmem:[%s2007_s16 + $0x18] sm:$0xff]  }
  0x1d   : > { %v709_v6 = vrot.slane %v707_v62, 1  ;;  %v712_v7 = vrot.slane %v710_v63, 2  ;;  %v586_v17 = vrot.slane %v2139_v13, 1  ;;  %v733_v25 = vshrl.u32 %v2157_v23, 16  ;;  %v1950_v63 = vld [vmem:[%s2425_s1 + $0x40] sm:$0xff]  }
  0x1e   : > { %v726_v20 = vrot.slane %v724_v15, 1  ;;  %v729_v21 = vrot.slane %v727_v16, 2  ;;  %v736_v26 = vshll.u32 %v2157_v23, 16  ;;  %v588_v27 = vrot.slane %v2157_v23, 1 }
  0x1f   : > { %v735_v29 = vrot.slane %v733_v25, 1  ;;  %v742_v33 = vshrl.u32 %v2053_v36, 16  ;;  %v754_v45 = vshll.u32 %v2181_v39, 16 }
  0x20   : > { %1732 = vmatmul.mubr.msk.bf16.gmra.mxu1 %vm240_vm2, %v233_v38  ;;  %v730_v24 = vor.u32 %v729_v21, %v726_v20  ;;  %v738_v30 = vrot.slane %v736_v26, 2  ;;  %v589_v31 = vsel %vm425_vm3, %v586_v17, %v588_v27  ;;  %v591_v40 = vsel %vm425_vm3, %v588_v27, %v590_v41  ;;  %v1308_v26 = vld [vmem:[%s2007_s16 + $0x8] sm:$0x8] }
  0x21   : > { %1720 = vmatmul.mubr.msk.bf16.gmra.mxu0 %vm240_vm2, %v209_v34  ;;  %1737 = vmatprep.mubr.msk.bf16.mxu1 %vm1966_vm0, %v1965_v1  ;;  %v745_v34 = vshll.u32 %v2053_v36, 16  ;;  %v744_v37 = vrot.slane %v742_v33, 1  ;;  %v756_v48 = vrot.slane %v754_v45, 2 }
  0x22   : > { %1723 = vmatprep.mubr.msk.bf16.mxu0 %vm1966_vm0, %v1965_v1  ;;  %v739_v32 = vor.u32 %v738_v30, %v735_v29  ;;  %v1169_v29 = vshrl.u32 %v2231_v0, 16  ;;  %v1172_v30 = vshll.u32 %v2231_v0, 16 }
  0x23   : > { %v747_v38 = vrot.slane %v745_v34, 2 }
  0x24   : > { %v740_v35 = vsel %vm705_vm4, %v730_v24, %v739_v32  ;;  %v1171_v34 = vrot.slane %v1169_v29, 2 }
  0x25   : > { %v748_v42 = vor.u32 %v747_v38, %v744_v37 }
  0x27   : > { %v749_v41 = vsel %vm705_vm4, %v739_v32, %v748_v42 }
  0x28   : > { %1738 = vmatmul.mubr.msk.bf16.vlgmr.msra.gmra.mxu1 %vm240_vm2, %v1546_v4  ;;  %v584_v4 = vrot.slane %v2120_v60, 1 }
  0x29   : > { %1724 = vmatmul.mubr.msk.bf16.gmra.mxu0 %vm240_vm2, %v217_v44  ;;  %1780 = vmatpush3.bf16.msra.mxu1 %v1934_v46  ;;  %v751_v44 = vshrl.u32 %v2181_v39, 16  ;;  %v863_v46 = vld [vmem:[%s2007_s16 + $0x4] sm:$0xc] }
  0x2a   : > { %1759 = vmatprep.mubr.msk.bf16.mxu0 %vm1966_vm0, %v1965_v1  ;;  %1741 = vmatprep.mubr.msk.bf16.mxu1 %vm1966_vm0, %v1965_v1  ;;  %v587_v22 = vsel %vm425_vm3, %v584_v4, %v586_v17 }
  0x2b   : > { %1823 = vmatprep.subr.bf16.mxu1 %v1965_v1  ;;  %v753_v47 = vrot.slane %v751_v44, 1 }
  0x30   : > { %1742 = vmatmul.mubr.msk.bf16.gmra.mxu1 %vm240_vm2, %v2012_v5  ;;  %v436_v5 = vsel %vm425_vm3, %v433_v55, %v435_v61  ;;  %v874_v61 = vrot.slane %v2139_v13, 2 }
  0x31   : > { %1760 = vmatmul.mubr.msk.bf16.vlgmr.msra.gmra.mxu0 %vm240_vm2, %v428_v49  ;;  %1745 = vmatprep.mubr.msk.bf16.mxu1 %vm1966_vm0, %v1965_v1  ;;  %v1598_v49 = vcombine.low %v863_v46, %v2115_v57  ;;  %v2212_v57 = vld [vmem:[%s2007_s16 + $0x10] sm:$0xff]  }
  0x32   : > { %1802 = vmatpush3.bf16.msra.mxu0 %v1936_v50  ;;  %1763 = vmatprep.mubr.msk.bf16.mxu0 %vm1966_vm0, %v1965_v1  ;;  %v757_v50 = vor.u32 %v756_v48, %v753_v47  ;;  %v1160_v16 = vshrl.u32 %v2212_v57, 16  ;;  %v1163_v17 = vshll.u32 %v2212_v57, 16  ;;  %v1317_v38 = vrot.slane %v2212_v57, 3 }
  0x33   : > { %1845 = vmatprep.subr.bf16.mxu0 %v1965_v1  ;;  %v871_v53 = vrot.slane %v1598_v49, 2  ;;  %v1319_v47 = vrot.slane %v2231_v0, 3 }
  0x34   : > { %v758_v55 = vsel %vm705_vm4, %v748_v42, %v757_v50 }
  0x38   : > { %1746 = vmatmul.mubr.msk.bf16.gmra.mxu1 %vm240_vm2, %v2022_v11  ;;  %v585_v11 = vsel %vm425_vm3, %v583_v3, %v584_v4  ;;  %v1031_v3 = vrot.slane %v2231_v0, 2  ;;  %v876_v4 = vrot.slane %v2157_v23, 2  ;;  %v1162_v23 = vrot.slane %v1160_v16, 2 }
  0x39   : > { %1764 = vmatmul.mubr.msk.bf16.gmra.mxu0 %vm240_vm2, %v430_v52  ;;  %1749 = vmatprep.mubr.msk.bf16.mxu1 %vm1966_vm0, %v1965_v1  ;;  %v2204_v52 = vld [vmem:[%s2007_s16 + $0xc] sm:$0xf] }
  0x3a   : > { %1767 = vmatprep.mubr.msk.bf16.mxu0 %vm1966_vm0, %v1965_v1  ;;  %v1607_v56 = vcombine.low %v986_v51, %v2204_v52  ;;  %v1630_v32 = vcombine.low %v1308_v26, %v2204_v52  ;;  %v1320_v51 = vsel %vm1315_vm7, %v1317_v38, %v1319_v47 }
  0x3c   : > { %v1028_v59 = vrot.slane %v1607_v56, 2  ;;  %v1155_v15 = vshll.u32 %v1607_v56, 16  ;;  %v1316_v37 = vrot.slane %v1630_v32, 3 }
  0x3e   : > { %v1318_v44 = vsel %vm1315_vm7, %v1316_v37, %v1317_v38 }
  0x40   : > { %1750 = vmatmul.mubr.msk.bf16.gmra.mxu1 %vm240_vm2, %v2016_v9  ;;  %v720_v9 = vrot.slane %v718_v2, 2 }
  0x41   : > { %1768 = vmatmul.mubr.msk.bf16.gmra.mxu0 %vm240_vm2, %v432_v54  ;;  %1753 = vmatprep.mubr.msk.bf16.mxu1 %vm1966_vm0, %v1965_v1  ;;  %v872_v54 = vrot.slane %v2120_v60, 2  ;;  %v1029_v60 = vrot.slane %v2212_v57, 2 }
  0x42   : > { %1771 = vmatprep.mubr.msk.bf16.mxu0 %vm1966_vm0, %v1965_v1  ;;  %v721_v14 = vor.u32 %v720_v9, %v717_v8  ;;  %v878_v9 = vrot.slane %v2053_v36, 2  ;;  %v1152_v36 = vshrl.u32 %v1607_v56, 16 }
  0x43   : > { %v1030_v62 = vsel %vm870_vm5, %v1028_v59, %v1029_v60  ;;  %v875_v2 = vsel %vm870_vm5, %v872_v54, %v874_v61 }
  0x44   : > { %v731_v28 = vsel %vm705_vm4, %v721_v14, %v730_v24  ;;  %v879_v13 = vsel %vm870_vm5, %v876_v4, %v878_v9  ;;  %v1154_v21 = vrot.slane %v1152_v36, 2  ;;  %v1165_v24 = vrot.slane %v1163_v17, 3 }
  0x48   : > { %1754 = vmatmul.mubr.msk.bf16.gmra.mxu1 %vm240_vm2, %v2019_v10  ;;  %v713_v10 = vor.u32 %v712_v7, %v709_v6  ;;  %v2244_v6 = vld [vmem:[%s2007_s16 + $0x20] sm:$0xff]   ;;  %v877_v7 = vsel %vm870_vm5, %v874_v61, %v876_v4 }
  0x49   : > { %1772 = vmatmul.mubr.msk.bf16.gmra.mxu0 %vm240_vm2, %v434_v58  ;;  %1781 = vmatprep.mubr.msk.bf16.mxu1 %vm1966_vm0, %v1965_v1  ;;  %v873_v58 = vsel %vm870_vm5, %v871_v53, %v872_v54  ;;  %v1033_v8 = vrot.slane %v2244_v6, 2  ;;  %v1181_v42 = vshll.u32 %v2244_v6, 16  ;;  %v1321_v56 = vrot.slane %v2244_v6, 3 }
  0x4a   : > { %1775 = vmatprep.mubr.msk.bf16.mxu0 %vm1966_vm0, %v1965_v1  ;;  %v722_v18 = vsel %vm705_vm4, %v713_v10, %v721_v14  ;;  %v880_v14 = vrot.slane %v2181_v39, 2 }
  0x4b   : > { %v1322_v59 = vsel %vm1315_vm7, %v1319_v47, %v1321_v56 }
  0x4c   : > { %v881_v20 = vsel %vm870_vm5, %v878_v9, %v880_v14 }
  0x50   : > { %1782 = vmatmul.mubr.msk.bf16.vlgmr.msra.gmra.mxu1 %vm240_vm2, %v585_v11  ;;  %v1034_v11 = vsel %vm870_vm5, %v1031_v3, %v1033_v8 }
  0x51   : > { %1776 = vmatmul.mubr.msk.bf16.gmra.mxu0 %vm240_vm2, %v436_v5  ;;  %1824 = vmatpush3.bf16.msra.mxu1 %v1939_v12  ;;  %v1032_v5 = vsel %vm870_vm5, %v1029_v60, %v1031_v3  ;;  %v2257_v12 = vld [vmem:[%s2007_s16 + $0x28] sm:$0xff]  }
  0x52   : > { %1803 = vmatprep.mubr.msk.bf16.mxu0 %vm1966_vm0, %v1965_v1  ;;  %1785 = vmatprep.mubr.msk.bf16.mxu1 %vm1966_vm0, %v1965_v1  ;;  %v1035_v10 = vrot.slane %v2257_v12, 2  ;;  %v1187_v49 = vshrl.u32 %v2257_v12, 16  ;;  %v1190_v50 = vshll.u32 %v2257_v12, 16 }
  0x53   : > { %1867 = vmatprep.subr.bf16.mxu1 %v1965_v1 }
  0x54   : > { %v1189_v53 = vrot.slane %v1187_v49, 2  ;;  %v1192_v54 = vrot.slane %v1190_v50, 3 }
  0x56   : > { %v1193_v57 = vor.u32 %v1192_v54, %v1189_v53 }
  0x58   : > { %1786 = vmatmul.mubr.msk.bf16.gmra.mxu1 %vm240_vm2, %v587_v22  ;;  %v1157_v22 = vrot.slane %v1155_v15, 3 }
  0x59   : > { %1804 = vmatmul.mubr.msk.bf16.vlgmr.msra.gmra.mxu0 %vm240_vm2, %v722_v18  ;;  %1789 = vmatprep.mubr.msk.bf16.mxu1 %vm1966_vm0, %v1965_v1  ;;  %v1036_v18 = vsel %vm870_vm5, %v1033_v8, %v1035_v10 }
  0x5a   : > { %1846 = vmatpush3.bf16.msra.mxu0 %v1941_v19  ;;  %1807 = vmatprep.mubr.msk.bf16.mxu0 %vm1966_vm0, %v1965_v1  ;;  %v1954_v19 = vld [vmem:[%s2007_s16 + $0x30] ss:$0 sps:$4 sm:$0x33]   ;;  %v1158_v27 = vor.u32 %v1157_v22, %v1154_v21 }
  0x5b   : > { %1889 = vmatprep.subr.bf16.mxu0 %v1965_v1  ;;  %v1037_v25 = vrot.slane %v1954_v19, 2 }
  0x60   : > { %1790 = vmatmul.mubr.msk.bf16.gmra.mxu1 %vm240_vm2, %v589_v31  ;;  %v1038_v31 = vsel %vm870_vm5, %v1035_v10, %v1037_v25 }
  0x61   : > { %1808 = vmatmul.mubr.msk.bf16.gmra.mxu0 %vm240_vm2, %v731_v28  ;;  %1793 = vmatprep.mubr.msk.bf16.mxu1 %vm1966_vm0, %v1965_v1  ;;  %v1166_v28 = vor.u32 %v1165_v24, %v1162_v23 }
  0x62   : > { %1811 = vmatprep.mubr.msk.bf16.mxu0 %vm1966_vm0, %v1965_v1 }
  0x63   : > { %v1167_v33 = vsel %vm1150_vm6, %v1158_v27, %v1166_v28 }
  0x68   : > { %1794 = vmatmul.mubr.msk.bf16.gmra.mxu1 %vm240_vm2, %v591_v40  ;;  %v1178_v40 = vshrl.u32 %v2244_v6, 16 }
  0x69   : > { %1812 = vmatmul.mubr.msk.bf16.gmra.mxu0 %vm240_vm2, %v740_v35  ;;  %1797 = vmatprep.mubr.msk.bf16.mxu1 %vm1966_vm0, %v1965_v1  ;;  %v1174_v35 = vrot.slane %v1172_v30, 3 }
  0x6a   : > { %1815 = vmatprep.mubr.msk.bf16.mxu0 %vm1966_vm0, %v1965_v1  ;;  %v1180_v46 = vrot.slane %v1178_v40, 2 }
  0x6b   : > { %v1175_v39 = vor.u32 %v1174_v35, %v1171_v34 }
  0x6d   : > { %v1176_v45 = vsel %vm1150_vm6, %v1166_v28, %v1175_v39 }
  0x70   : > { %1798 = vmatmul.mubr.msk.bf16.gmra.mxu1 %vm240_vm2, %v2068_v43  ;;  %v1947_v43 = vld [vmem:[%s2425_s1 + $0x38] sm:$0xff]  }
  0x71   : > { %1816 = vmatmul.mubr.msk.bf16.gmra.mxu0 %vm240_vm2, %v749_v41  ;;  %1825 = vmatprep.mubr.msk.bf16.mxu1 %vm1966_vm0, %v1965_v1  ;;  %v1183_v41 = vrot.slane %v1181_v42, 3 }
  0x72   : > { %1819 = vmatprep.mubr.msk.bf16.mxu0 %vm1966_vm0, %v1965_v1 }
  0x73   : > { %v1184_v48 = vor.u32 %v1183_v41, %v1180_v46 }
  0x75   : > { %v1185_v52 = vsel %vm1150_vm6, %v1175_v39, %v1184_v48  ;;  %v1194_v60 = vsel %vm1150_vm6, %v1184_v48, %v1193_v57 }
  0x78   : > { %1826 = vmatmul.mubr.msk.bf16.vlgmr.msra.gmra.mxu1 %vm240_vm2, %v873_v58 }
  0x79   : > { %1820 = vmatmul.mubr.msk.bf16.gmra.mxu0 %vm240_vm2, %v758_v55  ;;  %1868 = vmatpush3.bf16.msra.mxu1 %v1947_v43  ;;  %v1956_v55 = vld [vmem:[%s2007_s16 + $0x30] ss:$0 sps:$4 sm:$0x77]  }
  0x7a   : > { %1847 = vmatprep.mubr.msk.bf16.mxu0 %vm1966_vm0, %v1965_v1  ;;  %1829 = vmatprep.mubr.msk.bf16.mxu1 %vm1966_vm0, %v1965_v1  ;;  %v1196_v58 = vshrl.u32 %v1956_v55, 16  ;;  %v1199_v43 = vshll.u32 %v1956_v55, 16  ;;  %v1325_v4 = vrot.slane %v1956_v55, 3 }
  0x7c   : > { %v1198_v61 = vrot.slane %v1196_v58, 2 }
  0x80   : > { %1830 = vmatmul.mubr.msk.bf16.gmra.mxu1 %vm240_vm2, %v875_v2 }
  0x81   : > { %1848 = vmatmul.mubr.msk.bf16.vlgmr.msra.gmra.mxu0 %vm240_vm2, %v1030_v62  ;;  %1833 = vmatprep.mubr.msk.bf16.mxu1 %vm1966_vm0, %v1965_v1  ;;  %v1201_v62 = vrot.slane %v1199_v43, 3 }
  0x82   : > { %1890 = vmatpush3.bf16.msra.mxu0 %v1950_v63  ;;  %1851 = vmatprep.mubr.msk.bf16.mxu0 %vm1966_vm0, %v1965_v1  ;;  %v1323_v63 = vrot.slane %v2257_v12, 3 }
  0x83   : > { %v1202_v0 = vor.u32 %v1201_v62, %v1198_v61 }
  0x84   : > { %v1324_v2 = vsel %vm1315_vm7, %v1321_v56, %v1323_v63 }
  0x85   : > { %v1203_v3 = vsel %vm1150_vm6, %v1193_v57, %v1202_v0 }
  0x88   : > { %1834 = vmatmul.mubr.msk.bf16.gmra.mxu1 %vm240_vm2, %v877_v7 }
  0x89   : > { %1852 = vmatmul.mubr.msk.bf16.gmra.mxu0 %vm240_vm2, %v1032_v5  ;;  %1837 = vmatprep.mubr.msk.bf16.mxu1 %vm1966_vm0, %v1965_v1  ;;  %v1326_v5 = vsel %vm1315_vm7, %v1323_v63, %v1325_v4 }
  0x8a   : > { %1855 = vmatprep.mubr.msk.bf16.mxu0 %vm1966_vm0, %v1965_v1 }
  0x90   : > { %1838 = vmatmul.mubr.msk.bf16.gmra.mxu1 %vm240_vm2, %v879_v13 }
  0x91   : > { %1856 = vmatmul.mubr.msk.bf16.gmra.mxu0 %vm240_vm2, %v1034_v11  ;;  %1841 = vmatprep.mubr.msk.bf16.mxu1 %vm1966_vm0, %v1965_v1 }
  0x92   : > { %1859 = vmatprep.mubr.msk.bf16.mxu0 %vm1966_vm0, %v1965_v1 }
  0x98   : > { %1842 = vmatmul.mubr.msk.bf16.gmra.mxu1 %vm240_vm2, %v881_v20 }
  0x99   : > { %1860 = vmatmul.mubr.msk.bf16.gmra.mxu0 %vm240_vm2, %v1036_v18  ;;  %1869 = vmatprep.mubr.msk.bf16.mxu1 %vm1966_vm0, %v1965_v1 }
  0x9a   : > { %1863 = vmatprep.mubr.msk.bf16.mxu0 %vm1966_vm0, %v1965_v1 }
  0xa0   : > { %1870 = vmatmul.mubr.msk.bf16.vlgmr.msra.gmra.mxu1 %vm240_vm2, %v1167_v33 }
  0xa1   : > { %1864 = vmatmul.mubr.msk.bf16.gmra.mxu0 %vm240_vm2, %v1038_v31  ;;  %1873 = vmatprep.mubr.msk.bf16.mxu1 %vm1966_vm0, %v1965_v1 }
  0xa2   : > { %1891 = vmatprep.mubr.msk.bf16.mxu0 %vm1966_vm0, %v1965_v1 }
  0xa8   : > { %1874 = vmatmul.mubr.msk.bf16.gmra.mxu1 %vm240_vm2, %v1176_v45 }
  0xa9   : > { %1892 = vmatmul.mubr.msk.bf16.vlgmr.msra.gmra.mxu0 %vm240_vm2, %v1318_v44  ;;  %1877 = vmatprep.mubr.msk.bf16.mxu1 %vm1966_vm0, %v1965_v1 }
  0xaa   : > { %1895 = vmatprep.mubr.msk.bf16.mxu0 %vm1966_vm0, %v1965_v1 }
  0xb0   : > { %1878 = vmatmul.mubr.msk.bf16.gmra.mxu1 %vm240_vm2, %v1185_v52 }
  0xb1   : > { %1896 = vmatmul.mubr.msk.bf16.gmra.mxu0 %vm240_vm2, %v1320_v51  ;;  %1881 = vmatprep.mubr.msk.bf16.mxu1 %vm1966_vm0, %v1965_v1 }
  0xb2   : > { %1899 = vmatprep.mubr.msk.bf16.mxu0 %vm1966_vm0, %v1965_v1 }
  0xb8   : > { %1882 = vmatmul.mubr.msk.bf16.gmra.mxu1 %vm240_vm2, %v1194_v60 }
  0xb9   : > { %1900 = vmatmul.mubr.msk.bf16.gmra.mxu0 %vm240_vm2, %v1322_v59  ;;  %1885 = vmatprep.mubr.msk.bf16.mxu1 %vm1966_vm0, %v1965_v1 }
  0xba   : > { %1903 = vmatprep.mubr.msk.bf16.mxu0 %vm1966_vm0, %v1965_v1 }
  0xc0   : > { %1886 = vmatmul.mubr.msk.bf16.gmra.mxu1 %vm240_vm2, %v1203_v3 }
  0xc1   : > { %1904 = vmatmul.mubr.msk.bf16.gmra.mxu0 %vm240_vm2, %v1324_v2 }
  0xc2   : > { %1907 = vmatprep.mubr.msk.bf16.mxu0 %vm1966_vm0, %v1965_v1 }
  0xc9   : > { %1908 = vmatmul.mubr.msk.bf16.gmra.mxu0 %vm240_vm2, %v1326_v5 }
  0xd8   : > { %v314_v7 = vpop.f32.mrf.mxu1 }
  0xd9   : > { %v290_v6 = vpop.f32.mrf.mxu0 }
  0xda   : > { %v1729_v9 = vpop.f32.mrf.mxu1 }
  0xdb   : > { %v1717_v8 = vpop.f32.mrf.mxu0 }
  0xdc   : > { %v317_v12 = vpop.f32.mrf.mxu1 }
  0xdd   : > { %v293_v11 = vpop.f32.mrf.mxu0 }
  0xde   : > { %v1730_v10 = vpop.f32.mrf.mxu1 }
  0xdf   : > { %v1718_v13 = vpop.f32.mrf.mxu0 }
  0xe0   : > { %v322_v36 = vpop.f32.mrf.mxu1 }
  0xe1   : > { %v298_v14 = vpop.f32.mrf.mxu0 }
  0xe2   : > { %v1733_v16 = vpop.f32.mrf.mxu1 }
  0xe3   : > { %v1721_v15 = vpop.f32.mrf.mxu0 }
  0xe4   : > { %v325_v17 = vpop.f32.mrf.mxu1 }
  0xe5   : > { %v301_v1 = vpop.f32.mrf.mxu0 }
  0xe6   : > { %v1734_v19 = vpop.f32.mrf.mxu1 }
  0xe7   : > { %v1722_v18 = vpop.f32.mrf.mxu0 }
  0xe8   : > { %v379_v21 = vpop.f32.mrf.mxu1 }
  0xe9   : > { %v306_v20 = vpop.f32.mrf.mxu0  ;;  %v380_v23 = vadd.f32 %v379_v21, %v290_v6 }
  0xea   : > { %v1739_v24 = vpop.f32.mrf.mxu1 }
  0xeb   : > { %v1725_v22 = vpop.f32.mrf.mxu0 }
  0xec   : > { %v382_v26 = vpop.f32.mrf.mxu1 }
  0xed   : > { %v309_v25 = vpop.f32.mrf.mxu0  ;;  %v383_v28 = vadd.f32 %v382_v26, %v293_v11 }
  0xee   : > { %v1740_v29 = vpop.f32.mrf.mxu1 }
  0xef   : > { %v1726_v27 = vpop.f32.mrf.mxu0 }
  0xf0   : > { %v387_v32 = vpop.f32.mrf.mxu1 }
  0xf1   : > { %v492_v30 = vpop.f32.mrf.mxu0  ;;  %v388_v34 = vadd.f32 %v387_v32, %v298_v14 }
  0xf2   : > { %v531_v31 = vadd.f32 %v492_v30, %v380_v23  ;;  %v1743_v35 = vpop.f32.mrf.mxu1 }
  0xf3   : > { %v1761_v33 = vpop.f32.mrf.mxu0 }
  0xf4   : > { %v390_v39 = vpop.f32.mrf.mxu1 }
  0xf5   : > { %v495_v37 = vpop.f32.mrf.mxu0  ;;  %v391_v42 = vadd.f32 %v390_v39, %v301_v1 }
  0xf6   : > { %v532_v38 = vadd.f32 %v495_v37, %v383_v28  ;;  %v1744_v44 = vpop.f32.mrf.mxu1 }
  0xf7   : > { %v1762_v40 = vpop.f32.mrf.mxu0 }
  0xf8   : > { %v395_v41 = vpop.f32.mrf.mxu1 }
  0xf9   : > { %v500_v45 = vpop.f32.mrf.mxu0  ;;  %v396_v48 = vadd.f32 %v395_v41, %v306_v20 }
  0xfa   : > { %v533_v46 = vadd.f32 %v500_v45, %v388_v34  ;;  %v1747_v49 = vpop.f32.mrf.mxu1 }
  0xfb   : > { %v1765_v47 = vpop.f32.mrf.mxu0 }
  0xfc   : > { %v398_v52 = vpop.f32.mrf.mxu1 }
  0xfd   : > { %v503_v50 = vpop.f32.mrf.mxu0  ;;  %v399_v54 = vadd.f32 %v398_v52, %v309_v25 }
  0xfe   : > { %v534_v51 = vadd.f32 %v503_v50, %v391_v42  ;;  %v1748_v55 = vpop.f32.mrf.mxu1 }
  0xff   : > { %v1766_v53 = vpop.f32.mrf.mxu0 }
 0x100   : > { %v403_v58 = vpop.f32.mrf.mxu1 }
 0x101   : > { %v508_v56 = vpop.f32.mrf.mxu0  ;;  %v404_v59 = vadd.f32 %v403_v58, %v314_v7 }
 0x102   : > { %v535_v57 = vadd.f32 %v508_v56, %v396_v48  ;;  %v1751_v60 = vpop.f32.mrf.mxu1 }
 0x103   : > { %v1769_v43 = vpop.f32.mrf.mxu0 }
 0x104   : > { %v406_v63 = vpop.f32.mrf.mxu1 }
 0x105   : > { %v511_v61 = vpop.f32.mrf.mxu0  ;;  %v407_v2 = vadd.f32 %v406_v63, %v317_v12 }
 0x106   : > { %v536_v62 = vadd.f32 %v511_v61, %v399_v54  ;;  %v1752_v3 = vpop.f32.mrf.mxu1 }
 0x107   : > { %v1770_v0 = vpop.f32.mrf.mxu0 }
 0x108   : > { %v411_v6 = vpop.f32.mrf.mxu1 }
 0x109   : > { %v516_v4 = vpop.f32.mrf.mxu0  ;;  %v412_v9 = vadd.f32 %v411_v6, %v322_v36 }
 0x10a   : > { %v537_v5 = vadd.f32 %v516_v4, %v404_v59  ;;  %v1755_v11 = vpop.f32.mrf.mxu1 }
 0x10b   : > { %v1773_v8 = vpop.f32.mrf.mxu0 }
 0x10c   : > { %v414_v14 = vpop.f32.mrf.mxu1 }
 0x10d   : > { %v519_v13 = vpop.f32.mrf.mxu0  ;;  %v415_v16 = vadd.f32 %v414_v14, %v325_v17 }
 0x10e   : > { %v538_v10 = vadd.f32 %v519_v13, %v407_v2  ;;  %v1756_v1 = vpop.f32.mrf.mxu1 }
 0x10f   : > { %v1774_v15 = vpop.f32.mrf.mxu0 }
 0x110   : > { %v649_v19 = vpop.f32.mrf.mxu1 }
 0x111   : > { %v524_v7 = vpop.f32.mrf.mxu0  ;;  %v688_v21 = vadd.f32 %v649_v19, %v531_v31 }
 0x112   : > { %v539_v18 = vadd.f32 %v524_v7, %v412_v9  ;;  %v1783_v22 = vpop.f32.mrf.mxu1 }
 0x113   : > { %v1777_v20 = vpop.f32.mrf.mxu0 }
 0x114   : > { %v652_v24 = vpop.f32.mrf.mxu1 }
 0x115   : > { %v527_v12 = vpop.f32.mrf.mxu0  ;;  %v689_v26 = vadd.f32 %v652_v24, %v532_v38 }
 0x116   : > { %v540_v23 = vadd.f32 %v527_v12, %v415_v16  ;;  %v1784_v27 = vpop.f32.mrf.mxu1 }
 0x117   : > { %v1778_v25 = vpop.f32.mrf.mxu0 }
 0x118   : > { %v657_v29 = vpop.f32.mrf.mxu1 }
 0x119   : > { %v814_v36 = vpop.f32.mrf.mxu0  ;;  %v690_v32 = vadd.f32 %v657_v29, %v533_v46 }
 0x11a   : > { %v2332_v28 = vadd.f32 %v814_v36, %v688_v21  ;;  %v1787_v17 = vpop.f32.mrf.mxu1 }
 0x11b   : > { %v1805_v30 = vpop.f32.mrf.mxu0 }
 0x11c   : > { %v660_v35 = vpop.f32.mrf.mxu1 }
 0x11d   : > { %v817_v33 = vpop.f32.mrf.mxu0  ;;  %v691_v31 = vadd.f32 %v660_v35, %v534_v51 }
 0x11e   : > { %v2334_v34 = vadd.f32 %v817_v33, %v689_v26  ;;  %v1788_v39 = vpop.f32.mrf.mxu1 }
 0x11f   : > { %v1806_v37 = vpop.f32.mrf.mxu0 }
 0x120   : > { %v665_v44 = vpop.f32.mrf.mxu1 }
 0x121   : > { %v822_v40 = vpop.f32.mrf.mxu0  ;;  %v692_v45 = vadd.f32 %v665_v44, %v535_v57 }
 0x122   : > { %v2336_v42 = vadd.f32 %v822_v40, %v690_v32  ;;  %v1791_v41 = vpop.f32.mrf.mxu1 }
 0x123   : > { %v1809_v38 = vpop.f32.mrf.mxu0 }
 0x124   : > { %v668_v49 = vpop.f32.mrf.mxu1 }
 0x125   : > { %v825_v47 = vpop.f32.mrf.mxu0  ;;  %v693_v50 = vadd.f32 %v668_v49, %v536_v62 }
 0x126   : > { %v2338_v48 = vadd.f32 %v825_v47, %v691_v31  ;;  %v1792_v52 = vpop.f32.mrf.mxu1 }
 0x127   : > { %v1810_v46 = vpop.f32.mrf.mxu0 }
 0x128   : > { %v673_v55 = vpop.f32.mrf.mxu1 }
 0x129   : > { %v830_v53 = vpop.f32.mrf.mxu0  ;;  %v694_v56 = vadd.f32 %v673_v55, %v537_v5 }
 0x12a   : > { %v2340_v54 = vadd.f32 %v830_v53, %v692_v45  ;;  %v1795_v58 = vpop.f32.mrf.mxu1 }
 0x12b   : > { %v1813_v51 = vpop.f32.mrf.mxu0 }
 0x12c   : > { %v676_v60 = vpop.f32.mrf.mxu1 }
 0x12d   : > { %v833_v43 = vpop.f32.mrf.mxu0  ;;  %v695_v61 = vadd.f32 %v676_v60, %v538_v10 }
 0x12e   : > { %v2342_v59 = vadd.f32 %v833_v43, %v693_v50  ;;  %v1796_v63 = vpop.f32.mrf.mxu1 }
 0x12f   : > { %v1814_v57 = vpop.f32.mrf.mxu0 }
 0x130   : > { %v681_v3 = vpop.f32.mrf.mxu1 }
 0x131   : > { %v838_v0 = vpop.f32.mrf.mxu0  ;;  %v696_v4 = vadd.f32 %v681_v3, %v539_v18 }
 0x132   : > { %v2344_v2 = vadd.f32 %v838_v0, %v694_v56  ;;  %v1799_v6 = vpop.f32.mrf.mxu1 }
 0x133   : > { %v1817_v62 = vpop.f32.mrf.mxu0 }
 0x134   : > { %v684_v11 = vpop.f32.mrf.mxu1 }
 0x135   : > { %v841_v8 = vpop.f32.mrf.mxu0  ;;  %v697_v13 = vadd.f32 %v684_v11, %v540_v23 }
 0x136   : > { %v2346_v9 = vadd.f32 %v841_v8, %v695_v61  ;;  %v1800_v14 = vpop.f32.mrf.mxu1 }
 0x137   : > { %v1818_v5 = vpop.f32.mrf.mxu0 }
 0x138   : > { %v937_v1 = vpop.f32.mrf.mxu1 }
 0x139   : > { %v846_v15 = vpop.f32.mrf.mxu0  ;;  %v976_v63 = vadd.f32 %v937_v1, %v2332_v28 }
 0x13a   : > { %v2348_v16 = vadd.f32 %v846_v15, %v696_v4  ;;  %v1827_v7 = vpop.f32.mrf.mxu1 }
 0x13b   : > { %v1821_v10 = vpop.f32.mrf.mxu0 }
 0x13c   : > { %v940_v21 = vpop.f32.mrf.mxu1 }
 0x13d   : > { %v849_v19 = vpop.f32.mrf.mxu0  ;;  %v977_v8 = vadd.f32 %v940_v21, %v2334_v34 }
 0x13e   : > { %v2350_v20 = vadd.f32 %v849_v19, %v697_v13  ;;  %v1828_v18 = vpop.f32.mrf.mxu1 }
 0x13f   : > { %v1822_v22 = vpop.f32.mrf.mxu0 }
 0x140   : > { %v945_v24 = vpop.f32.mrf.mxu1 }
 0x141   : > { %v1094_v12 = vpop.f32.mrf.mxu0  ;;  %v978_v1 = vadd.f32 %v945_v24, %v2336_v42 }
 0x142   : > { %v1831_v26 = vpop.f32.mrf.mxu1  ;;  %v1133_v62 = vadd.f32 %v1094_v12, %v976_v63 }
 0x143   : > { %v1849_v25 = vpop.f32.mrf.mxu0 }
 0x144   : > { %v948_v36 = vpop.f32.mrf.mxu1 }
 0x145   : > { %v1097_v27 = vpop.f32.mrf.mxu0  ;;  %v979_v26 = vadd.f32 %v948_v36, %v2338_v48 }
 0x146   : > { %v1832_v29 = vpop.f32.mrf.mxu1  ;;  %v1134_v14 = vadd.f32 %v1097_v27, %v977_v8 }
 0x147   : > { %v1850_v23 = vpop.f32.mrf.mxu0 }
 0x148   : > { %v2352_v32 = vpop.f32.mrf.mxu1 }
 0x149   : > { %v1102_v30 = vpop.f32.mrf.mxu0 }
 0x14a   : > { %v1835_v33 = vpop.f32.mrf.mxu1  ;;  %v1135_v22 = vadd.f32 %v1102_v30, %v978_v1  ;;  %v980_v30 = vadd.f32 %v2352_v32, %v2340_v54 }
 0x14b   : > { %v1853_v17 = vpop.f32.mrf.mxu0 }
 0x14c   : > { %v2354_v37 = vpop.f32.mrf.mxu1 }
 0x14d   : > { %v1105_v35 = vpop.f32.mrf.mxu0 }
 0x14e   : > { %v1836_v39 = vpop.f32.mrf.mxu1  ;;  %v1136_v33 = vadd.f32 %v1105_v35, %v979_v26  ;;  %v981_v35 = vadd.f32 %v2354_v37, %v2342_v59 }
 0x14f   : > { %v1854_v31 = vpop.f32.mrf.mxu0 }
 0x150   : > { %v2356_v44 = vpop.f32.mrf.mxu1 }
 0x151   : > { %v1110_v40 = vpop.f32.mrf.mxu0  ;;  %v982_v63 = vadd.f32 %v2356_v44, %v2344_v2 }
 0x152   : > { %v1839_v45 = vpop.f32.mrf.mxu1  ;;  %v1137_v48 = vadd.f32 %v1110_v40, %v980_v30 }
 0x153   : > { %v1857_v38 = vpop.f32.mrf.mxu0 }
 0x154   : > { %v2360_v47 = vpop.f32.mrf.mxu1 }
 0x155   : > { %v2358_v41 = vpop.f32.mrf.mxu0 }
 0x156   : > { %v1840_v46 = vpop.f32.mrf.mxu1  ;;  %v1138_v54 = vadd.f32 %v2358_v41, %v981_v35 }
 0x157   : > { %v1858_v49 = vpop.f32.mrf.mxu0 }
 0x158   : > { %v2364_v52 = vpop.f32.mrf.mxu1 }
 0x159   : > { %v2362_v50 = vpop.f32.mrf.mxu0 }
 0x15a   : > { %v1843_v55 = vpop.f32.mrf.mxu1  ;;  %v1139_v37 = vadd.f32 %v2362_v50, %v982_v63 }
 0x15b   : > { %v1861_v53 = vpop.f32.mrf.mxu0 }
 0x15c   : > { %v2368_v56 = vpop.f32.mrf.mxu1 }
 0x15d   : > { %v2366_v51 = vpop.f32.mrf.mxu0 }
 0x15e   : > { %v1844_v43 = vpop.f32.mrf.mxu1 }
 0x15f   : > { %v1862_v58 = vpop.f32.mrf.mxu0 }
 0x160   : > { %v1259_v57 = vpop.f32.mrf.mxu1 }
 0x161   : > { %v2370_v60 = vpop.f32.mrf.mxu0  ;;  %v1298_v11 = vadd.f32 %v1259_v57, %v1133_v62 }
 0x162   : > { %v1871_v0 = vpop.f32.mrf.mxu1 }
 0x163   : > { %v1865_v61 = vpop.f32.mrf.mxu0 }
 0x164   : > { %v1262_v4 = vpop.f32.mrf.mxu1 }
 0x165   : > { %v2373_v3 = vpop.f32.mrf.mxu0  ;;  %v1299_v7 = vadd.f32 %v1262_v4, %v1134_v14 }
 0x166   : > { %v1872_v5 = vpop.f32.mrf.mxu1 }
 0x167   : > { %v1866_v6 = vpop.f32.mrf.mxu0 }
 0x168   : > { %v1267_v10 = vpop.f32.mrf.mxu1 }
 0x169   : > { %v1382_v13 = vpop.f32.mrf.mxu0  ;;  %v1300_v27 = vadd.f32 %v1267_v10, %v1135_v22  ;;  %v985_v22 = vadd.f32 %v2368_v56, %v2350_v20 }
 0x16a   : > { %v1421_v15 = vadd.f32 %v1382_v13, %v1298_v11  ;;  %v1875_v34 = vpop.f32.mrf.mxu1  ;;  %v983_v11 = vadd.f32 %v2360_v47, %v2346_v9 }
 0x16b   : > { %v1893_v28 = vpop.f32.mrf.mxu0 }
 0x16c   : > { %v1649_v19 = vpack.c.bf16 %v1421_v15, %v1421_v15  ;;  %v1270_v12 = vpop.f32.mrf.mxu1  ;;  %v1140_v44 = vadd.f32 %v2366_v51, %v983_v11  ;;  %v984_v28 = vadd.f32 %v2364_v52, %v2348_v16 }
 0x16d   : > { %v1385_v21 = vpop.f32.mrf.mxu0  ;;  %v1301_v39 = vadd.f32 %v1270_v12, %v1136_v33 }
 0x16e   : > { %1472 = vst.msk [vmem:[%s2380_s8] sm:$0xf] %vm1471_vm8, %v1649_v19  ;;  %v1422_v18 = vadd.f32 %v1385_v21, %v1299_v7  ;;  %v1876_v29 = vpop.f32.mrf.mxu1  ;;  %v1141_v47 = vadd.f32 %v2370_v60, %v984_v28 }
 0x16f   : > { %v1894_v25 = vpop.f32.mrf.mxu0 }
 0x170   : > { %v1650_v23 = vpack.c.bf16 %v1422_v18, %v1422_v18  ;;  %v1275_v24 = vpop.f32.mrf.mxu1  ;;  %v1142_v25 = vadd.f32 %v2373_v3, %v985_v22 }
 0x171   : > { %v1390_v17 = vpop.f32.mrf.mxu0  ;;  %v1302_v55 = vadd.f32 %v1275_v24, %v1137_v48 }
 0x172   : > { %1473 = vst.msk [vmem:[%s2380_s8 + $0x4] sm:$0xf] %vm1471_vm8, %v1650_v23  ;;  %v1423_v42 = vadd.f32 %v1390_v17, %v1300_v27  ;;  %v1879_v45 = vpop.f32.mrf.mxu1 }
 0x173   : > { %v1897_v31 = vpop.f32.mrf.mxu0 }
 0x174   : > { %v1651_v38 = vpack.c.bf16 %v1423_v42, %v1423_v42  ;;  %v1278_v46 = vpop.f32.mrf.mxu1 }
 0x175   : > { %v1393_v49 = vpop.f32.mrf.mxu0  ;;  %v1303_v0 = vadd.f32 %v1278_v46, %v1138_v54 }
 0x176   : > { %1474 = vst.msk [vmem:[%s2380_s8 + $0x8] sm:$0xf] %vm1471_vm8, %v1651_v38  ;;  %v1424_v36 = vadd.f32 %v1393_v49, %v1301_v39  ;;  %v1880_v43 = vpop.f32.mrf.mxu1 }
 0x177   : > { %v1898_v53 = vpop.f32.mrf.mxu0 }
 0x178   : > { %v1652_v58 = vpack.c.bf16 %v1424_v36, %v1424_v36  ;;  %v1283_v61 = vpop.f32.mrf.mxu1 }
 0x179   : > { %v1398_v57 = vpop.f32.mrf.mxu0  ;;  %v1304_v5 = vadd.f32 %v1283_v61, %v1139_v37 }
 0x17a   : > { %1475 = vst.msk [vmem:[%s2380_s8 + $0xc] sm:$0xf] %vm1471_vm8, %v1652_v58  ;;  %v1425_v32 = vadd.f32 %v1398_v57, %v1302_v55  ;;  %v1883_v4 = vpop.f32.mrf.mxu1 }
 0x17b   : > { %v1901_v40 = vpop.f32.mrf.mxu0 }
 0x17c   : > { %v1653_v62 = vpack.c.bf16 %v1425_v32, %v1425_v32  ;;  %v1286_v8 = vpop.f32.mrf.mxu1 }
 0x17d   : > { %v1401_v59 = vpop.f32.mrf.mxu0  ;;  %v1305_v1 = vadd.f32 %v1286_v8, %v1140_v44 }
 0x17e   : > { %1476 = vst.msk [vmem:[%s2380_s8 + $0x10] sm:$0xf] %vm1471_vm8, %v1653_v62  ;;  %v1426_v6 = vadd.f32 %v1401_v59, %v1303_v0  ;;  %v1884_v14 = vpop.f32.mrf.mxu1 }
 0x17f   : > { %v1902_v41 = vpop.f32.mrf.mxu0 }
 0x180   : > { %v1654_v13 = vpack.c.bf16 %v1426_v6, %v1426_v6  ;;  %v1291_v10 = vpop.f32.mrf.mxu1 }
 0x181   : > { %v1406_v2 = vpop.f32.mrf.mxu0  ;;  %v1306_v18 = vadd.f32 %v1291_v10, %v1141_v47 }
 0x182   : > { %1477 = vst.msk [vmem:[%s2380_s8 + $0x14] sm:$0xf] %vm1471_vm8, %v1654_v13  ;;  %v1427_v15 = vadd.f32 %v1406_v2, %v1304_v5  ;;  %v1887_v19 = vpop.f32.mrf.mxu1 }
 0x183   : > { %v1905_v50 = vpop.f32.mrf.mxu0 }
 0x184   : > { %v1655_v7 = vpack.c.bf16 %v1427_v15, %v1427_v15  ;;  %v1294_v51 = vpop.f32.mrf.mxu1 }
 0x185   : > { %v1409_v9 = vpop.f32.mrf.mxu0  ;;  %v1307_v27 = vadd.f32 %v1294_v51, %v1142_v25 }
 0x186   : > { %1478 = vst.msk [vmem:[%s2380_s8 + $0x18] sm:$0xf] %vm1471_vm8, %v1655_v7  ;;  %v1428_v34 = vadd.f32 %v1409_v9, %v1305_v1  ;;  %v1888_v16 = vpop.f32.mrf.mxu1 }
 0x187   : > { %v1906_v21 = vpop.f32.mrf.mxu0 }
 0x188   : > { %v1656_v12 = vpack.c.bf16 %v1428_v34, %v1428_v34 }
 0x189   : > { %v1414_v52 = vpop.f32.mrf.mxu0 }
 0x18a   : > { %1479 = vst.msk [vmem:[%s2380_s8 + $0x1c] sm:$0xf] %vm1471_vm8, %v1656_v12  ;;  %v1429_v26 = vadd.f32 %v1414_v52, %v1306_v18 }
 0x18b   : > { %v1909_v60 = vpop.f32.mrf.mxu0 }
 0x18c   : > { %v1657_v23 = vpack.c.bf16 %v1429_v26, %v1429_v26 }
 0x18d   : > { %v1417_v29 = vpop.f32.mrf.mxu0 }
 0x18e   : > { %1480 = vst.msk [vmem:[%s2380_s8 + $0x20] sm:$0xf] %vm1471_vm8, %v1657_v23  ;;  %v1430_v17 = vadd.f32 %v1417_v29, %v1307_v27 }
 0x18f   : > { %v1910_v33 = vpop.f32.mrf.mxu0 }
 0x190   : > { %v1658_v42 = vpack.c.bf16 %v1430_v17, %v1430_v17 }
 0x192   : > { %1481 = vst.msk [vmem:[%s2380_s8 + $0x24] sm:$0xf] %vm1471_vm8, %v1658_v42 }
 0x193 PF: > { %s12_s9 = sadd.s32 1, %s1963_s9  }
 0x194   : > { %p9_p4 = scmp.ge.s32.totalorder %s12_s9, 6  }
 0x196   :  { %11 = sbr.rel (!%p9_p4) target bundleno = 1 (0x1), region = 66 }

// kernel: densenet_trick_v3_forward.33
= control target key start
LH: loop header
LB: loop body
LE: loop exit
PB: predicated region body
PF: predicated region fallthrough
CT: control target
= control target key end

     0   :  { %vm96_vm0 = vcmask 1043456   ;;  %vm83_vm1 = vcmask 64512   ;;  %vm235_vm2 = vcmask 125952   ;;  %s408_s1 = inlined_call_operand.vmem [shape: bf16[8,16], index: 1, kind: input, shape index: {}]   ;;  %s409_s0 = inlined_call_operand.vmem [shape: bf16[64,8], index: 0, kind: input, shape index: {}]   ;;  %s410_s2 = inlined_call_operand.vmem [shape: f32[1,8], index: 2, kind: input, shape index: {}]   ;;  %s411_s3 = inlined_call_operand.vmem [shape: f32[1,8], index: 3, kind: input, shape index: {}]   ;;  %s412_s4 = inlined_call_operand.vmem [shape: f32[1,16], index: 4, kind: input, shape index: {}]   ;;  %s413_s5 = inlined_call_operand.vmem [shape: f32[1,16], index: 5, kind: input, shape index: {}]   ;;  %s414_s6 = inlined_call_operand.vmem [shape: bf16[64,16], index: 6, kind: output, shape index: {}]  }
   0x1   :  { %v82_v0 = vld [vmem:[%s408_s1] sm:$0xf]  ;;  %v289_v6 = vld [vmem:[%s409_s0 + $0x10] sm:$0xff]   ;;  %v288_v7 = vld [vmem:[%s409_s0 + $0x8] sm:$0xff]  }
   0x2   :  { %v273_v1 = vld [vmem:[%s409_s0] sm:$0xff]   ;;  %308 = vmatprep.subr.msk.bf16.mxu0 %vm96_vm0, %v82_v0  ;;  %309 = vmatprep.subr.msk.bf16.mxu1 %vm96_vm0, %v82_v0  ;;  %v98_v3 = vsel %vm96_vm0, %v82_v0, 0  ;;  %v282_v9 = vunpack.c.l.bf16 %v289_v6  ;;  %v283_v10 = vunpack.c.h.bf16 %v289_v6  ;;  %v278_v11 = vunpack.c.l.bf16 %v288_v7  ;;  %v290_v13 = vld [vmem:[%s409_s0 + $0x18] sm:$0xff]  }
   0x3   :  { %v248_v2 = vld [vmem:[%s410_s2] ss:$0 sm:$0xff]  ;;  %v274_v4 = vunpack.c.l.bf16 %v273_v1  ;;  %v275_v5 = vunpack.c.h.bf16 %v273_v1  ;;  %297 = vmatpush3.bf16.msra.mxu0 %v98_v3  ;;  %307 = vmatpush3.bf16.msra.mxu1 %v98_v3  ;;  %v279_v12 = vunpack.c.h.bf16 %v288_v7  ;;  %v286_v16 = vunpack.c.l.bf16 %v290_v13 }
   0x4   :  { %v249_v8 = vld [vmem:[%s411_s3] ss:$0 sm:$0xff]  ;;  %v287_v17 = vunpack.c.h.bf16 %v290_v13  ;;  %v51_v18 = vmul.f32 %v282_v9, %v248_v2  ;;  %v52_v19 = vmul.f32 %v283_v10, %v248_v2  ;;  %v49_v20 = vmul.f32 %v278_v11, %v248_v2 }
   0x5   :  { %v47_v14 = vmul.f32 %v274_v4, %v248_v2  ;;  %v48_v15 = vmul.f32 %v275_v5, %v248_v2  ;;  %v50_v21 = vmul.f32 %v279_v12, %v248_v2  ;;  %v53_v24 = vmul.f32 %v286_v16, %v248_v2  ;;  %v254_v44 = vld [vmem:[%s412_s4] ss:$0 sm:$0xff] }
   0x6   :  { %v54_v25 = vmul.f32 %v287_v17, %v248_v2  ;;  %v66_v26 = vadd.f32 %v249_v8, %v51_v18  ;;  %v67_v27 = vadd.f32 %v249_v8, %v52_v19  ;;  %v64_v28 = vadd.f32 %v249_v8, %v49_v20  ;;  %v255_v46 = vld [vmem:[%s413_s5] ss:$0 sm:$0xff] }
   0x7   :  { %v62_v22 = vadd.f32 %v249_v8, %v47_v14  ;;  %v63_v23 = vadd.f32 %v249_v8, %v48_v15  ;;  %v65_v29 = vadd.f32 %v249_v8, %v50_v21  ;;  %v68_v32 = vadd.f32 %v249_v8, %v53_v24 }
   0x8   :  { %v69_v33 = vadd.f32 %v249_v8, %v54_v25  ;;  %v74_v34 = vmax.f32 %v66_v26, 0.0  ;;  %v75_v35 = vmax.f32 %v67_v27, 0.0  ;;  %v72_v36 = vmax.f32 %v64_v28, 0.0 }
   0x9   :  { %v70_v30 = vmax.f32 %v62_v22, 0.0  ;;  %v71_v31 = vmax.f32 %v63_v23, 0.0  ;;  %v73_v37 = vmax.f32 %v65_v29, 0.0  ;;  %v76_v39 = vmax.f32 %v68_v32, 0.0 }
   0xa   :  { %v77_v40 = vmax.f32 %v69_v33, 0.0  ;;  %v80_v41 = vpack.c.bf16 %v75_v35, %v74_v34 }
   0xb   :  { %v78_v38 = vpack.c.bf16 %v71_v31, %v70_v30  ;;  %v79_v42 = vpack.c.bf16 %v73_v37, %v72_v36 }
   0xc   :  { %v81_v43 = vpack.c.bf16 %v77_v40, %v76_v39  ;;  %302 = vmatprep.mubr.msk.bf16.mxu1 %vm83_vm1, %v80_v41 }
   0xd   :  { %298 = vmatprep.mubr.msk.bf16.mxu0 %vm83_vm1, %v78_v38 }
   0xe   :  { %299 = vmatmul.mubr.msk.bf16.vlgmr.msra.gmra.mxu0 %vm83_vm1, %v79_v42  ;;  %303 = vmatmul.mubr.msk.bf16.vlgmr.msra.gmra.mxu1 %vm83_vm1, %v81_v43 }
  0xce   :  { %v300_v45 = vpop.f32.mrf.mxu0  ;;  %v304_v48 = vpop.f32.mrf.mxu1 }
  0xcf   :  { %v174_v47 = vmul.f32 %v300_v45, %v254_v44  ;;  %v178_v49 = vmul.f32 %v304_v48, %v254_v44 }
  0xd0   :  { %v134_v50 = vpop.f32.mrf.mxu0  ;;  %v150_v53 = vpop.f32.mrf.mxu1 }
  0xd1   :  { %v189_v51 = vadd.f32 %v255_v46, %v174_v47  ;;  %v172_v52 = vmul.f32 %v254_v44, %v134_v50  ;;  %v193_v54 = vadd.f32 %v255_v46, %v178_v49  ;;  %v176_v55 = vmul.f32 %v254_v44, %v150_v53 }
  0xd2   :  { %v301_v56 = vpop.f32.mrf.mxu0  ;;  %v305_v60 = vpop.f32.mrf.mxu1 }
  0xd3   :  { %v197_v57 = vmax.f32 %v189_v51, 0.0  ;;  %v187_v58 = vadd.f32 %v255_v46, %v172_v52  ;;  %v175_v59 = vmul.f32 %v301_v56, %v254_v44  ;;  %v201_v61 = vmax.f32 %v193_v54, 0.0 }
  0xd4   :  { %v191_v62 = vadd.f32 %v255_v46, %v176_v55  ;;  %v179_v63 = vmul.f32 %v305_v60, %v254_v44  ;;  %v137_v0 = vpop.f32.mrf.mxu0  ;;  %v153_v5 = vpop.f32.mrf.mxu1 }
  0xd5   :  { %v266_v1 = vpack.c.bf16 %v197_v57, %v197_v57  ;;  %v195_v2 = vmax.f32 %v187_v58, 0.0  ;;  %v190_v3 = vadd.f32 %v255_v46, %v175_v59  ;;  %v173_v4 = vmul.f32 %v254_v44, %v137_v0 }
  0xd6   :  { %v270_v6 = vpack.c.bf16 %v201_v61, %v201_v61  ;;  %v199_v7 = vmax.f32 %v191_v62, 0.0  ;;  %v194_v8 = vadd.f32 %v255_v46, %v179_v63  ;;  %v177_v9 = vmul.f32 %v254_v44, %v153_v5 }
  0xd7   :  { %238 = vst.msk [vmem:[%s414_s6 + $0x8] sm:$0xf] %vm235_vm2, %v266_v1  ;;  %v264_v10 = vpack.c.bf16 %v195_v2, %v195_v2  ;;  %v198_v11 = vmax.f32 %v190_v3, 0.0  ;;  %v188_v12 = vadd.f32 %v255_v46, %v173_v4 }
  0xd8   :  { %242 = vst.msk [vmem:[%s414_s6 + $0x18] sm:$0xf] %vm235_vm2, %v270_v6  ;;  %v268_v13 = vpack.c.bf16 %v199_v7, %v199_v7  ;;  %v202_v14 = vmax.f32 %v194_v8, 0.0  ;;  %v192_v15 = vadd.f32 %v255_v46, %v177_v9 }
  0xd9   :  { %236 = vst.msk [vmem:[%s414_s6] sm:$0xf] %vm235_vm2, %v264_v10  ;;  %v267_v16 = vpack.c.bf16 %v198_v11, %v198_v11  ;;  %v196_v17 = vmax.f32 %v188_v12, 0.0 }
  0xda   :  { %240 = vst.msk [vmem:[%s414_s6 + $0x10] sm:$0xf] %vm235_vm2, %v268_v13  ;;  %v271_v18 = vpack.c.bf16 %v202_v14, %v202_v14  ;;  %v200_v19 = vmax.f32 %v192_v15, 0.0 }
  0xdb   :  { %239 = vst.msk [vmem:[%s414_s6 + $0xc] sm:$0xf] %vm235_vm2, %v267_v16  ;;  %v265_v20 = vpack.c.bf16 %v196_v17, %v196_v17 }
  0xdc   :  { %243 = vst.msk [vmem:[%s414_s6 + $0x1c] sm:$0xf] %vm235_vm2, %v271_v18  ;;  %v269_v21 = vpack.c.bf16 %v200_v19, %v200_v19 }
  0xdd   :  { %237 = vst.msk [vmem:[%s414_s6 + $0x4] sm:$0xf] %vm235_vm2, %v265_v20 }
  0xde   :  { %241 = vst.msk [vmem:[%s414_s6 + $0x14] sm:$0xf] %vm235_vm2, %v269_v21 }

// kernel: densenet_trick_v3_forward.32
= control target key start
LH: loop header
LB: loop body
LE: loop exit
PB: predicated region body
PF: predicated region fallthrough
CT: control target
= control target key end

     0   :  { %v843_v0 = vlaneseq  ;;  %v2129_v4 = vmov 1983009808   ;;  %vm1801_vm0 = vcmask 1041409   ;;  %vm1804_vm1 = vcmask 1042434   ;;  %s2782_s0 = inlined_call_operand.vmem [shape: bf16[16,2,4,2,8], index: 0, kind: input, shape index: {}]   ;;  %s2783_s1 = inlined_call_operand.vmem [shape: bf16[16,4,8], index: 1, kind: output, shape index: {}]  }
   0x1   :  { %v8_v1 = vld [vmem:[%s2782_s0] sm:$0x1]  ;;  %v9_v2 = vld [vmem:[%s2782_s0 + $0x1] sm:$0x1]  ;;  %v10_v3 = vld [vmem:[%s2782_s0 + $0x2] sm:$0x1]  ;;  %v841_v5 = vunpack.c.l.s4 %v2129_v4 }
   0x2   :  { %v11_v6 = vld [vmem:[%s2782_s0 + $0x3] sm:$0x1]  ;;  %v12_v7 = vld [vmem:[%s2782_s0 + $0x4] sm:$0x1]  ;;  %v13_v8 = vld [vmem:[%s2782_s0 + $0x5] sm:$0x1]  ;;  %v136_v9 = vunpack.c.l.bf16 %v8_v1  ;;  %v137_v10 = vunpack.c.l.bf16 %v9_v2  ;;  %v138_v11 = vunpack.c.l.bf16 %v10_v3 }
   0x3   :  { %v14_v12 = vld [vmem:[%s2782_s0 + $0x6] sm:$0x1]  ;;  %v15_v13 = vld [vmem:[%s2782_s0 + $0x7] sm:$0x1]  ;;  %v139_v14 = vunpack.c.l.bf16 %v11_v6  ;;  %v140_v15 = vunpack.c.l.bf16 %v12_v7  ;;  %v141_v16 = vunpack.c.l.bf16 %v13_v8  ;;  %v842_v17 = vunpack.c.0.s8 %v841_v5  ;;  %v16_v18 = vld [vmem:[%s2782_s0 + $0x8] sm:$0x1] }
   0x4   :  { %v142_v19 = vunpack.c.l.bf16 %v14_v12  ;;  %v143_v20 = vunpack.c.l.bf16 %v15_v13  ;;  %v844_v21 = vshrl.u32 %v843_v0, 7  ;;  %v17_v22 = vld [vmem:[%s2782_s0 + $0x9] sm:$0x1]  ;;  %v18_v23 = vld [vmem:[%s2782_s0 + $0xa] sm:$0x1]  ;;  %v144_v28 = vunpack.c.l.bf16 %v16_v18 }
   0x5   :  { %v264_v24 = vadd.f32 %v140_v15, %v136_v9  ;;  %v265_v25 = vadd.f32 %v141_v16, %v137_v10  ;;  %v19_v26 = vld [vmem:[%s2782_s0 + $0xb] sm:$0x1]  ;;  %v20_v27 = vld [vmem:[%s2782_s0 + $0xc] sm:$0x1]  ;;  %v21_v32 = vld [vmem:[%s2782_s0 + $0xd] sm:$0x1]  ;;  %v145_v35 = vunpack.c.l.bf16 %v17_v22  ;;  %v146_v38 = vunpack.c.l.bf16 %v18_v23 }
   0x6   :  { %v266_v29 = vadd.f32 %v142_v19, %v138_v11  ;;  %v267_v30 = vadd.f32 %v143_v20, %v139_v14  ;;  %v2179_v31 = vsub.s32 %v842_v17, %v844_v21  ;;  %v22_v33 = vld [vmem:[%s2782_s0 + $0xe] sm:$0x1]  ;;  %v23_v34 = vld [vmem:[%s2782_s0 + $0xf] sm:$0x1]  ;;  %v147_v39 = vunpack.c.l.bf16 %v19_v26  ;;  %v24_v20 = vld [vmem:[%s2782_s0 + $0x10] sm:$0x1] }
   0x7   :  { %v2064_v36 = vrot.slane %v264_v24, 9  ;;  %v2065_v37 = vrot.slane %v265_v25, 9  ;;  %v148_v42 = vunpack.c.l.bf16 %v20_v27  ;;  %v149_v43 = vunpack.c.l.bf16 %v21_v32 }
   0x8   :  { %v2066_v40 = vrot.slane %v266_v29, 9  ;;  %v2067_v41 = vrot.slane %v267_v30, 9  ;;  %v150_v46 = vunpack.c.l.bf16 %v22_v33  ;;  %v151_v47 = vunpack.c.l.bf16 %v23_v34  ;;  %v26_v34 = vld [vmem:[%s2782_s0 + $0x12] sm:$0x1] }
   0x9   :  { %v584_v44 = vadd.f32 %v2064_v36, %v264_v24  ;;  %v585_v45 = vadd.f32 %v2065_v37, %v265_v25  ;;  %v268_v50 = vadd.f32 %v148_v42, %v144_v28  ;;  %v269_v51 = vadd.f32 %v149_v43, %v145_v35 }
   0xa   :  { %v586_v48 = vadd.f32 %v2066_v40, %v266_v29  ;;  %v587_v49 = vadd.f32 %v2067_v41, %v267_v30  ;;  %v270_v54 = vadd.f32 %v150_v46, %v146_v38  ;;  %v271_v55 = vadd.f32 %v151_v47, %v147_v39  ;;  %v25_v29 = vld [vmem:[%s2782_s0 + $0x11] sm:$0x1]  ;;  %v27_v40 = vld [vmem:[%s2782_s0 + $0x13] sm:$0x1] }
   0xb   :  { %v648_v52 = vmul.f32 0.25, %v584_v44  ;;  %v649_v53 = vmul.f32 0.25, %v585_v45  ;;  %v2068_v58 = vrot.slane %v268_v50, 9  ;;  %v2069_v59 = vrot.slane %v269_v51, 9  ;;  %v28_v44 = vld [vmem:[%s2782_s0 + $0x14] sm:$0x1] }
   0xc   :  { %v650_v56 = vmul.f32 0.25, %v586_v48  ;;  %v651_v57 = vmul.f32 0.25, %v587_v49  ;;  %v2070_v62 = vrot.slane %v270_v54, 9  ;;  %v2071_v63 = vrot.slane %v271_v55, 9  ;;  %v29_v45 = vld [vmem:[%s2782_s0 + $0x15] sm:$0x1] }
   0xd   :  { %v712_v60 = vpack.c.bf16 %v648_v52, %v648_v52  ;;  %v713_v61 = vpack.c.bf16 %v649_v53, %v649_v53  ;;  %vm1807_vm2 = vcmask 1043459   ;;  %v588_v2 = vadd.f32 %v2068_v58, %v268_v50  ;;  %v30_v50 = vld [vmem:[%s2782_s0 + $0x16] sm:$0x1] }
   0xe   :  { %v714_v0 = vpack.c.bf16 %v650_v56, %v650_v56  ;;  %v715_v1 = vpack.c.bf16 %v651_v57, %v651_v57  ;;  %v589_v3 = vadd.f32 %v2069_v59, %v269_v51  ;;  %v590_v6 = vadd.f32 %v2070_v62, %v270_v54  ;;  %v31_v51 = vld [vmem:[%s2782_s0 + $0x17] sm:$0x1] }
   0xf   :  { %v846_v4 = vrot.slane %v712_v60, %v2179_v31  ;;  %v853_v5 = vrot.slane %v713_v61, %v2179_v31  ;;  %v591_v7 = vadd.f32 %v2071_v63, %v271_v55  ;;  %v652_v10 = vmul.f32 0.25, %v588_v2  ;;  %v32_v61 = vld [vmem:[%s2782_s0 + $0x18] sm:$0x1]  ;;  %v33_v2 = vld [vmem:[%s2782_s0 + $0x19] sm:$0x1] }
  0x10   :  { %v860_v8 = vrot.slane %v714_v0, %v2179_v31  ;;  %v867_v9 = vrot.slane %v715_v1, %v2179_v31  ;;  %v653_v11 = vmul.f32 0.25, %v589_v3  ;;  %v654_v14 = vmul.f32 0.25, %v590_v6 }
  0x11   :  { %v1294_v12 = vrot.slane %v846_v4, %v2179_v31  ;;  %v1301_v13 = vrot.slane %v853_v5, %v2179_v31  ;;  %v655_v15 = vmul.f32 0.25, %v591_v7  ;;  %v716_v18 = vpack.c.bf16 %v652_v10, %v652_v10  ;;  %v34_v7 = vld [vmem:[%s2782_s0 + $0x1a] sm:$0x1] }
  0x12   :  { %v1308_v16 = vrot.slane %v860_v8, %v2179_v31  ;;  %v1315_v17 = vrot.slane %v867_v9, %v2179_v31  ;;  %v717_v19 = vpack.c.bf16 %v653_v11, %v653_v11  ;;  %vm2043_vm3 = vcmask 58368   ;;  %v35_v11 = vld [vmem:[%s2782_s0 + $0x1b] sm:$0x1] }
  0x13   :  { %v1736_v21 = vunpack.c.l.b16 %v1294_v12  ;;  %v1737_v22 = vunpack.c.l.b16 %v1301_v13  ;;  %v718_v23 = vpack.c.bf16 %v654_v14, %v654_v14  ;;  %v719_v24 = vpack.c.bf16 %v655_v15, %v655_v15  ;;  %v36_v12 = vld [vmem:[%s2782_s0 + $0x1c] sm:$0x1] }
  0x14   :  { %v1738_v25 = vunpack.c.l.b16 %v1308_v16  ;;  %v1739_v26 = vunpack.c.l.b16 %v1315_v17  ;;  %v874_v27 = vrot.slane %v716_v18, %v2179_v31  ;;  %v881_v28 = vrot.slane %v717_v19, %v2179_v31  ;;  %v37_v17 = vld [vmem:[%s2782_s0 + $0x1d] sm:$0x1] }
  0x15   :  { %v1800_v30 = vrot.slane %v1737_v22, 7  ;;  %v888_v32 = vrot.slane %v718_v23, %v2179_v31  ;;  %v895_v33 = vrot.slane %v719_v24, %v2179_v31  ;;  %v152_v35 = vunpack.c.l.bf16 %v24_v20  ;;  %v38_v22 = vld [vmem:[%s2782_s0 + $0x1e] sm:$0x1]  ;;  %v39_v23 = vld [vmem:[%s2782_s0 + $0x1f] sm:$0x1] }
  0x16   :  { %v1803_v36 = vrot.slane %v1738_v25, 6  ;;  %v1806_v37 = vrot.slane %v1739_v26, 5  ;;  %v1322_v38 = vrot.slane %v874_v27, %v2179_v31  ;;  %v1329_v39 = vrot.slane %v881_v28, %v2179_v31 }
  0x17   :  { %v1802_v41 = vsel %vm1801_vm0, %v1800_v30, %v1736_v21  ;;  %v1336_v42 = vrot.slane %v888_v32, %v2179_v31  ;;  %v1343_v43 = vrot.slane %v895_v33, %v2179_v31  ;;  %v153_v46 = vunpack.c.l.bf16 %v25_v29 }
  0x18   :  { %v1805_v47 = vsel %vm1804_vm1, %v1803_v36, %v1802_v41  ;;  %v1740_v48 = vunpack.c.l.b16 %v1322_v38  ;;  %v1741_v49 = vunpack.c.l.b16 %v1329_v39  ;;  %v154_v52 = vunpack.c.l.bf16 %v26_v34 }
  0x19   :  { %v1808_v53 = vsel %vm1807_vm2, %v1806_v37, %v1805_v47  ;;  %v1742_v54 = vunpack.c.l.b16 %v1336_v42  ;;  %v1743_v55 = vunpack.c.l.b16 %v1343_v43  ;;  %v155_v56 = vunpack.c.l.bf16 %v27_v40 }
  0x1a   :  { %v1899_v57 = vpack.c.b16 %v1808_v53, %v1808_v53  ;;  %v1809_v58 = vrot.slane %v1741_v49, 7  ;;  %v156_v59 = vunpack.c.l.bf16 %v28_v44  ;;  %v157_v60 = vunpack.c.l.bf16 %v29_v45 }
  0x1b   :  { %v1811_v62 = vrot.slane %v1742_v54, 6  ;;  %v1813_v63 = vrot.slane %v1743_v55, 5  ;;  %v158_v0 = vunpack.c.l.bf16 %v30_v50  ;;  %v159_v1 = vunpack.c.l.bf16 %v31_v51 }
  0x1c   :  { %v1921_v3 = vrot.slane %v1899_v57, %v2179_v31  ;;  %v1810_v4 = vsel %vm1801_vm0, %v1809_v58, %v1740_v48  ;;  %v272_v5 = vadd.f32 %v156_v59, %v152_v35  ;;  %v273_v6 = vadd.f32 %v157_v60, %v153_v46 }
  0x1d   :  { %v1812_v8 = vsel %vm1804_vm1, %v1811_v62, %v1810_v4  ;;  %v274_v9 = vadd.f32 %v158_v0, %v154_v52  ;;  %v275_v10 = vadd.f32 %v159_v1, %v155_v56  ;;  %v160_v13 = vunpack.c.l.bf16 %v32_v61 }
  0x1e   :  { %2044 = vst.msk [vmem:[%s2783_s1] sm:$0x3] %vm2043_vm3, %v1921_v3  ;;  %v1814_v14 = vsel %vm1807_vm2, %v1813_v63, %v1812_v8  ;;  %v2072_v15 = vrot.slane %v272_v5, 9  ;;  %v2073_v16 = vrot.slane %v273_v6, 9  ;;  %v161_v18 = vunpack.c.l.bf16 %v33_v2  ;;  %v40_v2 = vld [vmem:[%s2782_s0 + $0x20] sm:$0x1] }
  0x1f   :  { %v1900_v19 = vpack.c.b16 %v1814_v14, %v1814_v14  ;;  %v2074_v20 = vrot.slane %v274_v9, 9  ;;  %v2075_v21 = vrot.slane %v275_v10, 9  ;;  %v162_v24 = vunpack.c.l.bf16 %v34_v7 }
  0x20   :  { %v592_v25 = vadd.f32 %v2072_v15, %v272_v5  ;;  %v593_v26 = vadd.f32 %v2073_v16, %v273_v6  ;;  %v163_v27 = vunpack.c.l.bf16 %v35_v11  ;;  %v164_v28 = vunpack.c.l.bf16 %v36_v12  ;;  %v41_v11 = vld [vmem:[%s2782_s0 + $0x21] sm:$0x1]  ;;  %v42_v15 = vld [vmem:[%s2782_s0 + $0x22] sm:$0x1] }
  0x21   :  { %v1928_v29 = vrot.slane %v1900_v19, %v2179_v31  ;;  %v594_v30 = vadd.f32 %v2074_v20, %v274_v9  ;;  %v595_v32 = vadd.f32 %v2075_v21, %v275_v10  ;;  %v165_v33 = vunpack.c.l.bf16 %v37_v17  ;;  %v43_v21 = vld [vmem:[%s2782_s0 + $0x23] sm:$0x1] }
  0x22   :  { %v656_v34 = vmul.f32 0.25, %v592_v25  ;;  %v657_v35 = vmul.f32 0.25, %v593_v26  ;;  %v166_v36 = vunpack.c.l.bf16 %v38_v22  ;;  %v167_v37 = vunpack.c.l.bf16 %v39_v23  ;;  %v44_v25 = vld [vmem:[%s2782_s0 + $0x24] sm:$0x1] }
  0x23   :  { %2045 = vst.msk [vmem:[%s2783_s1 + $0x2] sm:$0x3] %vm2043_vm3, %v1928_v29  ;;  %v658_v38 = vmul.f32 0.25, %v594_v30  ;;  %v659_v39 = vmul.f32 0.25, %v595_v32  ;;  %v276_v40 = vadd.f32 %v164_v28, %v160_v13  ;;  %v277_v41 = vadd.f32 %v165_v33, %v161_v18  ;;  %v45_v30 = vld [vmem:[%s2782_s0 + $0x25] sm:$0x1] }
  0x24   :  { %v720_v42 = vpack.c.bf16 %v656_v34, %v656_v34  ;;  %v721_v43 = vpack.c.bf16 %v657_v35, %v657_v35  ;;  %v278_v44 = vadd.f32 %v166_v36, %v162_v24  ;;  %v279_v45 = vadd.f32 %v167_v37, %v163_v27  ;;  %v46_v32 = vld [vmem:[%s2782_s0 + $0x26] sm:$0x1]  ;;  %v47_v37 = vld [vmem:[%s2782_s0 + $0x27] sm:$0x1] }
  0x25   :  { %v722_v46 = vpack.c.bf16 %v658_v38, %v658_v38  ;;  %v723_v47 = vpack.c.bf16 %v659_v39, %v659_v39  ;;  %v2076_v48 = vrot.slane %v276_v40, 9  ;;  %v2077_v49 = vrot.slane %v277_v41, 9 }
  0x26   :  { %v902_v50 = vrot.slane %v720_v42, %v2179_v31  ;;  %v909_v51 = vrot.slane %v721_v43, %v2179_v31  ;;  %v2078_v52 = vrot.slane %v278_v44, 9  ;;  %v2079_v53 = vrot.slane %v279_v45, 9 }
  0x27   :  { %v916_v54 = vrot.slane %v722_v46, %v2179_v31  ;;  %v923_v55 = vrot.slane %v723_v47, %v2179_v31  ;;  %v596_v56 = vadd.f32 %v2076_v48, %v276_v40  ;;  %v597_v57 = vadd.f32 %v2077_v49, %v277_v41  ;;  %v48_v47 = vld [vmem:[%s2782_s0 + $0x28] sm:$0x1] }
  0x28   :  { %v1350_v58 = vrot.slane %v902_v50, %v2179_v31  ;;  %v1357_v59 = vrot.slane %v909_v51, %v2179_v31  ;;  %v598_v60 = vadd.f32 %v2078_v52, %v278_v44  ;;  %v599_v61 = vadd.f32 %v2079_v53, %v279_v45  ;;  %v49_v52 = vld [vmem:[%s2782_s0 + $0x29] sm:$0x1] }
  0x29   :  { %v1364_v62 = vrot.slane %v916_v54, %v2179_v31  ;;  %v1371_v63 = vrot.slane %v923_v55, %v2179_v31  ;;  %v660_v0 = vmul.f32 0.25, %v596_v56  ;;  %v661_v1 = vmul.f32 0.25, %v597_v57  ;;  %v50_v57 = vld [vmem:[%s2782_s0 + $0x2a] sm:$0x1] }
  0x2a   :  { %v1744_v3 = vunpack.c.l.b16 %v1350_v58  ;;  %v1745_v4 = vunpack.c.l.b16 %v1357_v59  ;;  %v662_v5 = vmul.f32 0.25, %v598_v60  ;;  %v663_v6 = vmul.f32 0.25, %v599_v61  ;;  %v51_v61 = vld [vmem:[%s2782_s0 + $0x2b] sm:$0x1] }
  0x2b   :  { %v1746_v7 = vunpack.c.l.b16 %v1364_v62  ;;  %v1747_v8 = vunpack.c.l.b16 %v1371_v63  ;;  %v724_v9 = vpack.c.bf16 %v660_v0, %v660_v0  ;;  %v725_v10 = vpack.c.bf16 %v661_v1, %v661_v1 }
  0x2c   :  { %v1815_v12 = vrot.slane %v1745_v4, 7  ;;  %v726_v13 = vpack.c.bf16 %v662_v5, %v662_v5  ;;  %v727_v14 = vpack.c.bf16 %v663_v6, %v663_v6  ;;  %v168_v16 = vunpack.c.l.bf16 %v40_v2  ;;  %v52_v2 = vld [vmem:[%s2782_s0 + $0x2c] sm:$0x1] }
  0x2d   :  { %v1817_v17 = vrot.slane %v1746_v7, 6  ;;  %v1819_v18 = vrot.slane %v1747_v8, 5  ;;  %v930_v19 = vrot.slane %v724_v9, %v2179_v31  ;;  %v937_v20 = vrot.slane %v725_v10, %v2179_v31  ;;  %v54_v8 = vld [vmem:[%s2782_s0 + $0x2e] sm:$0x1] }
  0x2e   :  { %v1816_v22 = vsel %vm1801_vm0, %v1815_v12, %v1744_v3  ;;  %v944_v23 = vrot.slane %v726_v13, %v2179_v31  ;;  %v951_v24 = vrot.slane %v727_v14, %v2179_v31  ;;  %v169_v26 = vunpack.c.l.bf16 %v41_v11  ;;  %v53_v3 = vld [vmem:[%s2782_s0 + $0x2d] sm:$0x1]  ;;  %v55_v13 = vld [vmem:[%s2782_s0 + $0x2f] sm:$0x1] }
  0x2f   :  { %v1818_v27 = vsel %vm1804_vm1, %v1817_v17, %v1816_v22  ;;  %v1378_v28 = vrot.slane %v930_v19, %v2179_v31  ;;  %v1385_v29 = vrot.slane %v937_v20, %v2179_v31  ;;  %v170_v33 = vunpack.c.l.bf16 %v42_v15 }
  0x30   :  { %v1820_v34 = vsel %vm1807_vm2, %v1819_v18, %v1818_v27  ;;  %v1392_v35 = vrot.slane %v944_v23, %v2179_v31  ;;  %v1399_v36 = vrot.slane %v951_v24, %v2179_v31  ;;  %v171_v38 = vunpack.c.l.bf16 %v43_v21 }
  0x31   :  { %v1901_v39 = vpack.c.b16 %v1820_v34, %v1820_v34  ;;  %v1748_v40 = vunpack.c.l.b16 %v1378_v28  ;;  %v1749_v41 = vunpack.c.l.b16 %v1385_v29  ;;  %v172_v42 = vunpack.c.l.bf16 %v44_v25 }
  0x32   :  { %v1750_v43 = vunpack.c.l.b16 %v1392_v35  ;;  %v1751_v44 = vunpack.c.l.b16 %v1399_v36  ;;  %v173_v45 = vunpack.c.l.bf16 %v45_v30  ;;  %v174_v46 = vunpack.c.l.bf16 %v46_v32 }
  0x33   :  { %v1935_v48 = vrot.slane %v1901_v39, %v2179_v31  ;;  %v1821_v49 = vrot.slane %v1749_v41, 7  ;;  %v175_v50 = vunpack.c.l.bf16 %v47_v37  ;;  %v280_v51 = vadd.f32 %v172_v42, %v168_v16 }
  0x34   :  { %v1823_v53 = vrot.slane %v1750_v43, 6  ;;  %v1825_v54 = vrot.slane %v1751_v44, 5  ;;  %v281_v55 = vadd.f32 %v173_v45, %v169_v26  ;;  %v282_v56 = vadd.f32 %v174_v46, %v170_v33 }
  0x35   :  { %2046 = vst.msk [vmem:[%s2783_s1 + $0x4] sm:$0x3] %vm2043_vm3, %v1935_v48  ;;  %v1822_v58 = vsel %vm1801_vm0, %v1821_v49, %v1748_v40  ;;  %v283_v59 = vadd.f32 %v175_v50, %v171_v38  ;;  %v2080_v60 = vrot.slane %v280_v51, 9  ;;  %v176_v62 = vunpack.c.l.bf16 %v48_v47  ;;  %v56_v48 = vld [vmem:[%s2782_s0 + $0x30] sm:$0x1] }
  0x36   :  { %v1824_v63 = vsel %vm1804_vm1, %v1823_v53, %v1822_v58  ;;  %v2081_v0 = vrot.slane %v281_v55, 9  ;;  %v2082_v1 = vrot.slane %v282_v56, 9  ;;  %v177_v4 = vunpack.c.l.bf16 %v49_v52 }
  0x37   :  { %v1826_v5 = vsel %vm1807_vm2, %v1825_v54, %v1824_v63  ;;  %v2083_v6 = vrot.slane %v283_v59, 9  ;;  %v600_v7 = vadd.f32 %v2080_v60, %v280_v51  ;;  %v178_v9 = vunpack.c.l.bf16 %v50_v57  ;;  %v57_v57 = vld [vmem:[%s2782_s0 + $0x31] sm:$0x1] }
  0x38   :  { %v1902_v10 = vpack.c.b16 %v1826_v5, %v1826_v5  ;;  %v601_v11 = vadd.f32 %v2081_v0, %v281_v55  ;;  %v602_v12 = vadd.f32 %v2082_v1, %v282_v56  ;;  %v179_v14 = vunpack.c.l.bf16 %v51_v61  ;;  %v58_v61 = vld [vmem:[%s2782_s0 + $0x32] sm:$0x1] }
  0x39   :  { %v603_v15 = vadd.f32 %v2083_v6, %v283_v59  ;;  %v664_v16 = vmul.f32 0.25, %v600_v7  ;;  %v180_v17 = vunpack.c.l.bf16 %v52_v2  ;;  %v181_v18 = vunpack.c.l.bf16 %v53_v3  ;;  %v59_v3 = vld [vmem:[%s2782_s0 + $0x33] sm:$0x1]  ;;  %v60_v7 = vld [vmem:[%s2782_s0 + $0x34] sm:$0x1] }
  0x3a   :  { %v1942_v19 = vrot.slane %v1902_v10, %v2179_v31  ;;  %v665_v20 = vmul.f32 0.25, %v601_v11  ;;  %v666_v21 = vmul.f32 0.25, %v602_v12  ;;  %v182_v22 = vunpack.c.l.bf16 %v54_v8  ;;  %v61_v12 = vld [vmem:[%s2782_s0 + $0x35] sm:$0x1] }
  0x3b   :  { %v667_v23 = vmul.f32 0.25, %v603_v15  ;;  %v728_v24 = vpack.c.bf16 %v664_v16, %v664_v16  ;;  %v183_v25 = vunpack.c.l.bf16 %v55_v13  ;;  %v284_v26 = vadd.f32 %v180_v17, %v176_v62  ;;  %v62_v17 = vld [vmem:[%s2782_s0 + $0x36] sm:$0x1] }
  0x3c   :  { %2047 = vst.msk [vmem:[%s2783_s1 + $0x6] sm:$0x3] %vm2043_vm3, %v1942_v19  ;;  %v729_v27 = vpack.c.bf16 %v665_v20, %v665_v20  ;;  %v730_v28 = vpack.c.bf16 %v666_v21, %v666_v21  ;;  %v285_v29 = vadd.f32 %v181_v18, %v177_v4  ;;  %v286_v30 = vadd.f32 %v182_v22, %v178_v9  ;;  %v63_v18 = vld [vmem:[%s2782_s0 + $0x37] sm:$0x1] }
  0x3d   :  { %v731_v32 = vpack.c.bf16 %v667_v23, %v667_v23  ;;  %v958_v33 = vrot.slane %v728_v24, %v2179_v31  ;;  %v287_v34 = vadd.f32 %v183_v25, %v179_v14  ;;  %v2084_v35 = vrot.slane %v284_v26, 9 }
  0x3e   :  { %v965_v36 = vrot.slane %v729_v27, %v2179_v31  ;;  %v972_v37 = vrot.slane %v730_v28, %v2179_v31  ;;  %v2085_v38 = vrot.slane %v285_v29, 9  ;;  %v2086_v39 = vrot.slane %v286_v30, 9 }
  0x3f   :  { %v979_v40 = vrot.slane %v731_v32, %v2179_v31  ;;  %v1406_v41 = vrot.slane %v958_v33, %v2179_v31  ;;  %v2087_v42 = vrot.slane %v287_v34, 9  ;;  %v604_v43 = vadd.f32 %v2084_v35, %v284_v26  ;;  %v64_v33 = vld [vmem:[%s2782_s0 + $0x38] sm:$0x1] }
  0x40   :  { %v1413_v44 = vrot.slane %v965_v36, %v2179_v31  ;;  %v1420_v45 = vrot.slane %v972_v37, %v2179_v31  ;;  %v605_v46 = vadd.f32 %v2085_v38, %v285_v29  ;;  %v606_v47 = vadd.f32 %v2086_v39, %v286_v30  ;;  %v65_v38 = vld [vmem:[%s2782_s0 + $0x39] sm:$0x1] }
  0x41   :  { %v1427_v49 = vrot.slane %v979_v40, %v2179_v31  ;;  %v1752_v50 = vunpack.c.l.b16 %v1406_v41  ;;  %v607_v51 = vadd.f32 %v2087_v42, %v287_v34  ;;  %v668_v52 = vmul.f32 0.25, %v604_v43  ;;  %v66_v43 = vld [vmem:[%s2782_s0 + $0x3a] sm:$0x1] }
  0x42   :  { %v1753_v53 = vunpack.c.l.b16 %v1413_v44  ;;  %v1754_v54 = vunpack.c.l.b16 %v1420_v45  ;;  %v669_v55 = vmul.f32 0.25, %v605_v46  ;;  %v670_v56 = vmul.f32 0.25, %v606_v47  ;;  %v67_v47 = vld [vmem:[%s2782_s0 + $0x3b] sm:$0x1] }
  0x43   :  { %v1755_v58 = vunpack.c.l.b16 %v1427_v49  ;;  %v671_v59 = vmul.f32 0.25, %v607_v51  ;;  %v732_v60 = vpack.c.bf16 %v668_v52, %v668_v52  ;;  %v184_v62 = vunpack.c.l.bf16 %v56_v48  ;;  %v68_v52 = vld [vmem:[%s2782_s0 + $0x3c] sm:$0x1] }
  0x44   :  { %v1827_v63 = vrot.slane %v1753_v53, 7  ;;  %v1829_v0 = vrot.slane %v1754_v54, 6  ;;  %v733_v1 = vpack.c.bf16 %v669_v55, %v669_v55  ;;  %v734_v2 = vpack.c.bf16 %v670_v56, %v670_v56 }
  0x45   :  { %v1831_v4 = vrot.slane %v1755_v58, 5  ;;  %v735_v5 = vpack.c.bf16 %v671_v59, %v671_v59  ;;  %v986_v6 = vrot.slane %v732_v60, %v2179_v31  ;;  %v185_v8 = vunpack.c.l.bf16 %v57_v57  ;;  %v69_v57 = vld [vmem:[%s2782_s0 + $0x3d] sm:$0x1]  ;;  %v70_v58 = vld [vmem:[%s2782_s0 + $0x3e] sm:$0x1] }
  0x46   :  { %v1828_v9 = vsel %vm1801_vm0, %v1827_v63, %v1752_v50  ;;  %v993_v10 = vrot.slane %v733_v1, %v2179_v31  ;;  %v1000_v11 = vrot.slane %v734_v2, %v2179_v31  ;;  %v186_v13 = vunpack.c.l.bf16 %v58_v61  ;;  %v71_v63 = vld [vmem:[%s2782_s0 + $0x3f] sm:$0x1] }
  0x47   :  { %v1830_v14 = vsel %vm1804_vm1, %v1829_v0, %v1828_v9  ;;  %v1007_v15 = vrot.slane %v735_v5, %v2179_v31  ;;  %v1434_v16 = vrot.slane %v986_v6, %v2179_v31  ;;  %v187_v19 = vunpack.c.l.bf16 %v59_v3 }
  0x48   :  { %v1832_v20 = vsel %vm1807_vm2, %v1831_v4, %v1830_v14  ;;  %v1441_v21 = vrot.slane %v993_v10, %v2179_v31  ;;  %v1448_v22 = vrot.slane %v1000_v11, %v2179_v31  ;;  %v188_v23 = vunpack.c.l.bf16 %v60_v7 }
  0x49   :  { %v1903_v24 = vpack.c.b16 %v1832_v20, %v1832_v20  ;;  %v1455_v25 = vrot.slane %v1007_v15, %v2179_v31  ;;  %v1756_v26 = vunpack.c.l.b16 %v1434_v16  ;;  %v189_v27 = vunpack.c.l.bf16 %v61_v12 }
  0x4a   :  { %v1757_v28 = vunpack.c.l.b16 %v1441_v21  ;;  %v1758_v29 = vunpack.c.l.b16 %v1448_v22  ;;  %v190_v30 = vunpack.c.l.bf16 %v62_v17  ;;  %v191_v32 = vunpack.c.l.bf16 %v63_v18 }
  0x4b   :  { %v1949_v34 = vrot.slane %v1903_v24, %v2179_v31  ;;  %v1759_v35 = vunpack.c.l.b16 %v1455_v25  ;;  %v288_v36 = vadd.f32 %v188_v23, %v184_v62  ;;  %v289_v37 = vadd.f32 %v189_v27, %v185_v8 }
  0x4c   :  { %v1833_v39 = vrot.slane %v1757_v28, 7  ;;  %v1835_v40 = vrot.slane %v1758_v29, 6  ;;  %v290_v41 = vadd.f32 %v190_v30, %v186_v13  ;;  %v291_v42 = vadd.f32 %v191_v32, %v187_v19 }
  0x4d   :  { %2048 = vst.msk [vmem:[%s2783_s1 + $0x8] sm:$0x3] %vm2043_vm3, %v1949_v34  ;;  %v1837_v44 = vrot.slane %v1759_v35, 5  ;;  %v2088_v45 = vrot.slane %v288_v36, 9  ;;  %v2089_v46 = vrot.slane %v289_v37, 9  ;;  %v192_v48 = vunpack.c.l.bf16 %v64_v33 }
  0x4e   :  { %v1834_v49 = vsel %vm1801_vm0, %v1833_v39, %v1756_v26  ;;  %v2090_v50 = vrot.slane %v290_v41, 9  ;;  %v2091_v51 = vrot.slane %v291_v42, 9  ;;  %v193_v53 = vunpack.c.l.bf16 %v65_v38  ;;  %v72_v34 = vld [vmem:[%s2782_s0 + $0x40] sm:$0x1] }
  0x4f   :  { %v1836_v54 = vsel %vm1804_vm1, %v1835_v40, %v1834_v49  ;;  %v608_v55 = vadd.f32 %v2088_v45, %v288_v36  ;;  %v609_v56 = vadd.f32 %v2089_v46, %v289_v37  ;;  %v194_v59 = vunpack.c.l.bf16 %v66_v43  ;;  %v73_v43 = vld [vmem:[%s2782_s0 + $0x41] sm:$0x1] }
  0x50   :  { %v1838_v60 = vsel %vm1807_vm2, %v1837_v44, %v1836_v54  ;;  %v610_v61 = vadd.f32 %v2090_v50, %v290_v41  ;;  %v611_v62 = vadd.f32 %v2091_v51, %v291_v42  ;;  %v195_v0 = vunpack.c.l.bf16 %v67_v47  ;;  %v74_v47 = vld [vmem:[%s2782_s0 + $0x42] sm:$0x1] }
  0x51   :  { %v1904_v1 = vpack.c.b16 %v1838_v60, %v1838_v60  ;;  %v672_v2 = vmul.f32 0.25, %v608_v55  ;;  %v673_v3 = vmul.f32 0.25, %v609_v56  ;;  %v196_v4 = vunpack.c.l.bf16 %v68_v52 }
  0x52   :  { %v674_v5 = vmul.f32 0.25, %v610_v61  ;;  %v675_v6 = vmul.f32 0.25, %v611_v62  ;;  %v197_v7 = vunpack.c.l.bf16 %v69_v57  ;;  %v198_v8 = vunpack.c.l.bf16 %v70_v58  ;;  %v76_v57 = vld [vmem:[%s2782_s0 + $0x44] sm:$0x1]  ;;  %v77_v62 = vld [vmem:[%s2782_s0 + $0x45] sm:$0x1] }
  0x53   :  { %v1956_v9 = vrot.slane %v1904_v1, %v2179_v31  ;;  %v736_v10 = vpack.c.bf16 %v672_v2, %v672_v2  ;;  %v737_v11 = vpack.c.bf16 %v673_v3, %v673_v3  ;;  %v199_v12 = vunpack.c.l.bf16 %v71_v63  ;;  %v78_v63 = vld [vmem:[%s2782_s0 + $0x46] sm:$0x1] }
  0x54   :  { %v738_v13 = vpack.c.bf16 %v674_v5, %v674_v5  ;;  %v739_v14 = vpack.c.bf16 %v675_v6, %v675_v6  ;;  %v292_v15 = vadd.f32 %v196_v4, %v192_v48  ;;  %v293_v16 = vadd.f32 %v197_v7, %v193_v53  ;;  %v75_v53 = vld [vmem:[%s2782_s0 + $0x43] sm:$0x1]  ;;  %v79_v4 = vld [vmem:[%s2782_s0 + $0x47] sm:$0x1] }
  0x55   :  { %2049 = vst.msk [vmem:[%s2783_s1 + $0xa] sm:$0x3] %vm2043_vm3, %v1956_v9  ;;  %v1014_v17 = vrot.slane %v736_v10, %v2179_v31  ;;  %v1021_v18 = vrot.slane %v737_v11, %v2179_v31  ;;  %v294_v19 = vadd.f32 %v198_v8, %v194_v59  ;;  %v295_v20 = vadd.f32 %v199_v12, %v195_v0 }
  0x56   :  { %v1028_v21 = vrot.slane %v738_v13, %v2179_v31  ;;  %v1035_v22 = vrot.slane %v739_v14, %v2179_v31  ;;  %v2092_v23 = vrot.slane %v292_v15, 9  ;;  %v2093_v24 = vrot.slane %v293_v16, 9  ;;  %v80_v14 = vld [vmem:[%s2782_s0 + $0x48] sm:$0x1] }
  0x57   :  { %v1462_v25 = vrot.slane %v1014_v17, %v2179_v31  ;;  %v1469_v26 = vrot.slane %v1021_v18, %v2179_v31  ;;  %v2094_v27 = vrot.slane %v294_v19, 9  ;;  %v2095_v28 = vrot.slane %v295_v20, 9 }
  0x58   :  { %v1476_v29 = vrot.slane %v1028_v21, %v2179_v31  ;;  %v1483_v30 = vrot.slane %v1035_v22, %v2179_v31  ;;  %v612_v32 = vadd.f32 %v2092_v23, %v292_v15  ;;  %v613_v33 = vadd.f32 %v2093_v24, %v293_v16  ;;  %v81_v23 = vld [vmem:[%s2782_s0 + $0x49] sm:$0x1] }
  0x59   :  { %v1760_v35 = vunpack.c.l.b16 %v1462_v25  ;;  %v1761_v36 = vunpack.c.l.b16 %v1469_v26  ;;  %v614_v37 = vadd.f32 %v2094_v27, %v294_v19  ;;  %v615_v38 = vadd.f32 %v2095_v28, %v295_v20  ;;  %v82_v27 = vld [vmem:[%s2782_s0 + $0x4a] sm:$0x1] }
  0x5a   :  { %v1762_v39 = vunpack.c.l.b16 %v1476_v29  ;;  %v1763_v40 = vunpack.c.l.b16 %v1483_v30  ;;  %v676_v41 = vmul.f32 0.25, %v612_v32  ;;  %v677_v42 = vmul.f32 0.25, %v613_v33 }
  0x5b   :  { %v1839_v44 = vrot.slane %v1761_v36, 7  ;;  %v678_v45 = vmul.f32 0.25, %v614_v37  ;;  %v679_v46 = vmul.f32 0.25, %v615_v38  ;;  %v200_v48 = vunpack.c.l.bf16 %v72_v34  ;;  %v83_v34 = vld [vmem:[%s2782_s0 + $0x4b] sm:$0x1] }
  0x5c   :  { %v1841_v49 = vrot.slane %v1762_v39, 6  ;;  %v1843_v50 = vrot.slane %v1763_v40, 5  ;;  %v740_v51 = vpack.c.bf16 %v676_v41, %v676_v41  ;;  %v741_v52 = vpack.c.bf16 %v677_v42, %v677_v42  ;;  %v84_v38 = vld [vmem:[%s2782_s0 + $0x4c] sm:$0x1] }
  0x5d   :  { %v1840_v54 = vsel %vm1801_vm0, %v1839_v44, %v1760_v35  ;;  %v742_v55 = vpack.c.bf16 %v678_v45, %v678_v45  ;;  %v743_v56 = vpack.c.bf16 %v679_v46, %v679_v46  ;;  %v201_v58 = vunpack.c.l.bf16 %v73_v43  ;;  %v85_v43 = vld [vmem:[%s2782_s0 + $0x4d] sm:$0x1]  ;;  %v86_v44 = vld [vmem:[%s2782_s0 + $0x4e] sm:$0x1] }
  0x5e   :  { %v1842_v59 = vsel %vm1804_vm1, %v1841_v49, %v1840_v54  ;;  %v1042_v60 = vrot.slane %v740_v51, %v2179_v31  ;;  %v1049_v61 = vrot.slane %v741_v52, %v2179_v31  ;;  %v202_v0 = vunpack.c.l.bf16 %v74_v47  ;;  %v87_v49 = vld [vmem:[%s2782_s0 + $0x4f] sm:$0x1] }
  0x5f   :  { %v1844_v1 = vsel %vm1807_vm2, %v1843_v50, %v1842_v59  ;;  %v1056_v2 = vrot.slane %v742_v55, %v2179_v31  ;;  %v1063_v3 = vrot.slane %v743_v56, %v2179_v31  ;;  %v203_v5 = vunpack.c.l.bf16 %v75_v53 }
  0x60   :  { %v1905_v6 = vpack.c.b16 %v1844_v1, %v1844_v1  ;;  %v1490_v7 = vrot.slane %v1042_v60, %v2179_v31  ;;  %v1497_v8 = vrot.slane %v1049_v61, %v2179_v31  ;;  %v204_v9 = vunpack.c.l.bf16 %v76_v57 }
  0x61   :  { %v1504_v10 = vrot.slane %v1056_v2, %v2179_v31  ;;  %v1511_v11 = vrot.slane %v1063_v3, %v2179_v31  ;;  %v205_v12 = vunpack.c.l.bf16 %v77_v62  ;;  %v206_v13 = vunpack.c.l.bf16 %v78_v63 }
  0x62   :  { %v1963_v15 = vrot.slane %v1905_v6, %v2179_v31  ;;  %v1764_v16 = vunpack.c.l.b16 %v1490_v7  ;;  %v1765_v17 = vunpack.c.l.b16 %v1497_v8  ;;  %v207_v18 = vunpack.c.l.bf16 %v79_v4 }
  0x63   :  { %v1766_v19 = vunpack.c.l.b16 %v1504_v10  ;;  %v1767_v20 = vunpack.c.l.b16 %v1511_v11  ;;  %v296_v21 = vadd.f32 %v204_v9, %v200_v48  ;;  %v297_v22 = vadd.f32 %v205_v12, %v201_v58 }
  0x64   :  { %2050 = vst.msk [vmem:[%s2783_s1 + $0xc] sm:$0x3] %vm2043_vm3, %v1963_v15  ;;  %v1845_v24 = vrot.slane %v1765_v17, 7  ;;  %v298_v25 = vadd.f32 %v206_v13, %v202_v0  ;;  %v299_v26 = vadd.f32 %v207_v18, %v203_v5  ;;  %v208_v28 = vunpack.c.l.bf16 %v80_v14 }
  0x65   :  { %v1847_v29 = vrot.slane %v1766_v19, 6  ;;  %v1849_v30 = vrot.slane %v1767_v20, 5  ;;  %v2096_v32 = vrot.slane %v296_v21, 9  ;;  %v2097_v33 = vrot.slane %v297_v22, 9  ;;  %v88_v19 = vld [vmem:[%s2782_s0 + $0x50] sm:$0x1] }
  0x66   :  { %v1846_v35 = vsel %vm1801_vm0, %v1845_v24, %v1764_v16  ;;  %v2098_v36 = vrot.slane %v298_v25, 9  ;;  %v2099_v37 = vrot.slane %v299_v26, 9  ;;  %v209_v39 = vunpack.c.l.bf16 %v81_v23 }
  0x67   :  { %v1848_v40 = vsel %vm1804_vm1, %v1847_v29, %v1846_v35  ;;  %v616_v41 = vadd.f32 %v2096_v32, %v296_v21  ;;  %v617_v42 = vadd.f32 %v2097_v33, %v297_v22  ;;  %v210_v45 = vunpack.c.l.bf16 %v82_v27  ;;  %v90_v33 = vld [vmem:[%s2782_s0 + $0x52] sm:$0x1] }
  0x68   :  { %v1850_v46 = vsel %vm1807_vm2, %v1849_v30, %v1848_v40  ;;  %v618_v47 = vadd.f32 %v2098_v36, %v298_v25  ;;  %v619_v48 = vadd.f32 %v2099_v37, %v299_v26  ;;  %v211_v50 = vunpack.c.l.bf16 %v83_v34 }
  0x69   :  { %v1906_v51 = vpack.c.b16 %v1850_v46, %v1850_v46  ;;  %v680_v52 = vmul.f32 0.25, %v616_v41  ;;  %v681_v53 = vmul.f32 0.25, %v617_v42  ;;  %v212_v54 = vunpack.c.l.bf16 %v84_v38 }
  0x6a   :  { %v682_v55 = vmul.f32 0.25, %v618_v47  ;;  %v683_v56 = vmul.f32 0.25, %v619_v48  ;;  %v213_v57 = vunpack.c.l.bf16 %v85_v43  ;;  %v214_v58 = vunpack.c.l.bf16 %v86_v44  ;;  %v92_v43 = vld [vmem:[%s2782_s0 + $0x54] sm:$0x1]  ;;  %v93_v48 = vld [vmem:[%s2782_s0 + $0x55] sm:$0x1] }
  0x6b   :  { %v1970_v59 = vrot.slane %v1906_v51, %v2179_v31  ;;  %v744_v60 = vpack.c.bf16 %v680_v52, %v680_v52  ;;  %v745_v61 = vpack.c.bf16 %v681_v53, %v681_v53  ;;  %v215_v62 = vunpack.c.l.bf16 %v87_v49  ;;  %v94_v49 = vld [vmem:[%s2782_s0 + $0x56] sm:$0x1] }
  0x6c   :  { %v746_v63 = vpack.c.bf16 %v682_v55, %v682_v55  ;;  %v747_v0 = vpack.c.bf16 %v683_v56, %v683_v56  ;;  %v300_v1 = vadd.f32 %v212_v54, %v208_v28  ;;  %v301_v2 = vadd.f32 %v213_v57, %v209_v39  ;;  %v89_v28 = vld [vmem:[%s2782_s0 + $0x51] sm:$0x1]  ;;  %v91_v39 = vld [vmem:[%s2782_s0 + $0x53] sm:$0x1]  ;;  %v95_v54 = vld [vmem:[%s2782_s0 + $0x57] sm:$0x1] }
  0x6d   :  { %2051 = vst.msk [vmem:[%s2783_s1 + $0xe] sm:$0x3] %vm2043_vm3, %v1970_v59  ;;  %v1070_v3 = vrot.slane %v744_v60, %v2179_v31  ;;  %v1077_v4 = vrot.slane %v745_v61, %v2179_v31  ;;  %v302_v5 = vadd.f32 %v214_v58, %v210_v45  ;;  %v303_v6 = vadd.f32 %v215_v62, %v211_v50 }
  0x6e   :  { %v1084_v7 = vrot.slane %v746_v63, %v2179_v31  ;;  %v1091_v8 = vrot.slane %v747_v0, %v2179_v31  ;;  %v2100_v9 = vrot.slane %v300_v1, 9  ;;  %v2101_v10 = vrot.slane %v301_v2, 9  ;;  %v96_v0 = vld [vmem:[%s2782_s0 + $0x58] sm:$0x1] }
  0x6f   :  { %v1518_v11 = vrot.slane %v1070_v3, %v2179_v31  ;;  %v1525_v12 = vrot.slane %v1077_v4, %v2179_v31  ;;  %v2102_v13 = vrot.slane %v302_v5, 9  ;;  %v2103_v14 = vrot.slane %v303_v6, 9 }
  0x70   :  { %v1532_v15 = vrot.slane %v1084_v7, %v2179_v31  ;;  %v1539_v16 = vrot.slane %v1091_v8, %v2179_v31  ;;  %v620_v17 = vadd.f32 %v2100_v9, %v300_v1  ;;  %v621_v18 = vadd.f32 %v2101_v10, %v301_v2  ;;  %v97_v9 = vld [vmem:[%s2782_s0 + $0x59] sm:$0x1] }
  0x71   :  { %v1768_v20 = vunpack.c.l.b16 %v1518_v11  ;;  %v1769_v21 = vunpack.c.l.b16 %v1525_v12  ;;  %v622_v22 = vadd.f32 %v2102_v13, %v302_v5  ;;  %v623_v23 = vadd.f32 %v2103_v14, %v303_v6  ;;  %v98_v13 = vld [vmem:[%s2782_s0 + $0x5a] sm:$0x1] }
  0x72   :  { %v1770_v24 = vunpack.c.l.b16 %v1532_v15  ;;  %v1771_v25 = vunpack.c.l.b16 %v1539_v16  ;;  %v684_v26 = vmul.f32 0.25, %v620_v17  ;;  %v685_v27 = vmul.f32 0.25, %v621_v18 }
  0x73   :  { %v1851_v29 = vrot.slane %v1769_v21, 7  ;;  %v686_v30 = vmul.f32 0.25, %v622_v22  ;;  %v687_v32 = vmul.f32 0.25, %v623_v23  ;;  %v216_v34 = vunpack.c.l.bf16 %v88_v19  ;;  %v99_v19 = vld [vmem:[%s2782_s0 + $0x5b] sm:$0x1] }
  0x74   :  { %v1853_v35 = vrot.slane %v1770_v24, 6  ;;  %v1855_v36 = vrot.slane %v1771_v25, 5  ;;  %v748_v37 = vpack.c.bf16 %v684_v26, %v684_v26  ;;  %v749_v38 = vpack.c.bf16 %v685_v27, %v685_v27  ;;  %v100_v23 = vld [vmem:[%s2782_s0 + $0x5c] sm:$0x1] }
  0x75   :  { %v1852_v40 = vsel %vm1801_vm0, %v1851_v29, %v1768_v20  ;;  %v750_v41 = vpack.c.bf16 %v686_v30, %v686_v30  ;;  %v751_v42 = vpack.c.bf16 %v687_v32, %v687_v32  ;;  %v217_v44 = vunpack.c.l.bf16 %v89_v28  ;;  %v101_v28 = vld [vmem:[%s2782_s0 + $0x5d] sm:$0x1]  ;;  %v102_v29 = vld [vmem:[%s2782_s0 + $0x5e] sm:$0x1] }
  0x76   :  { %v1854_v45 = vsel %vm1804_vm1, %v1853_v35, %v1852_v40  ;;  %v1098_v46 = vrot.slane %v748_v37, %v2179_v31  ;;  %v1105_v47 = vrot.slane %v749_v38, %v2179_v31  ;;  %v218_v50 = vunpack.c.l.bf16 %v90_v33  ;;  %v103_v35 = vld [vmem:[%s2782_s0 + $0x5f] sm:$0x1] }
  0x77   :  { %v1856_v51 = vsel %vm1807_vm2, %v1855_v36, %v1854_v45  ;;  %v1112_v52 = vrot.slane %v750_v41, %v2179_v31  ;;  %v1119_v53 = vrot.slane %v751_v42, %v2179_v31  ;;  %v219_v55 = vunpack.c.l.bf16 %v91_v39 }
  0x78   :  { %v1907_v56 = vpack.c.b16 %v1856_v51, %v1856_v51  ;;  %v1546_v57 = vrot.slane %v1098_v46, %v2179_v31  ;;  %v1553_v58 = vrot.slane %v1105_v47, %v2179_v31  ;;  %v220_v59 = vunpack.c.l.bf16 %v92_v43 }
  0x79   :  { %v1560_v60 = vrot.slane %v1112_v52, %v2179_v31  ;;  %v1567_v61 = vrot.slane %v1119_v53, %v2179_v31  ;;  %v221_v62 = vunpack.c.l.bf16 %v93_v48  ;;  %v222_v63 = vunpack.c.l.bf16 %v94_v49 }
  0x7a   :  { %v1977_v1 = vrot.slane %v1907_v56, %v2179_v31  ;;  %v1772_v2 = vunpack.c.l.b16 %v1546_v57  ;;  %v1773_v3 = vunpack.c.l.b16 %v1553_v58  ;;  %v223_v4 = vunpack.c.l.bf16 %v95_v54 }
  0x7b   :  { %v1774_v5 = vunpack.c.l.b16 %v1560_v60  ;;  %v1775_v6 = vunpack.c.l.b16 %v1567_v61  ;;  %v304_v7 = vadd.f32 %v220_v59, %v216_v34  ;;  %v305_v8 = vadd.f32 %v221_v62, %v217_v44 }
  0x7c   :  { %2052 = vst.msk [vmem:[%s2783_s1 + $0x10] sm:$0x3] %vm2043_vm3, %v1977_v1  ;;  %v1857_v10 = vrot.slane %v1773_v3, 7  ;;  %v306_v11 = vadd.f32 %v222_v63, %v218_v50  ;;  %v307_v12 = vadd.f32 %v223_v4, %v219_v55  ;;  %v224_v14 = vunpack.c.l.bf16 %v96_v0 }
  0x7d   :  { %v1859_v15 = vrot.slane %v1774_v5, 6  ;;  %v1861_v16 = vrot.slane %v1775_v6, 5  ;;  %v2104_v17 = vrot.slane %v304_v7, 9  ;;  %v2105_v18 = vrot.slane %v305_v8, 9  ;;  %v104_v5 = vld [vmem:[%s2782_s0 + $0x60] sm:$0x1] }
  0x7e   :  { %v1858_v20 = vsel %vm1801_vm0, %v1857_v10, %v1772_v2  ;;  %v2106_v21 = vrot.slane %v306_v11, 9  ;;  %v2107_v22 = vrot.slane %v307_v12, 9  ;;  %v225_v24 = vunpack.c.l.bf16 %v97_v9 }
  0x7f   :  { %v1860_v25 = vsel %vm1804_vm1, %v1859_v15, %v1858_v20  ;;  %v624_v26 = vadd.f32 %v2104_v17, %v304_v7  ;;  %v625_v27 = vadd.f32 %v2105_v18, %v305_v8  ;;  %v226_v30 = vunpack.c.l.bf16 %v98_v13  ;;  %v106_v18 = vld [vmem:[%s2782_s0 + $0x62] sm:$0x1] }
  0x80   :  { %v1862_v32 = vsel %vm1807_vm2, %v1861_v16, %v1860_v25  ;;  %v626_v33 = vadd.f32 %v2106_v21, %v306_v11  ;;  %v627_v34 = vadd.f32 %v2107_v22, %v307_v12  ;;  %v227_v36 = vunpack.c.l.bf16 %v99_v19 }
  0x81   :  { %v1908_v37 = vpack.c.b16 %v1862_v32, %v1862_v32  ;;  %v688_v38 = vmul.f32 0.25, %v624_v26  ;;  %v689_v39 = vmul.f32 0.25, %v625_v27  ;;  %v228_v40 = vunpack.c.l.bf16 %v100_v23 }
  0x82   :  { %v690_v41 = vmul.f32 0.25, %v626_v33  ;;  %v691_v42 = vmul.f32 0.25, %v627_v34  ;;  %v229_v43 = vunpack.c.l.bf16 %v101_v28  ;;  %v230_v44 = vunpack.c.l.bf16 %v102_v29  ;;  %v108_v28 = vld [vmem:[%s2782_s0 + $0x64] sm:$0x1]  ;;  %v109_v34 = vld [vmem:[%s2782_s0 + $0x65] sm:$0x1] }
  0x83   :  { %v1984_v45 = vrot.slane %v1908_v37, %v2179_v31  ;;  %v752_v46 = vpack.c.bf16 %v688_v38, %v688_v38  ;;  %v753_v47 = vpack.c.bf16 %v689_v39, %v689_v39  ;;  %v231_v48 = vunpack.c.l.bf16 %v103_v35  ;;  %v110_v35 = vld [vmem:[%s2782_s0 + $0x66] sm:$0x1] }
  0x84   :  { %v754_v49 = vpack.c.bf16 %v690_v41, %v690_v41  ;;  %v755_v50 = vpack.c.bf16 %v691_v42, %v691_v42  ;;  %v308_v51 = vadd.f32 %v228_v40, %v224_v14  ;;  %v309_v52 = vadd.f32 %v229_v43, %v225_v24  ;;  %v105_v14 = vld [vmem:[%s2782_s0 + $0x61] sm:$0x1]  ;;  %v107_v24 = vld [vmem:[%s2782_s0 + $0x63] sm:$0x1]  ;;  %v111_v40 = vld [vmem:[%s2782_s0 + $0x67] sm:$0x1] }
  0x85   :  { %2053 = vst.msk [vmem:[%s2783_s1 + $0x12] sm:$0x3] %vm2043_vm3, %v1984_v45  ;;  %v1126_v53 = vrot.slane %v752_v46, %v2179_v31  ;;  %v1133_v54 = vrot.slane %v753_v47, %v2179_v31  ;;  %v310_v55 = vadd.f32 %v230_v44, %v226_v30  ;;  %v311_v56 = vadd.f32 %v231_v48, %v227_v36 }
  0x86   :  { %v1140_v57 = vrot.slane %v754_v49, %v2179_v31  ;;  %v1147_v58 = vrot.slane %v755_v50, %v2179_v31  ;;  %v2108_v59 = vrot.slane %v308_v51, 9  ;;  %v2109_v60 = vrot.slane %v309_v52, 9  ;;  %v112_v50 = vld [vmem:[%s2782_s0 + $0x68] sm:$0x1] }
  0x87   :  { %v1574_v61 = vrot.slane %v1126_v53, %v2179_v31  ;;  %v1581_v62 = vrot.slane %v1133_v54, %v2179_v31  ;;  %v2110_v63 = vrot.slane %v310_v55, 9  ;;  %v2111_v0 = vrot.slane %v311_v56, 9 }
  0x88   :  { %v1588_v1 = vrot.slane %v1140_v57, %v2179_v31  ;;  %v1595_v2 = vrot.slane %v1147_v58, %v2179_v31  ;;  %v628_v3 = vadd.f32 %v2108_v59, %v308_v51  ;;  %v629_v4 = vadd.f32 %v2109_v60, %v309_v52  ;;  %v113_v59 = vld [vmem:[%s2782_s0 + $0x69] sm:$0x1] }
  0x89   :  { %v1776_v6 = vunpack.c.l.b16 %v1574_v61  ;;  %v1777_v7 = vunpack.c.l.b16 %v1581_v62  ;;  %v630_v8 = vadd.f32 %v2110_v63, %v310_v55  ;;  %v631_v9 = vadd.f32 %v2111_v0, %v311_v56  ;;  %v114_v63 = vld [vmem:[%s2782_s0 + $0x6a] sm:$0x1] }
  0x8a   :  { %v1778_v10 = vunpack.c.l.b16 %v1588_v1  ;;  %v1779_v11 = vunpack.c.l.b16 %v1595_v2  ;;  %v692_v12 = vmul.f32 0.25, %v628_v3  ;;  %v693_v13 = vmul.f32 0.25, %v629_v4 }
  0x8b   :  { %v1863_v15 = vrot.slane %v1777_v7, 7  ;;  %v694_v16 = vmul.f32 0.25, %v630_v8  ;;  %v695_v17 = vmul.f32 0.25, %v631_v9  ;;  %v232_v19 = vunpack.c.l.bf16 %v104_v5  ;;  %v115_v5 = vld [vmem:[%s2782_s0 + $0x6b] sm:$0x1] }
  0x8c   :  { %v1865_v20 = vrot.slane %v1778_v10, 6  ;;  %v1867_v21 = vrot.slane %v1779_v11, 5  ;;  %v756_v22 = vpack.c.bf16 %v692_v12, %v692_v12  ;;  %v757_v23 = vpack.c.bf16 %v693_v13, %v693_v13  ;;  %v116_v9 = vld [vmem:[%s2782_s0 + $0x6c] sm:$0x1] }
  0x8d   :  { %v1864_v25 = vsel %vm1801_vm0, %v1863_v15, %v1776_v6  ;;  %v758_v26 = vpack.c.bf16 %v694_v16, %v694_v16  ;;  %v759_v27 = vpack.c.bf16 %v695_v17, %v695_v17  ;;  %v233_v29 = vunpack.c.l.bf16 %v105_v14  ;;  %v117_v14 = vld [vmem:[%s2782_s0 + $0x6d] sm:$0x1]  ;;  %v118_v15 = vld [vmem:[%s2782_s0 + $0x6e] sm:$0x1] }
  0x8e   :  { %v1866_v30 = vsel %vm1804_vm1, %v1865_v20, %v1864_v25  ;;  %v1154_v32 = vrot.slane %v756_v22, %v2179_v31  ;;  %v1161_v33 = vrot.slane %v757_v23, %v2179_v31  ;;  %v234_v36 = vunpack.c.l.bf16 %v106_v18  ;;  %v119_v20 = vld [vmem:[%s2782_s0 + $0x6f] sm:$0x1] }
  0x8f   :  { %v1868_v37 = vsel %vm1807_vm2, %v1867_v21, %v1866_v30  ;;  %v1168_v38 = vrot.slane %v758_v26, %v2179_v31  ;;  %v1175_v39 = vrot.slane %v759_v27, %v2179_v31  ;;  %v235_v41 = vunpack.c.l.bf16 %v107_v24 }
  0x90   :  { %v1909_v42 = vpack.c.b16 %v1868_v37, %v1868_v37  ;;  %v1602_v43 = vrot.slane %v1154_v32, %v2179_v31  ;;  %v1609_v44 = vrot.slane %v1161_v33, %v2179_v31  ;;  %v236_v45 = vunpack.c.l.bf16 %v108_v28 }
  0x91   :  { %v1616_v46 = vrot.slane %v1168_v38, %v2179_v31  ;;  %v1623_v47 = vrot.slane %v1175_v39, %v2179_v31  ;;  %v237_v48 = vunpack.c.l.bf16 %v109_v34  ;;  %v238_v49 = vunpack.c.l.bf16 %v110_v35 }
  0x92   :  { %v1991_v51 = vrot.slane %v1909_v42, %v2179_v31  ;;  %v1780_v52 = vunpack.c.l.b16 %v1602_v43  ;;  %v1781_v53 = vunpack.c.l.b16 %v1609_v44  ;;  %v239_v54 = vunpack.c.l.bf16 %v111_v40 }
  0x93   :  { %v1782_v55 = vunpack.c.l.b16 %v1616_v46  ;;  %v1783_v56 = vunpack.c.l.b16 %v1623_v47  ;;  %v312_v57 = vadd.f32 %v236_v45, %v232_v19  ;;  %v313_v58 = vadd.f32 %v237_v48, %v233_v29 }
  0x94   :  { %2054 = vst.msk [vmem:[%s2783_s1 + $0x14] sm:$0x3] %vm2043_vm3, %v1991_v51  ;;  %v1869_v60 = vrot.slane %v1781_v53, 7  ;;  %v314_v61 = vadd.f32 %v238_v49, %v234_v36  ;;  %v315_v62 = vadd.f32 %v239_v54, %v235_v41  ;;  %v240_v0 = vunpack.c.l.bf16 %v112_v50 }
  0x95   :  { %v1871_v1 = vrot.slane %v1782_v55, 6  ;;  %v1873_v2 = vrot.slane %v1783_v56, 5  ;;  %v2112_v3 = vrot.slane %v312_v57, 9  ;;  %v2113_v4 = vrot.slane %v313_v58, 9  ;;  %v120_v55 = vld [vmem:[%s2782_s0 + $0x70] sm:$0x1] }
  0x96   :  { %v1870_v6 = vsel %vm1801_vm0, %v1869_v60, %v1780_v52  ;;  %v2114_v7 = vrot.slane %v314_v61, 9  ;;  %v2115_v8 = vrot.slane %v315_v62, 9  ;;  %v241_v10 = vunpack.c.l.bf16 %v113_v59 }
  0x97   :  { %v1872_v11 = vsel %vm1804_vm1, %v1871_v1, %v1870_v6  ;;  %v632_v12 = vadd.f32 %v2112_v3, %v312_v57  ;;  %v633_v13 = vadd.f32 %v2113_v4, %v313_v58  ;;  %v242_v16 = vunpack.c.l.bf16 %v114_v63  ;;  %v122_v4 = vld [vmem:[%s2782_s0 + $0x72] sm:$0x1] }
  0x98   :  { %v1874_v17 = vsel %vm1807_vm2, %v1873_v2, %v1872_v11  ;;  %v634_v18 = vadd.f32 %v2114_v7, %v314_v61  ;;  %v635_v19 = vadd.f32 %v2115_v8, %v315_v62  ;;  %v243_v21 = vunpack.c.l.bf16 %v115_v5 }
  0x99   :  { %v1910_v22 = vpack.c.b16 %v1874_v17, %v1874_v17  ;;  %v696_v23 = vmul.f32 0.25, %v632_v12  ;;  %v697_v24 = vmul.f32 0.25, %v633_v13  ;;  %v244_v25 = vunpack.c.l.bf16 %v116_v9 }
  0x9a   :  { %v698_v26 = vmul.f32 0.25, %v634_v18  ;;  %v699_v27 = vmul.f32 0.25, %v635_v19  ;;  %v245_v28 = vunpack.c.l.bf16 %v117_v14  ;;  %v246_v29 = vunpack.c.l.bf16 %v118_v15  ;;  %v124_v14 = vld [vmem:[%s2782_s0 + $0x74] sm:$0x1]  ;;  %v125_v19 = vld [vmem:[%s2782_s0 + $0x75] sm:$0x1] }
  0x9b   :  { %v1998_v30 = vrot.slane %v1910_v22, %v2179_v31  ;;  %v760_v32 = vpack.c.bf16 %v696_v23, %v696_v23  ;;  %v761_v33 = vpack.c.bf16 %v697_v24, %v697_v24  ;;  %v247_v34 = vunpack.c.l.bf16 %v119_v20  ;;  %v126_v20 = vld [vmem:[%s2782_s0 + $0x76] sm:$0x1] }
  0x9c   :  { %v762_v35 = vpack.c.bf16 %v698_v26, %v698_v26  ;;  %v763_v36 = vpack.c.bf16 %v699_v27, %v699_v27  ;;  %v316_v37 = vadd.f32 %v244_v25, %v240_v0  ;;  %v317_v38 = vadd.f32 %v245_v28, %v241_v10  ;;  %v121_v0 = vld [vmem:[%s2782_s0 + $0x71] sm:$0x1]  ;;  %v123_v10 = vld [vmem:[%s2782_s0 + $0x73] sm:$0x1]  ;;  %v127_v25 = vld [vmem:[%s2782_s0 + $0x77] sm:$0x1] }
  0x9d   :  { %2055 = vst.msk [vmem:[%s2783_s1 + $0x16] sm:$0x3] %vm2043_vm3, %v1998_v30  ;;  %v1182_v39 = vrot.slane %v760_v32, %v2179_v31  ;;  %v1189_v40 = vrot.slane %v761_v33, %v2179_v31  ;;  %v318_v41 = vadd.f32 %v246_v29, %v242_v16  ;;  %v319_v42 = vadd.f32 %v247_v34, %v243_v21 }
  0x9e   :  { %v1196_v43 = vrot.slane %v762_v35, %v2179_v31  ;;  %v1203_v44 = vrot.slane %v763_v36, %v2179_v31  ;;  %v2116_v45 = vrot.slane %v316_v37, 9  ;;  %v2117_v46 = vrot.slane %v317_v38, 9  ;;  %v128_v36 = vld [vmem:[%s2782_s0 + $0x78] sm:$0x1] }
  0x9f   :  { %v1630_v47 = vrot.slane %v1182_v39, %v2179_v31  ;;  %v1637_v48 = vrot.slane %v1189_v40, %v2179_v31  ;;  %v2118_v49 = vrot.slane %v318_v41, 9  ;;  %v2119_v50 = vrot.slane %v319_v42, 9 }
  0xa0   :  { %v1644_v51 = vrot.slane %v1196_v43, %v2179_v31  ;;  %v1651_v52 = vrot.slane %v1203_v44, %v2179_v31  ;;  %v636_v53 = vadd.f32 %v2116_v45, %v316_v37  ;;  %v637_v54 = vadd.f32 %v2117_v46, %v317_v38  ;;  %v129_v45 = vld [vmem:[%s2782_s0 + $0x79] sm:$0x1] }
  0xa1   :  { %v1784_v56 = vunpack.c.l.b16 %v1630_v47  ;;  %v1785_v57 = vunpack.c.l.b16 %v1637_v48  ;;  %v638_v58 = vadd.f32 %v2118_v49, %v318_v41  ;;  %v639_v59 = vadd.f32 %v2119_v50, %v319_v42  ;;  %v130_v49 = vld [vmem:[%s2782_s0 + $0x7a] sm:$0x1] }
  0xa2   :  { %v1786_v60 = vunpack.c.l.b16 %v1644_v51  ;;  %v1787_v61 = vunpack.c.l.b16 %v1651_v52  ;;  %v700_v62 = vmul.f32 0.25, %v636_v53  ;;  %v701_v63 = vmul.f32 0.25, %v637_v54 }
  0xa3   :  { %v1875_v1 = vrot.slane %v1785_v57, 7  ;;  %v702_v2 = vmul.f32 0.25, %v638_v58  ;;  %v703_v3 = vmul.f32 0.25, %v639_v59  ;;  %v248_v5 = vunpack.c.l.bf16 %v120_v55  ;;  %v131_v55 = vld [vmem:[%s2782_s0 + $0x7b] sm:$0x1] }
  0xa4   :  { %v1877_v6 = vrot.slane %v1786_v60, 6  ;;  %v1879_v7 = vrot.slane %v1787_v61, 5  ;;  %v764_v8 = vpack.c.bf16 %v700_v62, %v700_v62  ;;  %v765_v9 = vpack.c.bf16 %v701_v63, %v701_v63  ;;  %v132_v59 = vld [vmem:[%s2782_s0 + $0x7c] sm:$0x1] }
  0xa5   :  { %v1876_v11 = vsel %vm1801_vm0, %v1875_v1, %v1784_v56  ;;  %v766_v12 = vpack.c.bf16 %v702_v2, %v702_v2  ;;  %v767_v13 = vpack.c.bf16 %v703_v3, %v703_v3  ;;  %v249_v15 = vunpack.c.l.bf16 %v121_v0  ;;  %v133_v0 = vld [vmem:[%s2782_s0 + $0x7d] sm:$0x1]  ;;  %v134_v1 = vld [vmem:[%s2782_s0 + $0x7e] sm:$0x1] }
  0xa6   :  { %v1878_v16 = vsel %vm1804_vm1, %v1877_v6, %v1876_v11  ;;  %v1210_v17 = vrot.slane %v764_v8, %v2179_v31  ;;  %v1217_v18 = vrot.slane %v765_v9, %v2179_v31  ;;  %v250_v21 = vunpack.c.l.bf16 %v122_v4  ;;  %v135_v6 = vld [vmem:[%s2782_s0 + $0x7f] sm:$0x1] }
  0xa7   :  { %v1880_v22 = vsel %vm1807_vm2, %v1879_v7, %v1878_v16  ;;  %v1224_v23 = vrot.slane %v766_v12, %v2179_v31  ;;  %v1231_v24 = vrot.slane %v767_v13, %v2179_v31  ;;  %v251_v26 = vunpack.c.l.bf16 %v123_v10 }
  0xa8   :  { %v1911_v27 = vpack.c.b16 %v1880_v22, %v1880_v22  ;;  %v1658_v28 = vrot.slane %v1210_v17, %v2179_v31  ;;  %v1665_v29 = vrot.slane %v1217_v18, %v2179_v31  ;;  %v252_v30 = vunpack.c.l.bf16 %v124_v14 }
  0xa9   :  { %v1672_v32 = vrot.slane %v1224_v23, %v2179_v31  ;;  %v1679_v33 = vrot.slane %v1231_v24, %v2179_v31  ;;  %v253_v34 = vunpack.c.l.bf16 %v125_v19  ;;  %v254_v35 = vunpack.c.l.bf16 %v126_v20 }
  0xaa   :  { %v2005_v37 = vrot.slane %v1911_v27, %v2179_v31  ;;  %v1788_v38 = vunpack.c.l.b16 %v1658_v28  ;;  %v1789_v39 = vunpack.c.l.b16 %v1665_v29  ;;  %v255_v40 = vunpack.c.l.bf16 %v127_v25 }
  0xab   :  { %v1790_v41 = vunpack.c.l.b16 %v1672_v32  ;;  %v1791_v42 = vunpack.c.l.b16 %v1679_v33  ;;  %v320_v43 = vadd.f32 %v252_v30, %v248_v5  ;;  %v321_v44 = vadd.f32 %v253_v34, %v249_v15 }
  0xac   :  { %2056 = vst.msk [vmem:[%s2783_s1 + $0x18] sm:$0x3] %vm2043_vm3, %v2005_v37  ;;  %v1881_v46 = vrot.slane %v1789_v39, 7  ;;  %v322_v47 = vadd.f32 %v254_v35, %v250_v21  ;;  %v323_v48 = vadd.f32 %v255_v40, %v251_v26  ;;  %v256_v50 = vunpack.c.l.bf16 %v128_v36 }
  0xad   :  { %v1883_v51 = vrot.slane %v1790_v41, 6  ;;  %v1885_v52 = vrot.slane %v1791_v42, 5  ;;  %v2120_v53 = vrot.slane %v320_v43, 9  ;;  %v2121_v54 = vrot.slane %v321_v44, 9 }
  0xae   :  { %v1882_v56 = vsel %vm1801_vm0, %v1881_v46, %v1788_v38  ;;  %v2122_v57 = vrot.slane %v322_v47, 9  ;;  %v2123_v58 = vrot.slane %v323_v48, 9  ;;  %v257_v60 = vunpack.c.l.bf16 %v129_v45 }
  0xaf   :  { %v1884_v61 = vsel %vm1804_vm1, %v1883_v51, %v1882_v56  ;;  %v640_v62 = vadd.f32 %v2120_v53, %v320_v43  ;;  %v641_v63 = vadd.f32 %v2121_v54, %v321_v44  ;;  %v258_v2 = vunpack.c.l.bf16 %v130_v49 }
  0xb0   :  { %v1886_v3 = vsel %vm1807_vm2, %v1885_v52, %v1884_v61  ;;  %v642_v4 = vadd.f32 %v2122_v57, %v322_v47  ;;  %v643_v5 = vadd.f32 %v2123_v58, %v323_v48  ;;  %v259_v7 = vunpack.c.l.bf16 %v131_v55 }
  0xb1   :  { %v1912_v8 = vpack.c.b16 %v1886_v3, %v1886_v3  ;;  %v704_v9 = vmul.f32 0.25, %v640_v62  ;;  %v705_v10 = vmul.f32 0.25, %v641_v63  ;;  %v260_v11 = vunpack.c.l.bf16 %v132_v59 }
  0xb2   :  { %v706_v12 = vmul.f32 0.25, %v642_v4  ;;  %v707_v13 = vmul.f32 0.25, %v643_v5  ;;  %v261_v14 = vunpack.c.l.bf16 %v133_v0  ;;  %v262_v15 = vunpack.c.l.bf16 %v134_v1 }
  0xb3   :  { %v2012_v16 = vrot.slane %v1912_v8, %v2179_v31  ;;  %v768_v17 = vpack.c.bf16 %v704_v9, %v704_v9  ;;  %v769_v18 = vpack.c.bf16 %v705_v10, %v705_v10  ;;  %v263_v19 = vunpack.c.l.bf16 %v135_v6 }
  0xb4   :  { %v770_v20 = vpack.c.bf16 %v706_v12, %v706_v12  ;;  %v771_v21 = vpack.c.bf16 %v707_v13, %v707_v13  ;;  %v324_v22 = vadd.f32 %v260_v11, %v256_v50  ;;  %v325_v23 = vadd.f32 %v261_v14, %v257_v60 }
  0xb5   :  { %2057 = vst.msk [vmem:[%s2783_s1 + $0x1a] sm:$0x3] %vm2043_vm3, %v2012_v16  ;;  %v1238_v24 = vrot.slane %v768_v17, %v2179_v31  ;;  %v1245_v25 = vrot.slane %v769_v18, %v2179_v31  ;;  %v326_v26 = vadd.f32 %v262_v15, %v258_v2  ;;  %v327_v27 = vadd.f32 %v263_v19, %v259_v7 }
  0xb6   :  { %v1252_v28 = vrot.slane %v770_v20, %v2179_v31  ;;  %v1259_v29 = vrot.slane %v771_v21, %v2179_v31  ;;  %v2124_v30 = vrot.slane %v324_v22, 9  ;;  %v2125_v32 = vrot.slane %v325_v23, 9 }
  0xb7   :  { %v1686_v33 = vrot.slane %v1238_v24, %v2179_v31  ;;  %v1693_v34 = vrot.slane %v1245_v25, %v2179_v31  ;;  %v2126_v35 = vrot.slane %v326_v26, 9  ;;  %v2127_v36 = vrot.slane %v327_v27, 9 }
  0xb8   :  { %v1700_v37 = vrot.slane %v1252_v28, %v2179_v31  ;;  %v1707_v38 = vrot.slane %v1259_v29, %v2179_v31  ;;  %v644_v39 = vadd.f32 %v2124_v30, %v324_v22  ;;  %v645_v40 = vadd.f32 %v2125_v32, %v325_v23 }
  0xb9   :  { %v1792_v41 = vunpack.c.l.b16 %v1686_v33  ;;  %v1793_v42 = vunpack.c.l.b16 %v1693_v34  ;;  %v646_v43 = vadd.f32 %v2126_v35, %v326_v26  ;;  %v647_v44 = vadd.f32 %v2127_v36, %v327_v27 }
  0xba   :  { %v1794_v45 = vunpack.c.l.b16 %v1700_v37  ;;  %v1795_v46 = vunpack.c.l.b16 %v1707_v38  ;;  %v708_v47 = vmul.f32 0.25, %v644_v39  ;;  %v709_v48 = vmul.f32 0.25, %v645_v40 }
  0xbb   :  { %v1887_v49 = vrot.slane %v1793_v42, 7  ;;  %v710_v50 = vmul.f32 0.25, %v646_v43  ;;  %v711_v51 = vmul.f32 0.25, %v647_v44 }
  0xbc   :  { %v1889_v52 = vrot.slane %v1794_v45, 6  ;;  %v1891_v53 = vrot.slane %v1795_v46, 5  ;;  %v772_v54 = vpack.c.bf16 %v708_v47, %v708_v47  ;;  %v773_v55 = vpack.c.bf16 %v709_v48, %v709_v48 }
  0xbd   :  { %v1888_v56 = vsel %vm1801_vm0, %v1887_v49, %v1792_v41  ;;  %v774_v57 = vpack.c.bf16 %v710_v50, %v710_v50  ;;  %v775_v58 = vpack.c.bf16 %v711_v51, %v711_v51 }
  0xbe   :  { %v1890_v59 = vsel %vm1804_vm1, %v1889_v52, %v1888_v56  ;;  %v1266_v60 = vrot.slane %v772_v54, %v2179_v31  ;;  %v1273_v61 = vrot.slane %v773_v55, %v2179_v31 }
  0xbf   :  { %v1892_v62 = vsel %vm1807_vm2, %v1891_v53, %v1890_v59  ;;  %v1280_v63 = vrot.slane %v774_v57, %v2179_v31  ;;  %v1287_v0 = vrot.slane %v775_v58, %v2179_v31 }
  0xc0   :  { %v1913_v1 = vpack.c.b16 %v1892_v62, %v1892_v62  ;;  %v1714_v2 = vrot.slane %v1266_v60, %v2179_v31  ;;  %v1721_v3 = vrot.slane %v1273_v61, %v2179_v31 }
  0xc1   :  { %v1728_v4 = vrot.slane %v1280_v63, %v2179_v31  ;;  %v1735_v5 = vrot.slane %v1287_v0, %v2179_v31 }
  0xc2   :  { %v2019_v6 = vrot.slane %v1913_v1, %v2179_v31  ;;  %v1796_v7 = vunpack.c.l.b16 %v1714_v2  ;;  %v1797_v8 = vunpack.c.l.b16 %v1721_v3 }
  0xc3   :  { %v1798_v9 = vunpack.c.l.b16 %v1728_v4  ;;  %v1799_v10 = vunpack.c.l.b16 %v1735_v5 }
  0xc4   :  { %2058 = vst.msk [vmem:[%s2783_s1 + $0x1c] sm:$0x3] %vm2043_vm3, %v2019_v6  ;;  %v1893_v11 = vrot.slane %v1797_v8, 7 }
  0xc5   :  { %v1895_v12 = vrot.slane %v1798_v9, 6  ;;  %v1897_v13 = vrot.slane %v1799_v10, 5 }
  0xc6   :  { %v1894_v14 = vsel %vm1801_vm0, %v1893_v11, %v1796_v7 }
  0xc7   :  { %v1896_v15 = vsel %vm1804_vm1, %v1895_v12, %v1894_v14 }
  0xc8   :  { %v1898_v16 = vsel %vm1807_vm2, %v1897_v13, %v1896_v15 }
  0xc9   :  { %v1914_v17 = vpack.c.b16 %v1898_v16, %v1898_v16 }
  0xcb   :  { %v2026_v18 = vrot.slane %v1914_v17, %v2179_v31 }
  0xcd   :  { %2059 = vst.msk [vmem:[%s2783_s1 + $0x1e] sm:$0x3] %vm2043_vm3, %v2026_v18 }

// kernel: densenet_trick_v3_forward.34
= control target key start
LH: loop header
LB: loop body
LE: loop exit
PB: predicated region body
PF: predicated region fallthrough
CT: control target
= control target key end

     0   :  { %s1133_s9 = smov 0   ;;  %s1255_s0 = inlined_call_operand.vmem [shape: bf16[4,42,16], index: 0, kind: input, shape index: {}]   ;;  %s1256_s1 = inlined_call_operand.vmem [shape: bf16[9,16,4], index: 1, kind: input, shape index: {}]   ;;  %s1257_s2 = inlined_call_operand.vmem [shape: bf16[4,24,4], index: 2, kind: output, shape index: {}]  }
   0x1 LB: > { %s926_s10 = sadd.s32 4294967295, %s1116_s9   ;;  %p930_p0 = scmp.ge.s32.totalorder %s1116_s9, 1  ;;  %s1116_s9 = sphi %s1133_s9, %s12_s9  }
   0x2   : > { %p112_p1 = scmp.lt.s32.totalorder %s1116_s9, 5 }
   0x4   : > { %p113_p2 = pnand %p930_p0, %p112_p1 }
   0x5   : > { %p134_p3 = scmp.lt.s32.totalorder (!%p113_p2), %s926_s10, 3 }
   0x6   : > { %116 = sbr.rel (%p113_p2) target bundleno = 262 (0x106), region = 28 }
   0xb   : > { %v1088_v0 = vld [vmem:[%s1256_s1 + $0x8] sm:$0xff]   ;;  %v1089_v1 = vld [vmem:[%s1256_s1] sm:$0xff]   ;;  %s1259_s10 = smov (!%p134_p3, %s926_s10), 3  ;;  %v1152_v2 = vld [vmem:[%s1256_s1 + $0x10] sm:$0xff]   ;;  %vm186_vm0 = vcmask 130048   ;;  %vm308_vm2 = vcmask 1046528  }
   0xc   : > { %1024 = vmatprep.subr.bf16.mxu0 %v1088_v0  ;;  %1030 = vmatprep.subr.bf16.mxu1 %v1089_v1  ;;  %s1078_s17 = smul.u32 24, %s1259_s10  ;;  %v1094_v3 = vld [vmem:[%s1256_s1 + $0x18] sm:$0xff]   ;;  %vm164_vm1 = vsmask.f32 7424  ;;  %vm386_vm3 = vcmask 1044480   ;;  %v1174_v7 = vld [vmem:[%s1256_s1 + $0x28] sm:$0xff]  }
   0xd   : > { %1025 = vmatpush3.bf16.msra.mxu0 %v1088_v0  ;;  %1031 = vmatpush3.bf16.msra.mxu1 %v1089_v1  ;;  %v1098_v41 = vld [vmem:[%s1256_s1 + $0x20] sm:$0xff]   ;;  %v1104_v51 = vld [vmem:[%s1256_s1 + $0x38] sm:$0xff]   ;;  %vm460_vm4 = vsmask.f32 4352  ;;  %vm700_vm5 = vsmask.f32 5376 }
   0xe   : > { %1036 = vmatprep.subr.bf16.mxu0 %v1152_v2  ;;  %s1162_s22 = scalar_lea.vmem %s1255_s0, %s1078_s17  ;;  %1042 = vmatprep.subr.bf16.mxu1 %v1094_v3  ;;  %vm626_vm6 = vcmask 1045504   ;;  %s1079_s5 = smul.u32 12, %s1259_s10  ;;  %vm867_vm7 = vcmask 27648  }
   0xf   : > { %v145_v4 = vld [vmem:[%s1162_s22] sm:$0xf]  ;;  %v1166_v5 = vld [vmem:[%s1162_s22 + $0x4] sm:$0xf]  ;;  %v1169_v6 = vld [vmem:[%s1162_s22 + $0x8] sm:$0xf] }
  0x10   : > { %v150_v8 = vld [vmem:[%s1162_s22 + $0xc] sm:$0x1]  ;;  %v935_v9 = vcombine.low %v145_v4, %v1166_v5  ;;  %v940_v10 = vcombine.low %v1169_v6, %v1169_v6  ;;  %v301_v11 = vld [vmem:[%s1162_s22] sm:$0xe]  ;;  %v609_v33 = vld [vmem:[%s1162_s22 + $0x4] sm:$0xc]  ;;  %v965_v49 = vcombine.low %v1166_v5, %v1169_v6  ;;  %s143_s8 = scalar_lea.vmem %s1257_s2, %s1079_s5 }
  0x11   : > { %v375_v12 = vld [vmem:[%s1162_s22] sm:$0x8]  ;;  %v1183_v13 = vcombine.low %v1169_v6, %v150_v8  ;;  %v946_v14 = vcombine.low %v301_v11, %v1166_v5  ;;  %v376_v15 = vld [vmem:[%s1162_s22 + $0xc] sm:$0x7]  ;;  %v1203_v37 = vld [vmem:[%s1162_s22 + $0x8] sm:$0xf] }
  0x12   : > { %v952_v16 = vcombine.low %v375_v12, %v1166_v5  ;;  %v1189_v17 = vld [vmem:[%s1162_s22 + $0xc] sm:$0xf]  ;;  %v166_v18 = vshrl.u32 %v935_v9, 16  ;;  %v168_v19 = vshll.u32 %v935_v9, 16  ;;  %1032 = vmatprep.mubr.msk.bf16.mxu1 %vm186_vm0, %v935_v9  ;;  %v953_v20 = vcombine.low %v1169_v6, %v376_v15  ;;  %v693_v44 = vld [vmem:[%s1162_s22 + $0x10] sm:$0x7] }
  0x13   : > { %v959_v21 = vcombine.low %v1169_v6, %v1189_v17  ;;  %v173_v22 = vshll.u32 %v1183_v13, 16  ;;  %v177_v23 = vshrl.u32 %v1183_v13, 16  ;;  %1033 = vmatmul.mubr.msk.bf16.vlgmr.msra.gmra.mxu1 %vm186_vm0, %v940_v10  ;;  %v309_v24 = vrot.slane %v946_v14, 1  ;;  %v611_v38 = vld [vmem:[%s1162_s22 + $0xc] sm:$0xf]  ;;  %v1108_v10 = vld [vmem:[%s1256_s1 + $0x40] sm:$0xff]  }
  0x14   : > { %v310_v25 = vrot.slane %v1183_v13, 1  ;;  %v170_v26 = vrot.slane %v168_v19, 1  ;;  %1043 = vmatpush3.bf16.msra.mxu1 %v1094_v3  ;;  %v387_v27 = vrot.slane %v952_v16, 3  ;;  %v388_v28 = vrot.slane %v953_v20, 3  ;;  %v612_v59 = vld [vmem:[%s1162_s22 + $0x10] sm:$0x3] }
  0x15   : > { %v462_v29 = vshrl.u32 %v952_v16, 16  ;;  %v175_v30 = vrot.slane %v173_v22, 1  ;;  %1054 = vmatprep.subr.bf16.mxu1 %v1174_v7  ;;  %v465_v31 = vshll.u32 %v952_v16, 16  ;;  %v470_v32 = vshrl.u32 %v959_v21, 16  ;;  %v781_v8 = vld [vmem:[%s1162_s22 + $0x4] sm:$0x8] }
  0x16   : > { %v171_v34 = vor.u32 %v170_v26, %v166_v18  ;;  %v389_v35 = vsel %vm386_vm3, %v387_v27, %v388_v28  ;;  %v473_v36 = vshll.u32 %v959_v21, 16  ;;  %v311_v40 = vsel %vm308_vm2, %v309_v24, %v310_v25 }
  0x17   : > { %v179_v39 = vor.u32 %v177_v23, %v175_v30  ;;  %1044 = vmatprep.mubr.msk.bf16.mxu1 %vm186_vm0, %v389_v35  ;;  %v464_v42 = vrot.slane %v462_v29, 3  ;;  %v467_v43 = vrot.slane %v465_v31, 4  ;;  %v472_v46 = vrot.slane %v470_v32, 3 }
  0x18   : > { %v176_v45 = vsel %vm164_vm1, %v171_v34, %v175_v30  ;;  %v475_v47 = vrot.slane %v473_v36, 4  ;;  %v972_v48 = vcombine.low %v609_v33, %v1203_v37  ;;  %v979_v50 = vcombine.low %v611_v38, %v693_v44 }
  0x19   : > { %1026 = vmatprep.mubr.msk.bf16.mxu0 %vm186_vm0, %v176_v45  ;;  %v468_v56 = vor.u32 %v467_v43, %v464_v42  ;;  %v966_v3 = vcombine.low %v1189_v17, %v1189_v17  ;;  %v973_v4 = vcombine.low %v611_v38, %v612_v59  ;;  %v985_v11 = vcombine.low %v781_v8, %v1203_v37 }
  0x1a   : > { %1027 = vmatmul.mubr.msk.bf16.vlgmr.msra.gmra.mxu0 %vm186_vm0, %v179_v39  ;;  %v702_v52 = vshrl.u32 %v972_v48, 16  ;;  %v705_v53 = vshll.u32 %v972_v48, 16  ;;  %v710_v54 = vshrl.u32 %v979_v50, 16  ;;  %v713_v55 = vshll.u32 %v979_v50, 16 }
  0x1b   : > { %1037 = vmatpush3.bf16.msra.mxu0 %v1152_v2  ;;  %1038 = vmatprep.mubr.msk.bf16.mxu0 %vm186_vm0, %v311_v40  ;;  %v476_v57 = vor.u32 %v475_v47, %v472_v46  ;;  %v1102_v2 = vld [vmem:[%s1256_s1 + $0x30] sm:$0xff]   ;;  %v627_v6 = vrot.slane %v972_v48, 2  ;;  %v788_v12 = vrot.slane %v985_v11, 3  ;;  %v789_v13 = vrot.slane %v979_v50, 3 }
  0x1c   : > { %1048 = vmatprep.subr.bf16.mxu0 %v1098_v41  ;;  %1045 = vmatmul.mubr.msk.bf16.vlgmr.msra.gmra.mxu1 %vm186_vm0, %v388_v28  ;;  %v704_v58 = vrot.slane %v702_v52, 2  ;;  %v707_v60 = vrot.slane %v705_v53, 3  ;;  %v712_v61 = vrot.slane %v710_v54, 2  ;;  %v715_v62 = vrot.slane %v713_v55, 3 }
  0x1d   : > { %1055 = vmatpush3.bf16.msra.mxu1 %v1174_v7  ;;  %1056 = vmatprep.mubr.msk.bf16.mxu1 %vm186_vm0, %v965_v49  ;;  %v477_v1 = vsel %vm460_vm4, %v468_v56, %v476_v57  ;;  %v628_v7 = vrot.slane %v973_v4, 2  ;;  %v790_v14 = vsel %vm386_vm3, %v788_v12, %v789_v13 }
  0x1e   : > { %1066 = vmatprep.subr.bf16.mxu1 %v1104_v51  ;;  %v708_v63 = vor.u32 %v707_v60, %v704_v58  ;;  %v716_v0 = vor.u32 %v715_v62, %v712_v61 }
  0x1f   : > { %v629_v9 = vsel %vm626_vm6, %v627_v6, %v628_v7 }
  0x20   : > { %v717_v5 = vsel %vm700_vm5, %v708_v63, %v716_v0 }
  0x22   : > { %1039 = vmatmul.mubr.msk.bf16.vlgmr.msra.gmra.mxu0 %vm186_vm0, %v310_v25 }
  0x23   : > { %1049 = vmatpush3.bf16.msra.mxu0 %v1098_v41  ;;  %1050 = vmatprep.mubr.msk.bf16.mxu0 %vm186_vm0, %v477_v1 }
  0x24   : > { %1060 = vmatprep.subr.bf16.mxu0 %v1102_v2  ;;  %1057 = vmatmul.mubr.msk.bf16.vlgmr.msra.gmra.mxu1 %vm186_vm0, %v966_v3 }
  0x25   : > { %1067 = vmatpush3.bf16.msra.mxu1 %v1104_v51  ;;  %1068 = vmatprep.mubr.msk.bf16.mxu1 %vm186_vm0, %v717_v5 }
  0x2a   : > { %1051 = vmatmul.mubr.msk.bf16.vlgmr.msra.gmra.mxu0 %vm186_vm0, %v476_v57 }
  0x2b   : > { %1061 = vmatpush3.bf16.msra.mxu0 %v1102_v2  ;;  %1062 = vmatprep.mubr.msk.bf16.mxu0 %vm186_vm0, %v629_v9 }
  0x2c   : > { %1072 = vmatprep.subr.bf16.mxu0 %v1108_v10  ;;  %1069 = vmatmul.mubr.msk.bf16.vlgmr.msra.gmra.mxu1 %vm186_vm0, %v716_v0 }
  0x32   : > { %1063 = vmatmul.mubr.msk.bf16.vlgmr.msra.gmra.mxu0 %vm186_vm0, %v628_v7 }
  0x33   : > { %1073 = vmatpush3.bf16.msra.mxu0 %v1108_v10  ;;  %1074 = vmatprep.mubr.msk.bf16.mxu0 %vm186_vm0, %v790_v14 }
  0x3a   : > { %1075 = vmatmul.mubr.msk.bf16.vlgmr.msra.gmra.mxu0 %vm186_vm0, %v789_v13 }
  0xd3   : > { %v1034_v15 = vpop.f32.mrf.mxu1 }
  0xd5   : > { %v287_v16 = vpop.f32.mrf.mxu1 }
  0xd7   : > { %v1035_v17 = vpop.f32.mrf.mxu1 }
  0xd9   : > { %v290_v18 = vpop.f32.mrf.mxu1 }
  0xda   : > { %v1028_v19 = vpop.f32.mrf.mxu0 }
  0xdb   : > { %v296_v32 = vadd.f32 %v1034_v15, %v1028_v19 }
  0xdc   : > { %v227_v20 = vpop.f32.mrf.mxu0  ;;  %v1046_v21 = vpop.f32.mrf.mxu1 }
  0xdd   : > { %v288_v35 = vadd.f32 %v287_v16, %v227_v20 }
  0xde   : > { %v1029_v22 = vpop.f32.mrf.mxu0  ;;  %v436_v23 = vpop.f32.mrf.mxu1 }
  0xe0   : > { %v230_v24 = vpop.f32.mrf.mxu0  ;;  %v1047_v25 = vpop.f32.mrf.mxu1 }
  0xe1   : > { %v291_v42 = vadd.f32 %v290_v18, %v230_v24 }
  0xe2   : > { %v1040_v26 = vpop.f32.mrf.mxu0  ;;  %v439_v27 = vpop.f32.mrf.mxu1 }
  0xe3   : > { %v374_v36 = vadd.f32 %v1040_v26, %v296_v32 }
  0xe4   : > { %v358_v28 = vpop.f32.mrf.mxu0  ;;  %v1058_v29 = vpop.f32.mrf.mxu1 }
  0xe5   : > { %v372_v39 = vadd.f32 %v358_v28, %v288_v35  ;;  %v452_v43 = vadd.f32 %v1046_v21, %v374_v36 }
  0xe6   : > { %v1041_v30 = vpop.f32.mrf.mxu0  ;;  %v592_v31 = vpop.f32.mrf.mxu1 }
  0xe7   : > { %v450_v46 = vadd.f32 %v436_v23, %v372_v39 }
  0xe8   : > { %v361_v33 = vpop.f32.mrf.mxu0  ;;  %v1059_v34 = vpop.f32.mrf.mxu1 }
  0xe9   : > { %v373_v47 = vadd.f32 %v361_v33, %v291_v42 }
  0xea   : > { %v1052_v37 = vpop.f32.mrf.mxu0  ;;  %v595_v38 = vpop.f32.mrf.mxu1 }
  0xeb   : > { %v540_v48 = vadd.f32 %v1052_v37, %v452_v43  ;;  %v451_v53 = vadd.f32 %v439_v27, %v373_v47 }
  0xec   : > { %v524_v40 = vpop.f32.mrf.mxu0  ;;  %v1070_v41 = vpop.f32.mrf.mxu1 }
  0xed   : > { %v538_v51 = vadd.f32 %v524_v40, %v450_v46  ;;  %v608_v54 = vadd.f32 %v1058_v29, %v540_v48 }
  0xee   : > { %v1053_v44 = vpop.f32.mrf.mxu0  ;;  %v764_v45 = vpop.f32.mrf.mxu1 }
  0xef   : > { %v606_v56 = vadd.f32 %v592_v31, %v538_v51 }
  0xf0   : > { %v527_v49 = vpop.f32.mrf.mxu0  ;;  %v1071_v50 = vpop.f32.mrf.mxu1 }
  0xf1   : > { %v539_v57 = vadd.f32 %v527_v49, %v451_v53 }
  0xf2   : > { %v1064_v52 = vpop.f32.mrf.mxu0  ;;  %v767_v7 = vpop.f32.mrf.mxu1 }
  0xf3   : > { %v692_v58 = vadd.f32 %v1064_v52, %v608_v54  ;;  %v607_v62 = vadd.f32 %v595_v38, %v539_v57 }
  0xf4   : > { %v676_v55 = vpop.f32.mrf.mxu0 }
  0xf5   : > { %v690_v60 = vadd.f32 %v676_v55, %v606_v56  ;;  %v780_v63 = vadd.f32 %v1070_v41, %v692_v58 }
  0xf6   : > { %v1065_v59 = vpop.f32.mrf.mxu0 }
  0xf7   : > { %v778_v1 = vadd.f32 %v764_v45, %v690_v60 }
  0xf8   : > { %v679_v61 = vpop.f32.mrf.mxu0 }
  0xf9   : > { %v691_v2 = vadd.f32 %v679_v61, %v607_v62 }
  0xfa   : > { %v1076_v0 = vpop.f32.mrf.mxu0 }
  0xfb   : > { %v853_v3 = vadd.f32 %v1076_v0, %v780_v63  ;;  %v779_v9 = vadd.f32 %v767_v7, %v691_v2 }
  0xfc   : > { %v837_v4 = vpop.f32.mrf.mxu0 }
  0xfd   : > { %v996_v5 = vpack.c.bf16 %v853_v3, %v853_v3  ;;  %v851_v6 = vadd.f32 %v837_v4, %v778_v1 }
  0xfe   : > { %v1077_v8 = vpop.f32.mrf.mxu0 }
  0xff   : > { %870 = vst.msk [vmem:[%s143_s8 + $0x8] sm:$0xf] %vm867_vm7, %v996_v5  ;;  %v994_v10 = vpack.c.bf16 %v851_v6, %v851_v6 }
 0x100   : > { %v840_v11 = vpop.f32.mrf.mxu0 }
 0x101   : > { %868 = vst.msk [vmem:[%s143_s8] sm:$0xf] %vm867_vm7, %v994_v10  ;;  %v852_v12 = vadd.f32 %v840_v11, %v779_v9 }
 0x103   : > { %v995_v13 = vpack.c.bf16 %v852_v12, %v852_v12 }
 0x105   : > { %869 = vst.msk [vmem:[%s143_s8 + $0x4] sm:$0xf] %vm867_vm7, %v995_v13 }
 0x106 PF: > { %s12_s9 = sadd.s32 1, %s1116_s9  }
 0x107   : > { %p9_p4 = scmp.ge.s32.totalorder %s12_s9, 6  }
 0x109   :  { %11 = sbr.rel (!%p9_p4) target bundleno = 1 (0x1), region = 66 }

// kernel: densenet_trick_v3_forward.37
= control target key start
LH: loop header
LB: loop body
LE: loop exit
PB: predicated region body
PF: predicated region fallthrough
CT: control target
= control target key end

     0   :  { %vm84_vm0 = vcmask 130048   ;;  %vm194_vm1 = vcmask 60416   ;;  %s349_s1 = inlined_call_operand.vmem [shape: bf16[16,8], index: 1, kind: input, shape index: {}]   ;;  %s350_s0 = inlined_call_operand.vmem [shape: bf16[64,16], index: 0, kind: input, shape index: {}]   ;;  %s351_s2 = inlined_call_operand.vmem [shape: f32[1,16], index: 2, kind: input, shape index: {}]   ;;  %s352_s3 = inlined_call_operand.vmem [shape: f32[1,16], index: 3, kind: input, shape index: {}]   ;;  %s353_s4 = inlined_call_operand.vmem [shape: bf16[64,8], index: 4, kind: output, shape index: {}]  }
   0x1   :  { %v266_v0 = vld [vmem:[%s349_s1] sm:$0xff]   ;;  %v247_v5 = vld [vmem:[%s350_s0 + $0x10] sm:$0xff]   ;;  %v246_v6 = vld [vmem:[%s350_s0 + $0x8] sm:$0xff]  }
   0x2   :  { %v231_v1 = vld [vmem:[%s350_s0] sm:$0xff]   ;;  %254 = vmatprep.subr.bf16.mxu0 %v266_v0  ;;  %264 = vmatprep.subr.bf16.mxu1 %v266_v0  ;;  %v248_v7 = vld [vmem:[%s350_s0 + $0x18] sm:$0xff]   ;;  %v240_v9 = vunpack.c.l.bf16 %v247_v5  ;;  %v241_v10 = vunpack.c.h.bf16 %v247_v5  ;;  %v236_v11 = vunpack.c.l.bf16 %v246_v6  ;;  %v237_v12 = vunpack.c.h.bf16 %v246_v6 }
   0x3   :  { %v207_v2 = vld [vmem:[%s351_s2] ss:$0 sm:$0xff]  ;;  %v232_v3 = vunpack.c.l.bf16 %v231_v1  ;;  %v233_v4 = vunpack.c.h.bf16 %v231_v1  ;;  %255 = vmatpush3.bf16.msra.mxu0 %v266_v0  ;;  %265 = vmatpush3.bf16.msra.mxu1 %v266_v0  ;;  %v244_v15 = vunpack.c.l.bf16 %v248_v7  ;;  %v245_v16 = vunpack.c.h.bf16 %v248_v7 }
   0x4   :  { %v208_v8 = vld [vmem:[%s352_s3] ss:$0 sm:$0xff]  ;;  %v45_v17 = vmul.f32 %v240_v9, %v207_v2  ;;  %v46_v18 = vmul.f32 %v241_v10, %v207_v2  ;;  %v43_v19 = vmul.f32 %v236_v11, %v207_v2  ;;  %v44_v20 = vmul.f32 %v237_v12, %v207_v2 }
   0x5   :  { %v41_v13 = vmul.f32 %v232_v3, %v207_v2  ;;  %v42_v14 = vmul.f32 %v233_v4, %v207_v2  ;;  %v47_v23 = vmul.f32 %v244_v15, %v207_v2  ;;  %v48_v24 = vmul.f32 %v245_v16, %v207_v2 }
   0x6   :  { %v60_v25 = vadd.f32 %v208_v8, %v45_v17  ;;  %v61_v26 = vadd.f32 %v208_v8, %v46_v18  ;;  %v58_v27 = vadd.f32 %v208_v8, %v43_v19  ;;  %v59_v28 = vadd.f32 %v208_v8, %v44_v20 }
   0x7   :  { %v56_v21 = vadd.f32 %v208_v8, %v41_v13  ;;  %v57_v22 = vadd.f32 %v208_v8, %v42_v14  ;;  %v62_v31 = vadd.f32 %v208_v8, %v47_v23  ;;  %v63_v32 = vadd.f32 %v208_v8, %v48_v24 }
   0x8   :  { %v68_v33 = vmax.f32 %v60_v25, 0.0  ;;  %v69_v34 = vmax.f32 %v61_v26, 0.0  ;;  %v66_v35 = vmax.f32 %v58_v27, 0.0  ;;  %v67_v36 = vmax.f32 %v59_v28, 0.0 }
   0x9   :  { %v64_v29 = vmax.f32 %v56_v21, 0.0  ;;  %v65_v30 = vmax.f32 %v57_v22, 0.0  ;;  %v70_v38 = vmax.f32 %v62_v31, 0.0  ;;  %v71_v39 = vmax.f32 %v63_v32, 0.0 }
   0xa   :  { %v74_v40 = vpack.c.bf16 %v69_v34, %v68_v33  ;;  %v73_v41 = vpack.c.bf16 %v67_v36, %v66_v35 }
   0xb   :  { %v72_v37 = vpack.c.bf16 %v65_v30, %v64_v29  ;;  %v75_v42 = vpack.c.bf16 %v71_v39, %v70_v38 }
   0xc   :  { %260 = vmatprep.mubr.msk.bf16.mxu1 %vm84_vm0, %v74_v40 }
   0xd   :  { %256 = vmatprep.mubr.msk.bf16.mxu0 %vm84_vm0, %v72_v37  ;;  %261 = vmatmul.mubr.msk.bf16.vlgmr.msra.gmra.mxu1 %vm84_vm0, %v75_v42 }
   0xe   :  { %257 = vmatmul.mubr.msk.bf16.vlgmr.msra.gmra.mxu0 %vm84_vm0, %v73_v41 }
  0xcd   :  { %v262_v45 = vpop.f32.mrf.mxu1 }
  0xce   :  { %v258_v43 = vpop.f32.mrf.mxu0  ;;  %v228_v46 = vpack.c.bf16 %v262_v45, %v262_v45 }
  0xcf   :  { %v224_v44 = vpack.c.bf16 %v258_v43, %v258_v43  ;;  %v147_v49 = vpop.f32.mrf.mxu1 }
  0xd0   :  { %v131_v47 = vpop.f32.mrf.mxu0  ;;  %201 = vst.msk [vmem:[%s353_s4 + $0x18] sm:$0xf] %vm194_vm1, %v228_v46  ;;  %v226_v50 = vpack.c.bf16 %v147_v49, %v147_v49 }
  0xd1   :  { %197 = vst.msk [vmem:[%s353_s4 + $0x8] sm:$0xf] %vm194_vm1, %v224_v44  ;;  %v222_v48 = vpack.c.bf16 %v131_v47, %v131_v47  ;;  %v263_v53 = vpop.f32.mrf.mxu1 }
  0xd2   :  { %v259_v51 = vpop.f32.mrf.mxu0  ;;  %199 = vst.msk [vmem:[%s353_s4 + $0x10] sm:$0xf] %vm194_vm1, %v226_v50  ;;  %v229_v54 = vpack.c.bf16 %v263_v53, %v263_v53 }
  0xd3   :  { %195 = vst.msk [vmem:[%s353_s4] sm:$0xf] %vm194_vm1, %v222_v48  ;;  %v225_v52 = vpack.c.bf16 %v259_v51, %v259_v51  ;;  %v150_v57 = vpop.f32.mrf.mxu1 }
  0xd4   :  { %v134_v55 = vpop.f32.mrf.mxu0  ;;  %202 = vst.msk [vmem:[%s353_s4 + $0x1c] sm:$0xf] %vm194_vm1, %v229_v54  ;;  %v227_v58 = vpack.c.bf16 %v150_v57, %v150_v57 }
  0xd5   :  { %198 = vst.msk [vmem:[%s353_s4 + $0xc] sm:$0xf] %vm194_vm1, %v225_v52  ;;  %v223_v56 = vpack.c.bf16 %v134_v55, %v134_v55 }
  0xd6   :  { %200 = vst.msk [vmem:[%s353_s4 + $0x14] sm:$0xf] %vm194_vm1, %v227_v58 }
  0xd7   :  { %196 = vst.msk [vmem:[%s353_s4 + $0x4] sm:$0xf] %vm194_vm1, %v223_v56 }

// kernel: densenet_trick_v3_forward.35
= control target key start
LH: loop header
LB: loop body
LE: loop exit
PB: predicated region body
PF: predicated region fallthrough
CT: control target
= control target key end

     0   :  { %vm102_vm0 = vcmask 1045504   ;;  %vm89_vm1 = vcmask 97280   ;;  %vm241_vm2 = vcmask 125952   ;;  %s416_s1 = inlined_call_operand.vmem [shape: bf16[12,16], index: 1, kind: input, shape index: {}]   ;;  %s417_s0 = inlined_call_operand.vmem [shape: bf16[64,12], index: 0, kind: input, shape index: {}]   ;;  %s418_s2 = inlined_call_operand.vmem [shape: f32[1,12], index: 2, kind: input, shape index: {}]   ;;  %s419_s3 = inlined_call_operand.vmem [shape: f32[1,12], index: 3, kind: input, shape index: {}]   ;;  %s420_s4 = inlined_call_operand.vmem [shape: f32[1,16], index: 4, kind: input, shape index: {}]   ;;  %s421_s5 = inlined_call_operand.vmem [shape: f32[1,16], index: 5, kind: input, shape index: {}]   ;;  %s422_s6 = inlined_call_operand.vmem [shape: bf16[64,16], index: 6, kind: output, shape index: {}]  }
   0x1   :  { %v317_v0 = vld [vmem:[%s416_s1] sm:$0x3f]   ;;  %v296_v6 = vld [vmem:[%s417_s0 + $0x10] sm:$0xff]   ;;  %v295_v7 = vld [vmem:[%s417_s0 + $0x8] sm:$0xff]  }
   0x2   :  { %v280_v1 = vld [vmem:[%s417_s0] sm:$0xff]   ;;  %315 = vmatprep.subr.msk.bf16.mxu0 %vm102_vm0, %v317_v0  ;;  %316 = vmatprep.subr.msk.bf16.mxu1 %vm102_vm0, %v317_v0  ;;  %v104_v3 = vsel %vm102_vm0, %v317_v0, 0  ;;  %v297_v8 = vld [vmem:[%s417_s0 + $0x18] sm:$0xff]   ;;  %v289_v10 = vunpack.c.l.bf16 %v296_v6  ;;  %v290_v11 = vunpack.c.h.bf16 %v296_v6  ;;  %v285_v12 = vunpack.c.l.bf16 %v295_v7 }
   0x3   :  { %v254_v2 = vld [vmem:[%s418_s2] ss:$0 sm:$0xff]  ;;  %v281_v4 = vunpack.c.l.bf16 %v280_v1  ;;  %v282_v5 = vunpack.c.h.bf16 %v280_v1  ;;  %304 = vmatpush3.bf16.msra.mxu0 %v104_v3  ;;  %314 = vmatpush3.bf16.msra.mxu1 %v104_v3  ;;  %v286_v13 = vunpack.c.h.bf16 %v295_v7  ;;  %v293_v16 = vunpack.c.l.bf16 %v297_v8 }
   0x4   :  { %v255_v9 = vld [vmem:[%s419_s3] ss:$0 sm:$0xff]  ;;  %v294_v17 = vunpack.c.h.bf16 %v297_v8  ;;  %v51_v18 = vmul.f32 %v289_v10, %v254_v2  ;;  %v52_v19 = vmul.f32 %v290_v11, %v254_v2  ;;  %v49_v20 = vmul.f32 %v285_v12, %v254_v2 }
   0x5   :  { %v47_v14 = vmul.f32 %v281_v4, %v254_v2  ;;  %v48_v15 = vmul.f32 %v282_v5, %v254_v2  ;;  %v50_v21 = vmul.f32 %v286_v13, %v254_v2  ;;  %v53_v24 = vmul.f32 %v293_v16, %v254_v2  ;;  %v261_v44 = vld [vmem:[%s420_s4] ss:$0 sm:$0xff] }
   0x6   :  { %v54_v25 = vmul.f32 %v294_v17, %v254_v2  ;;  %v66_v26 = vadd.f32 %v255_v9, %v51_v18  ;;  %v67_v27 = vadd.f32 %v255_v9, %v52_v19  ;;  %v64_v28 = vadd.f32 %v255_v9, %v49_v20  ;;  %v262_v46 = vld [vmem:[%s421_s5] ss:$0 sm:$0xff] }
   0x7   :  { %v62_v22 = vadd.f32 %v255_v9, %v47_v14  ;;  %v63_v23 = vadd.f32 %v255_v9, %v48_v15  ;;  %v65_v29 = vadd.f32 %v255_v9, %v50_v21  ;;  %v68_v32 = vadd.f32 %v255_v9, %v53_v24 }
   0x8   :  { %v69_v33 = vadd.f32 %v255_v9, %v54_v25  ;;  %v74_v34 = vmax.f32 %v66_v26, 0.0  ;;  %v75_v35 = vmax.f32 %v67_v27, 0.0  ;;  %v72_v36 = vmax.f32 %v64_v28, 0.0 }
   0x9   :  { %v70_v30 = vmax.f32 %v62_v22, 0.0  ;;  %v71_v31 = vmax.f32 %v63_v23, 0.0  ;;  %v73_v37 = vmax.f32 %v65_v29, 0.0  ;;  %v76_v39 = vmax.f32 %v68_v32, 0.0 }
   0xa   :  { %v77_v40 = vmax.f32 %v69_v33, 0.0  ;;  %v80_v41 = vpack.c.bf16 %v75_v35, %v74_v34 }
   0xb   :  { %v78_v38 = vpack.c.bf16 %v71_v31, %v70_v30  ;;  %v79_v42 = vpack.c.bf16 %v73_v37, %v72_v36 }
   0xc   :  { %v81_v43 = vpack.c.bf16 %v77_v40, %v76_v39  ;;  %309 = vmatprep.mubr.msk.bf16.mxu1 %vm89_vm1, %v80_v41 }
   0xd   :  { %305 = vmatprep.mubr.msk.bf16.mxu0 %vm89_vm1, %v78_v38 }
   0xe   :  { %306 = vmatmul.mubr.msk.bf16.vlgmr.msra.gmra.mxu0 %vm89_vm1, %v79_v42  ;;  %310 = vmatmul.mubr.msk.bf16.vlgmr.msra.gmra.mxu1 %vm89_vm1, %v81_v43 }
  0xce   :  { %v307_v45 = vpop.f32.mrf.mxu0  ;;  %v311_v48 = vpop.f32.mrf.mxu1 }
  0xcf   :  { %v180_v47 = vmul.f32 %v307_v45, %v261_v44  ;;  %v184_v49 = vmul.f32 %v311_v48, %v261_v44 }
  0xd0   :  { %v140_v50 = vpop.f32.mrf.mxu0  ;;  %v156_v53 = vpop.f32.mrf.mxu1 }
  0xd1   :  { %v195_v51 = vadd.f32 %v262_v46, %v180_v47  ;;  %v178_v52 = vmul.f32 %v261_v44, %v140_v50  ;;  %v199_v54 = vadd.f32 %v262_v46, %v184_v49  ;;  %v182_v55 = vmul.f32 %v261_v44, %v156_v53 }
  0xd2   :  { %v308_v56 = vpop.f32.mrf.mxu0  ;;  %v312_v60 = vpop.f32.mrf.mxu1 }
  0xd3   :  { %v203_v57 = vmax.f32 %v195_v51, 0.0  ;;  %v193_v58 = vadd.f32 %v262_v46, %v178_v52  ;;  %v181_v59 = vmul.f32 %v308_v56, %v261_v44  ;;  %v207_v61 = vmax.f32 %v199_v54, 0.0 }
  0xd4   :  { %v197_v62 = vadd.f32 %v262_v46, %v182_v55  ;;  %v185_v63 = vmul.f32 %v312_v60, %v261_v44  ;;  %v143_v0 = vpop.f32.mrf.mxu0  ;;  %v159_v5 = vpop.f32.mrf.mxu1 }
  0xd5   :  { %v273_v1 = vpack.c.bf16 %v203_v57, %v203_v57  ;;  %v201_v2 = vmax.f32 %v193_v58, 0.0  ;;  %v196_v3 = vadd.f32 %v262_v46, %v181_v59  ;;  %v179_v4 = vmul.f32 %v261_v44, %v143_v0 }
  0xd6   :  { %v277_v6 = vpack.c.bf16 %v207_v61, %v207_v61  ;;  %v205_v7 = vmax.f32 %v197_v62, 0.0  ;;  %v200_v8 = vadd.f32 %v262_v46, %v185_v63  ;;  %v183_v9 = vmul.f32 %v261_v44, %v159_v5 }
  0xd7   :  { %244 = vst.msk [vmem:[%s422_s6 + $0x8] sm:$0xf] %vm241_vm2, %v273_v1  ;;  %v271_v10 = vpack.c.bf16 %v201_v2, %v201_v2  ;;  %v204_v11 = vmax.f32 %v196_v3, 0.0  ;;  %v194_v12 = vadd.f32 %v262_v46, %v179_v4 }
  0xd8   :  { %248 = vst.msk [vmem:[%s422_s6 + $0x18] sm:$0xf] %vm241_vm2, %v277_v6  ;;  %v275_v13 = vpack.c.bf16 %v205_v7, %v205_v7  ;;  %v208_v14 = vmax.f32 %v200_v8, 0.0  ;;  %v198_v15 = vadd.f32 %v262_v46, %v183_v9 }
  0xd9   :  { %242 = vst.msk [vmem:[%s422_s6] sm:$0xf] %vm241_vm2, %v271_v10  ;;  %v274_v16 = vpack.c.bf16 %v204_v11, %v204_v11  ;;  %v202_v17 = vmax.f32 %v194_v12, 0.0 }
  0xda   :  { %246 = vst.msk [vmem:[%s422_s6 + $0x10] sm:$0xf] %vm241_vm2, %v275_v13  ;;  %v278_v18 = vpack.c.bf16 %v208_v14, %v208_v14  ;;  %v206_v19 = vmax.f32 %v198_v15, 0.0 }
  0xdb   :  { %245 = vst.msk [vmem:[%s422_s6 + $0xc] sm:$0xf] %vm241_vm2, %v274_v16  ;;  %v272_v20 = vpack.c.bf16 %v202_v17, %v202_v17 }
  0xdc   :  { %249 = vst.msk [vmem:[%s422_s6 + $0x1c] sm:$0xf] %vm241_vm2, %v278_v18  ;;  %v276_v21 = vpack.c.bf16 %v206_v19, %v206_v19 }
  0xdd   :  { %243 = vst.msk [vmem:[%s422_s6 + $0x4] sm:$0xf] %vm241_vm2, %v272_v20 }
  0xde   :  { %247 = vst.msk [vmem:[%s422_s6 + $0x14] sm:$0xf] %vm241_vm2, %v276_v21 }

// kernel: densenet_trick_v3_forward.38
= control target key start
LH: loop header
LB: loop body
LE: loop exit
PB: predicated region body
PF: predicated region fallthrough
CT: control target
= control target key end

     0   :  { %v219_v0 = vlaneseq  ;;  %v856_v4 = vmov 1966171168   ;;  %v857_v6 = vmov 1935823168   ;;  %vm681_vm0 = vcmask 1041409   ;;  %s1088_s0 = inlined_call_operand.vmem [shape: bf16[8,2,2,2,8], index: 0, kind: input, shape index: {}]   ;;  %s1089_s1 = inlined_call_operand.vmem [shape: bf16[8,2,8], index: 1, kind: output, shape index: {}]  }
   0x1   :  { %v8_v1 = vld [vmem:[%s1088_s0] sm:$0x1]  ;;  %v9_v2 = vld [vmem:[%s1088_s0 + $0x1] sm:$0x1]  ;;  %v10_v3 = vld [vmem:[%s1088_s0 + $0x2] sm:$0x1]  ;;  %v217_v5 = vunpack.c.l.s4 %v856_v4  ;;  %v441_v7 = vunpack.c.l.s4 %v857_v6 }
   0x2   :  { %v11_v8 = vld [vmem:[%s1088_s0 + $0x3] sm:$0x1]  ;;  %v40_v9 = vunpack.c.l.bf16 %v8_v1  ;;  %v41_v10 = vunpack.c.l.bf16 %v9_v2  ;;  %v42_v11 = vunpack.c.l.bf16 %v10_v3  ;;  %v220_v12 = vshrl.u32 %v219_v0, 7  ;;  %v12_v13 = vld [vmem:[%s1088_s0 + $0x4] sm:$0x1] }
   0x3   :  { %v43_v14 = vunpack.c.l.bf16 %v11_v8  ;;  %v218_v15 = vunpack.c.0.s8 %v217_v5  ;;  %v442_v16 = vunpack.c.0.s8 %v441_v7  ;;  %v13_v17 = vld [vmem:[%s1088_s0 + $0x5] sm:$0x1]  ;;  %v14_v18 = vld [vmem:[%s1088_s0 + $0x6] sm:$0x1]  ;;  %v15_v20 = vld [vmem:[%s1088_s0 + $0x7] sm:$0x1]  ;;  %v44_v21 = vunpack.c.l.bf16 %v12_v13 }
   0x4   :  { %v72_v19 = vadd.f32 %v42_v11, %v40_v9  ;;  %v45_v22 = vunpack.c.l.bf16 %v13_v17  ;;  %v46_v23 = vunpack.c.l.bf16 %v14_v18  ;;  %v16_v24 = vld [vmem:[%s1088_s0 + $0x8] sm:$0x1]  ;;  %v17_v25 = vld [vmem:[%s1088_s0 + $0x9] sm:$0x1]  ;;  %v47_v29 = vunpack.c.l.bf16 %v15_v20  ;;  %v18_v30 = vld [vmem:[%s1088_s0 + $0xa] sm:$0x1] }
   0x5   :  { %v73_v26 = vadd.f32 %v43_v14, %v41_v10  ;;  %v898_v27 = vsub.s32 %v218_v15, %v220_v12  ;;  %v900_v28 = vsub.s32 %v442_v16, %v220_v12  ;;  %v19_v31 = vld [vmem:[%s1088_s0 + $0xb] sm:$0x1]  ;;  %v20_v32 = vld [vmem:[%s1088_s0 + $0xc] sm:$0x1]  ;;  %v48_v35 = vunpack.c.l.bf16 %v16_v24  ;;  %v21_v37 = vld [vmem:[%s1088_s0 + $0xd] sm:$0x1] }
   0x6   :  { %v838_v33 = vrot.slane %v72_v19, 9  ;;  %v74_v34 = vadd.f32 %v46_v23, %v44_v21  ;;  %v49_v36 = vunpack.c.l.bf16 %v17_v25  ;;  %v75_v39 = vadd.f32 %v47_v29, %v45_v22  ;;  %v22_v42 = vld [vmem:[%s1088_s0 + $0xe] sm:$0x1]  ;;  %v23_v43 = vld [vmem:[%s1088_s0 + $0xf] sm:$0x1] }
   0x7   :  { %v839_v38 = vrot.slane %v73_v26, 9  ;;  %v50_v40 = vunpack.c.l.bf16 %v18_v30  ;;  %v51_v41 = vunpack.c.l.bf16 %v19_v31  ;;  %v52_v46 = vunpack.c.l.bf16 %v20_v32 }
   0x8   :  { %v152_v44 = vadd.f32 %v838_v33, %v72_v19  ;;  %v840_v45 = vrot.slane %v74_v34, 9  ;;  %v53_v47 = vunpack.c.l.bf16 %v21_v37  ;;  %v841_v49 = vrot.slane %v75_v39, 9 }
   0x9   :  { %v153_v48 = vadd.f32 %v839_v38, %v73_v26  ;;  %v76_v50 = vadd.f32 %v50_v40, %v48_v35  ;;  %v77_v51 = vadd.f32 %v51_v41, %v49_v36  ;;  %v54_v54 = vunpack.c.l.bf16 %v22_v42  ;;  %v24_v38 = vld [vmem:[%s1088_s0 + $0x10] sm:$0x1] }
   0xa   :  { %v168_v52 = vmul.f32 0.25, %v152_v44  ;;  %v154_v53 = vadd.f32 %v840_v45, %v74_v34  ;;  %v55_v55 = vunpack.c.l.bf16 %v23_v43  ;;  %v155_v57 = vadd.f32 %v841_v49, %v75_v39 }
   0xb   :  { %v169_v56 = vmul.f32 0.25, %v153_v48  ;;  %v842_v58 = vrot.slane %v76_v50, 9  ;;  %v843_v59 = vrot.slane %v77_v51, 9  ;;  %v78_v62 = vadd.f32 %v54_v54, %v52_v46  ;;  %v26_v48 = vld [vmem:[%s1088_s0 + $0x12] sm:$0x1] }
   0xc   :  { %v184_v60 = vpack.c.bf16 %v168_v52, %v168_v52  ;;  %v170_v61 = vmul.f32 0.25, %v154_v53  ;;  %v79_v63 = vadd.f32 %v55_v55, %v53_v47  ;;  %v171_v1 = vmul.f32 0.25, %v155_v57  ;;  %v25_v47 = vld [vmem:[%s1088_s0 + $0x11] sm:$0x1]  ;;  %v27_v57 = vld [vmem:[%s1088_s0 + $0x13] sm:$0x1] }
   0xd   :  { %v185_v0 = vpack.c.bf16 %v169_v56, %v169_v56  ;;  %v156_v2 = vadd.f32 %v842_v58, %v76_v50  ;;  %v157_v3 = vadd.f32 %v843_v59, %v77_v51  ;;  %v844_v6 = vrot.slane %v78_v62, 9 }
   0xe   :  { %v222_v4 = vrot.slane %v184_v60, %v898_v27  ;;  %v186_v5 = vpack.c.bf16 %v170_v61, %v170_v61  ;;  %v845_v7 = vrot.slane %v79_v63, 9  ;;  %v187_v9 = vpack.c.bf16 %v171_v1, %v171_v1 }
   0xf   :  { %v236_v8 = vrot.slane %v185_v0, %v898_v27  ;;  %v172_v10 = vmul.f32 0.25, %v156_v2  ;;  %v173_v11 = vmul.f32 0.25, %v157_v3  ;;  %v158_v14 = vadd.f32 %v844_v6, %v78_v62  ;;  %v28_v62 = vld [vmem:[%s1088_s0 + $0x14] sm:$0x1] }
  0x10   :  { %v229_v12 = vrot.slane %v222_v4, %v898_v27  ;;  %v250_v13 = vrot.slane %v186_v5, %v898_v27  ;;  %v159_v15 = vadd.f32 %v845_v7, %v79_v63  ;;  %v264_v17 = vrot.slane %v187_v9, %v898_v27  ;;  %v29_v7 = vld [vmem:[%s1088_s0 + $0x15] sm:$0x1] }
  0x11   :  { %v243_v16 = vrot.slane %v236_v8, %v898_v27  ;;  %v188_v18 = vpack.c.bf16 %v172_v10, %v172_v10  ;;  %v189_v19 = vpack.c.bf16 %v173_v11, %v173_v11  ;;  %v174_v22 = vmul.f32 0.25, %v158_v14 }
  0x12   :  { %v446_v20 = vrot.slane %v229_v12, %v900_v28  ;;  %v257_v21 = vrot.slane %v250_v13, %v898_v27  ;;  %v175_v23 = vmul.f32 0.25, %v159_v15  ;;  %v271_v25 = vrot.slane %v264_v17, %v898_v27  ;;  %v31_v17 = vld [vmem:[%s1088_s0 + $0x17] sm:$0x1] }
  0x13   :  { %v460_v24 = vrot.slane %v243_v16, %v900_v28  ;;  %v278_v26 = vrot.slane %v188_v18, %v898_v27  ;;  %v292_v29 = vrot.slane %v189_v19, %v898_v27  ;;  %v190_v32 = vpack.c.bf16 %v174_v22, %v174_v22  ;;  %v30_v16 = vld [vmem:[%s1088_s0 + $0x16] sm:$0x1]  ;;  %v32_v22 = vld [vmem:[%s1088_s0 + $0x18] sm:$0x1] }
  0x14   :  { %v453_v30 = vrot.slane %v446_v20, %v900_v28  ;;  %v474_v31 = vrot.slane %v257_v21, %v900_v28  ;;  %v191_v33 = vpack.c.bf16 %v175_v23, %v175_v23  ;;  %v488_v35 = vrot.slane %v271_v25, %v900_v28 }
  0x15   :  { %v467_v34 = vrot.slane %v460_v24, %v900_v28  ;;  %v285_v36 = vrot.slane %v278_v26, %v898_v27  ;;  %v299_v37 = vrot.slane %v292_v29, %v898_v27  ;;  %v306_v41 = vrot.slane %v190_v32, %v898_v27 }
  0x16   :  { %v664_v39 = vunpack.c.l.b16 %v453_v30  ;;  %v481_v40 = vrot.slane %v474_v31, %v900_v28  ;;  %v320_v42 = vrot.slane %v191_v33, %v898_v27  ;;  %vm825_vm1 = vcmask 57344   ;;  %v33_v33 = vld [vmem:[%s1088_s0 + $0x19] sm:$0x1] }
  0x17   :  { %v665_v43 = vunpack.c.l.b16 %v467_v34  ;;  %v495_v44 = vrot.slane %v488_v35, %v900_v28  ;;  %v502_v45 = vrot.slane %v285_v36, %v900_v28  ;;  %v516_v46 = vrot.slane %v299_v37, %v900_v28  ;;  %v34_v34 = vld [vmem:[%s1088_s0 + $0x1a] sm:$0x1] }
  0x18   :  { %v666_v49 = vunpack.c.l.b16 %v481_v40  ;;  %v313_v50 = vrot.slane %v306_v41, %v898_v27  ;;  %v327_v51 = vrot.slane %v320_v42, %v898_v27  ;;  %v56_v52 = vunpack.c.l.bf16 %v24_v38 }
  0x19   :  { %v680_v53 = vrot.slane %v665_v43, 7  ;;  %v667_v54 = vunpack.c.l.b16 %v495_v44  ;;  %v509_v55 = vrot.slane %v502_v45, %v900_v28  ;;  %v523_v56 = vrot.slane %v516_v46, %v900_v28  ;;  %v35_v43 = vld [vmem:[%s1088_s0 + $0x1b] sm:$0x1]  ;;  %v36_v44 = vld [vmem:[%s1088_s0 + $0x1c] sm:$0x1] }
  0x1a   :  { %v530_v58 = vrot.slane %v313_v50, %v900_v28  ;;  %v544_v59 = vrot.slane %v327_v51, %v900_v28  ;;  %v57_v60 = vunpack.c.l.bf16 %v25_v47  ;;  %v58_v61 = vunpack.c.l.bf16 %v26_v48 }
  0x1b   :  { %v682_v63 = vsel %vm681_vm0, %v680_v53, %v664_v39  ;;  %v683_v0 = vrot.slane %v667_v54, 7  ;;  %v668_v1 = vunpack.c.l.b16 %v509_v55  ;;  %v669_v2 = vunpack.c.l.b16 %v523_v56  ;;  %v37_v53 = vld [vmem:[%s1088_s0 + $0x1d] sm:$0x1] }
  0x1c   :  { %v697_v3 = vpack.c.b16 %v682_v63, %v682_v63  ;;  %v537_v4 = vrot.slane %v530_v58, %v900_v28  ;;  %v551_v5 = vrot.slane %v544_v59, %v900_v28  ;;  %v59_v6 = vunpack.c.l.bf16 %v27_v57  ;;  %v38_v57 = vld [vmem:[%s1088_s0 + $0x1e] sm:$0x1]  ;;  %v39_v63 = vld [vmem:[%s1088_s0 + $0x1f] sm:$0x1] }
  0x1d   :  { %v684_v8 = vsel %vm681_vm0, %v683_v0, %v666_v49  ;;  %v685_v9 = vrot.slane %v669_v2, 7  ;;  %v80_v10 = vadd.f32 %v58_v61, %v56_v52  ;;  %v60_v11 = vunpack.c.l.bf16 %v28_v62 }
  0x1e   :  { %v711_v12 = vrot.slane %v697_v3, %v898_v27  ;;  %v698_v13 = vpack.c.b16 %v684_v8, %v684_v8  ;;  %v670_v14 = vunpack.c.l.b16 %v537_v4  ;;  %v671_v15 = vunpack.c.l.b16 %v551_v5 }
  0x1f   :  { %v686_v18 = vsel %vm681_vm0, %v685_v9, %v668_v1  ;;  %v81_v19 = vadd.f32 %v59_v6, %v57_v60  ;;  %v846_v20 = vrot.slane %v80_v10, 9  ;;  %v61_v21 = vunpack.c.l.bf16 %v29_v7 }
  0x20   :  { %v718_v23 = vrot.slane %v711_v12, %v898_v27  ;;  %v725_v24 = vrot.slane %v698_v13, %v898_v27  ;;  %v699_v25 = vpack.c.b16 %v686_v18, %v686_v18  ;;  %v687_v26 = vrot.slane %v671_v15, 7 }
  0x21   :  { %v847_v29 = vrot.slane %v81_v19, 9  ;;  %v160_v30 = vadd.f32 %v846_v20, %v80_v10  ;;  %v62_v31 = vunpack.c.l.bf16 %v30_v16  ;;  %v63_v32 = vunpack.c.l.bf16 %v31_v17 }
  0x22   :  { %826 = vst.msk [vmem:[%s1089_s1] sm:$0x1] %vm825_vm1, %v718_v23  ;;  %v732_v35 = vrot.slane %v725_v24, %v898_v27  ;;  %v739_v36 = vrot.slane %v699_v25, %v898_v27  ;;  %v688_v37 = vsel %vm681_vm0, %v687_v26, %v670_v14  ;;  %v64_v38 = vunpack.c.l.bf16 %v32_v22 }
  0x23   :  { %v700_v39 = vpack.c.b16 %v688_v37, %v688_v37  ;;  %v161_v40 = vadd.f32 %v847_v29, %v81_v19  ;;  %v176_v41 = vmul.f32 0.25, %v160_v30  ;;  %v82_v42 = vadd.f32 %v62_v31, %v60_v11 }
  0x24   :  { %827 = vst.msk [vmem:[%s1089_s1 + $0x1] sm:$0x1] %vm825_vm1, %v732_v35  ;;  %v746_v45 = vrot.slane %v739_v36, %v898_v27  ;;  %v83_v46 = vadd.f32 %v63_v32, %v61_v21  ;;  %v65_v47 = vunpack.c.l.bf16 %v33_v33  ;;  %v66_v48 = vunpack.c.l.bf16 %v34_v34 }
  0x25   :  { %v753_v49 = vrot.slane %v700_v39, %v898_v27  ;;  %v177_v50 = vmul.f32 0.25, %v161_v40  ;;  %v192_v51 = vpack.c.bf16 %v176_v41, %v176_v41  ;;  %v848_v52 = vrot.slane %v82_v42, 9 }
  0x26   :  { %828 = vst.msk [vmem:[%s1089_s1 + $0x2] sm:$0x1] %vm825_vm1, %v746_v45  ;;  %v849_v54 = vrot.slane %v83_v46, 9  ;;  %v67_v55 = vunpack.c.l.bf16 %v35_v43  ;;  %v84_v56 = vadd.f32 %v66_v48, %v64_v38  ;;  %v68_v58 = vunpack.c.l.bf16 %v36_v44 }
  0x27   :  { %v760_v59 = vrot.slane %v753_v49, %v898_v27  ;;  %v193_v60 = vpack.c.bf16 %v177_v50, %v177_v50  ;;  %v334_v61 = vrot.slane %v192_v51, %v898_v27  ;;  %v162_v62 = vadd.f32 %v848_v52, %v82_v42 }
  0x28   :  { %v163_v0 = vadd.f32 %v849_v54, %v83_v46  ;;  %v85_v1 = vadd.f32 %v67_v55, %v65_v47  ;;  %v850_v2 = vrot.slane %v84_v56, 9  ;;  %v69_v3 = vunpack.c.l.bf16 %v37_v53 }
  0x29   :  { %829 = vst.msk [vmem:[%s1089_s1 + $0x3] sm:$0x1] %vm825_vm1, %v760_v59  ;;  %v341_v4 = vrot.slane %v334_v61, %v898_v27  ;;  %v348_v5 = vrot.slane %v193_v60, %v898_v27  ;;  %v178_v6 = vmul.f32 0.25, %v162_v62  ;;  %v70_v7 = vunpack.c.l.bf16 %v38_v57 }
  0x2a   :  { %v179_v8 = vmul.f32 0.25, %v163_v0  ;;  %v851_v9 = vrot.slane %v85_v1, 9  ;;  %v164_v10 = vadd.f32 %v850_v2, %v84_v56  ;;  %v71_v11 = vunpack.c.l.bf16 %v39_v63 }
  0x2b   :  { %v355_v12 = vrot.slane %v348_v5, %v898_v27  ;;  %v558_v13 = vrot.slane %v341_v4, %v900_v28  ;;  %v194_v14 = vpack.c.bf16 %v178_v6, %v178_v6  ;;  %v86_v15 = vadd.f32 %v70_v7, %v68_v58 }
  0x2c   :  { %v195_v16 = vpack.c.bf16 %v179_v8, %v179_v8  ;;  %v165_v17 = vadd.f32 %v851_v9, %v85_v1  ;;  %v180_v18 = vmul.f32 0.25, %v164_v10  ;;  %v87_v19 = vadd.f32 %v71_v11, %v69_v3 }
  0x2d   :  { %v565_v20 = vrot.slane %v558_v13, %v900_v28  ;;  %v572_v21 = vrot.slane %v355_v12, %v900_v28  ;;  %v362_v22 = vrot.slane %v194_v14, %v898_v27  ;;  %v852_v23 = vrot.slane %v86_v15, 9 }
  0x2e   :  { %v376_v24 = vrot.slane %v195_v16, %v898_v27  ;;  %v181_v25 = vmul.f32 0.25, %v165_v17  ;;  %v196_v26 = vpack.c.bf16 %v180_v18, %v180_v18  ;;  %v853_v29 = vrot.slane %v87_v19, 9 }
  0x2f   :  { %v579_v30 = vrot.slane %v572_v21, %v900_v28  ;;  %v369_v31 = vrot.slane %v362_v22, %v898_v27  ;;  %v166_v32 = vadd.f32 %v852_v23, %v86_v15  ;;  %v672_v37 = vunpack.c.l.b16 %v565_v20 }
  0x30   :  { %v383_v33 = vrot.slane %v376_v24, %v898_v27  ;;  %v197_v34 = vpack.c.bf16 %v181_v25, %v181_v25  ;;  %v390_v35 = vrot.slane %v196_v26, %v898_v27  ;;  %v167_v36 = vadd.f32 %v853_v29, %v87_v19 }
  0x31   :  { %v673_v38 = vunpack.c.l.b16 %v579_v30  ;;  %v586_v39 = vrot.slane %v369_v31, %v900_v28  ;;  %v182_v40 = vmul.f32 0.25, %v166_v32 }
  0x32   :  { %v600_v41 = vrot.slane %v383_v33, %v900_v28  ;;  %v397_v42 = vrot.slane %v390_v35, %v898_v27  ;;  %v404_v43 = vrot.slane %v197_v34, %v898_v27  ;;  %v183_v44 = vmul.f32 0.25, %v167_v36 }
  0x33   :  { %v689_v45 = vrot.slane %v673_v38, 7  ;;  %v593_v46 = vrot.slane %v586_v39, %v900_v28  ;;  %v198_v47 = vpack.c.bf16 %v182_v40, %v182_v40 }
  0x34   :  { %v607_v48 = vrot.slane %v600_v41, %v900_v28  ;;  %v411_v49 = vrot.slane %v404_v43, %v898_v27  ;;  %v614_v50 = vrot.slane %v397_v42, %v900_v28  ;;  %v199_v51 = vpack.c.bf16 %v183_v44, %v183_v44 }
  0x35   :  { %v690_v52 = vsel %vm681_vm0, %v689_v45, %v672_v37  ;;  %v674_v53 = vunpack.c.l.b16 %v593_v46  ;;  %v418_v54 = vrot.slane %v198_v47, %v898_v27 }
  0x36   :  { %v701_v55 = vpack.c.b16 %v690_v52, %v690_v52  ;;  %v675_v56 = vunpack.c.l.b16 %v607_v48  ;;  %v621_v57 = vrot.slane %v614_v50, %v900_v28  ;;  %v628_v58 = vrot.slane %v411_v49, %v900_v28 }
  0x37   :  { %v425_v59 = vrot.slane %v418_v54, %v898_v27  ;;  %v432_v60 = vrot.slane %v199_v51, %v898_v27 }
  0x38   :  { %v767_v61 = vrot.slane %v701_v55, %v898_v27  ;;  %v691_v62 = vrot.slane %v675_v56, 7  ;;  %v635_v63 = vrot.slane %v628_v58, %v900_v28  ;;  %v676_v4 = vunpack.c.l.b16 %v621_v57 }
  0x39   :  { %v439_v0 = vrot.slane %v432_v60, %v898_v27  ;;  %v642_v1 = vrot.slane %v425_v59, %v900_v28 }
  0x3a   :  { %v774_v2 = vrot.slane %v767_v61, %v898_v27  ;;  %v692_v3 = vsel %vm681_vm0, %v691_v62, %v674_v53  ;;  %v677_v5 = vunpack.c.l.b16 %v635_v63 }
  0x3b   :  { %v702_v6 = vpack.c.b16 %v692_v3, %v692_v3  ;;  %v649_v7 = vrot.slane %v642_v1, %v900_v28  ;;  %v656_v8 = vrot.slane %v439_v0, %v900_v28 }
  0x3c   :  { %830 = vst.msk [vmem:[%s1089_s1 + $0x4] sm:$0x1] %vm825_vm1, %v774_v2  ;;  %v693_v9 = vrot.slane %v677_v5, 7 }
  0x3d   :  { %v781_v10 = vrot.slane %v702_v6, %v898_v27  ;;  %v663_v11 = vrot.slane %v656_v8, %v900_v28  ;;  %v678_v15 = vunpack.c.l.b16 %v649_v7 }
  0x3e   :  { %v694_v12 = vsel %vm681_vm0, %v693_v9, %v676_v4 }
  0x3f   :  { %v788_v13 = vrot.slane %v781_v10, %v898_v27  ;;  %v703_v14 = vpack.c.b16 %v694_v12, %v694_v12  ;;  %v679_v16 = vunpack.c.l.b16 %v663_v11 }
  0x41   :  { %831 = vst.msk [vmem:[%s1089_s1 + $0x5] sm:$0x1] %vm825_vm1, %v788_v13  ;;  %v795_v17 = vrot.slane %v703_v14, %v898_v27  ;;  %v695_v18 = vrot.slane %v679_v16, 7 }
  0x43   :  { %v802_v19 = vrot.slane %v795_v17, %v898_v27  ;;  %v696_v20 = vsel %vm681_vm0, %v695_v18, %v678_v15 }
  0x44   :  { %v704_v28 = vpack.c.b16 %v696_v20, %v696_v20 }
  0x45   :  { %832 = vst.msk [vmem:[%s1089_s1 + $0x6] sm:$0x1] %vm825_vm1, %v802_v19 }
  0x46   :  { %v809_v21 = vrot.slane %v704_v28, %v898_v27 }
  0x48   :  { %v816_v22 = vrot.slane %v809_v21, %v898_v27 }
  0x4a   :  { %833 = vst.msk [vmem:[%s1089_s1 + $0x7] sm:$0x1] %vm825_vm1, %v816_v22 }

// kernel: densenet_trick_v3_forward.39
= control target key start
LH: loop header
LB: loop body
LE: loop exit
PB: predicated region body
PF: predicated region fallthrough
CT: control target
= control target key end

     0   :  { %vm54_vm0 = vcmask 1043456   ;;  %v157_v0 = vmov 0.0   ;;  %vm158_vm1 = vmmov 0   ;;  %vm50_vm2 = vcmask 64512   ;;  %s218_s1 = inlined_call_operand.vmem [shape: bf16[8,16], index: 1, kind: input, shape index: {}]   ;;  %s219_s0 = inlined_call_operand.vmem [shape: bf16[16,8], index: 0, kind: input, shape index: {}]   ;;  %s220_s2 = inlined_call_operand.vmem [shape: f32[1,8], index: 2, kind: input, shape index: {}]   ;;  %s221_s3 = inlined_call_operand.vmem [shape: f32[1,8], index: 3, kind: input, shape index: {}]   ;;  %s222_s4 = inlined_call_operand.vmem [shape: f32[1,16], index: 4, kind: input, shape index: {}]   ;;  %s223_s5 = inlined_call_operand.vmem [shape: f32[1,16], index: 5, kind: input, shape index: {}]   ;;  %s224_s6 = inlined_call_operand.vmem [shape: bf16[16,16], index: 6, kind: output, shape index: {}]  }
   0x1   :  { %149 = vmatprep.subr.bf16.mxu0 %v157_v0  ;;  %v49_v1 = vld [vmem:[%s218_s1] sm:$0xf]  ;;  %151 = vmatprep.mubr.msk.bf16.mxu0 %vm158_vm1, %v157_v0  ;;  %vm127_vm3 = vcmask 125952  }
   0x2   :  { %v144_v2 = vld [vmem:[%s219_s0] sm:$0xff]   ;;  %v56_v4 = vsel %vm54_vm0, %v49_v1, 0 }
   0x3   :  { %v134_v3 = vld [vmem:[%s220_s2] ss:$0 sm:$0xff]  ;;  %v145_v5 = vunpack.c.l.bf16 %v144_v2  ;;  %v146_v6 = vunpack.c.h.bf16 %v144_v2  ;;  %150 = vmatpush3.bf16.msra.mxu0 %v56_v4 }
   0x4   :  { %v135_v7 = vld [vmem:[%s221_s3] ss:$0 sm:$0xff] }
   0x5   :  { %v35_v8 = vmul.f32 %v145_v5, %v134_v3  ;;  %v36_v9 = vmul.f32 %v146_v6, %v134_v3  ;;  %v137_v15 = vld [vmem:[%s222_s4] ss:$0 sm:$0xff] }
   0x6   :  { %v138_v17 = vld [vmem:[%s223_s5] ss:$0 sm:$0xff] }
   0x7   :  { %v44_v10 = vadd.f32 %v135_v7, %v35_v8  ;;  %v45_v11 = vadd.f32 %v135_v7, %v36_v9 }
   0x9   :  { %v46_v12 = vmax.f32 %v44_v10, 0.0  ;;  %v47_v13 = vmax.f32 %v45_v11, 0.0 }
   0xb   :  { %v48_v14 = vpack.c.bf16 %v47_v13, %v46_v12 }
   0xd   :  { %152 = vmatmul.mubr.msk.bf16.vlgmr.msra.gmra.mxu0 %vm50_vm2, %v48_v14 }
  0xcd   :  { %v92_v16 = vpop.f32.mrf.mxu0 }
  0xce   :  { %v106_v18 = vmul.f32 %v137_v15, %v92_v16 }
  0xcf   :  { %v153_v19 = vpop.f32.mrf.mxu0 }
  0xd0   :  { %v115_v20 = vadd.f32 %v138_v17, %v106_v18 }
  0xd1   :  { %v95_v21 = vpop.f32.mrf.mxu0 }
  0xd2   :  { %v117_v22 = vmax.f32 %v115_v20, 0.0  ;;  %v107_v23 = vmul.f32 %v137_v15, %v95_v21 }
  0xd3   :  { %v154_v24 = vpop.f32.mrf.mxu0 }
  0xd4   :  { %v141_v25 = vpack.c.bf16 %v117_v22, %v117_v22  ;;  %v116_v26 = vadd.f32 %v138_v17, %v107_v23 }
  0xd6   :  { %128 = vst.msk [vmem:[%s224_s6] sm:$0xf] %vm127_vm3, %v141_v25  ;;  %v118_v27 = vmax.f32 %v116_v26, 0.0 }
  0xd8   :  { %v142_v28 = vpack.c.bf16 %v118_v27, %v118_v27 }
  0xda   :  { %129 = vst.msk [vmem:[%s224_s6 + $0x4] sm:$0xf] %vm127_vm3, %v142_v28 }

// kernel: densenet_trick_v3_forward.41
= control target key start
LH: loop header
LB: loop body
LE: loop exit
PB: predicated region body
PF: predicated region fallthrough
CT: control target
= control target key end

     0   :  { %vm60_vm0 = vcmask 1045504   ;;  %v165_v0 = vmov 0.0   ;;  %vm166_vm1 = vmmov 0   ;;  %vm56_vm2 = vcmask 97280   ;;  %s226_s1 = inlined_call_operand.vmem [shape: bf16[12,16], index: 1, kind: input, shape index: {}]   ;;  %s227_s0 = inlined_call_operand.vmem [shape: bf16[16,12], index: 0, kind: input, shape index: {}]   ;;  %s228_s2 = inlined_call_operand.vmem [shape: f32[1,12], index: 2, kind: input, shape index: {}]   ;;  %s229_s3 = inlined_call_operand.vmem [shape: f32[1,12], index: 3, kind: input, shape index: {}]   ;;  %s230_s4 = inlined_call_operand.vmem [shape: f32[1,16], index: 4, kind: input, shape index: {}]   ;;  %s231_s5 = inlined_call_operand.vmem [shape: f32[1,16], index: 5, kind: input, shape index: {}]   ;;  %s232_s6 = inlined_call_operand.vmem [shape: bf16[16,16], index: 6, kind: output, shape index: {}]  }
   0x1   :  { %156 = vmatprep.subr.bf16.mxu0 %v165_v0  ;;  %v164_v1 = vld [vmem:[%s226_s1] sm:$0x3f]   ;;  %158 = vmatprep.mubr.msk.bf16.mxu0 %vm166_vm1, %v165_v0  ;;  %vm133_vm3 = vcmask 125952  }
   0x2   :  { %v151_v2 = vld [vmem:[%s227_s0] sm:$0xff]   ;;  %v62_v4 = vsel %vm60_vm0, %v164_v1, 0 }
   0x3   :  { %v140_v3 = vld [vmem:[%s228_s2] ss:$0 sm:$0xff]  ;;  %v152_v5 = vunpack.c.l.bf16 %v151_v2  ;;  %v153_v6 = vunpack.c.h.bf16 %v151_v2  ;;  %157 = vmatpush3.bf16.msra.mxu0 %v62_v4 }
   0x4   :  { %v141_v7 = vld [vmem:[%s229_s3] ss:$0 sm:$0xff] }
   0x5   :  { %v35_v8 = vmul.f32 %v152_v5, %v140_v3  ;;  %v36_v9 = vmul.f32 %v153_v6, %v140_v3  ;;  %v144_v15 = vld [vmem:[%s230_s4] ss:$0 sm:$0xff] }
   0x6   :  { %v145_v17 = vld [vmem:[%s231_s5] ss:$0 sm:$0xff] }
   0x7   :  { %v44_v10 = vadd.f32 %v141_v7, %v35_v8  ;;  %v45_v11 = vadd.f32 %v141_v7, %v36_v9 }
   0x9   :  { %v46_v12 = vmax.f32 %v44_v10, 0.0  ;;  %v47_v13 = vmax.f32 %v45_v11, 0.0 }
   0xb   :  { %v48_v14 = vpack.c.bf16 %v47_v13, %v46_v12 }
   0xd   :  { %159 = vmatmul.mubr.msk.bf16.vlgmr.msra.gmra.mxu0 %vm56_vm2, %v48_v14 }
  0xcd   :  { %v98_v16 = vpop.f32.mrf.mxu0 }
  0xce   :  { %v112_v18 = vmul.f32 %v144_v15, %v98_v16 }
  0xcf   :  { %v160_v19 = vpop.f32.mrf.mxu0 }
  0xd0   :  { %v121_v20 = vadd.f32 %v145_v17, %v112_v18 }
  0xd1   :  { %v101_v21 = vpop.f32.mrf.mxu0 }
  0xd2   :  { %v123_v22 = vmax.f32 %v121_v20, 0.0  ;;  %v113_v23 = vmul.f32 %v144_v15, %v101_v21 }
  0xd3   :  { %v161_v24 = vpop.f32.mrf.mxu0 }
  0xd4   :  { %v148_v25 = vpack.c.bf16 %v123_v22, %v123_v22  ;;  %v122_v26 = vadd.f32 %v145_v17, %v113_v23 }
  0xd6   :  { %134 = vst.msk [vmem:[%s232_s6] sm:$0xf] %vm133_vm3, %v148_v25  ;;  %v124_v27 = vmax.f32 %v122_v26, 0.0 }
  0xd8   :  { %v149_v28 = vpack.c.bf16 %v124_v27, %v124_v27 }
  0xda   :  { %135 = vst.msk [vmem:[%s232_s6 + $0x4] sm:$0xf] %vm133_vm3, %v149_v28 }

// kernel: densenet_trick_v3_forward.40
= control target key start
LH: loop header
LB: loop body
LE: loop exit
PB: predicated region body
PF: predicated region fallthrough
CT: control target
= control target key end

     0   :  { %s912_s9 = smov 0   ;;  %s1009_s0 = inlined_call_operand.vmem [shape: bf16[4,20,16], index: 0, kind: input, shape index: {}]   ;;  %s1010_s1 = inlined_call_operand.vmem [shape: bf16[9,16,4], index: 1, kind: input, shape index: {}]   ;;  %s1011_s2 = inlined_call_operand.vmem [shape: bf16[4,8,4], index: 2, kind: output, shape index: {}]  }
   0x1 LB: > { %s738_s10 = sadd.s32 4294967295, %s893_s9   ;;  %p742_p0 = scmp.ge.s32.totalorder %s893_s9, 1  ;;  %s893_s9 = sphi %s912_s9, %s12_s9  }
   0x2   : > { %p112_p1 = scmp.lt.s32.totalorder %s893_s9, 5 }
   0x4   : > { %p113_p2 = pnand %p742_p0, %p112_p1 }
   0x5   : > { %p133_p3 = scmp.lt.s32.totalorder (!%p113_p2), %s738_s10, 3 }
   0x6   : > { %116 = sbr.rel (%p113_p2) target bundleno = 255 (0xff), region = 28 }
   0xb   : > { %v871_v0 = vld [vmem:[%s1010_s1 + $0x8] sm:$0xff]   ;;  %v895_v1 = vmov 0.0   ;;  %v872_v2 = vld [vmem:[%s1010_s1] sm:$0xff]   ;;  %vm896_vm0 = vmmov 0   ;;  %s1013_s10 = smov (!%p133_p3, %s738_s10), 3  ;;  %vm168_vm1 = vcmask 130048  }
   0xc   : > { %806 = vmatprep.subr.bf16.mxu0 %v895_v1  ;;  %812 = vmatprep.subr.bf16.mxu1 %v895_v1  ;;  %s860_s15 = smul.u32 12, %s1013_s10  ;;  %v875_v3 = vld [vmem:[%s1010_s1 + $0x18] sm:$0xff]   ;;  %v874_v12 = vld [vmem:[%s1010_s1 + $0x10] sm:$0xff]   ;;  %v880_v21 = vld [vmem:[%s1010_s1 + $0x28] sm:$0xff]   ;;  %s744_s5 = sshll.u32 %s1013_s10, 2  ;;  %vm683_vm2 = vcmask 27648  }
   0xd   : > { %807 = vmatpush3.bf16.msra.mxu0 %v871_v0  ;;  %808 = vmatprep.mubr.msk.bf16.mxu0 %vm896_vm0, %v895_v1  ;;  %v877_v31 = vld [vmem:[%s1010_s1 + $0x20] sm:$0xff]   ;;  %v883_v32 = vld [vmem:[%s1010_s1 + $0x38] sm:$0xff]   ;;  %v881_v39 = vld [vmem:[%s1010_s1 + $0x30] sm:$0xff]   ;;  %s141_s8 = scalar_lea.vmem %s1011_s2, %s744_s5 }
   0xe   : > { %813 = vmatpush3.bf16.msra.mxu1 %v872_v2  ;;  %814 = vmatprep.mubr.msk.bf16.mxu1 %vm896_vm0, %v895_v1  ;;  %s943_s20 = scalar_lea.vmem %s1009_s0, %s860_s15  ;;  %v884_v41 = vld [vmem:[%s1010_s1 + $0x40] sm:$0xff]  }
   0xf   : > { %818 = vmatprep.subr.bf16.mxu0 %v895_v1  ;;  %824 = vmatprep.subr.bf16.mxu1 %v895_v1  ;;  %v143_v4 = vld [vmem:[%s943_s20] sm:$0xf]  ;;  %v146_v5 = vld [vmem:[%s943_s20 + $0x4] sm:$0x1]  ;;  %v558_v19 = vld [vmem:[%s943_s20 + $0x8] sm:$0x1] }
  0x10   : > { %v747_v6 = vcombine.low %v143_v4, %v146_v5  ;;  %v319_v7 = vld [vmem:[%s943_s20] sm:$0xc]  ;;  %v320_v8 = vld [vmem:[%s943_s20 + $0x4] sm:$0x3] }
  0x11   : > { %815 = vmatmul.mubr.msk.bf16.vlgmr.msra.gmra.mxu1 %vm168_vm1, %v143_v4  ;;  %v759_v9 = vcombine.low %v319_v7, %v320_v8  ;;  %v261_v14 = vld [vmem:[%s943_s20] sm:$0xe]  ;;  %v380_v16 = vld [vmem:[%s943_s20 + $0x4] sm:$0x7] }
  0x12   : > { %825 = vmatpush3.bf16.msra.mxu1 %v875_v3  ;;  %826 = vmatprep.mubr.msk.bf16.mxu1 %vm896_vm0, %v895_v1  ;;  %v156_v10 = vshrl.u32 %v747_v6, 16  ;;  %v158_v11 = vshll.u32 %v747_v6, 16  ;;  %v445_v17 = vld [vmem:[%s943_s20] sm:$0x8]  ;;  %v557_v18 = vld [vmem:[%s943_s20 + $0x4] sm:$0xf]  ;;  %v754_v22 = vcombine.low %v261_v14, %v146_v5  ;;  %v764_v23 = vcombine.low %v319_v7, %v380_v16 }
  0x13   : > { %836 = vmatprep.subr.bf16.mxu1 %v895_v1  ;;  %v329_v15 = vrot.slane %v759_v9, 2  ;;  %v769_v24 = vcombine.low %v445_v17, %v380_v16  ;;  %v778_v25 = vcombine.low %v557_v18, %v558_v19  ;;  %v503_v40 = vld [vmem:[%s943_s20 + $0x4] sm:$0xf] }
  0x14   : > { %v160_v13 = vrot.slane %v158_v11, 1  ;;  %v268_v26 = vrot.slane %v754_v22, 1  ;;  %v388_v27 = vshrl.u32 %v764_v23, 16  ;;  %v391_v28 = vshll.u32 %v764_v23, 16  ;;  %v624_v42 = vld [vmem:[%s943_s20 + $0x4] sm:$0xe] }
  0x15   : > { %v452_v29 = vrot.slane %v769_v24, 3  ;;  %v570_v30 = vshll.u32 %v778_v25, 16  ;;  %v568_v35 = vshrl.u32 %v778_v25, 16  ;;  %v783_v43 = vcombine.low %v624_v42, %v558_v19 }
  0x16   : > { %v161_v20 = vor.u32 %v160_v13, %v156_v10  ;;  %v390_v33 = vrot.slane %v388_v27, 2  ;;  %v393_v34 = vrot.slane %v391_v28, 3 }
  0x17   : > { %v572_v36 = vrot.slane %v570_v30, 1  ;;  %v631_v44 = vrot.slane %v783_v43, 1 }
  0x18   : > { %809 = vmatmul.mubr.msk.bf16.vlgmr.msra.gmra.mxu0 %vm168_vm1, %v161_v20  ;;  %v394_v37 = vor.u32 %v393_v34, %v390_v33 }
  0x19   : > { %827 = vmatmul.mubr.msk.bf16.vlgmr.msra.gmra.mxu1 %vm168_vm1, %v329_v15  ;;  %819 = vmatpush3.bf16.msra.mxu0 %v874_v12  ;;  %v573_v38 = vor.u32 %v572_v36, %v568_v35 }
  0x1a   : > { %820 = vmatprep.mubr.msk.bf16.mxu0 %vm896_vm0, %v895_v1  ;;  %830 = vmatprep.subr.bf16.mxu0 %v895_v1 }
  0x1b   : > { %837 = vmatpush3.bf16.msra.mxu1 %v880_v21  ;;  %838 = vmatprep.mubr.msk.bf16.mxu1 %vm896_vm0, %v895_v1 }
  0x1c   : > { %848 = vmatprep.subr.bf16.mxu1 %v895_v1 }
  0x20   : > { %821 = vmatmul.mubr.msk.bf16.vlgmr.msra.gmra.mxu0 %vm168_vm1, %v268_v26 }
  0x21   : > { %839 = vmatmul.mubr.msk.bf16.vlgmr.msra.gmra.mxu1 %vm168_vm1, %v452_v29  ;;  %831 = vmatpush3.bf16.msra.mxu0 %v877_v31 }
  0x22   : > { %832 = vmatprep.mubr.msk.bf16.mxu0 %vm896_vm0, %v895_v1  ;;  %842 = vmatprep.subr.bf16.mxu0 %v895_v1 }
  0x23   : > { %849 = vmatpush3.bf16.msra.mxu1 %v883_v32  ;;  %850 = vmatprep.mubr.msk.bf16.mxu1 %vm896_vm0, %v895_v1 }
  0x28   : > { %833 = vmatmul.mubr.msk.bf16.vlgmr.msra.gmra.mxu0 %vm168_vm1, %v394_v37 }
  0x29   : > { %851 = vmatmul.mubr.msk.bf16.vlgmr.msra.gmra.mxu1 %vm168_vm1, %v573_v38  ;;  %843 = vmatpush3.bf16.msra.mxu0 %v881_v39 }
  0x2a   : > { %844 = vmatprep.mubr.msk.bf16.mxu0 %vm896_vm0, %v895_v1  ;;  %854 = vmatprep.subr.bf16.mxu0 %v895_v1 }
  0x30   : > { %845 = vmatmul.mubr.msk.bf16.vlgmr.msra.gmra.mxu0 %vm168_vm1, %v503_v40 }
  0x31   : > { %855 = vmatpush3.bf16.msra.mxu0 %v884_v41  ;;  %856 = vmatprep.mubr.msk.bf16.mxu0 %vm896_vm0, %v895_v1 }
  0x38   : > { %857 = vmatmul.mubr.msk.bf16.vlgmr.msra.gmra.mxu0 %vm168_vm1, %v631_v44 }
  0xd1   : > { %v255_v45 = vpop.f32.mrf.mxu1 }
  0xd3   : > { %v816_v46 = vpop.f32.mrf.mxu1 }
  0xd5   : > { %v258_v47 = vpop.f32.mrf.mxu1 }
  0xd7   : > { %v817_v48 = vpop.f32.mrf.mxu1 }
  0xd8   : > { %v206_v49 = vpop.f32.mrf.mxu0 }
  0xd9   : > { %v373_v50 = vpop.f32.mrf.mxu1  ;;  %v256_v63 = vadd.f32 %v255_v45, %v206_v49 }
  0xda   : > { %v810_v51 = vpop.f32.mrf.mxu0 }
  0xdb   : > { %v828_v52 = vpop.f32.mrf.mxu1 }
  0xdc   : > { %v209_v53 = vpop.f32.mrf.mxu0 }
  0xdd   : > { %v376_v54 = vpop.f32.mrf.mxu1 }
  0xde   : > { %v811_v55 = vpop.f32.mrf.mxu0 }
  0xdf   : > { %v829_v56 = vpop.f32.mrf.mxu1 }
  0xe0   : > { %v312_v57 = vpop.f32.mrf.mxu0 }
  0xe1   : > { %v496_v58 = vpop.f32.mrf.mxu1  ;;  %v318_v2 = vadd.f32 %v312_v57, %v256_v63 }
  0xe2   : > { %v822_v59 = vpop.f32.mrf.mxu0 }
  0xe3   : > { %v840_v60 = vpop.f32.mrf.mxu1  ;;  %v379_v7 = vadd.f32 %v373_v50, %v318_v2 }
  0xe4   : > { %v315_v61 = vpop.f32.mrf.mxu0 }
  0xe5   : > { %v499_v62 = vpop.f32.mrf.mxu1 }
  0xe6   : > { %v823_v0 = vpop.f32.mrf.mxu0 }
  0xe7   : > { %v841_v1 = vpop.f32.mrf.mxu1 }
  0xe8   : > { %v438_v3 = vpop.f32.mrf.mxu0 }
  0xe9   : > { %v617_v4 = vpop.f32.mrf.mxu1  ;;  %v444_v10 = vadd.f32 %v438_v3, %v379_v7 }
  0xea   : > { %v834_v5 = vpop.f32.mrf.mxu0 }
  0xeb   : > { %v852_v6 = vpop.f32.mrf.mxu1  ;;  %v502_v14 = vadd.f32 %v496_v58, %v444_v10 }
  0xec   : > { %v441_v8 = vpop.f32.mrf.mxu0 }
  0xed   : > { %v620_v9 = vpop.f32.mrf.mxu1 }
  0xee   : > { %v835_v11 = vpop.f32.mrf.mxu0 }
  0xef   : > { %v853_v12 = vpop.f32.mrf.mxu1 }
  0xf0   : > { %v550_v13 = vpop.f32.mrf.mxu0 }
  0xf1   : > { %v556_v16 = vadd.f32 %v550_v13, %v502_v14 }
  0xf2   : > { %v846_v15 = vpop.f32.mrf.mxu0 }
  0xf3   : > { %v623_v19 = vadd.f32 %v617_v4, %v556_v16 }
  0xf4   : > { %v553_v17 = vpop.f32.mrf.mxu0 }
  0xf6   : > { %v847_v18 = vpop.f32.mrf.mxu0 }
  0xf8   : > { %v675_v20 = vpop.f32.mrf.mxu0 }
  0xf9   : > { %v681_v21 = vadd.f32 %v675_v20, %v623_v19 }
  0xfa   : > { %v858_v22 = vpop.f32.mrf.mxu0 }
  0xfb   : > { %v682_v23 = vpack.c.bf16 %v681_v21, %v681_v21 }
  0xfc   : > { %v678_v24 = vpop.f32.mrf.mxu0 }
  0xfd   : > { %684 = vst.msk [vmem:[%s141_s8] sm:$0xf] %vm683_vm2, %v682_v23 }
  0xfe   : > { %v859_v25 = vpop.f32.mrf.mxu0 }
  0xff PF: > { %s12_s9 = sadd.s32 1, %s893_s9  }
 0x100   : > { %p9_p4 = scmp.ge.s32.totalorder %s12_s9, 6  }
 0x102   :  { %11 = sbr.rel (!%p9_p4) target bundleno = 1 (0x1), region = 66 }

// kernel: densenet_trick_v3_forward.43
= control target key start
LH: loop header
LB: loop body
LE: loop exit
PB: predicated region body
PF: predicated region fallthrough
CT: control target
= control target key end

     0   :  { %v134_v0 = vmov 0.0   ;;  %vm135_vm0 = vmmov 0   ;;  %vm51_vm1 = vcmask 130048   ;;  %vm104_vm2 = vcmask 60416   ;;  %s179_s1 = inlined_call_operand.vmem [shape: bf16[16,8], index: 1, kind: input, shape index: {}]   ;;  %s180_s0 = inlined_call_operand.vmem [shape: bf16[16,16], index: 0, kind: input, shape index: {}]   ;;  %s181_s2 = inlined_call_operand.vmem [shape: f32[1,16], index: 2, kind: input, shape index: {}]   ;;  %s182_s3 = inlined_call_operand.vmem [shape: f32[1,16], index: 3, kind: input, shape index: {}]   ;;  %s183_s4 = inlined_call_operand.vmem [shape: bf16[16,8], index: 4, kind: output, shape index: {}]  }
   0x1   :  { %125 = vmatprep.subr.bf16.mxu0 %v134_v0  ;;  %v133_v1 = vld [vmem:[%s179_s1] sm:$0xff]   ;;  %127 = vmatprep.mubr.msk.bf16.mxu0 %vm135_vm0, %v134_v0 }
   0x2   :  { %v120_v2 = vld [vmem:[%s180_s0] sm:$0xff]   ;;  %126 = vmatpush3.bf16.msra.mxu0 %v133_v1 }
   0x3   :  { %v111_v3 = vld [vmem:[%s181_s2] ss:$0 sm:$0xff]  ;;  %v121_v4 = vunpack.c.l.bf16 %v120_v2  ;;  %v122_v5 = vunpack.c.h.bf16 %v120_v2 }
   0x4   :  { %v112_v6 = vld [vmem:[%s182_s3] ss:$0 sm:$0xff] }
   0x5   :  { %v29_v7 = vmul.f32 %v121_v4, %v111_v3  ;;  %v30_v8 = vmul.f32 %v122_v5, %v111_v3 }
   0x7   :  { %v38_v9 = vadd.f32 %v112_v6, %v29_v7  ;;  %v39_v10 = vadd.f32 %v112_v6, %v30_v8 }
   0x9   :  { %v40_v11 = vmax.f32 %v38_v9, 0.0  ;;  %v41_v12 = vmax.f32 %v39_v10, 0.0 }
   0xb   :  { %v42_v13 = vpack.c.bf16 %v41_v12, %v40_v11 }
   0xd   :  { %128 = vmatmul.mubr.msk.bf16.vlgmr.msra.gmra.mxu0 %vm51_vm1, %v42_v13 }
  0xcd   :  { %v89_v14 = vpop.f32.mrf.mxu0 }
  0xce   :  { %v117_v15 = vpack.c.bf16 %v89_v14, %v89_v14 }
  0xcf   :  { %v129_v16 = vpop.f32.mrf.mxu0 }
  0xd0   :  { %105 = vst.msk [vmem:[%s183_s4] sm:$0xf] %vm104_vm2, %v117_v15 }
  0xd1   :  { %v92_v17 = vpop.f32.mrf.mxu0 }
  0xd2   :  { %v118_v18 = vpack.c.bf16 %v92_v17, %v92_v17 }
  0xd3   :  { %v130_v19 = vpop.f32.mrf.mxu0 }
  0xd4   :  { %106 = vst.msk [vmem:[%s183_s4 + $0x4] sm:$0xf] %vm104_vm2, %v118_v18 }

// kernel: densenet_trick_v3_forward.44
= control target key start
LH: loop header
LB: loop body
LE: loop exit
PB: predicated region body
PF: predicated region fallthrough
CT: control target
= control target key end

     0   :  { %vm56_vm0 = vcmask 57344   ;;  %vm57_vm1 = vsmask.f32 256  ;;  %s149_s0 = inlined_call_operand.vmem [shape: bf16[4,2,1,2,8], index: 0, kind: input, shape index: {}]   ;;  %s150_s1 = inlined_call_operand.vmem [shape: bf16[4,1,8], index: 1, kind: output, shape index: {}]  }
   0x1   :  { %v8_v0 = vld [vmem:[%s149_s0] sm:$0x1]  ;;  %v9_v1 = vld [vmem:[%s149_s0 + $0x1] sm:$0x1]  ;;  %v10_v4 = vld [vmem:[%s149_s0 + $0x2] sm:$0x1] }
   0x2   :  { %v16_v2 = vunpack.c.l.bf16 %v8_v0  ;;  %v17_v3 = vunpack.c.l.bf16 %v9_v1  ;;  %v11_v5 = vld [vmem:[%s149_s0 + $0x3] sm:$0x1]  ;;  %v18_v6 = vunpack.c.l.bf16 %v10_v4  ;;  %v12_v8 = vld [vmem:[%s149_s0 + $0x4] sm:$0x1]  ;;  %v13_v9 = vld [vmem:[%s149_s0 + $0x5] sm:$0x1] }
   0x3   :  { %v19_v7 = vunpack.c.l.bf16 %v11_v5  ;;  %v20_v11 = vunpack.c.l.bf16 %v12_v8  ;;  %v21_v12 = vunpack.c.l.bf16 %v13_v9  ;;  %v14_v13 = vld [vmem:[%s149_s0 + $0x6] sm:$0x1]  ;;  %v15_v14 = vld [vmem:[%s149_s0 + $0x7] sm:$0x1]  ;;  %vm113_vm2 = vmand %vm56_vm0, %vm57_vm1 }
   0x4   :  { %v24_v10 = vadd.f32 %v17_v3, %v16_v2  ;;  %v22_v16 = vunpack.c.l.bf16 %v14_v13  ;;  %v23_v17 = vunpack.c.l.bf16 %v15_v14  ;;  %v59_v29 = vld [vmem:[%s150_s1] sm:$0x1]  ;;  %v62_v33 = vld [vmem:[%s150_s1 + $0x1] sm:$0x1]  ;;  %v65_v36 = vld [vmem:[%s150_s1 + $0x2] sm:$0x1] }
   0x5   :  { %v25_v15 = vadd.f32 %v19_v7, %v18_v6  ;;  %v26_v19 = vadd.f32 %v21_v12, %v20_v11  ;;  %v68_v40 = vld [vmem:[%s150_s1 + $0x3] sm:$0x1] }
   0x6   :  { %v75_v18 = vrot.slane %v24_v10, 9  ;;  %v27_v21 = vadd.f32 %v23_v17, %v22_v16 }
   0x7   :  { %v76_v20 = vrot.slane %v25_v15, 9  ;;  %v77_v23 = vrot.slane %v26_v19, 9 }
   0x8   :  { %v44_v22 = vadd.f32 %v75_v18, %v24_v10  ;;  %v78_v25 = vrot.slane %v27_v21, 9 }
   0x9   :  { %v45_v24 = vadd.f32 %v76_v20, %v25_v15  ;;  %v46_v27 = vadd.f32 %v77_v23, %v26_v19 }
   0xa   :  { %v48_v26 = vmul.f32 0.25, %v44_v22  ;;  %v47_v31 = vadd.f32 %v78_v25, %v27_v21 }
   0xb   :  { %v49_v30 = vmul.f32 0.25, %v45_v24  ;;  %v50_v34 = vmul.f32 0.25, %v46_v27 }
   0xc   :  { %v52_v32 = vpack.c.bf16 %v48_v26, %v48_v26  ;;  %v51_v37 = vmul.f32 0.25, %v47_v31 }
   0xd   :  { %v53_v35 = vpack.c.bf16 %v49_v30, %v49_v30  ;;  %v54_v39 = vpack.c.bf16 %v50_v34, %v50_v34 }
   0xe   :  { %v60_v38 = vsel %vm113_vm2, %v52_v32, %v59_v29  ;;  %v55_v42 = vpack.c.bf16 %v51_v37, %v51_v37 }
   0xf   :  { %61 = vst [vmem:[%s150_s1] sm:$0x1] %v60_v38  ;;  %v63_v41 = vsel %vm113_vm2, %v53_v35, %v62_v33  ;;  %v66_v43 = vsel %vm113_vm2, %v54_v39, %v65_v36 }
  0x10   :  { %64 = vst [vmem:[%s150_s1 + $0x1] sm:$0x1] %v63_v41  ;;  %67 = vst [vmem:[%s150_s1 + $0x2] sm:$0x1] %v66_v43  ;;  %v69_v44 = vsel %vm113_vm2, %v55_v42, %v68_v40 }
  0x11   :  { %70 = vst [vmem:[%s150_s1 + $0x3] sm:$0x1] %v69_v44 }

// kernel: densenet_trick_v3_forward.47
= control target key start
LH: loop header
LB: loop body
LE: loop exit
PB: predicated region body
PF: predicated region fallthrough
CT: control target
= control target key end

     0   :  { %vm55_vm0 = vcmask 1045504   ;;  %v140_v0 = vmov 0.0   ;;  %vm141_vm1 = vmmov 0   ;;  %vm51_vm2 = vcmask 97280   ;;  %s198_s1 = inlined_call_operand.vmem [shape: bf16[12,16], index: 1, kind: input, shape index: {}]   ;;  %s199_s0 = inlined_call_operand.vmem [shape: bf16[4,12], index: 0, kind: input, shape index: {}]   ;;  %s200_s2 = inlined_call_operand.vmem [shape: f32[1,12], index: 2, kind: input, shape index: {}]   ;;  %s201_s3 = inlined_call_operand.vmem [shape: f32[1,12], index: 3, kind: input, shape index: {}]   ;;  %s202_s4 = inlined_call_operand.vmem [shape: f32[1,16], index: 4, kind: input, shape index: {}]   ;;  %s203_s5 = inlined_call_operand.vmem [shape: f32[1,16], index: 5, kind: input, shape index: {}]   ;;  %s204_s6 = inlined_call_operand.vmem [shape: bf16[4,16], index: 6, kind: output, shape index: {}]  }
   0x1   :  { %131 = vmatprep.subr.bf16.mxu0 %v140_v0  ;;  %v139_v1 = vld [vmem:[%s198_s1] sm:$0x3f]   ;;  %133 = vmatprep.mubr.msk.bf16.mxu0 %vm141_vm1, %v140_v0  ;;  %vm117_vm3 = vcmask 123904  }
   0x2   :  { %v24_v2 = vld [vmem:[%s199_s0] sm:$0x3]  ;;  %v57_v4 = vsel %vm55_vm0, %v139_v1, 0 }
   0x3   :  { %v123_v3 = vld [vmem:[%s200_s2] ss:$0 sm:$0xff]  ;;  %v25_v5 = vunpack.c.l.bf16 %v24_v2  ;;  %132 = vmatpush3.bf16.msra.mxu0 %v57_v4 }
   0x4   :  { %v124_v6 = vld [vmem:[%s201_s3] ss:$0 sm:$0xff] }
   0x5   :  { %v33_v7 = vmul.f32 %v123_v3, %v25_v5  ;;  %v127_v11 = vld [vmem:[%s202_s4] ss:$0 sm:$0xff] }
   0x6   :  { %v128_v13 = vld [vmem:[%s203_s5] ss:$0 sm:$0xff] }
   0x7   :  { %v41_v8 = vadd.f32 %v124_v6, %v33_v7 }
   0x9   :  { %v42_v9 = vmax.f32 %v41_v8, 0.0 }
   0xb   :  { %v43_v10 = vpack.c.bf16 %v42_v9, %v42_v9 }
   0xd   :  { %134 = vmatmul.mubr.msk.bf16.vlgmr.msra.gmra.mxu0 %vm51_vm2, %v43_v10 }
  0xcd   :  { %v93_v12 = vpop.f32.mrf.mxu0 }
  0xce   :  { %v106_v14 = vmul.f32 %v127_v11, %v93_v12 }
  0xcf   :  { %v135_v15 = vpop.f32.mrf.mxu0 }
  0xd0   :  { %v114_v16 = vadd.f32 %v128_v13, %v106_v14 }
  0xd1   :  { %v96_v17 = vpop.f32.mrf.mxu0 }
  0xd2   :  { %v115_v18 = vmax.f32 %v114_v16, 0.0 }
  0xd3   :  { %v136_v19 = vpop.f32.mrf.mxu0 }
  0xd4   :  { %v116_v20 = vpack.c.bf16 %v115_v18, %v115_v18 }
  0xd6   :  { %118 = vst.msk [vmem:[%s204_s6] sm:$0x3] %vm117_vm3, %v116_v20 }

// kernel: densenet_trick_v3_forward.45
= control target key start
LH: loop header
LB: loop body
LE: loop exit
PB: predicated region body
PF: predicated region fallthrough
CT: control target
= control target key end

     0   :  { %vm49_vm0 = vcmask 1043456   ;;  %v132_v0 = vmov 0.0   ;;  %vm133_vm1 = vmmov 0   ;;  %vm45_vm2 = vcmask 64512   ;;  %s190_s1 = inlined_call_operand.vmem [shape: bf16[8,16], index: 1, kind: input, shape index: {}]   ;;  %s191_s0 = inlined_call_operand.vmem [shape: bf16[4,8], index: 0, kind: input, shape index: {}]   ;;  %s192_s2 = inlined_call_operand.vmem [shape: f32[1,8], index: 2, kind: input, shape index: {}]   ;;  %s193_s3 = inlined_call_operand.vmem [shape: f32[1,8], index: 3, kind: input, shape index: {}]   ;;  %s194_s4 = inlined_call_operand.vmem [shape: f32[1,16], index: 4, kind: input, shape index: {}]   ;;  %s195_s5 = inlined_call_operand.vmem [shape: f32[1,16], index: 5, kind: input, shape index: {}]   ;;  %s196_s6 = inlined_call_operand.vmem [shape: bf16[4,16], index: 6, kind: output, shape index: {}]  }
   0x1   :  { %124 = vmatprep.subr.bf16.mxu0 %v132_v0  ;;  %v44_v1 = vld [vmem:[%s190_s1] sm:$0xf]  ;;  %126 = vmatprep.mubr.msk.bf16.mxu0 %vm133_vm1, %v132_v0  ;;  %vm111_vm3 = vcmask 123904  }
   0x2   :  { %v24_v2 = vld [vmem:[%s191_s0] sm:$0x3]  ;;  %v51_v4 = vsel %vm49_vm0, %v44_v1, 0 }
   0x3   :  { %v117_v3 = vld [vmem:[%s192_s2] ss:$0 sm:$0xff]  ;;  %v25_v5 = vunpack.c.l.bf16 %v24_v2  ;;  %125 = vmatpush3.bf16.msra.mxu0 %v51_v4 }
   0x4   :  { %v118_v6 = vld [vmem:[%s193_s3] ss:$0 sm:$0xff] }
   0x5   :  { %v33_v7 = vmul.f32 %v117_v3, %v25_v5  ;;  %v120_v11 = vld [vmem:[%s194_s4] ss:$0 sm:$0xff] }
   0x6   :  { %v121_v13 = vld [vmem:[%s195_s5] ss:$0 sm:$0xff] }
   0x7   :  { %v41_v8 = vadd.f32 %v118_v6, %v33_v7 }
   0x9   :  { %v42_v9 = vmax.f32 %v41_v8, 0.0 }
   0xb   :  { %v43_v10 = vpack.c.bf16 %v42_v9, %v42_v9 }
   0xd   :  { %127 = vmatmul.mubr.msk.bf16.vlgmr.msra.gmra.mxu0 %vm45_vm2, %v43_v10 }
  0xcd   :  { %v87_v12 = vpop.f32.mrf.mxu0 }
  0xce   :  { %v100_v14 = vmul.f32 %v120_v11, %v87_v12 }
  0xcf   :  { %v128_v15 = vpop.f32.mrf.mxu0 }
  0xd0   :  { %v108_v16 = vadd.f32 %v121_v13, %v100_v14 }
  0xd1   :  { %v90_v17 = vpop.f32.mrf.mxu0 }
  0xd2   :  { %v109_v18 = vmax.f32 %v108_v16, 0.0 }
  0xd3   :  { %v129_v19 = vpop.f32.mrf.mxu0 }
  0xd4   :  { %v110_v20 = vpack.c.bf16 %v109_v18, %v109_v18 }
  0xd6   :  { %112 = vst.msk [vmem:[%s196_s6] sm:$0x3] %vm111_vm3, %v110_v20 }

// kernel: densenet_trick_v3_forward.46
= control target key start
LH: loop header
LB: loop body
LE: loop exit
PB: predicated region body
PF: predicated region fallthrough
CT: control target
= control target key end

     0   :  { %s901_s9 = smov 0   ;;  %s992_s0 = inlined_call_operand.vmem [shape: bf16[4,12,16], index: 0, kind: input, shape index: {}]   ;;  %s993_s1 = inlined_call_operand.vmem [shape: bf16[9,16,4], index: 1, kind: input, shape index: {}]   ;;  %s994_s2 = inlined_call_operand.vmem [shape: bf16[4,3,4], index: 2, kind: output, shape index: {}]  }
   0x1 LB: > { %s732_s10 = sadd.s32 4294967295, %s882_s9   ;;  %p736_p0 = scmp.ge.s32.totalorder %s882_s9, 1  ;;  %s882_s9 = sphi %s901_s9, %s12_s9  }
   0x2   : > { %p112_p1 = scmp.lt.s32.totalorder %s882_s9, 5 }
   0x4   : > { %p113_p2 = pnand %p736_p0, %p112_p1 }
   0x5   : > { %p133_p3 = scmp.lt.s32.totalorder (!%p113_p2), %s732_s10, 3 }
   0x6   : > { %116 = sbr.rel (%p113_p2) target bundleno = 254 (0xfe), region = 28 }
   0xb   : > { %v863_v0 = vld [vmem:[%s993_s1 + $0x8] sm:$0xff]   ;;  %v884_v1 = vmov 0.0   ;;  %v864_v2 = vld [vmem:[%s993_s1] sm:$0xff]   ;;  %vm885_vm0 = vmmov 0   ;;  %s996_s10 = smov (!%p133_p3, %s732_s10), 3  ;;  %vm165_vm1 = vcmask 130048  }
   0xc   : > { %799 = vmatprep.subr.bf16.mxu0 %v884_v1  ;;  %805 = vmatprep.subr.bf16.mxu1 %v884_v1  ;;  %s780_s15 = sshll.u32 %s996_s10, 3  ;;  %v867_v3 = vld [vmem:[%s993_s1 + $0x18] sm:$0xff]   ;;  %v866_v14 = vld [vmem:[%s993_s1 + $0x10] sm:$0xff]   ;;  %v870_v20 = vld [vmem:[%s993_s1 + $0x28] sm:$0xff]   ;;  %s739_s5 = sshll.u32 %s996_s10, 1  ;;  %vm673_vm2 = vcmask 25600  }
   0xd   : > { %800 = vmatpush3.bf16.msra.mxu0 %v863_v0  ;;  %801 = vmatprep.mubr.msk.bf16.mxu0 %vm885_vm0, %v884_v1  ;;  %s932_s20 = scalar_lea.vmem %s992_s0, %s780_s15  ;;  %v869_v25 = vld [vmem:[%s993_s1 + $0x20] sm:$0xff]   ;;  %v873_v29 = vld [vmem:[%s993_s1 + $0x38] sm:$0xff]   ;;  %v872_v33 = vld [vmem:[%s993_s1 + $0x30] sm:$0xff]   ;;  %s141_s8 = scalar_lea.vmem %s994_s2, %s739_s5  ;;  %vm674_vm3 = vsmask.f32 1280 }
   0xe   : > { %806 = vmatpush3.bf16.msra.mxu1 %v864_v2  ;;  %807 = vmatprep.mubr.msk.bf16.mxu1 %vm885_vm0, %v884_v1  ;;  %v143_v4 = vld [vmem:[%s932_s20] sm:$0x3]  ;;  %v874_v23 = vld [vmem:[%s932_s20] sm:$0x18]   ;;  %vm675_vm4 = vmand %vm673_vm2, %vm674_vm3 }
   0xf   : > { %811 = vmatprep.subr.bf16.mxu0 %v884_v1  ;;  %817 = vmatprep.subr.bf16.mxu1 %v884_v1  ;;  %v742_v5 = vcombine.low %v143_v4, %v143_v4  ;;  %v868_v6 = vld [vmem:[%s932_s20] ss:$0 sps:$4 sm:$0x66]   ;;  %v561_v27 = vshrl.u32 %v874_v23, 16  ;;  %v564_v28 = vshll.u32 %v874_v23, 16  ;;  %v506_v35 = vrot.slane %v874_v23, 3 }
  0x10   : > { %v320_v9 = vshrl.u32 %v868_v6, 16  ;;  %v871_v10 = vld [vmem:[%s932_s20] ss:$0 sps:$4 sm:$0xcc]   ;;  %v323_v11 = vshll.u32 %v868_v6, 16  ;;  %v265_v24 = vrot.slane %v868_v6, 1 }
  0x11   : > { %808 = vmatmul.mubr.msk.bf16.vlgmr.msra.gmra.mxu1 %vm165_vm1, %v143_v4  ;;  %v153_v7 = vshrl.u32 %v742_v5, 16  ;;  %v155_v8 = vshll.u32 %v742_v5, 16  ;;  %v439_v17 = vshrl.u32 %v871_v10, 16  ;;  %v442_v18 = vshll.u32 %v871_v10, 16  ;;  %v875_v36 = vld [vmem:[%s993_s1 + $0x40] sm:$0xff]  }
  0x12   : > { %818 = vmatpush3.bf16.msra.mxu1 %v867_v3  ;;  %819 = vmatprep.mubr.msk.bf16.mxu1 %vm885_vm0, %v884_v1  ;;  %v322_v13 = vrot.slane %v320_v9, 1  ;;  %v325_v15 = vrot.slane %v323_v11, 2  ;;  %v563_v30 = vrot.slane %v561_v27, 3  ;;  %v566_v31 = vrot.slane %v564_v28, 4  ;;  %v618_v37 = vld [vmem:[%s932_s20 + $0x4] sm:$0x3] }
  0x13   : > { %829 = vmatprep.subr.bf16.mxu1 %v884_v1  ;;  %v157_v12 = vrot.slane %v155_v8, 1  ;;  %v441_v21 = vrot.slane %v439_v17, 2  ;;  %v444_v22 = vrot.slane %v442_v18, 3  ;;  %v384_v32 = vrot.slane %v871_v10, 2 }
  0x14   : > { %v326_v19 = vor.u32 %v325_v15, %v322_v13  ;;  %v567_v34 = vor.u32 %v566_v31, %v563_v30  ;;  %v676_v15 = vld [vmem:[%s141_s8] sm:$0x3] }
  0x15   : > { %v158_v16 = vor.u32 %v157_v12, %v153_v7  ;;  %v445_v26 = vor.u32 %v444_v22, %v441_v21 }
  0x17   : > { %802 = vmatmul.mubr.msk.bf16.vlgmr.msra.gmra.mxu0 %vm165_vm1, %v158_v16 }
  0x18   : > { %812 = vmatpush3.bf16.msra.mxu0 %v866_v14  ;;  %813 = vmatprep.mubr.msk.bf16.mxu0 %vm885_vm0, %v884_v1 }
  0x19   : > { %823 = vmatprep.subr.bf16.mxu0 %v884_v1  ;;  %820 = vmatmul.mubr.msk.bf16.vlgmr.msra.gmra.mxu1 %vm165_vm1, %v326_v19 }
  0x1a   : > { %830 = vmatpush3.bf16.msra.mxu1 %v870_v20  ;;  %831 = vmatprep.mubr.msk.bf16.mxu1 %vm885_vm0, %v884_v1 }
  0x1b   : > { %841 = vmatprep.subr.bf16.mxu1 %v884_v1 }
  0x1f   : > { %814 = vmatmul.mubr.msk.bf16.vlgmr.msra.gmra.mxu0 %vm165_vm1, %v265_v24 }
  0x20   : > { %824 = vmatpush3.bf16.msra.mxu0 %v869_v25  ;;  %825 = vmatprep.mubr.msk.bf16.mxu0 %vm885_vm0, %v884_v1 }
  0x21   : > { %835 = vmatprep.subr.bf16.mxu0 %v884_v1  ;;  %832 = vmatmul.mubr.msk.bf16.vlgmr.msra.gmra.mxu1 %vm165_vm1, %v445_v26 }
  0x22   : > { %842 = vmatpush3.bf16.msra.mxu1 %v873_v29  ;;  %843 = vmatprep.mubr.msk.bf16.mxu1 %vm885_vm0, %v884_v1 }
  0x27   : > { %826 = vmatmul.mubr.msk.bf16.vlgmr.msra.gmra.mxu0 %vm165_vm1, %v384_v32 }
  0x28   : > { %836 = vmatpush3.bf16.msra.mxu0 %v872_v33  ;;  %837 = vmatprep.mubr.msk.bf16.mxu0 %vm885_vm0, %v884_v1 }
  0x29   : > { %847 = vmatprep.subr.bf16.mxu0 %v884_v1  ;;  %844 = vmatmul.mubr.msk.bf16.vlgmr.msra.gmra.mxu1 %vm165_vm1, %v567_v34 }
  0x2f   : > { %838 = vmatmul.mubr.msk.bf16.vlgmr.msra.gmra.mxu0 %vm165_vm1, %v506_v35 }
  0x30   : > { %848 = vmatpush3.bf16.msra.mxu0 %v875_v36  ;;  %849 = vmatprep.mubr.msk.bf16.mxu0 %vm885_vm0, %v884_v1 }
  0x37   : > { %850 = vmatmul.mubr.msk.bf16.vlgmr.msra.gmra.mxu0 %vm165_vm1, %v618_v37 }
  0xd1   : > { %v252_v38 = vpop.f32.mrf.mxu1 }
  0xd3   : > { %v809_v39 = vpop.f32.mrf.mxu1 }
  0xd5   : > { %v255_v40 = vpop.f32.mrf.mxu1 }
  0xd7   : > { %v810_v41 = vpop.f32.mrf.mxu1  ;;  %v203_v42 = vpop.f32.mrf.mxu0 }
  0xd8   : > { %v253_v55 = vadd.f32 %v252_v38, %v203_v42 }
  0xd9   : > { %v803_v43 = vpop.f32.mrf.mxu0  ;;  %v370_v44 = vpop.f32.mrf.mxu1 }
  0xdb   : > { %v206_v45 = vpop.f32.mrf.mxu0  ;;  %v821_v46 = vpop.f32.mrf.mxu1 }
  0xdd   : > { %v804_v47 = vpop.f32.mrf.mxu0  ;;  %v373_v48 = vpop.f32.mrf.mxu1 }
  0xdf   : > { %v309_v49 = vpop.f32.mrf.mxu0  ;;  %v822_v50 = vpop.f32.mrf.mxu1 }
  0xe0   : > { %v315_v58 = vadd.f32 %v309_v49, %v253_v55 }
  0xe1   : > { %v815_v51 = vpop.f32.mrf.mxu0  ;;  %v489_v52 = vpop.f32.mrf.mxu1 }
  0xe2   : > { %v376_v63 = vadd.f32 %v370_v44, %v315_v58 }
  0xe3   : > { %v312_v53 = vpop.f32.mrf.mxu0  ;;  %v833_v54 = vpop.f32.mrf.mxu1 }
  0xe5   : > { %v816_v56 = vpop.f32.mrf.mxu0  ;;  %v492_v57 = vpop.f32.mrf.mxu1 }
  0xe7   : > { %v428_v59 = vpop.f32.mrf.mxu0  ;;  %v834_v60 = vpop.f32.mrf.mxu1 }
  0xe8   : > { %v434_v2 = vadd.f32 %v428_v59, %v376_v63 }
  0xe9   : > { %v827_v61 = vpop.f32.mrf.mxu0  ;;  %v611_v62 = vpop.f32.mrf.mxu1 }
  0xea   : > { %v495_v7 = vadd.f32 %v489_v52, %v434_v2 }
  0xeb   : > { %v431_v0 = vpop.f32.mrf.mxu0  ;;  %v845_v1 = vpop.f32.mrf.mxu1 }
  0xed   : > { %v828_v3 = vpop.f32.mrf.mxu0  ;;  %v614_v4 = vpop.f32.mrf.mxu1 }
  0xef   : > { %v550_v5 = vpop.f32.mrf.mxu0  ;;  %v846_v6 = vpop.f32.mrf.mxu1 }
  0xf0   : > { %v556_v9 = vadd.f32 %v550_v5, %v495_v7 }
  0xf1   : > { %v839_v8 = vpop.f32.mrf.mxu0 }
  0xf2   : > { %v617_v12 = vadd.f32 %v611_v62, %v556_v9 }
  0xf3   : > { %v553_v10 = vpop.f32.mrf.mxu0 }
  0xf5   : > { %v840_v11 = vpop.f32.mrf.mxu0 }
  0xf7   : > { %v665_v13 = vpop.f32.mrf.mxu0 }
  0xf8   : > { %v671_v14 = vadd.f32 %v665_v13, %v617_v12 }
  0xf9   : > { %v851_v16 = vpop.f32.mrf.mxu0 }
  0xfa   : > { %v672_v17 = vpack.c.bf16 %v671_v14, %v671_v14 }
  0xfb   : > { %v668_v18 = vpop.f32.mrf.mxu0 }
  0xfc   : > { %v677_v19 = vsel %vm675_vm4, %v672_v17, %v676_v15 }
  0xfd   : > { %678 = vst [vmem:[%s141_s8] sm:$0x3] %v677_v19  ;;  %v852_v20 = vpop.f32.mrf.mxu0 }
  0xfe PF: > { %s12_s9 = sadd.s32 1, %s882_s9  }
  0xff   : > { %p9_p4 = scmp.ge.s32.totalorder %s12_s9, 6  }
 0x101   :  { %11 = sbr.rel (!%p9_p4) target bundleno = 1 (0x1), region = 66 }

// kernel: densenet_trick_v3_forward.49
= control target key start
LH: loop header
LB: loop body
LE: loop exit
PB: predicated region body
PF: predicated region fallthrough
CT: control target
= control target key end

     0   :  { %v56_v3 = vlaneseq  ;;  %v202_v4 = vmov 0.0   ;;  %vm203_vm0 = vmmov 0   ;;  %s265_s0 = inlined_call_operand.vmem [shape: bf16[4,1,16], index: 0, kind: input, shape index: {}]   ;;  %s266_s1 = inlined_call_operand.vmem [shape: f32[1,16], index: 1, kind: input, shape index: {}]   ;;  %s267_s2 = inlined_call_operand.vmem [shape: f32[1,16], index: 2, kind: input, shape index: {}]   ;;  %s268_s3 = inlined_call_operand.vmem [shape: f32[16,5], index: 3, kind: input, shape index: {}]   ;;  %s269_s4 = inlined_call_operand.vmem [shape: f32[1,5], index: 4, kind: input, shape index: {}]   ;;  %s270_s5 = inlined_call_operand.hbm [shape: f32[2,5], index: 5, kind: output, shape index: {}]  }
   0x1   :  { %v46_v0 = vld [vmem:[%s268_s3 + $0x8] sm:$0xff]  ;;  %v45_v1 = vld [vmem:[%s268_s3] sm:$0xff]  ;;  %166 = vmatprep.subr.mxu0 %v202_v4  ;;  %170 = vmatprep.mubr.msk.f32.mxu0 %vm203_vm0, %v202_v4 }
   0x2   :  { %v21_v2 = vld [vmem:[%s265_s0] sm:$0x1]  ;;  %v22_v5 = vld [vmem:[%s265_s0 + $0x1] sm:$0x1]  ;;  %v23_v6 = vld [vmem:[%s265_s0 + $0x2] sm:$0x1]  ;;  %167 = vmatpush3.msra.mxu0 %v46_v0 }
   0x3   :  { %v24_v7 = vld [vmem:[%s265_s0 + $0x3] sm:$0x1]  ;;  %v25_v8 = vunpack.c.l.bf16 %v21_v2  ;;  %v26_v9 = vunpack.c.l.bf16 %v22_v5  ;;  %v27_v10 = vunpack.c.l.bf16 %v23_v6  ;;  %v29_v12 = vld [vmem:[%s266_s1] sm:$0x1]  ;;  %v57_v14 = vshrl.u32 %v56_v3, 7  ;;  %168 = vmatprep.subr.mxu0 %v202_v4 }
   0x4   :  { %v28_v11 = vunpack.c.l.bf16 %v24_v7  ;;  %v34_v13 = vld [vmem:[%s267_s2] sm:$0x1] }
   0x5   :  { %v30_v15 = vmul.f32 %v29_v12, %v25_v8 }
   0x6   :  { %10 = vsyncpa [#allocation3], 0  ;;  %169 = vmatpush3.msra.mxu0 %v45_v1  ;;  %v31_v16 = vmul.f32 %v29_v12, %v26_v9  ;;  %v32_v17 = vmul.f32 %v29_v12, %v27_v10  ;;  %v33_v18 = vmul.f32 %v29_v12, %v28_v11  ;;  %v58_v23 = vsub.s32 0, %v57_v14  ;;  %v161_v29 = vld [vmem:[%s269_s4] ss:$0 sm:$0xff]  ;;  %s204_s2 = smov [#allocation2]  }
   0x7   :  { %v35_v19 = vadd.f32 %v34_v13, %v30_v15  ;;  %vm64_vm1 = vcmask 1041409   ;;  %vm66_vm2 = vcmask 130048   ;;  %s153_s8 = sshll.u32 %s204_s2, 4  ;;  %vm145_vm3 = vcmask 33792   ;;  %s154_s8 = int_to_ptr.vmem [resolvable:$true] %s153_s8 }
   0x8   :  { %v36_v20 = vadd.f32 %v34_v13, %v31_v16  ;;  %v37_v21 = vadd.f32 %v34_v13, %v32_v17  ;;  %v38_v22 = vadd.f32 %v34_v13, %v33_v18  ;;  %s180_s9 = scalar_lea.vmem %s154_s8, 32  ;;  %p185_p1 = scmp.lt.s32.totalorder %s154_s8, %s154_s8 }
   0x9   :  { %p181_p0 = scmp.ne.s32.totalorder %s154_s8, %s180_s9  ;;  %p186_p2 = scmp.lt.s32.totalorder %s180_s9, %s180_s9 }
   0xa   :  { %v43_v24 = vmax.f32 %v35_v19, %v37_v21  ;;  %v44_v25 = vmax.f32 %v36_v20, %v38_v22 }
   0xb   :  { %p187_p3 = por %p186_p2, %p185_p1 }
   0xc   :  { %v59_v26 = vrot.slane %v43_v24, %v58_v23  ;;  %v63_v27 = vrot.slane %v44_v25, %v58_v23 }
   0xd   :  { %p188_p4 = pnand %p187_p3, %p181_p0 }
   0xe   :  { %v65_v28 = vsel %vm64_vm1, %v63_v27, %v59_v26 }
   0xf   :  { %171 = vmatmul.mubr.msk.f32.vlgmr.msra.gmra.mxu0 %vm66_vm2, %v65_v28 }
  0xcf   :  { %v135_v30 = vpop.f32.mrf.mxu0 }
  0xd0   :  { %v136_v31 = vadd.f32 %v161_v29, %v135_v30 }
  0xd1   :  { %v172_v32 = vpop.f32.mrf.mxu0 }
  0xd2   :  { %v139_v33 = vsub.f32 0.0, %v136_v31 }
  0xd4   :  { %v140_v34 = vmul.f32 1.442695, %v139_v33 }
  0xd6   :  { %176 = vpow2.f32 %v140_v34 }
  0xe3   :  { %v177_v35 = vpop.eup %176 }
  0xe4   :  { %v142_v36 = vadd.f32 1.0, %v177_v35 }
  0xe6   :  { %178 = vrcp.f32 %v142_v36 }
  0xf3   :  { %v179_v37 = vpop.eup %178 }
  0xf4   :  { %146 = vst.msk [vmem:[#allocation2] sm:$0x3] %vm145_vm3, %v179_v37 }
  0xf5   :  { %191 = shalt.err (!%p188_p4)
}
  0xf6   :  { %156 = dma.vmem_to_hbm [thread:$0]  %s154_s8, 32, %s270_s5, [#allocation3]  }
  0xf7   :  { %200 = dma.done.wait [#allocation3], 32  }
  0xf8   :  { %201 = vsyncadd [#allocation3], 4294967264 }
  0xf9   :  { %160 = vsyncpa [#allocation3], 1 }

</bundles_post_ra>
